<compile_context>
chip_gen: v7x
topology: tpu7x:2x2x1
jax: 0.10.0
libtpu: 0.0.40
codegen_flags: <defaults>
</compile_context>

<pallas_src>
import numpy as np
import jax
import jax.numpy as jnp
from jax import lax
from jax.experimental import pallas as pl
from jax.experimental.pallas import tpu as pltpu


# --------------------------------------------------------------------------- #
# Grid layout: an activation with spatial size (H, W) is a (C, N*Hg*Wg) f32
# matrix, Hg, Wg = H + 2, W + 2; pixel (n, y, x) lives at flat index
# n*Hg*Wg + (y+1)*Wg + (x+1); the 1-pixel ring is always zero (it doubles as
# the 3x3 conv zero padding).  Conv inputs carry G = Wg+1 guard zero columns
# on both sides so every shifted slice stays in range.
# --------------------------------------------------------------------------- #

def _interior_mask_img(hw):
    H, W = hw
    m = np.zeros((H + 2, W + 2), np.float32)
    m[1:H + 1, 1:W + 1] = 1.0
    return m.reshape(-1)                                   # (Hg*Wg,)


def _pool_select_img(hw_in, stride):
    """Per-image fused 4-tap MaxPool2d(2x2) gather: (Pi, 4*Po) 0/1 matrix that
    also re-embeds the pooled result into the next resolution's grid layout."""
    Hi, Wi = hw_in
    sh, sw = stride
    Ho, Wo = (Hi - 2) // sh + 1, (Wi - 2) // sw + 1
    Hgi, Wgi = Hi + 2, Wi + 2
    Hgo, Wgo = Ho + 2, Wo + 2
    Pi, Po = Hgi * Wgi, Hgo * Wgo
    S = np.zeros((Pi, 4 * Po), np.float32)
    for t, (dy, dx) in enumerate([(0, 0), (0, 1), (1, 0), (1, 1)]):
        for i in range(Ho):
            for j in range(Wo):
                pin = (sh * i + dy + 1) * Wgi + (sw * j + dx + 1)
                pout = (i + 1) * Wgo + (j + 1)
                S[pin, t * Po + pout] = 1.0
    return S, (Ho, Wo)


def _dilate_select_img(hw_in, stride, pad, out_pad):
    """Per-image (Pi, Po) 0/1 matrix: ConvTranspose2d zero-dilation plus
    asymmetric padding, written directly into the output-resolution grid (the
    transposed conv then becomes an ordinary in-grid 3x3 conv with the
    spatially flipped, channel-swapped kernel)."""
    Hi, Wi = hw_in
    sh, sw = stride
    ph, pw = pad
    oh, ow = out_pad
    Ho = (Hi - 1) * sh - 2 * ph + 3 + oh
    Wo = (Wi - 1) * sw - 2 * pw + 3 + ow
    Hgi, Wgi = Hi + 2, Wi + 2
    Hgo, Wgo = Ho + 2, Wo + 2
    top, left = 2 - ph, 2 - pw
    D = np.zeros((Hgi * Wgi, Hgo * Wgo), np.float32)
    for i in range(Hi):
        for j in range(Wi):
            pin = (i + 1) * Wgi + (j + 1)
            pout = (top + sh * i) * Wgo + (left + sw * j)
            D[pin, pout] = 1.0
    return D, (Ho, Wo)


def _conv_w2(w):
    """Conv2d weight (Co, Ci, 3, 3) -> single-matmul im2col weight (Co, 9*Ci).
    Column order: tap-major (t = ky*3+kx), channel-minor."""
    w = np.asarray(w, np.float32)
    co, ci = w.shape[0], w.shape[1]
    taps = np.transpose(w, (2, 3, 0, 1)).reshape(9, co, ci)
    return np.ascontiguousarray(np.transpose(taps, (1, 0, 2))).reshape(co, 9 * ci)


def _tconv_w2(w):
    """ConvTranspose2d weight (Ci, Co, 3, 3) -> equivalent-conv im2col weight
    (Co, 9*Ci): spatial flip + channel swap, then same packing as _conv_w2."""
    w = np.asarray(w, np.float32)[:, :, ::-1, ::-1]
    w_eq = np.ascontiguousarray(np.transpose(w, (1, 0, 2, 3)))
    return _conv_w2(w_eq)


# ------------------------------ fused kernel ------------------------------- #

def _make_kernel(N, geo, meta, kmax, gsm_meta):
    WG = {l: geo[l][1] + 2 for l in geo}                       # grid row width
    PG = {l: (geo[l][0] + 2) * (geo[l][1] + 2) for l in geo}   # per-image grid
    NPOS = {l: N * PG[l] for l in geo}
    NVAL = {l: N * geo[l][0] * geo[l][1] for l in geo}         # BN counts

    def kernel(x_ref, prm_ref, msk_ref, gs1_ref, gd4_ref, gsm_ref, o_ref):
        prm = prm_ref[...]                                     # (117, kmax+3)
        msk = msk_ref[...]
        mask = {l: msk[l - 1:l, :NPOS[l]] for l in (1, 2, 3, 4)}
        gs1 = gs1_ref[...].astype(jnp.float32)                 # 0/1 exact in bf16
        gd4 = gd4_ref[...].astype(jnp.float32)
        gsm = gsm_ref[...].astype(jnp.float32)

        def gmat(name):
            r, nr, nc = gsm_meta[name]
            return gsm[r:r + nr, :nc]

        def pad_g(y, level):
            g = WG[level] + 1
            z = jnp.zeros((y.shape[0], g), jnp.float32)
            return jnp.concatenate([z, y, z], axis=1)

        def conv_bn_lrelu(name, parts, level):
            # parts: guard-padded (C, NPOS+2G) activations with a zero ring.
            r0, co, k = meta[name]
            wg = WG[level]
            g = wg + 1
            n = NPOS[level]
            slab = prm[r0:r0 + co, :]
            w2 = slab[:, :k]                                   # (Co, K)
            bias = slab[:, kmax:kmax + 1]
            gamma = slab[:, kmax + 1:kmax + 2]
            beta = slab[:, kmax + 2:kmax + 3]
            # im2col: fold the 9 taps (and both skip halves) into K.
            cols = []
            for xp in parts:
                for t in range(9):
                    dy, dx = divmod(t, 3)
                    off = g + (dy - 1) * wg + (dx - 1)
                    cols.append(xp[:, off:off + n])
            stack = cols[0] if len(cols) == 1 else jnp.concatenate(cols, axis=0)
            acc = jnp.dot(w2, stack, preferred_element_type=jnp.float32) + bias
            # training-mode BatchNorm over interior pixels, single masked pass.
            m = mask[level]
            inv_n = 1.0 / float(NVAL[level])
            acc_m = acc * m
            s1 = jnp.sum(acc_m, axis=1, keepdims=True)
            s2 = jnp.sum(acc_m * acc, axis=1, keepdims=True)
            mean = s1 * inv_n
            var = jnp.maximum(s2 * inv_n - mean * mean, 0.0)
            y = (acc - mean) * lax.rsqrt(var + 1e-5) * gamma + beta
            y = jnp.where(y >= 0.0, y, 0.1 * y)                # LeakyReLU(0.1)
            return y * m                                       # zero the ring

        def maxpool(y, sel, lin, lout):
            # fused 4-tap gather, block-diagonal over the N images.
            pi, po = PG[lin], PG[lout]
            outs = []
            for img in range(N):
                t = jnp.dot(y[:, img * pi:(img + 1) * pi], sel,
                            preferred_element_type=jnp.float32)      # (C, 4*Po)
                outs.append(jnp.maximum(
                    jnp.maximum(t[:, 0:po], t[:, po:2 * po]),
                    jnp.maximum(t[:, 2 * po:3 * po], t[:, 3 * po:4 * po])))
            return jnp.concatenate(outs, axis=1)

        def dilate(y, dm, lin):
            pi = PG[lin]
            outs = [jnp.dot(y[:, img * pi:(img + 1) * pi], dm,
                            preferred_element_type=jnp.float32)
                    for img in range(N)]
            return jnp.concatenate(outs, axis=1)

        x_pad = x_ref[...]                      # guard columns baked in by host

        down_1 = conv_bn_lrelu("down_1", [x_pad], 1)
        down_1p = pad_g(down_1, 1)
        pool_1 = maxpool(down_1, gs1, 1, 2)
        down_2 = conv_bn_lrelu("down_2", [pad_g(pool_1, 2)], 2)
        down_2p = pad_g(down_2, 2)
        pool_2 = maxpool(down_2, gmat("s2"), 2, 3)
        down_3 = conv_bn_lrelu("down_3", [pad_g(pool_2, 3)], 3)
        down_3p = pad_g(down_3, 3)
        pool_3 = maxpool(down_3, gmat("s3"), 3, 4)
        bridge = conv_bn_lrelu("bridge", [pad_g(pool_3, 4)], 4)

        t2_in = dilate(bridge, gmat("d2"), 4)                  # level 4 -> 3
        trans_2 = conv_bn_lrelu("trans_2", [pad_g(t2_in, 3)], 3)
        up_2 = conv_bn_lrelu("up_2", [pad_g(trans_2, 3), down_3p], 3)

        t3_in = dilate(up_2, gmat("d3"), 3)                    # level 3 -> 2
        trans_3 = conv_bn_lrelu("trans_3", [pad_g(t3_in, 2)], 2)
        up_3 = conv_bn_lrelu("up_3", [pad_g(trans_3, 2), down_2p], 2)

        t4_in = dilate(up_3, gd4, 2)                           # level 2 -> 1
        trans_4 = conv_bn_lrelu("trans_4", [pad_g(t4_in, 1)], 1)
        up_4 = conv_bn_lrelu("up_4", [pad_g(trans_4, 1), down_1p], 1)
        up_5 = conv_bn_lrelu("up_5", [pad_g(up_4, 1)], 1)

        o_ref[...] = up_5

    return kernel


# --------------------------- parameters / model ----------------------------- #

def init_params(key, in_dim=1, out_dim=1, nf=4):
    def conv_p(k, ci, co):
        k1, k2 = jax.random.split(k)
        return {"w": jax.random.normal(k1, (co, ci, 3, 3), jnp.float32) * 0.1,
                "b": jax.random.normal(k2, (co,), jnp.float32) * 0.1,
                "gamma": jnp.ones((co,), jnp.float32),
                "beta": jnp.zeros((co,), jnp.float32)}

    def convt_p(k, ci, co):
        k1, k2 = jax.random.split(k)
        return {"w": jax.random.normal(k1, (ci, co, 3, 3), jnp.float32) * 0.1,
                "b": jax.random.normal(k2, (co,), jnp.float32) * 0.1,
                "gamma": jnp.ones((co,), jnp.float32),
                "beta": jnp.zeros((co,), jnp.float32)}

    ks = jax.random.split(key, 11)
    return {
        "down_1": conv_p(ks[0], in_dim, nf),
        "down_2": conv_p(ks[1], nf, nf * 2),
        "down_3": conv_p(ks[2], nf * 2, nf * 4),
        "bridge": conv_p(ks[3], nf * 4, nf * 8),
        "trans_2": convt_p(ks[4], nf * 8, nf * 4),
        "up_2": conv_p(ks[5], nf * 8, nf * 4),
        "trans_3": convt_p(ks[6], nf * 4, nf * 2),
        "up_3": conv_p(ks[7], nf * 4, nf * 2),
        "trans_4": convt_p(ks[8], nf * 2, nf),
        "up_4": conv_p(ks[9], nf * 2, nf),
        "up_5": conv_p(ks[10], nf, out_dim),
    }


def build_unet_forward(params, N, H, W):
    """Packs all parameters / gather constants once and returns a jitted
    forward(x_nchw) -> (N, out_dim, H, W) that runs one fused Pallas kernel."""
    out_dim = int(params["up_5"]["w"].shape[0])

    hw1 = (H, W)
    hw2 = ((H - 2) // 3 + 1, (W - 2) // 3 + 1)                 # pool_1 (3, 3)
    hw3 = ((hw2[0] - 2) // 2 + 1, (hw2[1] - 2) // 3 + 1)       # pool_2 (2, 3)
    hw4 = ((hw3[0] - 2) // 3 + 1, (hw3[1] - 2) // 2 + 1)       # pool_3 (3, 2)
    geo = {1: hw1, 2: hw2, 3: hw3, 4: hw4}

    s1, p1hw = _pool_select_img(hw1, (3, 3))
    s2, p2hw = _pool_select_img(hw2, (2, 3))
    s3, p3hw = _pool_select_img(hw3, (3, 2))
    assert p1hw == hw2 and p2hw == hw3 and p3hw == hw4
    d2, t2hw = _dilate_select_img(hw4, (3, 2), (1, 0), (1, 0))
    d3, t3hw = _dilate_select_img(hw3, (2, 3), (1, 0), (1, 0))
    d4, t4hw = _dilate_select_img(hw2, (3, 3), (0, 0), (0, 0))
    # transposed convs must land exactly on the skip-connection resolutions
    assert t2hw == hw3 and t3hw == hw2 and t4hw == hw1

    # ---- one flat parameter slab: im2col weights + [bias, gamma, beta] ----
    def split_w2(p):
        w = np.asarray(p["w"], np.float32)
        half = w.shape[1] // 2
        return np.concatenate([_conv_w2(w[:, :half]), _conv_w2(w[:, half:])], 1)

    layer_w2 = {
        "down_1": _conv_w2(params["down_1"]["w"]),
        "down_2": _conv_w2(params["down_2"]["w"]),
        "down_3": _conv_w2(params["down_3"]["w"]),
        "bridge": _conv_w2(params["bridge"]["w"]),
        "trans_2": _tconv_w2(params["trans_2"]["w"]),
        "up_2": split_w2(params["up_2"]),
        "trans_3": _tconv_w2(params["trans_3"]["w"]),
        "up_3": split_w2(params["up_3"]),
        "trans_4": _tconv_w2(params["trans_4"]["w"]),
        "up_4": split_w2(params["up_4"]),
        "up_5": _conv_w2(params["up_5"]["w"]),
    }
    order = ["down_1", "down_2", "down_3", "bridge", "trans_2", "up_2",
             "trans_3", "up_3", "trans_4", "up_4", "up_5"]
    kmax = max(w.shape[1] for w in layer_w2.values())
    total_rows = sum(w.shape[0] for w in layer_w2.values())
    slab = np.zeros((total_rows, kmax + 3), np.float32)
    meta = {}
    r = 0
    for name in order:
        w2 = layer_w2[name]
        co, k = w2.shape
        slab[r:r + co, :k] = w2
        slab[r:r + co, kmax + 0] = np.asarray(params[name]["b"], np.float32)
        slab[r:r + co, kmax + 1] = np.asarray(params[name]["gamma"], np.float32)
        slab[r:r + co, kmax + 2] = np.asarray(params[name]["beta"], np.float32)
        meta[name] = (r, co, k)
        r += co

    # ---- masks (one operand) and small gathers (one packed bf16 operand) ----
    npos = {l: N * (geo[l][0] + 2) * (geo[l][1] + 2) for l in geo}
    masks = np.zeros((4, npos[1]), np.float32)
    for l in (1, 2, 3, 4):
        masks[l - 1, :npos[l]] = np.tile(_interior_mask_img(geo[l]), N)

    small = [("s2", s2), ("s3", s3), ("d2", d2), ("d3", d3)]
    gsm = np.zeros((sum(v.shape[0] for _, v in small),
                    max(v.shape[1] for _, v in small)), np.float32)
    gsm_meta = {}
    r = 0
    for name, v in small:
        gsm[r:r + v.shape[0], :v.shape[1]] = v
        gsm_meta[name] = (r, v.shape[0], v.shape[1])
        r += v.shape[0]

    consts = (jnp.asarray(slab, jnp.float32),
              jnp.asarray(masks, jnp.float32),
              jnp.asarray(s1, jnp.bfloat16),      # 0/1 exact in bf16
              jnp.asarray(d4, jnp.bfloat16),
              jnp.asarray(gsm, jnp.bfloat16))

    kernel = _make_kernel(N, geo, meta, kmax, gsm_meta)
    npos1 = npos[1]
    G1 = (W + 2) + 1
    vmem_spec = pl.BlockSpec(memory_space=pltpu.MemorySpace.VMEM)
    fused_call = pl.pallas_call(
        kernel,
        out_shape=jax.ShapeDtypeStruct((out_dim, npos1), jnp.float32),
        in_specs=[vmem_spec] * (1 + len(consts)),
        out_specs=vmem_spec,
    )

    @jax.jit
    def forward(x_nchw, cs):
        n, c, h, w = x_nchw.shape
        # tiny boundary glue: NCHW -> padded lane-dense grid layout (+guards)
        xp = jnp.pad(x_nchw, ((0, 0), (0, 0), (1, 1), (1, 1)))
        xg = jnp.transpose(xp, (1, 0, 2, 3)).reshape(c, n * (h + 2) * (w + 2))
        xg = jnp.pad(xg, ((0, 0), (G1, G1)))
        out = fused_call(xg, *cs)
        out = out.reshape(out_dim, n, h + 2, w + 2)[:, :, 1:h + 1, 1:w + 1]
        return jnp.transpose(out, (1, 0, 2, 3))

    return lambda x: forward(x, consts)


if __name__ == "__main__":
    key = jax.random.PRNGKey(0)
    pkey, xkey = jax.random.split(key)
    params = init_params(pkey, in_dim=1, out_dim=1, nf=4)
    # (H, W) = (12, 27) so every pool / transposed-conv skip connection lines
    # up exactly with the PyTorch shape arithmetic of the mini U-Net.
    x = jax.random.normal(xkey, (2, 1, 12, 27), jnp.float32)
    fwd = build_unet_forward(params, N=2, H=12, W=27)
    out = jax.block_until_ready(fwd(x))
    assert out.shape == (2, 1, 12, 27), out.shape
    assert bool(jnp.all(jnp.isfinite(out)))
    print("KERNEL_OK")
</pallas_src>

<mosaic_0001>
module attributes {stable_mosaic.version = 11 : i64} {
  func.func @kernel(%arg0: memref<1x872xf32, #tpu.memory_space<vmem>>, %arg1: memref<117x291xf32, #tpu.memory_space<vmem>>, %arg2: memref<4x812xf32, #tpu.memory_space<vmem>>, %arg3: memref<406x264xbf16, #tpu.memory_space<vmem>>, %arg4: memref<66x406xbf16, #tpu.memory_space<vmem>>, %arg5: memref<115x80xbf16, #tpu.memory_space<vmem>>, %arg6: memref<1x812xf32, #tpu.memory_space<vmem>>) attributes {dimension_semantics = [], scalar_prefetch = 0 : i64, scratch_operands = 0 : i64, tpu.core_type = #tpu.core_type<tc>} {
    %c0 = arith.constant 0 : index
    %c0_0 = arith.constant 0 : index
    %0 = vector.load %arg1[%c0, %c0_0] : memref<117x291xf32, #tpu.memory_space<vmem>>, vector<117x291xf32>
    %c0_1 = arith.constant 0 : index
    %c0_2 = arith.constant 0 : index
    %1 = vector.load %arg2[%c0_1, %c0_2] : memref<4x812xf32, #tpu.memory_space<vmem>>, vector<4x812xf32>
    %2 = vector.extract_strided_slice %1 {offsets = [0, 0], sizes = [1, 812], strides = [1, 1]} : vector<4x812xf32> to vector<1x812xf32>
    %3 = vector.extract_strided_slice %1 {offsets = [1, 0], sizes = [1, 132], strides = [1, 1]} : vector<4x812xf32> to vector<1x132xf32>
    %4 = vector.extract_strided_slice %1 {offsets = [2, 0], sizes = [1, 40], strides = [1, 1]} : vector<4x812xf32> to vector<1x40xf32>
    %5 = vector.extract_strided_slice %1 {offsets = [3, 0], sizes = [1, 18], strides = [1, 1]} : vector<4x812xf32> to vector<1x18xf32>
    %c0_3 = arith.constant 0 : index
    %c0_4 = arith.constant 0 : index
    %6 = vector.load %arg3[%c0_3, %c0_4] : memref<406x264xbf16, #tpu.memory_space<vmem>>, vector<406x264xbf16>
    %7 = arith.extf %6 : vector<406x264xbf16> to vector<406x264xf32>
    %c0_5 = arith.constant 0 : index
    %c0_6 = arith.constant 0 : index
    %8 = vector.load %arg4[%c0_5, %c0_6] : memref<66x406xbf16, #tpu.memory_space<vmem>>, vector<66x406xbf16>
    %9 = arith.extf %8 : vector<66x406xbf16> to vector<66x406xf32>
    %c0_7 = arith.constant 0 : index
    %c0_8 = arith.constant 0 : index
    %10 = vector.load %arg5[%c0_7, %c0_8] : memref<115x80xbf16, #tpu.memory_space<vmem>>, vector<115x80xbf16>
    %11 = arith.extf %10 : vector<115x80xbf16> to vector<115x80xf32>
    %c0_9 = arith.constant 0 : index
    %c0_10 = arith.constant 0 : index
    %12 = vector.load %arg0[%c0_9, %c0_10] : memref<1x872xf32, #tpu.memory_space<vmem>>, vector<1x872xf32>
    %13 = vector.extract_strided_slice %0 {offsets = [0, 0], sizes = [4, 291], strides = [1, 1]} : vector<117x291xf32> to vector<4x291xf32>
    %14 = vector.extract_strided_slice %13 {offsets = [0, 0], sizes = [4, 9], strides = [1, 1]} : vector<4x291xf32> to vector<4x9xf32>
    %15 = vector.extract_strided_slice %13 {offsets = [0, 288], sizes = [4, 1], strides = [1, 1]} : vector<4x291xf32> to vector<4x1xf32>
    %16 = vector.extract_strided_slice %13 {offsets = [0, 289], sizes = [4, 1], strides = [1, 1]} : vector<4x291xf32> to vector<4x1xf32>
    %17 = vector.extract_strided_slice %13 {offsets = [0, 290], sizes = [4, 1], strides = [1, 1]} : vector<4x291xf32> to vector<4x1xf32>
    %18 = vector.extract_strided_slice %12 {offsets = [0, 0], sizes = [1, 812], strides = [1, 1]} : vector<1x872xf32> to vector<1x812xf32>
    %19 = vector.extract_strided_slice %12 {offsets = [0, 1], sizes = [1, 812], strides = [1, 1]} : vector<1x872xf32> to vector<1x812xf32>
    %20 = vector.extract_strided_slice %12 {offsets = [0, 2], sizes = [1, 812], strides = [1, 1]} : vector<1x872xf32> to vector<1x812xf32>
    %21 = vector.extract_strided_slice %12 {offsets = [0, 29], sizes = [1, 812], strides = [1, 1]} : vector<1x872xf32> to vector<1x812xf32>
    %22 = vector.extract_strided_slice %12 {offsets = [0, 30], sizes = [1, 812], strides = [1, 1]} : vector<1x872xf32> to vector<1x812xf32>
    %23 = vector.extract_strided_slice %12 {offsets = [0, 31], sizes = [1, 812], strides = [1, 1]} : vector<1x872xf32> to vector<1x812xf32>
    %24 = vector.extract_strided_slice %12 {offsets = [0, 58], sizes = [1, 812], strides = [1, 1]} : vector<1x872xf32> to vector<1x812xf32>
    %25 = vector.extract_strided_slice %12 {offsets = [0, 59], sizes = [1, 812], strides = [1, 1]} : vector<1x872xf32> to vector<1x812xf32>
    %26 = vector.extract_strided_slice %12 {offsets = [0, 60], sizes = [1, 812], strides = [1, 1]} : vector<1x872xf32> to vector<1x812xf32>
    %27 = tpu.concatenate %18, %19, %20, %21, %22, %23, %24, %25, %26 in 0 : vector<1x812xf32>, vector<1x812xf32>, vector<1x812xf32>, vector<1x812xf32>, vector<1x812xf32>, vector<1x812xf32>, vector<1x812xf32>, vector<1x812xf32>, vector<1x812xf32> -> vector<9x812xf32>
    %cst = arith.constant dense<0.000000e+00> : vector<4x812xf32>
    %28 = tpu.matmul %14, %27, %cst {dimension_numbers = #tpu.dot_dimension_numbers<[1], [0], [0], [1], [0, 0, 1, 1], [], []>} : vector<4x9xf32>, vector<9x812xf32>, vector<4x812xf32> -> vector<4x812xf32>
    %29 = vector.broadcast %15 : vector<4x1xf32> to vector<4x812xf32>
    %30 = arith.addf %28, %29 : vector<4x812xf32>
    %31 = vector.broadcast %2 : vector<1x812xf32> to vector<4x812xf32>
    %32 = arith.mulf %30, %31 : vector<4x812xf32>
    %cst_11 = arith.constant dense<0.000000e+00> : vector<4xf32>
    %33 = vector.multi_reduction <add>, %32, %cst_11 [1] : vector<4x812xf32> to vector<4xf32>
    %34 = vector.shape_cast %33 : vector<4xf32> to vector<4x1xf32>
    %35 = arith.mulf %32, %30 : vector<4x812xf32>
    %cst_12 = arith.constant dense<0.000000e+00> : vector<4xf32>
    %36 = vector.multi_reduction <add>, %35, %cst_12 [1] : vector<4x812xf32> to vector<4xf32>
    %37 = vector.shape_cast %36 : vector<4xf32> to vector<4x1xf32>
    %cst_13 = arith.constant 0.00154320989 : f32
    %38 = vector.broadcast %cst_13 : f32 to vector<4x1xf32>
    %39 = arith.mulf %34, %38 : vector<4x1xf32>
    %cst_14 = arith.constant 0.00154320989 : f32
    %40 = vector.broadcast %cst_14 : f32 to vector<4x1xf32>
    %41 = arith.mulf %37, %40 : vector<4x1xf32>
    %42 = arith.mulf %39, %39 : vector<4x1xf32>
    %43 = arith.subf %41, %42 : vector<4x1xf32>
    %cst_15 = arith.constant 0.000000e+00 : f32
    %44 = vector.broadcast %cst_15 : f32 to vector<4x1xf32>
    %45 = arith.maximumf %43, %44 : vector<4x1xf32>
    %46 = vector.broadcast %39 : vector<4x1xf32> to vector<4x812xf32>
    %47 = arith.subf %30, %46 : vector<4x812xf32>
    %cst_16 = arith.constant 9.99999974E-6 : f32
    %48 = vector.broadcast %cst_16 : f32 to vector<4x1xf32>
    %49 = arith.addf %45, %48 : vector<4x1xf32>
    %50 = math.rsqrt %49 : vector<4x1xf32>
    %51 = vector.broadcast %50 : vector<4x1xf32> to vector<4x812xf32>
    %52 = arith.mulf %47, %51 : vector<4x812xf32>
    %53 = vector.broadcast %16 : vector<4x1xf32> to vector<4x812xf32>
    %54 = arith.mulf %52, %53 : vector<4x812xf32>
    %55 = vector.broadcast %17 : vector<4x1xf32> to vector<4x812xf32>
    %56 = arith.addf %54, %55 : vector<4x812xf32>
    %cst_17 = arith.constant 0.000000e+00 : f32
    %57 = vector.broadcast %cst_17 : f32 to vector<4x812xf32>
    %58 = arith.cmpf oge, %56, %57 : vector<4x812xf32>
    %cst_18 = arith.constant 1.000000e-01 : f32
    %59 = vector.broadcast %cst_18 : f32 to vector<4x812xf32>
    %60 = arith.mulf %59, %56 : vector<4x812xf32>
    %61 = arith.select %58, %56, %60 : vector<4x812xi1>, vector<4x812xf32>
    %62 = vector.broadcast %2 : vector<1x812xf32> to vector<4x812xf32>
    %63 = arith.mulf %61, %62 : vector<4x812xf32>
    %cst_19 = arith.constant 0.000000e+00 : f32
    %64 = vector.broadcast %cst_19 : f32 to vector<4x30xf32>
    %65 = tpu.concatenate %64, %63, %64 in 1 : vector<4x30xf32>, vector<4x812xf32>, vector<4x30xf32> -> vector<4x872xf32>
    %66 = vector.extract_strided_slice %63 {offsets = [0, 0], sizes = [4, 406], strides = [1, 1]} : vector<4x812xf32> to vector<4x406xf32>
    %cst_20 = arith.constant dense<0.000000e+00> : vector<4x264xf32>
    %67 = tpu.matmul %66, %7, %cst_20 {dimension_numbers = #tpu.dot_dimension_numbers<[1], [0], [0], [1], [0, 0, 1, 1], [], []>} : vector<4x406xf32>, vector<406x264xf32>, vector<4x264xf32> -> vector<4x264xf32>
    %68 = vector.extract_strided_slice %67 {offsets = [0, 0], sizes = [4, 66], strides = [1, 1]} : vector<4x264xf32> to vector<4x66xf32>
    %69 = vector.extract_strided_slice %67 {offsets = [0, 66], sizes = [4, 66], strides = [1, 1]} : vector<4x264xf32> to vector<4x66xf32>
    %70 = arith.maximumf %68, %69 : vector<4x66xf32>
    %71 = vector.extract_strided_slice %67 {offsets = [0, 132], sizes = [4, 66], strides = [1, 1]} : vector<4x264xf32> to vector<4x66xf32>
    %72 = vector.extract_strided_slice %67 {offsets = [0, 198], sizes = [4, 66], strides = [1, 1]} : vector<4x264xf32> to vector<4x66xf32>
    %73 = arith.maximumf %71, %72 : vector<4x66xf32>
    %74 = arith.maximumf %70, %73 : vector<4x66xf32>
    %75 = vector.extract_strided_slice %63 {offsets = [0, 406], sizes = [4, 406], strides = [1, 1]} : vector<4x812xf32> to vector<4x406xf32>
    %cst_21 = arith.constant dense<0.000000e+00> : vector<4x264xf32>
    %76 = tpu.matmul %75, %7, %cst_21 {dimension_numbers = #tpu.dot_dimension_numbers<[1], [0], [0], [1], [0, 0, 1, 1], [], []>} : vector<4x406xf32>, vector<406x264xf32>, vector<4x264xf32> -> vector<4x264xf32>
    %77 = vector.extract_strided_slice %76 {offsets = [0, 0], sizes = [4, 66], strides = [1, 1]} : vector<4x264xf32> to vector<4x66xf32>
    %78 = vector.extract_strided_slice %76 {offsets = [0, 66], sizes = [4, 66], strides = [1, 1]} : vector<4x264xf32> to vector<4x66xf32>
    %79 = arith.maximumf %77, %78 : vector<4x66xf32>
    %80 = vector.extract_strided_slice %76 {offsets = [0, 132], sizes = [4, 66], strides = [1, 1]} : vector<4x264xf32> to vector<4x66xf32>
    %81 = vector.extract_strided_slice %76 {offsets = [0, 198], sizes = [4, 66], strides = [1, 1]} : vector<4x264xf32> to vector<4x66xf32>
    %82 = arith.maximumf %80, %81 : vector<4x66xf32>
    %83 = arith.maximumf %79, %82 : vector<4x66xf32>
    %84 = tpu.concatenate %74, %83 in 1 : vector<4x66xf32>, vector<4x66xf32> -> vector<4x132xf32>
    %cst_22 = arith.constant 0.000000e+00 : f32
    %85 = vector.broadcast %cst_22 : f32 to vector<4x12xf32>
    %86 = tpu.concatenate %85, %84, %85 in 1 : vector<4x12xf32>, vector<4x132xf32>, vector<4x12xf32> -> vector<4x156xf32>
    %87 = vector.extract_strided_slice %0 {offsets = [4, 0], sizes = [8, 291], strides = [1, 1]} : vector<117x291xf32> to vector<8x291xf32>
    %88 = vector.extract_strided_slice %87 {offsets = [0, 0], sizes = [8, 36], strides = [1, 1]} : vector<8x291xf32> to vector<8x36xf32>
    %89 = vector.extract_strided_slice %87 {offsets = [0, 288], sizes = [8, 1], strides = [1, 1]} : vector<8x291xf32> to vector<8x1xf32>
    %90 = vector.extract_strided_slice %87 {offsets = [0, 289], sizes = [8, 1], strides = [1, 1]} : vector<8x291xf32> to vector<8x1xf32>
    %91 = vector.extract_strided_slice %87 {offsets = [0, 290], sizes = [8, 1], strides = [1, 1]} : vector<8x291xf32> to vector<8x1xf32>
    %92 = vector.extract_strided_slice %86 {offsets = [0, 0], sizes = [4, 132], strides = [1, 1]} : vector<4x156xf32> to vector<4x132xf32>
    %93 = vector.extract_strided_slice %86 {offsets = [0, 1], sizes = [4, 132], strides = [1, 1]} : vector<4x156xf32> to vector<4x132xf32>
    %94 = vector.extract_strided_slice %86 {offsets = [0, 2], sizes = [4, 132], strides = [1, 1]} : vector<4x156xf32> to vector<4x132xf32>
    %95 = vector.extract_strided_slice %86 {offsets = [0, 11], sizes = [4, 132], strides = [1, 1]} : vector<4x156xf32> to vector<4x132xf32>
    %96 = vector.extract_strided_slice %86 {offsets = [0, 12], sizes = [4, 132], strides = [1, 1]} : vector<4x156xf32> to vector<4x132xf32>
    %97 = vector.extract_strided_slice %86 {offsets = [0, 13], sizes = [4, 132], strides = [1, 1]} : vector<4x156xf32> to vector<4x132xf32>
    %98 = vector.extract_strided_slice %86 {offsets = [0, 22], sizes = [4, 132], strides = [1, 1]} : vector<4x156xf32> to vector<4x132xf32>
    %99 = vector.extract_strided_slice %86 {offsets = [0, 23], sizes = [4, 132], strides = [1, 1]} : vector<4x156xf32> to vector<4x132xf32>
    %100 = vector.extract_strided_slice %86 {offsets = [0, 24], sizes = [4, 132], strides = [1, 1]} : vector<4x156xf32> to vector<4x132xf32>
    %101 = tpu.concatenate %92, %93, %94, %95, %96, %97, %98, %99, %100 in 0 : vector<4x132xf32>, vector<4x132xf32>, vector<4x132xf32>, vector<4x132xf32>, vector<4x132xf32>, vector<4x132xf32>, vector<4x132xf32>, vector<4x132xf32>, vector<4x132xf32> -> vector<36x132xf32>
    %cst_23 = arith.constant dense<0.000000e+00> : vector<8x132xf32>
    %102 = tpu.matmul %88, %101, %cst_23 {dimension_numbers = #tpu.dot_dimension_numbers<[1], [0], [0], [1], [0, 0, 1, 1], [], []>} : vector<8x36xf32>, vector<36x132xf32>, vector<8x132xf32> -> vector<8x132xf32>
    %103 = vector.broadcast %89 : vector<8x1xf32> to vector<8x132xf32>
    %104 = arith.addf %102, %103 : vector<8x132xf32>
    %105 = vector.broadcast %3 : vector<1x132xf32> to vector<8x132xf32>
    %106 = arith.mulf %104, %105 : vector<8x132xf32>
    %cst_24 = arith.constant dense<0.000000e+00> : vector<8xf32>
    %107 = vector.multi_reduction <add>, %106, %cst_24 [1] : vector<8x132xf32> to vector<8xf32>
    %108 = vector.shape_cast %107 : vector<8xf32> to vector<8x1xf32>
    %109 = arith.mulf %106, %104 : vector<8x132xf32>
    %cst_25 = arith.constant dense<0.000000e+00> : vector<8xf32>
    %110 = vector.multi_reduction <add>, %109, %cst_25 [1] : vector<8x132xf32> to vector<8xf32>
    %111 = vector.shape_cast %110 : vector<8xf32> to vector<8x1xf32>
    %cst_26 = arith.constant 0.013888889 : f32
    %112 = vector.broadcast %cst_26 : f32 to vector<8x1xf32>
    %113 = arith.mulf %108, %112 : vector<8x1xf32>
    %cst_27 = arith.constant 0.013888889 : f32
    %114 = vector.broadcast %cst_27 : f32 to vector<8x1xf32>
    %115 = arith.mulf %111, %114 : vector<8x1xf32>
    %116 = arith.mulf %113, %113 : vector<8x1xf32>
    %117 = arith.subf %115, %116 : vector<8x1xf32>
    %cst_28 = arith.constant 0.000000e+00 : f32
    %118 = vector.broadcast %cst_28 : f32 to vector<8x1xf32>
    %119 = arith.maximumf %117, %118 : vector<8x1xf32>
    %120 = vector.broadcast %113 : vector<8x1xf32> to vector<8x132xf32>
    %121 = arith.subf %104, %120 : vector<8x132xf32>
    %cst_29 = arith.constant 9.99999974E-6 : f32
    %122 = vector.broadcast %cst_29 : f32 to vector<8x1xf32>
    %123 = arith.addf %119, %122 : vector<8x1xf32>
    %124 = math.rsqrt %123 : vector<8x1xf32>
    %125 = vector.broadcast %124 : vector<8x1xf32> to vector<8x132xf32>
    %126 = arith.mulf %121, %125 : vector<8x132xf32>
    %127 = vector.broadcast %90 : vector<8x1xf32> to vector<8x132xf32>
    %128 = arith.mulf %126, %127 : vector<8x132xf32>
    %129 = vector.broadcast %91 : vector<8x1xf32> to vector<8x132xf32>
    %130 = arith.addf %128, %129 : vector<8x132xf32>
    %cst_30 = arith.constant 0.000000e+00 : f32
    %131 = vector.broadcast %cst_30 : f32 to vector<8x132xf32>
    %132 = arith.cmpf oge, %130, %131 : vector<8x132xf32>
    %cst_31 = arith.constant 1.000000e-01 : f32
    %133 = vector.broadcast %cst_31 : f32 to vector<8x132xf32>
    %134 = arith.mulf %133, %130 : vector<8x132xf32>
    %135 = arith.select %132, %130, %134 : vector<8x132xi1>, vector<8x132xf32>
    %136 = vector.broadcast %3 : vector<1x132xf32> to vector<8x132xf32>
    %137 = arith.mulf %135, %136 : vector<8x132xf32>
    %cst_32 = arith.constant 0.000000e+00 : f32
    %138 = vector.broadcast %cst_32 : f32 to vector<8x12xf32>
    %139 = tpu.concatenate %138, %137, %138 in 1 : vector<8x12xf32>, vector<8x132xf32>, vector<8x12xf32> -> vector<8x156xf32>
    %140 = vector.extract_strided_slice %11 {offsets = [0, 0], sizes = [66, 80], strides = [1, 1]} : vector<115x80xf32> to vector<66x80xf32>
    %141 = vector.extract_strided_slice %137 {offsets = [0, 0], sizes = [8, 66], strides = [1, 1]} : vector<8x132xf32> to vector<8x66xf32>
    %cst_33 = arith.constant dense<0.000000e+00> : vector<8x80xf32>
    %142 = tpu.matmul %141, %140, %cst_33 {dimension_numbers = #tpu.dot_dimension_numbers<[1], [0], [0], [1], [0, 0, 1, 1], [], []>} : vector<8x66xf32>, vector<66x80xf32>, vector<8x80xf32> -> vector<8x80xf32>
    %143 = vector.extract_strided_slice %142 {offsets = [0, 0], sizes = [8, 20], strides = [1, 1]} : vector<8x80xf32> to vector<8x20xf32>
    %144 = vector.extract_strided_slice %142 {offsets = [0, 20], sizes = [8, 20], strides = [1, 1]} : vector<8x80xf32> to vector<8x20xf32>
    %145 = arith.maximumf %143, %144 : vector<8x20xf32>
    %146 = vector.extract_strided_slice %142 {offsets = [0, 40], sizes = [8, 20], strides = [1, 1]} : vector<8x80xf32> to vector<8x20xf32>
    %147 = vector.extract_strided_slice %142 {offsets = [0, 60], sizes = [8, 20], strides = [1, 1]} : vector<8x80xf32> to vector<8x20xf32>
    %148 = arith.maximumf %146, %147 : vector<8x20xf32>
    %149 = arith.maximumf %145, %148 : vector<8x20xf32>
    %150 = vector.extract_strided_slice %137 {offsets = [0, 66], sizes = [8, 66], strides = [1, 1]} : vector<8x132xf32> to vector<8x66xf32>
    %cst_34 = arith.constant dense<0.000000e+00> : vector<8x80xf32>
    %151 = tpu.matmul %150, %140, %cst_34 {dimension_numbers = #tpu.dot_dimension_numbers<[1], [0], [0], [1], [0, 0, 1, 1], [], []>} : vector<8x66xf32>, vector<66x80xf32>, vector<8x80xf32> -> vector<8x80xf32>
    %152 = vector.extract_strided_slice %151 {offsets = [0, 0], sizes = [8, 20], strides = [1, 1]} : vector<8x80xf32> to vector<8x20xf32>
    %153 = vector.extract_strided_slice %151 {offsets = [0, 20], sizes = [8, 20], strides = [1, 1]} : vector<8x80xf32> to vector<8x20xf32>
    %154 = arith.maximumf %152, %153 : vector<8x20xf32>
    %155 = vector.extract_strided_slice %151 {offsets = [0, 40], sizes = [8, 20], strides = [1, 1]} : vector<8x80xf32> to vector<8x20xf32>
    %156 = vector.extract_strided_slice %151 {offsets = [0, 60], sizes = [8, 20], strides = [1, 1]} : vector<8x80xf32> to vector<8x20xf32>
    %157 = arith.maximumf %155, %156 : vector<8x20xf32>
    %158 = arith.maximumf %154, %157 : vector<8x20xf32>
    %159 = tpu.concatenate %149, %158 in 1 : vector<8x20xf32>, vector<8x20xf32> -> vector<8x40xf32>
    %cst_35 = arith.constant 0.000000e+00 : f32
    %160 = vector.broadcast %cst_35 : f32 to vector<8x6xf32>
    %161 = tpu.concatenate %160, %159, %160 in 1 : vector<8x6xf32>, vector<8x40xf32>, vector<8x6xf32> -> vector<8x52xf32>
    %162 = vector.extract_strided_slice %0 {offsets = [12, 0], sizes = [16, 291], strides = [1, 1]} : vector<117x291xf32> to vector<16x291xf32>
    %163 = vector.extract_strided_slice %162 {offsets = [0, 0], sizes = [16, 72], strides = [1, 1]} : vector<16x291xf32> to vector<16x72xf32>
    %164 = vector.extract_strided_slice %162 {offsets = [0, 288], sizes = [16, 1], strides = [1, 1]} : vector<16x291xf32> to vector<16x1xf32>
    %165 = vector.extract_strided_slice %162 {offsets = [0, 289], sizes = [16, 1], strides = [1, 1]} : vector<16x291xf32> to vector<16x1xf32>
    %166 = vector.extract_strided_slice %162 {offsets = [0, 290], sizes = [16, 1], strides = [1, 1]} : vector<16x291xf32> to vector<16x1xf32>
    %167 = vector.extract_strided_slice %161 {offsets = [0, 0], sizes = [8, 40], strides = [1, 1]} : vector<8x52xf32> to vector<8x40xf32>
    %168 = vector.extract_strided_slice %161 {offsets = [0, 1], sizes = [8, 40], strides = [1, 1]} : vector<8x52xf32> to vector<8x40xf32>
    %169 = vector.extract_strided_slice %161 {offsets = [0, 2], sizes = [8, 40], strides = [1, 1]} : vector<8x52xf32> to vector<8x40xf32>
    %170 = vector.extract_strided_slice %161 {offsets = [0, 5], sizes = [8, 40], strides = [1, 1]} : vector<8x52xf32> to vector<8x40xf32>
    %171 = vector.extract_strided_slice %161 {offsets = [0, 6], sizes = [8, 40], strides = [1, 1]} : vector<8x52xf32> to vector<8x40xf32>
    %172 = vector.extract_strided_slice %161 {offsets = [0, 7], sizes = [8, 40], strides = [1, 1]} : vector<8x52xf32> to vector<8x40xf32>
    %173 = vector.extract_strided_slice %161 {offsets = [0, 10], sizes = [8, 40], strides = [1, 1]} : vector<8x52xf32> to vector<8x40xf32>
    %174 = vector.extract_strided_slice %161 {offsets = [0, 11], sizes = [8, 40], strides = [1, 1]} : vector<8x52xf32> to vector<8x40xf32>
    %175 = vector.extract_strided_slice %161 {offsets = [0, 12], sizes = [8, 40], strides = [1, 1]} : vector<8x52xf32> to vector<8x40xf32>
    %176 = tpu.concatenate %167, %168, %169, %170, %171, %172, %173, %174, %175 in 0 : vector<8x40xf32>, vector<8x40xf32>, vector<8x40xf32>, vector<8x40xf32>, vector<8x40xf32>, vector<8x40xf32>, vector<8x40xf32>, vector<8x40xf32>, vector<8x40xf32> -> vector<72x40xf32>
    %cst_36 = arith.constant dense<0.000000e+00> : vector<16x40xf32>
    %177 = tpu.matmul %163, %176, %cst_36 {dimension_numbers = #tpu.dot_dimension_numbers<[1], [0], [0], [1], [0, 0, 1, 1], [], []>} : vector<16x72xf32>, vector<72x40xf32>, vector<16x40xf32> -> vector<16x40xf32>
    %178 = vector.broadcast %164 : vector<16x1xf32> to vector<16x40xf32>
    %179 = arith.addf %177, %178 : vector<16x40xf32>
    %180 = vector.broadcast %4 : vector<1x40xf32> to vector<16x40xf32>
    %181 = arith.mulf %179, %180 : vector<16x40xf32>
    %cst_37 = arith.constant dense<0.000000e+00> : vector<16xf32>
    %182 = vector.multi_reduction <add>, %181, %cst_37 [1] : vector<16x40xf32> to vector<16xf32>
    %183 = vector.shape_cast %182 : vector<16xf32> to vector<16x1xf32>
    %184 = arith.mulf %181, %179 : vector<16x40xf32>
    %cst_38 = arith.constant dense<0.000000e+00> : vector<16xf32>
    %185 = vector.multi_reduction <add>, %184, %cst_38 [1] : vector<16x40xf32> to vector<16xf32>
    %186 = vector.shape_cast %185 : vector<16xf32> to vector<16x1xf32>
    %cst_39 = arith.constant 0.0833333358 : f32
    %187 = vector.broadcast %cst_39 : f32 to vector<16x1xf32>
    %188 = arith.mulf %183, %187 : vector<16x1xf32>
    %cst_40 = arith.constant 0.0833333358 : f32
    %189 = vector.broadcast %cst_40 : f32 to vector<16x1xf32>
    %190 = arith.mulf %186, %189 : vector<16x1xf32>
    %191 = arith.mulf %188, %188 : vector<16x1xf32>
    %192 = arith.subf %190, %191 : vector<16x1xf32>
    %cst_41 = arith.constant 0.000000e+00 : f32
    %193 = vector.broadcast %cst_41 : f32 to vector<16x1xf32>
    %194 = arith.maximumf %192, %193 : vector<16x1xf32>
    %195 = vector.broadcast %188 : vector<16x1xf32> to vector<16x40xf32>
    %196 = arith.subf %179, %195 : vector<16x40xf32>
    %cst_42 = arith.constant 9.99999974E-6 : f32
    %197 = vector.broadcast %cst_42 : f32 to vector<16x1xf32>
    %198 = arith.addf %194, %197 : vector<16x1xf32>
    %199 = math.rsqrt %198 : vector<16x1xf32>
    %200 = vector.broadcast %199 : vector<16x1xf32> to vector<16x40xf32>
    %201 = arith.mulf %196, %200 : vector<16x40xf32>
    %202 = vector.broadcast %165 : vector<16x1xf32> to vector<16x40xf32>
    %203 = arith.mulf %201, %202 : vector<16x40xf32>
    %204 = vector.broadcast %166 : vector<16x1xf32> to vector<16x40xf32>
    %205 = arith.addf %203, %204 : vector<16x40xf32>
    %cst_43 = arith.constant 0.000000e+00 : f32
    %206 = vector.broadcast %cst_43 : f32 to vector<16x40xf32>
    %207 = arith.cmpf oge, %205, %206 : vector<16x40xf32>
    %cst_44 = arith.constant 1.000000e-01 : f32
    %208 = vector.broadcast %cst_44 : f32 to vector<16x40xf32>
    %209 = arith.mulf %208, %205 : vector<16x40xf32>
    %210 = arith.select %207, %205, %209 : vector<16x40xi1>, vector<16x40xf32>
    %211 = vector.broadcast %4 : vector<1x40xf32> to vector<16x40xf32>
    %212 = arith.mulf %210, %211 : vector<16x40xf32>
    %cst_45 = arith.constant 0.000000e+00 : f32
    %213 = vector.broadcast %cst_45 : f32 to vector<16x6xf32>
    %214 = tpu.concatenate %213, %212, %213 in 1 : vector<16x6xf32>, vector<16x40xf32>, vector<16x6xf32> -> vector<16x52xf32>
    %215 = vector.extract_strided_slice %11 {offsets = [66, 0], sizes = [20, 36], strides = [1, 1]} : vector<115x80xf32> to vector<20x36xf32>
    %216 = vector.extract_strided_slice %212 {offsets = [0, 0], sizes = [16, 20], strides = [1, 1]} : vector<16x40xf32> to vector<16x20xf32>
    %cst_46 = arith.constant dense<0.000000e+00> : vector<16x36xf32>
    %217 = tpu.matmul %216, %215, %cst_46 {dimension_numbers = #tpu.dot_dimension_numbers<[1], [0], [0], [1], [0, 0, 1, 1], [], []>} : vector<16x20xf32>, vector<20x36xf32>, vector<16x36xf32> -> vector<16x36xf32>
    %218 = vector.extract_strided_slice %217 {offsets = [0, 0], sizes = [16, 9], strides = [1, 1]} : vector<16x36xf32> to vector<16x9xf32>
    %219 = vector.extract_strided_slice %217 {offsets = [0, 9], sizes = [16, 9], strides = [1, 1]} : vector<16x36xf32> to vector<16x9xf32>
    %220 = arith.maximumf %218, %219 : vector<16x9xf32>
    %221 = vector.extract_strided_slice %217 {offsets = [0, 18], sizes = [16, 9], strides = [1, 1]} : vector<16x36xf32> to vector<16x9xf32>
    %222 = vector.extract_strided_slice %217 {offsets = [0, 27], sizes = [16, 9], strides = [1, 1]} : vector<16x36xf32> to vector<16x9xf32>
    %223 = arith.maximumf %221, %222 : vector<16x9xf32>
    %224 = arith.maximumf %220, %223 : vector<16x9xf32>
    %225 = vector.extract_strided_slice %212 {offsets = [0, 20], sizes = [16, 20], strides = [1, 1]} : vector<16x40xf32> to vector<16x20xf32>
    %cst_47 = arith.constant dense<0.000000e+00> : vector<16x36xf32>
    %226 = tpu.matmul %225, %215, %cst_47 {dimension_numbers = #tpu.dot_dimension_numbers<[1], [0], [0], [1], [0, 0, 1, 1], [], []>} : vector<16x20xf32>, vector<20x36xf32>, vector<16x36xf32> -> vector<16x36xf32>
    %227 = vector.extract_strided_slice %226 {offsets = [0, 0], sizes = [16, 9], strides = [1, 1]} : vector<16x36xf32> to vector<16x9xf32>
    %228 = vector.extract_strided_slice %226 {offsets = [0, 9], sizes = [16, 9], strides = [1, 1]} : vector<16x36xf32> to vector<16x9xf32>
    %229 = arith.maximumf %227, %228 : vector<16x9xf32>
    %230 = vector.extract_strided_slice %226 {offsets = [0, 18], sizes = [16, 9], strides = [1, 1]} : vector<16x36xf32> to vector<16x9xf32>
    %231 = vector.extract_strided_slice %226 {offsets = [0, 27], sizes = [16, 9], strides = [1, 1]} : vector<16x36xf32> to vector<16x9xf32>
    %232 = arith.maximumf %230, %231 : vector<16x9xf32>
    %233 = arith.maximumf %229, %232 : vector<16x9xf32>
    %234 = tpu.concatenate %224, %233 in 1 : vector<16x9xf32>, vector<16x9xf32> -> vector<16x18xf32>
    %cst_48 = arith.constant 0.000000e+00 : f32
    %235 = vector.broadcast %cst_48 : f32 to vector<16x4xf32>
    %236 = tpu.concatenate %235, %234, %235 in 1 : vector<16x4xf32>, vector<16x18xf32>, vector<16x4xf32> -> vector<16x26xf32>
    %237 = vector.extract_strided_slice %0 {offsets = [28, 0], sizes = [32, 291], strides = [1, 1]} : vector<117x291xf32> to vector<32x291xf32>
    %238 = vector.extract_strided_slice %237 {offsets = [0, 0], sizes = [32, 144], strides = [1, 1]} : vector<32x291xf32> to vector<32x144xf32>
    %239 = vector.extract_strided_slice %237 {offsets = [0, 288], sizes = [32, 1], strides = [1, 1]} : vector<32x291xf32> to vector<32x1xf32>
    %240 = vector.extract_strided_slice %237 {offsets = [0, 289], sizes = [32, 1], strides = [1, 1]} : vector<32x291xf32> to vector<32x1xf32>
    %241 = vector.extract_strided_slice %237 {offsets = [0, 290], sizes = [32, 1], strides = [1, 1]} : vector<32x291xf32> to vector<32x1xf32>
    %242 = vector.extract_strided_slice %236 {offsets = [0, 0], sizes = [16, 18], strides = [1, 1]} : vector<16x26xf32> to vector<16x18xf32>
    %243 = vector.extract_strided_slice %236 {offsets = [0, 1], sizes = [16, 18], strides = [1, 1]} : vector<16x26xf32> to vector<16x18xf32>
    %244 = vector.extract_strided_slice %236 {offsets = [0, 2], sizes = [16, 18], strides = [1, 1]} : vector<16x26xf32> to vector<16x18xf32>
    %245 = vector.extract_strided_slice %236 {offsets = [0, 3], sizes = [16, 18], strides = [1, 1]} : vector<16x26xf32> to vector<16x18xf32>
    %246 = vector.extract_strided_slice %236 {offsets = [0, 4], sizes = [16, 18], strides = [1, 1]} : vector<16x26xf32> to vector<16x18xf32>
    %247 = vector.extract_strided_slice %236 {offsets = [0, 5], sizes = [16, 18], strides = [1, 1]} : vector<16x26xf32> to vector<16x18xf32>
    %248 = vector.extract_strided_slice %236 {offsets = [0, 6], sizes = [16, 18], strides = [1, 1]} : vector<16x26xf32> to vector<16x18xf32>
    %249 = vector.extract_strided_slice %236 {offsets = [0, 7], sizes = [16, 18], strides = [1, 1]} : vector<16x26xf32> to vector<16x18xf32>
    %250 = vector.extract_strided_slice %236 {offsets = [0, 8], sizes = [16, 18], strides = [1, 1]} : vector<16x26xf32> to vector<16x18xf32>
    %251 = tpu.concatenate %242, %243, %244, %245, %246, %247, %248, %249, %250 in 0 : vector<16x18xf32>, vector<16x18xf32>, vector<16x18xf32>, vector<16x18xf32>, vector<16x18xf32>, vector<16x18xf32>, vector<16x18xf32>, vector<16x18xf32>, vector<16x18xf32> -> vector<144x18xf32>
    %cst_49 = arith.constant dense<0.000000e+00> : vector<32x18xf32>
    %252 = tpu.matmul %238, %251, %cst_49 {dimension_numbers = #tpu.dot_dimension_numbers<[1], [0], [0], [1], [0, 0, 1, 1], [], []>} : vector<32x144xf32>, vector<144x18xf32>, vector<32x18xf32> -> vector<32x18xf32>
    %253 = vector.broadcast %239 : vector<32x1xf32> to vector<32x18xf32>
    %254 = arith.addf %252, %253 : vector<32x18xf32>
    %255 = vector.broadcast %5 : vector<1x18xf32> to vector<32x18xf32>
    %256 = arith.mulf %254, %255 : vector<32x18xf32>
    %cst_50 = arith.constant dense<0.000000e+00> : vector<32xf32>
    %257 = vector.multi_reduction <add>, %256, %cst_50 [1] : vector<32x18xf32> to vector<32xf32>
    %258 = vector.shape_cast %257 : vector<32xf32> to vector<32x1xf32>
    %259 = arith.mulf %256, %254 : vector<32x18xf32>
    %cst_51 = arith.constant dense<0.000000e+00> : vector<32xf32>
    %260 = vector.multi_reduction <add>, %259, %cst_51 [1] : vector<32x18xf32> to vector<32xf32>
    %261 = vector.shape_cast %260 : vector<32xf32> to vector<32x1xf32>
    %cst_52 = arith.constant 5.000000e-01 : f32
    %262 = vector.broadcast %cst_52 : f32 to vector<32x1xf32>
    %263 = arith.mulf %258, %262 : vector<32x1xf32>
    %cst_53 = arith.constant 5.000000e-01 : f32
    %264 = vector.broadcast %cst_53 : f32 to vector<32x1xf32>
    %265 = arith.mulf %261, %264 : vector<32x1xf32>
    %266 = arith.mulf %263, %263 : vector<32x1xf32>
    %267 = arith.subf %265, %266 : vector<32x1xf32>
    %cst_54 = arith.constant 0.000000e+00 : f32
    %268 = vector.broadcast %cst_54 : f32 to vector<32x1xf32>
    %269 = arith.maximumf %267, %268 : vector<32x1xf32>
    %270 = vector.broadcast %263 : vector<32x1xf32> to vector<32x18xf32>
    %271 = arith.subf %254, %270 : vector<32x18xf32>
    %cst_55 = arith.constant 9.99999974E-6 : f32
    %272 = vector.broadcast %cst_55 : f32 to vector<32x1xf32>
    %273 = arith.addf %269, %272 : vector<32x1xf32>
    %274 = math.rsqrt %273 : vector<32x1xf32>
    %275 = vector.broadcast %274 : vector<32x1xf32> to vector<32x18xf32>
    %276 = arith.mulf %271, %275 : vector<32x18xf32>
    %277 = vector.broadcast %240 : vector<32x1xf32> to vector<32x18xf32>
    %278 = arith.mulf %276, %277 : vector<32x18xf32>
    %279 = vector.broadcast %241 : vector<32x1xf32> to vector<32x18xf32>
    %280 = arith.addf %278, %279 : vector<32x18xf32>
    %cst_56 = arith.constant 0.000000e+00 : f32
    %281 = vector.broadcast %cst_56 : f32 to vector<32x18xf32>
    %282 = arith.cmpf oge, %280, %281 : vector<32x18xf32>
    %cst_57 = arith.constant 1.000000e-01 : f32
    %283 = vector.broadcast %cst_57 : f32 to vector<32x18xf32>
    %284 = arith.mulf %283, %280 : vector<32x18xf32>
    %285 = arith.select %282, %280, %284 : vector<32x18xi1>, vector<32x18xf32>
    %286 = vector.broadcast %5 : vector<1x18xf32> to vector<32x18xf32>
    %287 = arith.mulf %285, %286 : vector<32x18xf32>
    %288 = vector.extract_strided_slice %11 {offsets = [86, 0], sizes = [9, 20], strides = [1, 1]} : vector<115x80xf32> to vector<9x20xf32>
    %289 = vector.extract_strided_slice %287 {offsets = [0, 0], sizes = [32, 9], strides = [1, 1]} : vector<32x18xf32> to vector<32x9xf32>
    %cst_58 = arith.constant dense<0.000000e+00> : vector<32x20xf32>
    %290 = tpu.matmul %289, %288, %cst_58 {dimension_numbers = #tpu.dot_dimension_numbers<[1], [0], [0], [1], [0, 0, 1, 1], [], []>} : vector<32x9xf32>, vector<9x20xf32>, vector<32x20xf32> -> vector<32x20xf32>
    %291 = vector.extract_strided_slice %287 {offsets = [0, 9], sizes = [32, 9], strides = [1, 1]} : vector<32x18xf32> to vector<32x9xf32>
    %cst_59 = arith.constant dense<0.000000e+00> : vector<32x20xf32>
    %292 = tpu.matmul %291, %288, %cst_59 {dimension_numbers = #tpu.dot_dimension_numbers<[1], [0], [0], [1], [0, 0, 1, 1], [], []>} : vector<32x9xf32>, vector<9x20xf32>, vector<32x20xf32> -> vector<32x20xf32>
    %293 = tpu.concatenate %290, %292 in 1 : vector<32x20xf32>, vector<32x20xf32> -> vector<32x40xf32>
    %cst_60 = arith.constant 0.000000e+00 : f32
    %294 = vector.broadcast %cst_60 : f32 to vector<32x6xf32>
    %295 = tpu.concatenate %294, %293, %294 in 1 : vector<32x6xf32>, vector<32x40xf32>, vector<32x6xf32> -> vector<32x52xf32>
    %296 = vector.extract_strided_slice %0 {offsets = [60, 0], sizes = [16, 291], strides = [1, 1]} : vector<117x291xf32> to vector<16x291xf32>
    %297 = vector.extract_strided_slice %296 {offsets = [0, 0], sizes = [16, 288], strides = [1, 1]} : vector<16x291xf32> to vector<16x288xf32>
    %298 = vector.extract_strided_slice %296 {offsets = [0, 288], sizes = [16, 1], strides = [1, 1]} : vector<16x291xf32> to vector<16x1xf32>
    %299 = vector.extract_strided_slice %296 {offsets = [0, 289], sizes = [16, 1], strides = [1, 1]} : vector<16x291xf32> to vector<16x1xf32>
    %300 = vector.extract_strided_slice %296 {offsets = [0, 290], sizes = [16, 1], strides = [1, 1]} : vector<16x291xf32> to vector<16x1xf32>
    %301 = vector.extract_strided_slice %295 {offsets = [0, 0], sizes = [32, 40], strides = [1, 1]} : vector<32x52xf32> to vector<32x40xf32>
    %302 = vector.extract_strided_slice %295 {offsets = [0, 1], sizes = [32, 40], strides = [1, 1]} : vector<32x52xf32> to vector<32x40xf32>
    %303 = vector.extract_strided_slice %295 {offsets = [0, 2], sizes = [32, 40], strides = [1, 1]} : vector<32x52xf32> to vector<32x40xf32>
    %304 = vector.extract_strided_slice %295 {offsets = [0, 5], sizes = [32, 40], strides = [1, 1]} : vector<32x52xf32> to vector<32x40xf32>
    %305 = vector.extract_strided_slice %295 {offsets = [0, 6], sizes = [32, 40], strides = [1, 1]} : vector<32x52xf32> to vector<32x40xf32>
    %306 = vector.extract_strided_slice %295 {offsets = [0, 7], sizes = [32, 40], strides = [1, 1]} : vector<32x52xf32> to vector<32x40xf32>
    %307 = vector.extract_strided_slice %295 {offsets = [0, 10], sizes = [32, 40], strides = [1, 1]} : vector<32x52xf32> to vector<32x40xf32>
    %308 = vector.extract_strided_slice %295 {offsets = [0, 11], sizes = [32, 40], strides = [1, 1]} : vector<32x52xf32> to vector<32x40xf32>
    %309 = vector.extract_strided_slice %295 {offsets = [0, 12], sizes = [32, 40], strides = [1, 1]} : vector<32x52xf32> to vector<32x40xf32>
    %310 = tpu.concatenate %301, %302, %303, %304, %305, %306, %307, %308, %309 in 0 : vector<32x40xf32>, vector<32x40xf32>, vector<32x40xf32>, vector<32x40xf32>, vector<32x40xf32>, vector<32x40xf32>, vector<32x40xf32>, vector<32x40xf32>, vector<32x40xf32> -> vector<288x40xf32>
    %cst_61 = arith.constant dense<0.000000e+00> : vector<16x40xf32>
    %311 = tpu.matmul %297, %310, %cst_61 {dimension_numbers = #tpu.dot_dimension_numbers<[1], [0], [0], [1], [0, 0, 1, 1], [], []>} : vector<16x288xf32>, vector<288x40xf32>, vector<16x40xf32> -> vector<16x40xf32>
    %312 = vector.broadcast %298 : vector<16x1xf32> to vector<16x40xf32>
    %313 = arith.addf %311, %312 : vector<16x40xf32>
    %314 = vector.broadcast %4 : vector<1x40xf32> to vector<16x40xf32>
    %315 = arith.mulf %313, %314 : vector<16x40xf32>
    %cst_62 = arith.constant dense<0.000000e+00> : vector<16xf32>
    %316 = vector.multi_reduction <add>, %315, %cst_62 [1] : vector<16x40xf32> to vector<16xf32>
    %317 = vector.shape_cast %316 : vector<16xf32> to vector<16x1xf32>
    %318 = arith.mulf %315, %313 : vector<16x40xf32>
    %cst_63 = arith.constant dense<0.000000e+00> : vector<16xf32>
    %319 = vector.multi_reduction <add>, %318, %cst_63 [1] : vector<16x40xf32> to vector<16xf32>
    %320 = vector.shape_cast %319 : vector<16xf32> to vector<16x1xf32>
    %cst_64 = arith.constant 0.0833333358 : f32
    %321 = vector.broadcast %cst_64 : f32 to vector<16x1xf32>
    %322 = arith.mulf %317, %321 : vector<16x1xf32>
    %cst_65 = arith.constant 0.0833333358 : f32
    %323 = vector.broadcast %cst_65 : f32 to vector<16x1xf32>
    %324 = arith.mulf %320, %323 : vector<16x1xf32>
    %325 = arith.mulf %322, %322 : vector<16x1xf32>
    %326 = arith.subf %324, %325 : vector<16x1xf32>
    %cst_66 = arith.constant 0.000000e+00 : f32
    %327 = vector.broadcast %cst_66 : f32 to vector<16x1xf32>
    %328 = arith.maximumf %326, %327 : vector<16x1xf32>
    %329 = vector.broadcast %322 : vector<16x1xf32> to vector<16x40xf32>
    %330 = arith.subf %313, %329 : vector<16x40xf32>
    %cst_67 = arith.constant 9.99999974E-6 : f32
    %331 = vector.broadcast %cst_67 : f32 to vector<16x1xf32>
    %332 = arith.addf %328, %331 : vector<16x1xf32>
    %333 = math.rsqrt %332 : vector<16x1xf32>
    %334 = vector.broadcast %333 : vector<16x1xf32> to vector<16x40xf32>
    %335 = arith.mulf %330, %334 : vector<16x40xf32>
    %336 = vector.broadcast %299 : vector<16x1xf32> to vector<16x40xf32>
    %337 = arith.mulf %335, %336 : vector<16x40xf32>
    %338 = vector.broadcast %300 : vector<16x1xf32> to vector<16x40xf32>
    %339 = arith.addf %337, %338 : vector<16x40xf32>
    %cst_68 = arith.constant 0.000000e+00 : f32
    %340 = vector.broadcast %cst_68 : f32 to vector<16x40xf32>
    %341 = arith.cmpf oge, %339, %340 : vector<16x40xf32>
    %cst_69 = arith.constant 1.000000e-01 : f32
    %342 = vector.broadcast %cst_69 : f32 to vector<16x40xf32>
    %343 = arith.mulf %342, %339 : vector<16x40xf32>
    %344 = arith.select %341, %339, %343 : vector<16x40xi1>, vector<16x40xf32>
    %345 = vector.broadcast %4 : vector<1x40xf32> to vector<16x40xf32>
    %346 = arith.mulf %344, %345 : vector<16x40xf32>
    %cst_70 = arith.constant 0.000000e+00 : f32
    %347 = vector.broadcast %cst_70 : f32 to vector<16x6xf32>
    %348 = tpu.concatenate %347, %346, %347 in 1 : vector<16x6xf32>, vector<16x40xf32>, vector<16x6xf32> -> vector<16x52xf32>
    %349 = vector.extract_strided_slice %0 {offsets = [76, 0], sizes = [16, 291], strides = [1, 1]} : vector<117x291xf32> to vector<16x291xf32>
    %350 = vector.extract_strided_slice %349 {offsets = [0, 0], sizes = [16, 288], strides = [1, 1]} : vector<16x291xf32> to vector<16x288xf32>
    %351 = vector.extract_strided_slice %349 {offsets = [0, 288], sizes = [16, 1], strides = [1, 1]} : vector<16x291xf32> to vector<16x1xf32>
    %352 = vector.extract_strided_slice %349 {offsets = [0, 289], sizes = [16, 1], strides = [1, 1]} : vector<16x291xf32> to vector<16x1xf32>
    %353 = vector.extract_strided_slice %349 {offsets = [0, 290], sizes = [16, 1], strides = [1, 1]} : vector<16x291xf32> to vector<16x1xf32>
    %354 = vector.extract_strided_slice %348 {offsets = [0, 0], sizes = [16, 40], strides = [1, 1]} : vector<16x52xf32> to vector<16x40xf32>
    %355 = vector.extract_strided_slice %348 {offsets = [0, 1], sizes = [16, 40], strides = [1, 1]} : vector<16x52xf32> to vector<16x40xf32>
    %356 = vector.extract_strided_slice %348 {offsets = [0, 2], sizes = [16, 40], strides = [1, 1]} : vector<16x52xf32> to vector<16x40xf32>
    %357 = vector.extract_strided_slice %348 {offsets = [0, 5], sizes = [16, 40], strides = [1, 1]} : vector<16x52xf32> to vector<16x40xf32>
    %358 = vector.extract_strided_slice %348 {offsets = [0, 6], sizes = [16, 40], strides = [1, 1]} : vector<16x52xf32> to vector<16x40xf32>
    %359 = vector.extract_strided_slice %348 {offsets = [0, 7], sizes = [16, 40], strides = [1, 1]} : vector<16x52xf32> to vector<16x40xf32>
    %360 = vector.extract_strided_slice %348 {offsets = [0, 10], sizes = [16, 40], strides = [1, 1]} : vector<16x52xf32> to vector<16x40xf32>
    %361 = vector.extract_strided_slice %348 {offsets = [0, 11], sizes = [16, 40], strides = [1, 1]} : vector<16x52xf32> to vector<16x40xf32>
    %362 = vector.extract_strided_slice %348 {offsets = [0, 12], sizes = [16, 40], strides = [1, 1]} : vector<16x52xf32> to vector<16x40xf32>
    %363 = vector.extract_strided_slice %214 {offsets = [0, 0], sizes = [16, 40], strides = [1, 1]} : vector<16x52xf32> to vector<16x40xf32>
    %364 = vector.extract_strided_slice %214 {offsets = [0, 1], sizes = [16, 40], strides = [1, 1]} : vector<16x52xf32> to vector<16x40xf32>
    %365 = vector.extract_strided_slice %214 {offsets = [0, 2], sizes = [16, 40], strides = [1, 1]} : vector<16x52xf32> to vector<16x40xf32>
    %366 = vector.extract_strided_slice %214 {offsets = [0, 5], sizes = [16, 40], strides = [1, 1]} : vector<16x52xf32> to vector<16x40xf32>
    %367 = vector.extract_strided_slice %214 {offsets = [0, 6], sizes = [16, 40], strides = [1, 1]} : vector<16x52xf32> to vector<16x40xf32>
    %368 = vector.extract_strided_slice %214 {offsets = [0, 7], sizes = [16, 40], strides = [1, 1]} : vector<16x52xf32> to vector<16x40xf32>
    %369 = vector.extract_strided_slice %214 {offsets = [0, 10], sizes = [16, 40], strides = [1, 1]} : vector<16x52xf32> to vector<16x40xf32>
    %370 = vector.extract_strided_slice %214 {offsets = [0, 11], sizes = [16, 40], strides = [1, 1]} : vector<16x52xf32> to vector<16x40xf32>
    %371 = vector.extract_strided_slice %214 {offsets = [0, 12], sizes = [16, 40], strides = [1, 1]} : vector<16x52xf32> to vector<16x40xf32>
    %372 = tpu.concatenate %354, %355, %356, %357, %358, %359, %360, %361, %362, %363, %364, %365, %366, %367, %368, %369 in 0 : vector<16x40xf32>, vector<16x40xf32>, vector<16x40xf32>, vector<16x40xf32>, vector<16x40xf32>, vector<16x40xf32>, vector<16x40xf32>, vector<16x40xf32>, vector<16x40xf32>, vector<16x40xf32>, vector<16x40xf32>, vector<16x40xf32>, vector<16x40xf32>, vector<16x40xf32>, vector<16x40xf32>, vector<16x40xf32> -> vector<256x40xf32>
    %373 = tpu.concatenate %370, %371 in 0 : vector<16x40xf32>, vector<16x40xf32> -> vector<32x40xf32>
    %374 = tpu.concatenate %372, %373 in 0 : vector<256x40xf32>, vector<32x40xf32> -> vector<288x40xf32>
    %cst_71 = arith.constant dense<0.000000e+00> : vector<16x40xf32>
    %375 = tpu.matmul %350, %374, %cst_71 {dimension_numbers = #tpu.dot_dimension_numbers<[1], [0], [0], [1], [0, 0, 1, 1], [], []>} : vector<16x288xf32>, vector<288x40xf32>, vector<16x40xf32> -> vector<16x40xf32>
    %376 = vector.broadcast %351 : vector<16x1xf32> to vector<16x40xf32>
    %377 = arith.addf %375, %376 : vector<16x40xf32>
    %378 = vector.broadcast %4 : vector<1x40xf32> to vector<16x40xf32>
    %379 = arith.mulf %377, %378 : vector<16x40xf32>
    %cst_72 = arith.constant dense<0.000000e+00> : vector<16xf32>
    %380 = vector.multi_reduction <add>, %379, %cst_72 [1] : vector<16x40xf32> to vector<16xf32>
    %381 = vector.shape_cast %380 : vector<16xf32> to vector<16x1xf32>
    %382 = arith.mulf %379, %377 : vector<16x40xf32>
    %cst_73 = arith.constant dense<0.000000e+00> : vector<16xf32>
    %383 = vector.multi_reduction <add>, %382, %cst_73 [1] : vector<16x40xf32> to vector<16xf32>
    %384 = vector.shape_cast %383 : vector<16xf32> to vector<16x1xf32>
    %cst_74 = arith.constant 0.0833333358 : f32
    %385 = vector.broadcast %cst_74 : f32 to vector<16x1xf32>
    %386 = arith.mulf %381, %385 : vector<16x1xf32>
    %cst_75 = arith.constant 0.0833333358 : f32
    %387 = vector.broadcast %cst_75 : f32 to vector<16x1xf32>
    %388 = arith.mulf %384, %387 : vector<16x1xf32>
    %389 = arith.mulf %386, %386 : vector<16x1xf32>
    %390 = arith.subf %388, %389 : vector<16x1xf32>
    %cst_76 = arith.constant 0.000000e+00 : f32
    %391 = vector.broadcast %cst_76 : f32 to vector<16x1xf32>
    %392 = arith.maximumf %390, %391 : vector<16x1xf32>
    %393 = vector.broadcast %386 : vector<16x1xf32> to vector<16x40xf32>
    %394 = arith.subf %377, %393 : vector<16x40xf32>
    %cst_77 = arith.constant 9.99999974E-6 : f32
    %395 = vector.broadcast %cst_77 : f32 to vector<16x1xf32>
    %396 = arith.addf %392, %395 : vector<16x1xf32>
    %397 = math.rsqrt %396 : vector<16x1xf32>
    %398 = vector.broadcast %397 : vector<16x1xf32> to vector<16x40xf32>
    %399 = arith.mulf %394, %398 : vector<16x40xf32>
    %400 = vector.broadcast %352 : vector<16x1xf32> to vector<16x40xf32>
    %401 = arith.mulf %399, %400 : vector<16x40xf32>
    %402 = vector.broadcast %353 : vector<16x1xf32> to vector<16x40xf32>
    %403 = arith.addf %401, %402 : vector<16x40xf32>
    %cst_78 = arith.constant 0.000000e+00 : f32
    %404 = vector.broadcast %cst_78 : f32 to vector<16x40xf32>
    %405 = arith.cmpf oge, %403, %404 : vector<16x40xf32>
    %cst_79 = arith.constant 1.000000e-01 : f32
    %406 = vector.broadcast %cst_79 : f32 to vector<16x40xf32>
    %407 = arith.mulf %406, %403 : vector<16x40xf32>
    %408 = arith.select %405, %403, %407 : vector<16x40xi1>, vector<16x40xf32>
    %409 = vector.broadcast %4 : vector<1x40xf32> to vector<16x40xf32>
    %410 = arith.mulf %408, %409 : vector<16x40xf32>
    %411 = vector.extract_strided_slice %11 {offsets = [95, 0], sizes = [20, 66], strides = [1, 1]} : vector<115x80xf32> to vector<20x66xf32>
    %412 = vector.extract_strided_slice %410 {offsets = [0, 0], sizes = [16, 20], strides = [1, 1]} : vector<16x40xf32> to vector<16x20xf32>
    %cst_80 = arith.constant dense<0.000000e+00> : vector<16x66xf32>
    %413 = tpu.matmul %412, %411, %cst_80 {dimension_numbers = #tpu.dot_dimension_numbers<[1], [0], [0], [1], [0, 0, 1, 1], [], []>} : vector<16x20xf32>, vector<20x66xf32>, vector<16x66xf32> -> vector<16x66xf32>
    %414 = vector.extract_strided_slice %410 {offsets = [0, 20], sizes = [16, 20], strides = [1, 1]} : vector<16x40xf32> to vector<16x20xf32>
    %cst_81 = arith.constant dense<0.000000e+00> : vector<16x66xf32>
    %415 = tpu.matmul %414, %411, %cst_81 {dimension_numbers = #tpu.dot_dimension_numbers<[1], [0], [0], [1], [0, 0, 1, 1], [], []>} : vector<16x20xf32>, vector<20x66xf32>, vector<16x66xf32> -> vector<16x66xf32>
    %416 = tpu.concatenate %413, %415 in 1 : vector<16x66xf32>, vector<16x66xf32> -> vector<16x132xf32>
    %cst_82 = arith.constant 0.000000e+00 : f32
    %417 = vector.broadcast %cst_82 : f32 to vector<16x12xf32>
    %418 = tpu.concatenate %417, %416, %417 in 1 : vector<16x12xf32>, vector<16x132xf32>, vector<16x12xf32> -> vector<16x156xf32>
    %419 = vector.extract_strided_slice %0 {offsets = [92, 0], sizes = [8, 291], strides = [1, 1]} : vector<117x291xf32> to vector<8x291xf32>
    %420 = vector.extract_strided_slice %419 {offsets = [0, 0], sizes = [8, 144], strides = [1, 1]} : vector<8x291xf32> to vector<8x144xf32>
    %421 = vector.extract_strided_slice %419 {offsets = [0, 288], sizes = [8, 1], strides = [1, 1]} : vector<8x291xf32> to vector<8x1xf32>
    %422 = vector.extract_strided_slice %419 {offsets = [0, 289], sizes = [8, 1], strides = [1, 1]} : vector<8x291xf32> to vector<8x1xf32>
    %423 = vector.extract_strided_slice %419 {offsets = [0, 290], sizes = [8, 1], strides = [1, 1]} : vector<8x291xf32> to vector<8x1xf32>
    %424 = vector.extract_strided_slice %418 {offsets = [0, 0], sizes = [16, 132], strides = [1, 1]} : vector<16x156xf32> to vector<16x132xf32>
    %425 = vector.extract_strided_slice %418 {offsets = [0, 1], sizes = [16, 132], strides = [1, 1]} : vector<16x156xf32> to vector<16x132xf32>
    %426 = vector.extract_strided_slice %418 {offsets = [0, 2], sizes = [16, 132], strides = [1, 1]} : vector<16x156xf32> to vector<16x132xf32>
    %427 = vector.extract_strided_slice %418 {offsets = [0, 11], sizes = [16, 132], strides = [1, 1]} : vector<16x156xf32> to vector<16x132xf32>
    %428 = vector.extract_strided_slice %418 {offsets = [0, 12], sizes = [16, 132], strides = [1, 1]} : vector<16x156xf32> to vector<16x132xf32>
    %429 = vector.extract_strided_slice %418 {offsets = [0, 13], sizes = [16, 132], strides = [1, 1]} : vector<16x156xf32> to vector<16x132xf32>
    %430 = vector.extract_strided_slice %418 {offsets = [0, 22], sizes = [16, 132], strides = [1, 1]} : vector<16x156xf32> to vector<16x132xf32>
    %431 = vector.extract_strided_slice %418 {offsets = [0, 23], sizes = [16, 132], strides = [1, 1]} : vector<16x156xf32> to vector<16x132xf32>
    %432 = vector.extract_strided_slice %418 {offsets = [0, 24], sizes = [16, 132], strides = [1, 1]} : vector<16x156xf32> to vector<16x132xf32>
    %433 = tpu.concatenate %424, %425, %426, %427, %428, %429, %430, %431, %432 in 0 : vector<16x132xf32>, vector<16x132xf32>, vector<16x132xf32>, vector<16x132xf32>, vector<16x132xf32>, vector<16x132xf32>, vector<16x132xf32>, vector<16x132xf32>, vector<16x132xf32> -> vector<144x132xf32>
    %cst_83 = arith.constant dense<0.000000e+00> : vector<8x132xf32>
    %434 = tpu.matmul %420, %433, %cst_83 {dimension_numbers = #tpu.dot_dimension_numbers<[1], [0], [0], [1], [0, 0, 1, 1], [], []>} : vector<8x144xf32>, vector<144x132xf32>, vector<8x132xf32> -> vector<8x132xf32>
    %435 = vector.broadcast %421 : vector<8x1xf32> to vector<8x132xf32>
    %436 = arith.addf %434, %435 : vector<8x132xf32>
    %437 = vector.broadcast %3 : vector<1x132xf32> to vector<8x132xf32>
    %438 = arith.mulf %436, %437 : vector<8x132xf32>
    %cst_84 = arith.constant dense<0.000000e+00> : vector<8xf32>
    %439 = vector.multi_reduction <add>, %438, %cst_84 [1] : vector<8x132xf32> to vector<8xf32>
    %440 = vector.shape_cast %439 : vector<8xf32> to vector<8x1xf32>
    %441 = arith.mulf %438, %436 : vector<8x132xf32>
    %cst_85 = arith.constant dense<0.000000e+00> : vector<8xf32>
    %442 = vector.multi_reduction <add>, %441, %cst_85 [1] : vector<8x132xf32> to vector<8xf32>
    %443 = vector.shape_cast %442 : vector<8xf32> to vector<8x1xf32>
    %cst_86 = arith.constant 0.013888889 : f32
    %444 = vector.broadcast %cst_86 : f32 to vector<8x1xf32>
    %445 = arith.mulf %440, %444 : vector<8x1xf32>
    %cst_87 = arith.constant 0.013888889 : f32
    %446 = vector.broadcast %cst_87 : f32 to vector<8x1xf32>
    %447 = arith.mulf %443, %446 : vector<8x1xf32>
    %448 = arith.mulf %445, %445 : vector<8x1xf32>
    %449 = arith.subf %447, %448 : vector<8x1xf32>
    %cst_88 = arith.constant 0.000000e+00 : f32
    %450 = vector.broadcast %cst_88 : f32 to vector<8x1xf32>
    %451 = arith.maximumf %449, %450 : vector<8x1xf32>
    %452 = vector.broadcast %445 : vector<8x1xf32> to vector<8x132xf32>
    %453 = arith.subf %436, %452 : vector<8x132xf32>
    %cst_89 = arith.constant 9.99999974E-6 : f32
    %454 = vector.broadcast %cst_89 : f32 to vector<8x1xf32>
    %455 = arith.addf %451, %454 : vector<8x1xf32>
    %456 = math.rsqrt %455 : vector<8x1xf32>
    %457 = vector.broadcast %456 : vector<8x1xf32> to vector<8x132xf32>
    %458 = arith.mulf %453, %457 : vector<8x132xf32>
    %459 = vector.broadcast %422 : vector<8x1xf32> to vector<8x132xf32>
    %460 = arith.mulf %458, %459 : vector<8x132xf32>
    %461 = vector.broadcast %423 : vector<8x1xf32> to vector<8x132xf32>
    %462 = arith.addf %460, %461 : vector<8x132xf32>
    %cst_90 = arith.constant 0.000000e+00 : f32
    %463 = vector.broadcast %cst_90 : f32 to vector<8x132xf32>
    %464 = arith.cmpf oge, %462, %463 : vector<8x132xf32>
    %cst_91 = arith.constant 1.000000e-01 : f32
    %465 = vector.broadcast %cst_91 : f32 to vector<8x132xf32>
    %466 = arith.mulf %465, %462 : vector<8x132xf32>
    %467 = arith.select %464, %462, %466 : vector<8x132xi1>, vector<8x132xf32>
    %468 = vector.broadcast %3 : vector<1x132xf32> to vector<8x132xf32>
    %469 = arith.mulf %467, %468 : vector<8x132xf32>
    %cst_92 = arith.constant 0.000000e+00 : f32
    %470 = vector.broadcast %cst_92 : f32 to vector<8x12xf32>
    %471 = tpu.concatenate %470, %469, %470 in 1 : vector<8x12xf32>, vector<8x132xf32>, vector<8x12xf32> -> vector<8x156xf32>
    %472 = vector.extract_strided_slice %0 {offsets = [100, 0], sizes = [8, 291], strides = [1, 1]} : vector<117x291xf32> to vector<8x291xf32>
    %473 = vector.extract_strided_slice %472 {offsets = [0, 0], sizes = [8, 144], strides = [1, 1]} : vector<8x291xf32> to vector<8x144xf32>
    %474 = vector.extract_strided_slice %472 {offsets = [0, 288], sizes = [8, 1], strides = [1, 1]} : vector<8x291xf32> to vector<8x1xf32>
    %475 = vector.extract_strided_slice %472 {offsets = [0, 289], sizes = [8, 1], strides = [1, 1]} : vector<8x291xf32> to vector<8x1xf32>
    %476 = vector.extract_strided_slice %472 {offsets = [0, 290], sizes = [8, 1], strides = [1, 1]} : vector<8x291xf32> to vector<8x1xf32>
    %477 = vector.extract_strided_slice %471 {offsets = [0, 0], sizes = [8, 132], strides = [1, 1]} : vector<8x156xf32> to vector<8x132xf32>
    %478 = vector.extract_strided_slice %471 {offsets = [0, 1], sizes = [8, 132], strides = [1, 1]} : vector<8x156xf32> to vector<8x132xf32>
    %479 = vector.extract_strided_slice %471 {offsets = [0, 2], sizes = [8, 132], strides = [1, 1]} : vector<8x156xf32> to vector<8x132xf32>
    %480 = vector.extract_strided_slice %471 {offsets = [0, 11], sizes = [8, 132], strides = [1, 1]} : vector<8x156xf32> to vector<8x132xf32>
    %481 = vector.extract_strided_slice %471 {offsets = [0, 12], sizes = [8, 132], strides = [1, 1]} : vector<8x156xf32> to vector<8x132xf32>
    %482 = vector.extract_strided_slice %471 {offsets = [0, 13], sizes = [8, 132], strides = [1, 1]} : vector<8x156xf32> to vector<8x132xf32>
    %483 = vector.extract_strided_slice %471 {offsets = [0, 22], sizes = [8, 132], strides = [1, 1]} : vector<8x156xf32> to vector<8x132xf32>
    %484 = vector.extract_strided_slice %471 {offsets = [0, 23], sizes = [8, 132], strides = [1, 1]} : vector<8x156xf32> to vector<8x132xf32>
    %485 = vector.extract_strided_slice %471 {offsets = [0, 24], sizes = [8, 132], strides = [1, 1]} : vector<8x156xf32> to vector<8x132xf32>
    %486 = vector.extract_strided_slice %139 {offsets = [0, 0], sizes = [8, 132], strides = [1, 1]} : vector<8x156xf32> to vector<8x132xf32>
    %487 = vector.extract_strided_slice %139 {offsets = [0, 1], sizes = [8, 132], strides = [1, 1]} : vector<8x156xf32> to vector<8x132xf32>
    %488 = vector.extract_strided_slice %139 {offsets = [0, 2], sizes = [8, 132], strides = [1, 1]} : vector<8x156xf32> to vector<8x132xf32>
    %489 = vector.extract_strided_slice %139 {offsets = [0, 11], sizes = [8, 132], strides = [1, 1]} : vector<8x156xf32> to vector<8x132xf32>
    %490 = vector.extract_strided_slice %139 {offsets = [0, 12], sizes = [8, 132], strides = [1, 1]} : vector<8x156xf32> to vector<8x132xf32>
    %491 = vector.extract_strided_slice %139 {offsets = [0, 13], sizes = [8, 132], strides = [1, 1]} : vector<8x156xf32> to vector<8x132xf32>
    %492 = vector.extract_strided_slice %139 {offsets = [0, 22], sizes = [8, 132], strides = [1, 1]} : vector<8x156xf32> to vector<8x132xf32>
    %493 = vector.extract_strided_slice %139 {offsets = [0, 23], sizes = [8, 132], strides = [1, 1]} : vector<8x156xf32> to vector<8x132xf32>
    %494 = vector.extract_strided_slice %139 {offsets = [0, 24], sizes = [8, 132], strides = [1, 1]} : vector<8x156xf32> to vector<8x132xf32>
    %495 = tpu.concatenate %477, %478, %479, %480, %481, %482, %483, %484, %485, %486, %487, %488, %489, %490, %491, %492 in 0 : vector<8x132xf32>, vector<8x132xf32>, vector<8x132xf32>, vector<8x132xf32>, vector<8x132xf32>, vector<8x132xf32>, vector<8x132xf32>, vector<8x132xf32>, vector<8x132xf32>, vector<8x132xf32>, vector<8x132xf32>, vector<8x132xf32>, vector<8x132xf32>, vector<8x132xf32>, vector<8x132xf32>, vector<8x132xf32> -> vector<128x132xf32>
    %496 = tpu.concatenate %493, %494 in 0 : vector<8x132xf32>, vector<8x132xf32> -> vector<16x132xf32>
    %497 = tpu.concatenate %495, %496 in 0 : vector<128x132xf32>, vector<16x132xf32> -> vector<144x132xf32>
    %cst_93 = arith.constant dense<0.000000e+00> : vector<8x132xf32>
    %498 = tpu.matmul %473, %497, %cst_93 {dimension_numbers = #tpu.dot_dimension_numbers<[1], [0], [0], [1], [0, 0, 1, 1], [], []>} : vector<8x144xf32>, vector<144x132xf32>, vector<8x132xf32> -> vector<8x132xf32>
    %499 = vector.broadcast %474 : vector<8x1xf32> to vector<8x132xf32>
    %500 = arith.addf %498, %499 : vector<8x132xf32>
    %501 = vector.broadcast %3 : vector<1x132xf32> to vector<8x132xf32>
    %502 = arith.mulf %500, %501 : vector<8x132xf32>
    %cst_94 = arith.constant dense<0.000000e+00> : vector<8xf32>
    %503 = vector.multi_reduction <add>, %502, %cst_94 [1] : vector<8x132xf32> to vector<8xf32>
    %504 = vector.shape_cast %503 : vector<8xf32> to vector<8x1xf32>
    %505 = arith.mulf %502, %500 : vector<8x132xf32>
    %cst_95 = arith.constant dense<0.000000e+00> : vector<8xf32>
    %506 = vector.multi_reduction <add>, %505, %cst_95 [1] : vector<8x132xf32> to vector<8xf32>
    %507 = vector.shape_cast %506 : vector<8xf32> to vector<8x1xf32>
    %cst_96 = arith.constant 0.013888889 : f32
    %508 = vector.broadcast %cst_96 : f32 to vector<8x1xf32>
    %509 = arith.mulf %504, %508 : vector<8x1xf32>
    %cst_97 = arith.constant 0.013888889 : f32
    %510 = vector.broadcast %cst_97 : f32 to vector<8x1xf32>
    %511 = arith.mulf %507, %510 : vector<8x1xf32>
    %512 = arith.mulf %509, %509 : vector<8x1xf32>
    %513 = arith.subf %511, %512 : vector<8x1xf32>
    %cst_98 = arith.constant 0.000000e+00 : f32
    %514 = vector.broadcast %cst_98 : f32 to vector<8x1xf32>
    %515 = arith.maximumf %513, %514 : vector<8x1xf32>
    %516 = vector.broadcast %509 : vector<8x1xf32> to vector<8x132xf32>
    %517 = arith.subf %500, %516 : vector<8x132xf32>
    %cst_99 = arith.constant 9.99999974E-6 : f32
    %518 = vector.broadcast %cst_99 : f32 to vector<8x1xf32>
    %519 = arith.addf %515, %518 : vector<8x1xf32>
    %520 = math.rsqrt %519 : vector<8x1xf32>
    %521 = vector.broadcast %520 : vector<8x1xf32> to vector<8x132xf32>
    %522 = arith.mulf %517, %521 : vector<8x132xf32>
    %523 = vector.broadcast %475 : vector<8x1xf32> to vector<8x132xf32>
    %524 = arith.mulf %522, %523 : vector<8x132xf32>
    %525 = vector.broadcast %476 : vector<8x1xf32> to vector<8x132xf32>
    %526 = arith.addf %524, %525 : vector<8x132xf32>
    %cst_100 = arith.constant 0.000000e+00 : f32
    %527 = vector.broadcast %cst_100 : f32 to vector<8x132xf32>
    %528 = arith.cmpf oge, %526, %527 : vector<8x132xf32>
    %cst_101 = arith.constant 1.000000e-01 : f32
    %529 = vector.broadcast %cst_101 : f32 to vector<8x132xf32>
    %530 = arith.mulf %529, %526 : vector<8x132xf32>
    %531 = arith.select %528, %526, %530 : vector<8x132xi1>, vector<8x132xf32>
    %532 = vector.broadcast %3 : vector<1x132xf32> to vector<8x132xf32>
    %533 = arith.mulf %531, %532 : vector<8x132xf32>
    %534 = vector.extract_strided_slice %533 {offsets = [0, 0], sizes = [8, 66], strides = [1, 1]} : vector<8x132xf32> to vector<8x66xf32>
    %cst_102 = arith.constant dense<0.000000e+00> : vector<8x406xf32>
    %535 = tpu.matmul %534, %9, %cst_102 {dimension_numbers = #tpu.dot_dimension_numbers<[1], [0], [0], [1], [0, 0, 1, 1], [], []>} : vector<8x66xf32>, vector<66x406xf32>, vector<8x406xf32> -> vector<8x406xf32>
    %536 = vector.extract_strided_slice %533 {offsets = [0, 66], sizes = [8, 66], strides = [1, 1]} : vector<8x132xf32> to vector<8x66xf32>
    %cst_103 = arith.constant dense<0.000000e+00> : vector<8x406xf32>
    %537 = tpu.matmul %536, %9, %cst_103 {dimension_numbers = #tpu.dot_dimension_numbers<[1], [0], [0], [1], [0, 0, 1, 1], [], []>} : vector<8x66xf32>, vector<66x406xf32>, vector<8x406xf32> -> vector<8x406xf32>
    %538 = tpu.concatenate %535, %537 in 1 : vector<8x406xf32>, vector<8x406xf32> -> vector<8x812xf32>
    %cst_104 = arith.constant 0.000000e+00 : f32
    %539 = vector.broadcast %cst_104 : f32 to vector<8x30xf32>
    %540 = tpu.concatenate %539, %538, %539 in 1 : vector<8x30xf32>, vector<8x812xf32>, vector<8x30xf32> -> vector<8x872xf32>
    %541 = vector.extract_strided_slice %0 {offsets = [108, 0], sizes = [4, 291], strides = [1, 1]} : vector<117x291xf32> to vector<4x291xf32>
    %542 = vector.extract_strided_slice %541 {offsets = [0, 0], sizes = [4, 72], strides = [1, 1]} : vector<4x291xf32> to vector<4x72xf32>
    %543 = vector.extract_strided_slice %541 {offsets = [0, 288], sizes = [4, 1], strides = [1, 1]} : vector<4x291xf32> to vector<4x1xf32>
    %544 = vector.extract_strided_slice %541 {offsets = [0, 289], sizes = [4, 1], strides = [1, 1]} : vector<4x291xf32> to vector<4x1xf32>
    %545 = vector.extract_strided_slice %541 {offsets = [0, 290], sizes = [4, 1], strides = [1, 1]} : vector<4x291xf32> to vector<4x1xf32>
    %546 = vector.extract_strided_slice %540 {offsets = [0, 0], sizes = [8, 812], strides = [1, 1]} : vector<8x872xf32> to vector<8x812xf32>
    %547 = vector.extract_strided_slice %540 {offsets = [0, 1], sizes = [8, 812], strides = [1, 1]} : vector<8x872xf32> to vector<8x812xf32>
    %548 = vector.extract_strided_slice %540 {offsets = [0, 2], sizes = [8, 812], strides = [1, 1]} : vector<8x872xf32> to vector<8x812xf32>
    %549 = vector.extract_strided_slice %540 {offsets = [0, 29], sizes = [8, 812], strides = [1, 1]} : vector<8x872xf32> to vector<8x812xf32>
    %550 = vector.extract_strided_slice %540 {offsets = [0, 30], sizes = [8, 812], strides = [1, 1]} : vector<8x872xf32> to vector<8x812xf32>
    %551 = vector.extract_strided_slice %540 {offsets = [0, 31], sizes = [8, 812], strides = [1, 1]} : vector<8x872xf32> to vector<8x812xf32>
    %552 = vector.extract_strided_slice %540 {offsets = [0, 58], sizes = [8, 812], strides = [1, 1]} : vector<8x872xf32> to vector<8x812xf32>
    %553 = vector.extract_strided_slice %540 {offsets = [0, 59], sizes = [8, 812], strides = [1, 1]} : vector<8x872xf32> to vector<8x812xf32>
    %554 = vector.extract_strided_slice %540 {offsets = [0, 60], sizes = [8, 812], strides = [1, 1]} : vector<8x872xf32> to vector<8x812xf32>
    %555 = tpu.concatenate %546, %547, %548, %549, %550, %551, %552, %553, %554 in 0 : vector<8x812xf32>, vector<8x812xf32>, vector<8x812xf32>, vector<8x812xf32>, vector<8x812xf32>, vector<8x812xf32>, vector<8x812xf32>, vector<8x812xf32>, vector<8x812xf32> -> vector<72x812xf32>
    %cst_105 = arith.constant dense<0.000000e+00> : vector<4x812xf32>
    %556 = tpu.matmul %542, %555, %cst_105 {dimension_numbers = #tpu.dot_dimension_numbers<[1], [0], [0], [1], [0, 0, 1, 1], [], []>} : vector<4x72xf32>, vector<72x812xf32>, vector<4x812xf32> -> vector<4x812xf32>
    %557 = vector.broadcast %543 : vector<4x1xf32> to vector<4x812xf32>
    %558 = arith.addf %556, %557 : vector<4x812xf32>
    %559 = vector.broadcast %2 : vector<1x812xf32> to vector<4x812xf32>
    %560 = arith.mulf %558, %559 : vector<4x812xf32>
    %cst_106 = arith.constant dense<0.000000e+00> : vector<4xf32>
    %561 = vector.multi_reduction <add>, %560, %cst_106 [1] : vector<4x812xf32> to vector<4xf32>
    %562 = vector.shape_cast %561 : vector<4xf32> to vector<4x1xf32>
    %563 = arith.mulf %560, %558 : vector<4x812xf32>
    %cst_107 = arith.constant dense<0.000000e+00> : vector<4xf32>
    %564 = vector.multi_reduction <add>, %563, %cst_107 [1] : vector<4x812xf32> to vector<4xf32>
    %565 = vector.shape_cast %564 : vector<4xf32> to vector<4x1xf32>
    %cst_108 = arith.constant 0.00154320989 : f32
    %566 = vector.broadcast %cst_108 : f32 to vector<4x1xf32>
    %567 = arith.mulf %562, %566 : vector<4x1xf32>
    %cst_109 = arith.constant 0.00154320989 : f32
    %568 = vector.broadcast %cst_109 : f32 to vector<4x1xf32>
    %569 = arith.mulf %565, %568 : vector<4x1xf32>
    %570 = arith.mulf %567, %567 : vector<4x1xf32>
    %571 = arith.subf %569, %570 : vector<4x1xf32>
    %cst_110 = arith.constant 0.000000e+00 : f32
    %572 = vector.broadcast %cst_110 : f32 to vector<4x1xf32>
    %573 = arith.maximumf %571, %572 : vector<4x1xf32>
    %574 = vector.broadcast %567 : vector<4x1xf32> to vector<4x812xf32>
    %575 = arith.subf %558, %574 : vector<4x812xf32>
    %cst_111 = arith.constant 9.99999974E-6 : f32
    %576 = vector.broadcast %cst_111 : f32 to vector<4x1xf32>
    %577 = arith.addf %573, %576 : vector<4x1xf32>
    %578 = math.rsqrt %577 : vector<4x1xf32>
    %579 = vector.broadcast %578 : vector<4x1xf32> to vector<4x812xf32>
    %580 = arith.mulf %575, %579 : vector<4x812xf32>
    %581 = vector.broadcast %544 : vector<4x1xf32> to vector<4x812xf32>
    %582 = arith.mulf %580, %581 : vector<4x812xf32>
    %583 = vector.broadcast %545 : vector<4x1xf32> to vector<4x812xf32>
    %584 = arith.addf %582, %583 : vector<4x812xf32>
    %cst_112 = arith.constant 0.000000e+00 : f32
    %585 = vector.broadcast %cst_112 : f32 to vector<4x812xf32>
    %586 = arith.cmpf oge, %584, %585 : vector<4x812xf32>
    %cst_113 = arith.constant 1.000000e-01 : f32
    %587 = vector.broadcast %cst_113 : f32 to vector<4x812xf32>
    %588 = arith.mulf %587, %584 : vector<4x812xf32>
    %589 = arith.select %586, %584, %588 : vector<4x812xi1>, vector<4x812xf32>
    %590 = vector.broadcast %2 : vector<1x812xf32> to vector<4x812xf32>
    %591 = arith.mulf %589, %590 : vector<4x812xf32>
    %cst_114 = arith.constant 0.000000e+00 : f32
    %592 = vector.broadcast %cst_114 : f32 to vector<4x30xf32>
    %593 = tpu.concatenate %592, %591, %592 in 1 : vector<4x30xf32>, vector<4x812xf32>, vector<4x30xf32> -> vector<4x872xf32>
    %594 = vector.extract_strided_slice %0 {offsets = [112, 0], sizes = [4, 291], strides = [1, 1]} : vector<117x291xf32> to vector<4x291xf32>
    %595 = vector.extract_strided_slice %594 {offsets = [0, 0], sizes = [4, 72], strides = [1, 1]} : vector<4x291xf32> to vector<4x72xf32>
    %596 = vector.extract_strided_slice %594 {offsets = [0, 288], sizes = [4, 1], strides = [1, 1]} : vector<4x291xf32> to vector<4x1xf32>
    %597 = vector.extract_strided_slice %594 {offsets = [0, 289], sizes = [4, 1], strides = [1, 1]} : vector<4x291xf32> to vector<4x1xf32>
    %598 = vector.extract_strided_slice %594 {offsets = [0, 290], sizes = [4, 1], strides = [1, 1]} : vector<4x291xf32> to vector<4x1xf32>
    %599 = vector.extract_strided_slice %593 {offsets = [0, 0], sizes = [4, 812], strides = [1, 1]} : vector<4x872xf32> to vector<4x812xf32>
    %600 = vector.extract_strided_slice %593 {offsets = [0, 1], sizes = [4, 812], strides = [1, 1]} : vector<4x872xf32> to vector<4x812xf32>
    %601 = vector.extract_strided_slice %593 {offsets = [0, 2], sizes = [4, 812], strides = [1, 1]} : vector<4x872xf32> to vector<4x812xf32>
    %602 = vector.extract_strided_slice %593 {offsets = [0, 29], sizes = [4, 812], strides = [1, 1]} : vector<4x872xf32> to vector<4x812xf32>
    %603 = vector.extract_strided_slice %593 {offsets = [0, 30], sizes = [4, 812], strides = [1, 1]} : vector<4x872xf32> to vector<4x812xf32>
    %604 = vector.extract_strided_slice %593 {offsets = [0, 31], sizes = [4, 812], strides = [1, 1]} : vector<4x872xf32> to vector<4x812xf32>
    %605 = vector.extract_strided_slice %593 {offsets = [0, 58], sizes = [4, 812], strides = [1, 1]} : vector<4x872xf32> to vector<4x812xf32>
    %606 = vector.extract_strided_slice %593 {offsets = [0, 59], sizes = [4, 812], strides = [1, 1]} : vector<4x872xf32> to vector<4x812xf32>
    %607 = vector.extract_strided_slice %593 {offsets = [0, 60], sizes = [4, 812], strides = [1, 1]} : vector<4x872xf32> to vector<4x812xf32>
    %608 = vector.extract_strided_slice %65 {offsets = [0, 0], sizes = [4, 812], strides = [1, 1]} : vector<4x872xf32> to vector<4x812xf32>
    %609 = vector.extract_strided_slice %65 {offsets = [0, 1], sizes = [4, 812], strides = [1, 1]} : vector<4x872xf32> to vector<4x812xf32>
    %610 = vector.extract_strided_slice %65 {offsets = [0, 2], sizes = [4, 812], strides = [1, 1]} : vector<4x872xf32> to vector<4x812xf32>
    %611 = vector.extract_strided_slice %65 {offsets = [0, 29], sizes = [4, 812], strides = [1, 1]} : vector<4x872xf32> to vector<4x812xf32>
    %612 = vector.extract_strided_slice %65 {offsets = [0, 30], sizes = [4, 812], strides = [1, 1]} : vector<4x872xf32> to vector<4x812xf32>
    %613 = vector.extract_strided_slice %65 {offsets = [0, 31], sizes = [4, 812], strides = [1, 1]} : vector<4x872xf32> to vector<4x812xf32>
    %614 = vector.extract_strided_slice %65 {offsets = [0, 58], sizes = [4, 812], strides = [1, 1]} : vector<4x872xf32> to vector<4x812xf32>
    %615 = vector.extract_strided_slice %65 {offsets = [0, 59], sizes = [4, 812], strides = [1, 1]} : vector<4x872xf32> to vector<4x812xf32>
    %616 = vector.extract_strided_slice %65 {offsets = [0, 60], sizes = [4, 812], strides = [1, 1]} : vector<4x872xf32> to vector<4x812xf32>
    %617 = tpu.concatenate %599, %600, %601, %602, %603, %604, %605, %606, %607, %608, %609, %610, %611, %612, %613, %614 in 0 : vector<4x812xf32>, vector<4x812xf32>, vector<4x812xf32>, vector<4x812xf32>, vector<4x812xf32>, vector<4x812xf32>, vector<4x812xf32>, vector<4x812xf32>, vector<4x812xf32>, vector<4x812xf32>, vector<4x812xf32>, vector<4x812xf32>, vector<4x812xf32>, vector<4x812xf32>, vector<4x812xf32>, vector<4x812xf32> -> vector<64x812xf32>
    %618 = tpu.concatenate %615, %616 in 0 : vector<4x812xf32>, vector<4x812xf32> -> vector<8x812xf32>
    %619 = tpu.concatenate %617, %618 in 0 : vector<64x812xf32>, vector<8x812xf32> -> vector<72x812xf32>
    %cst_115 = arith.constant dense<0.000000e+00> : vector<4x812xf32>
    %620 = tpu.matmul %595, %619, %cst_115 {dimension_numbers = #tpu.dot_dimension_numbers<[1], [0], [0], [1], [0, 0, 1, 1], [], []>} : vector<4x72xf32>, vector<72x812xf32>, vector<4x812xf32> -> vector<4x812xf32>
    %621 = vector.broadcast %596 : vector<4x1xf32> to vector<4x812xf32>
    %622 = arith.addf %620, %621 : vector<4x812xf32>
    %623 = vector.broadcast %2 : vector<1x812xf32> to vector<4x812xf32>
    %624 = arith.mulf %622, %623 : vector<4x812xf32>
    %cst_116 = arith.constant dense<0.000000e+00> : vector<4xf32>
    %625 = vector.multi_reduction <add>, %624, %cst_116 [1] : vector<4x812xf32> to vector<4xf32>
    %626 = vector.shape_cast %625 : vector<4xf32> to vector<4x1xf32>
    %627 = arith.mulf %624, %622 : vector<4x812xf32>
    %cst_117 = arith.constant dense<0.000000e+00> : vector<4xf32>
    %628 = vector.multi_reduction <add>, %627, %cst_117 [1] : vector<4x812xf32> to vector<4xf32>
    %629 = vector.shape_cast %628 : vector<4xf32> to vector<4x1xf32>
    %cst_118 = arith.constant 0.00154320989 : f32
    %630 = vector.broadcast %cst_118 : f32 to vector<4x1xf32>
    %631 = arith.mulf %626, %630 : vector<4x1xf32>
    %cst_119 = arith.constant 0.00154320989 : f32
    %632 = vector.broadcast %cst_119 : f32 to vector<4x1xf32>
    %633 = arith.mulf %629, %632 : vector<4x1xf32>
    %634 = arith.mulf %631, %631 : vector<4x1xf32>
    %635 = arith.subf %633, %634 : vector<4x1xf32>
    %cst_120 = arith.constant 0.000000e+00 : f32
    %636 = vector.broadcast %cst_120 : f32 to vector<4x1xf32>
    %637 = arith.maximumf %635, %636 : vector<4x1xf32>
    %638 = vector.broadcast %631 : vector<4x1xf32> to vector<4x812xf32>
    %639 = arith.subf %622, %638 : vector<4x812xf32>
    %cst_121 = arith.constant 9.99999974E-6 : f32
    %640 = vector.broadcast %cst_121 : f32 to vector<4x1xf32>
    %641 = arith.addf %637, %640 : vector<4x1xf32>
    %642 = math.rsqrt %641 : vector<4x1xf32>
    %643 = vector.broadcast %642 : vector<4x1xf32> to vector<4x812xf32>
    %644 = arith.mulf %639, %643 : vector<4x812xf32>
    %645 = vector.broadcast %597 : vector<4x1xf32> to vector<4x812xf32>
    %646 = arith.mulf %644, %645 : vector<4x812xf32>
    %647 = vector.broadcast %598 : vector<4x1xf32> to vector<4x812xf32>
    %648 = arith.addf %646, %647 : vector<4x812xf32>
    %cst_122 = arith.constant 0.000000e+00 : f32
    %649 = vector.broadcast %cst_122 : f32 to vector<4x812xf32>
    %650 = arith.cmpf oge, %648, %649 : vector<4x812xf32>
    %cst_123 = arith.constant 1.000000e-01 : f32
    %651 = vector.broadcast %cst_123 : f32 to vector<4x812xf32>
    %652 = arith.mulf %651, %648 : vector<4x812xf32>
    %653 = arith.select %650, %648, %652 : vector<4x812xi1>, vector<4x812xf32>
    %654 = vector.broadcast %2 : vector<1x812xf32> to vector<4x812xf32>
    %655 = arith.mulf %653, %654 : vector<4x812xf32>
    %cst_124 = arith.constant 0.000000e+00 : f32
    %656 = vector.broadcast %cst_124 : f32 to vector<4x30xf32>
    %657 = tpu.concatenate %656, %655, %656 in 1 : vector<4x30xf32>, vector<4x812xf32>, vector<4x30xf32> -> vector<4x872xf32>
    %658 = vector.extract_strided_slice %0 {offsets = [116, 0], sizes = [1, 291], strides = [1, 1]} : vector<117x291xf32> to vector<1x291xf32>
    %659 = vector.extract_strided_slice %658 {offsets = [0, 0], sizes = [1, 36], strides = [1, 1]} : vector<1x291xf32> to vector<1x36xf32>
    %660 = vector.extract_strided_slice %658 {offsets = [0, 288], sizes = [1, 1], strides = [1, 1]} : vector<1x291xf32> to vector<1x1xf32>
    %661 = vector.extract_strided_slice %658 {offsets = [0, 289], sizes = [1, 1], strides = [1, 1]} : vector<1x291xf32> to vector<1x1xf32>
    %662 = vector.extract_strided_slice %658 {offsets = [0, 290], sizes = [1, 1], strides = [1, 1]} : vector<1x291xf32> to vector<1x1xf32>
    %663 = vector.extract_strided_slice %657 {offsets = [0, 0], sizes = [4, 812], strides = [1, 1]} : vector<4x872xf32> to vector<4x812xf32>
    %664 = vector.extract_strided_slice %657 {offsets = [0, 1], sizes = [4, 812], strides = [1, 1]} : vector<4x872xf32> to vector<4x812xf32>
    %665 = vector.extract_strided_slice %657 {offsets = [0, 2], sizes = [4, 812], strides = [1, 1]} : vector<4x872xf32> to vector<4x812xf32>
    %666 = vector.extract_strided_slice %657 {offsets = [0, 29], sizes = [4, 812], strides = [1, 1]} : vector<4x872xf32> to vector<4x812xf32>
    %667 = vector.extract_strided_slice %657 {offsets = [0, 30], sizes = [4, 812], strides = [1, 1]} : vector<4x872xf32> to vector<4x812xf32>
    %668 = vector.extract_strided_slice %657 {offsets = [0, 31], sizes = [4, 812], strides = [1, 1]} : vector<4x872xf32> to vector<4x812xf32>
    %669 = vector.extract_strided_slice %657 {offsets = [0, 58], sizes = [4, 812], strides = [1, 1]} : vector<4x872xf32> to vector<4x812xf32>
    %670 = vector.extract_strided_slice %657 {offsets = [0, 59], sizes = [4, 812], strides = [1, 1]} : vector<4x872xf32> to vector<4x812xf32>
    %671 = vector.extract_strided_slice %657 {offsets = [0, 60], sizes = [4, 812], strides = [1, 1]} : vector<4x872xf32> to vector<4x812xf32>
    %672 = tpu.concatenate %663, %664, %665, %666, %667, %668, %669, %670, %671 in 0 : vector<4x812xf32>, vector<4x812xf32>, vector<4x812xf32>, vector<4x812xf32>, vector<4x812xf32>, vector<4x812xf32>, vector<4x812xf32>, vector<4x812xf32>, vector<4x812xf32> -> vector<36x812xf32>
    %cst_125 = arith.constant dense<0.000000e+00> : vector<1x812xf32>
    %673 = tpu.matmul %659, %672, %cst_125 {dimension_numbers = #tpu.dot_dimension_numbers<[1], [0], [0], [1], [0, 0, 1, 1], [], []>} : vector<1x36xf32>, vector<36x812xf32>, vector<1x812xf32> -> vector<1x812xf32>
    %674 = vector.broadcast %660 : vector<1x1xf32> to vector<1x812xf32>
    %675 = arith.addf %673, %674 : vector<1x812xf32>
    %676 = arith.mulf %675, %2 : vector<1x812xf32>
    %cst_126 = arith.constant dense<0.000000e+00> : vector<1xf32>
    %677 = vector.multi_reduction <add>, %676, %cst_126 [1] : vector<1x812xf32> to vector<1xf32>
    %678 = vector.shape_cast %677 : vector<1xf32> to vector<1x1xf32>
    %679 = arith.mulf %676, %675 : vector<1x812xf32>
    %cst_127 = arith.constant dense<0.000000e+00> : vector<1xf32>
    %680 = vector.multi_reduction <add>, %679, %cst_127 [1] : vector<1x812xf32> to vector<1xf32>
    %681 = vector.shape_cast %680 : vector<1xf32> to vector<1x1xf32>
    %cst_128 = arith.constant 0.00154320989 : f32
    %682 = vector.broadcast %cst_128 : f32 to vector<1x1xf32>
    %683 = arith.mulf %678, %682 : vector<1x1xf32>
    %cst_129 = arith.constant 0.00154320989 : f32
    %684 = vector.broadcast %cst_129 : f32 to vector<1x1xf32>
    %685 = arith.mulf %681, %684 : vector<1x1xf32>
    %686 = arith.mulf %683, %683 : vector<1x1xf32>
    %687 = arith.subf %685, %686 : vector<1x1xf32>
    %cst_130 = arith.constant 0.000000e+00 : f32
    %688 = vector.broadcast %cst_130 : f32 to vector<1x1xf32>
    %689 = arith.maximumf %687, %688 : vector<1x1xf32>
    %690 = vector.broadcast %683 : vector<1x1xf32> to vector<1x812xf32>
    %691 = arith.subf %675, %690 : vector<1x812xf32>
    %cst_131 = arith.constant 9.99999974E-6 : f32
    %692 = vector.broadcast %cst_131 : f32 to vector<1x1xf32>
    %693 = arith.addf %689, %692 : vector<1x1xf32>
    %694 = math.rsqrt %693 : vector<1x1xf32>
    %695 = vector.broadcast %694 : vector<1x1xf32> to vector<1x812xf32>
    %696 = arith.mulf %691, %695 : vector<1x812xf32>
    %697 = vector.broadcast %661 : vector<1x1xf32> to vector<1x812xf32>
    %698 = arith.mulf %696, %697 : vector<1x812xf32>
    %699 = vector.broadcast %662 : vector<1x1xf32> to vector<1x812xf32>
    %700 = arith.addf %698, %699 : vector<1x812xf32>
    %cst_132 = arith.constant 0.000000e+00 : f32
    %701 = vector.broadcast %cst_132 : f32 to vector<1x812xf32>
    %702 = arith.cmpf oge, %700, %701 : vector<1x812xf32>
    %cst_133 = arith.constant 1.000000e-01 : f32
    %703 = vector.broadcast %cst_133 : f32 to vector<1x812xf32>
    %704 = arith.mulf %703, %700 : vector<1x812xf32>
    %705 = arith.select %702, %700, %704 : vector<1x812xi1>, vector<1x812xf32>
    %706 = arith.mulf %705, %2 : vector<1x812xf32>
    %c0_134 = arith.constant 0 : index
    %c0_135 = arith.constant 0 : index
    %707 = vector.load %arg6[%c0_134, %c0_135] : memref<1x812xf32, #tpu.memory_space<vmem>>, vector<1x812xf32>
    tpu.vector_store %arg6[%c0_134, %c0_135], %706 {strides = array<i32>} : memref<1x812xf32, #tpu.memory_space<vmem>>, vector<1x812xf32>,
    return
  }
}

</mosaic_0001>

<bundles_post_ra>
// kernel: forward.1
= control target key start
LH: loop header
LB: loop body
LE: loop exit
PB: predicated region body
PF: predicated region fallthrough
CT: control target
= control target key end

     0   :  { %v14581_v0 = vlaneseq  ;;  %s10437_s23 = smov 127   ;;  %s14690_s24 = smov 99   ;;  %v14595_v20 = vmov 0.0   ;;  %v14601_v22 = vmov 32   ;;  %vm14589_vm0 = vcmask 1031168   ;;  %s14574_s0 = inlined_call_operand.vmem [shape: f32[1,872], index: 0, kind: input, shape index: {}]   ;;  %s14575_s1 = inlined_call_operand.vmem [shape: f32[117,291], index: 1, kind: input, shape index: {}]   ;;  %s14576_s3 = inlined_call_operand.vmem [shape: bf16[406,264], index: 3, kind: input, shape index: {}]   ;;  %s14577_s2 = inlined_call_operand.vmem [shape: f32[4,812], index: 2, kind: input, shape index: {}]   ;;  %s14578_s5 = inlined_call_operand.vmem [shape: bf16[115,80], index: 5, kind: input, shape index: {}]   ;;  %s14579_s4 = inlined_call_operand.vmem [shape: bf16[66,406], index: 4, kind: input, shape index: {}]   ;;  %s14580_s6 = inlined_call_operand.vmem [shape: f32[1,812], index: 6, kind: output, shape index: {}]  }
   0x1   :  { %v407_v2 = vld [vmem:[%s14574_s0] sm:$0x7f]  ;;  %s10436_s0 = smov 126   ;;  %s10439_s25 = smov 98   ;;  %804 = vmatprep.mubr.f32.mxu1 %v14595_v20  ;;  %946 = vmatprep.mubr.f32.mxu0 %v14595_v20  ;;  %v10609_v23 = vld [vmem:[%s14575_s1 + $0x10] sm:$0xff]  ;;  %vm14587_vm1 = vcmask 1039360  }
   0x2   :  { %v10514_v1 = vshrl.u32 %v14581_v0, 7  ;;  %s14686_s26 = smov 97   ;;  %s14688_s27 = smov 70   ;;  %9291 = vset.pattern.permute.xlu0 %v14601_v22  ;;  %vm14586_vm2 = vcmask 1040384   ;;  %vm14583_vm3 = vcmask 809984   ;;  %vm14582_vm4 = vcmask 1041408  }
   0x3   :  { %s14679_s28 = smov 69   ;;  %s14681_s29 = smov 68   ;;  %vm677_vm5 = vcmask 1042432   ;;  %vm14670_vm6 = vcmask 801792   ;;  %vm14671_vm7 = vcmask 793600   ;;  %vm685_vm8 = vcmask 1043456  }
   0x4   :  { %14744 = vst [vmem:[#allocation2_spill] sm:$0xff] %v10514_v1  ;;  %v10520_v3 = vsub.s32 0, %v10514_v1  ;;  %v10523_v4 = vsub.s32 1, %v10514_v1  ;;  %v14591_v5 = vsub.s32 2, %v10514_v1  ;;  %v14590_v6 = vsub.s32 3, %v10514_v1  ;;  %s10451_s7 = smov 106  }
   0x5   :  { %v10544_v12 = vsub.s32 4, %v10514_v1  ;;  %v14592_v14 = vsub.s32 5, %v10514_v1  ;;  %v435_v18 = vsub.s32 6, %v10514_v1  ;;  %vm693_vm9 = vcmask 1044480   ;;  %v11297_v1 = vld [vmem:[%s14576_s3 + $0x184] ss:$12 sps:$4 sm:$0xff]  }
   0x6   :  { %14745 = vst [vmem:[#allocation3_spill] sm:$0xff] %v10523_v4  ;;  %v10528_v7 = vrot.slane %v407_v2, %v10523_v4  ;;  %v10532_v8 = vrot.slane %v407_v2, %v14591_v5  ;;  %v10535_v9 = vrot.slane %v407_v2, %v10520_v3  ;;  %v10539_v10 = vrot.slane %v407_v2, %v14590_v6  ;;  %s10453_s22 = smov 124   ;;  %s10454_s30 = smov 66  }
   0x7   :  { %v10552_v15 = vrot.slane %v407_v2, %v10544_v12  ;;  %v10558_v16 = vrot.slane %v407_v2, %v14592_v14  ;;  %v10577_v19 = vrot.slane %v407_v2, %v435_v18  ;;  %vm14669_vm10 = vcmask 572416   ;;  %14787 = vst [vmem:[#allocation34_spill] sm:$0xff] %v11297_v1  ;;  %s10455_s8 = smov 12   ;;  %s10456_s9 = smov 116  }
   0x8   :  { %v9181_v11 = vpack.i.bf16 %v10532_v8, %v10528_v7  ;;  %v9186_v13 = vpack.i.bf16 %v10539_v10, %v10535_v9  ;;  %vm701_vm11 = vcmask 1045504   ;;  %vm14588_vm12 = vcmask 564224   ;;  %s10457_s10 = smov 117   ;;  %s10458_s11 = smov 115  }
   0x9   :  { %v9206_v17 = vpack.i.bf16 %v10558_v16, %v10552_v15  ;;  %v9286_v21 = vpack.i.bf16 %v10577_v19, %v10558_v16  ;;  %vm14668_vm13 = vcmask 556032   ;;  %vm709_vm14 = vcmask 1046528   ;;  %s10459_s12 = smov 104   ;;  %s10460_s15 = smov 105  }
   0xa   :  { %9182 = vrot.lane.b32.xlu1 %v9181_v11, %s10436_s0  ;;  %9172 = vrot.lane.b32.xlu0 %v9181_v11, %s10437_s23  ;;  %vm722_vm15 = vcmask 72704   ;;  %v14788_v4 = vmov 0.0|0.0   ;;  %s10461_s13 = smov 108   ;;  %s10462_s14 = smov 88  }
   0xb   :  { %s10463_s16 = smov 20   ;;  %s10464_s17 = smov 6  }
   0xc   :  { %s10465_s18 = smov 122   ;;  %s10466_s19 = smov 123  }
   0xd   :  { %s10471_s20 = smov 9   ;;  %s10472_s21 = smov 4  }
   0xe   :  { %9187 = vrot.lane.b32.xlu1 %v9186_v13, %s10436_s0  ;;  %9177 = vrot.lane.b32.xlu0 %v9186_v13, %s10437_s23 }
  0x12   :  { %9197 = vrot.lane.b32.xlu1 %v9186_v13, %s14690_s24  ;;  %9192 = vrot.lane.b32.xlu0 %v9181_v11, %s14690_s24 }
  0x16   :  { %9207 = vrot.lane.b32.xlu1 %v9206_v17, %s10437_s23  ;;  %9202 = vrot.lane.b32.xlu0 %v9181_v11, %s10439_s25 }
  0x1a   :  { %9217 = vrot.lane.b32.xlu1 %v9181_v11, %s14686_s26  ;;  %9212 = vrot.lane.b32.xlu0 %v9186_v13, %s10439_s25 }
  0x1e   :  { %9227 = vrot.lane.b32.xlu1 %v9186_v13, %s14686_s26  ;;  %9222 = vrot.lane.b32.xlu0 %v9206_v17, %s10436_s0 }
  0x22   :  { %9237 = vrot.lane.b32.xlu1 %v9206_v17, %s14690_s24  ;;  %9232 = vrot.lane.b32.xlu0 %v9181_v11, %s14688_s27 }
  0x26   :  { %9247 = vrot.lane.b32.xlu1 %v9181_v11, %s14679_s28  ;;  %9242 = vrot.lane.b32.xlu0 %v9186_v13, %s14688_s27 }
  0x2a   :  { %9257 = vrot.lane.b32.xlu1 %v9186_v13, %s14679_s28  ;;  %9252 = vrot.lane.b32.xlu0 %v9206_v17, %s10439_s25 }
  0x2e   :  { %456 = vrot.lane.b32.xlu1 %v10577_v19, %s10437_s23  ;;  %9262 = vrot.lane.b32.xlu0 %v9181_v11, %s14681_s29 }
  0x32   :  { %9272 = vrot.lane.b32.xlu1 %v9186_v13, %s14681_s29  ;;  %9267 = vrot.lane.b32.xlu0 %v9206_v17, %s14686_s26 }
  0x36   :  { %9277 = vrot.lane.b32.xlu1 %v9206_v17, %s14688_s27  ;;  %484 = vrot.lane.b32.xlu0 %v10577_v19, %s10436_s0 }
  0x3a   :  { %9282 = vrot.lane.b32.xlu1 %v9206_v17, %s14679_s28  ;;  %512 = vrot.lane.b32.xlu0 %v10577_v19, %s14690_s24  ;;  %s14894_s24 = smov 69  }
  0x3e   :  { %648 = vrot.lane.b32.xlu1 %v10552_v15, %s14681_s29  ;;  %540 = vrot.lane.b32.xlu0 %v10577_v19, %s10439_s25 }
  0x42   :  { %596 = vrot.lane.b32.xlu1 %v10577_v19, %s14688_s27  ;;  %568 = vrot.lane.b32.xlu0 %v10577_v19, %s14686_s26 }
  0x46   :  { %9287 = vrot.lane.b32.xlu1 %v9286_v21, %s14681_s29  ;;  %624 = vrot.lane.b32.xlu0 %v10577_v19, %s14679_s28  ;;  %s10469_s28 = smov 119   ;;  %s10470_s29 = smov 110  }
  0x4a   :  { %719 = vperm.xlu0 %9291, %v10609_v23  }
  0x7c   :  { %v9183_v24 = vpop.permute.xlu1 %9182  ;;  %v9173_v25 = vpop.permute.xlu0 %9172 }
  0x7d   :  { %v9175_v36 = vunpack.i.h.bf16 %v9173_v25  ;;  %v9174_v37 = vunpack.i.l.bf16 %v9173_v25  ;;  %v9185_v39 = vunpack.i.h.bf16 %v9183_v24  ;;  %v9184_v40 = vunpack.i.l.bf16 %v9183_v24 }
  0x7f   :  { %v460_v45 = vsel %vm14587_vm1, %v9174_v37, %v9175_v36  ;;  %v488_v48 = vsel %vm14589_vm0, %v9184_v40, %v9185_v39 }
  0x80   :  { %v10612_v26 = vpop.permute.xlu1 %9187  ;;  %v10614_v27 = vpop.permute.xlu0 %9177  ;;  %v663_v50 = vsel %vm14586_vm2, %v10528_v7, %v460_v45 }
  0x81   :  { %v9179_v38 = vunpack.i.l.bf16 %v10614_v27  ;;  %v9180_v41 = vunpack.i.h.bf16 %v10614_v27  ;;  %v9189_v42 = vunpack.i.l.bf16 %v10612_v26  ;;  %v9190_v46 = vunpack.i.h.bf16 %v10612_v26 }
  0x82   :  { %v671_v7 = vsel %vm14582_vm4, %v663_v50, %v488_v48 }
  0x83   :  { %v459_v47 = vsel %vm14587_vm1, %v9179_v38, %v9174_v37  ;;  %v461_v49 = vsel %vm14587_vm1, %v9175_v36, %v9180_v41  ;;  %v487_v51 = vsel %vm14589_vm0, %v9189_v42, %v9184_v40  ;;  %v489_v60 = vsel %vm14589_vm0, %v9185_v39, %v9190_v46 }
  0x84   :  { %v10616_v28 = vpop.permute.xlu1 %9197  ;;  %v10618_v29 = vpop.permute.xlu0 %9192  ;;  %v662_v56 = vsel %vm14586_vm2, %v10535_v9, %v459_v47  ;;  %v664_v61 = vsel %vm14586_vm2, %v10532_v8, %v461_v49 }
  0x85   :  { %v9195_v52 = vunpack.i.h.bf16 %v10618_v29  ;;  %v9194_v53 = vunpack.i.l.bf16 %v10618_v29  ;;  %v9199_v57 = vunpack.i.l.bf16 %v10616_v28  ;;  %v9200_v2 = vunpack.i.h.bf16 %v10616_v28 }
  0x86   :  { %v670_v17 = vsel %vm14582_vm4, %v662_v56, %v487_v51  ;;  %v672_v29 = vsel %vm14582_vm4, %v664_v61, %v489_v60  ;;  %vm14584_vm4 = vmmov 1  }
  0x87   :  { %v516_v13 = vsel %vm14583_vm3, %v9194_v53, %v9195_v52  ;;  %v515_v25 = vsel %vm14583_vm3, %v9199_v57, %v9194_v53  ;;  %v517_v45 = vsel %vm14583_vm3, %v9195_v52, %v9200_v2  ;;  %vm10729_vm3 = vmpackc.low %vm14586_vm2, %vm14584_vm4  ;;  %vm14749_vm4 = vcmask 809984  }
  0x88   :  { %v10620_v30 = vpop.permute.xlu1 %9207  ;;  %v10622_v31 = vpop.permute.xlu0 %9202  ;;  %v679_v47 = vsel %vm677_vm5, %v671_v7, %v516_v13  ;;  %v678_v50 = vsel %vm677_vm5, %v670_v17, %v515_v25 }
  0x89   :  { %v9205_v58 = vunpack.i.h.bf16 %v10622_v31  ;;  %v9204_v59 = vunpack.i.l.bf16 %v10622_v31  ;;  %v9210_v38 = vunpack.i.h.bf16 %v10620_v30  ;;  %v9209_v39 = vunpack.i.l.bf16 %v10620_v30 }
  0x8b   :  { %v544_v36 = vsel %vm14670_vm6, %v9204_v59, %v9205_v58  ;;  %v462_v17 = vsel %vm14587_vm1, %v9180_v41, %v9209_v39  ;;  %v463_v25 = vsel %vm14587_vm1, %v9209_v39, %v9210_v38  ;;  %v14746_v41 = vmov 0 }
  0x8c   :  { %v10624_v32 = vpop.permute.xlu1 %9217  ;;  %v10626_v33 = vpop.permute.xlu0 %9212  ;;  %v687_v57 = vsel %vm685_vm8, %v679_v47, %v544_v36  ;;  %v14747_v41 = vsel %vm10729_vm3, 4294967295, %v14746_v41 }
  0x8d   :  { %v9220_v62 = vunpack.i.h.bf16 %v10624_v32  ;;  %v9219_v63 = vunpack.i.l.bf16 %v10624_v32  ;;  %v9214_v37 = vunpack.i.l.bf16 %v10626_v33  ;;  %14748 = vst [vmem:[#allocation4_spill] sm:$0xff] %v14747_v41  ;;  %v10782_v32 = vld [vmem:[%s14575_s1] sm:$0xff]  ;;  %v11276_v41 = vld [vmem:[%s14576_s3 + $0x170] ss:$12 sps:$4 sm:$0xff]  }
  0x8f   :  { %v572_v40 = vsel %vm14671_vm7, %v9219_v63, %v9220_v62  ;;  %v543_v60 = vsel %vm14670_vm6, %v9214_v37, %v9204_v59  ;;  %v9215_v59 = vunpack.i.h.bf16 %v10626_v33 }
  0x90   :  { %v10628_v34 = vpop.permute.xlu1 %9227  ;;  %v10630_v35 = vpop.permute.xlu0 %9222  ;;  %v695_v13 = vsel %vm693_vm9, %v687_v57, %v572_v40 }
  0x91   :  { %v9229_v42 = vunpack.i.l.bf16 %v10628_v34  ;;  %v9224_v39 = vunpack.i.l.bf16 %v10630_v35 }
  0x93   :  { %v571_v0 = vsel %vm14671_vm7, %v9229_v42, %v9219_v63  ;;  %v686_v63 = vsel %vm685_vm8, %v678_v50, %v543_v60  ;;  %v9225_v50 = vunpack.i.h.bf16 %v10630_v35  ;;  %v666_v35 = vsel %vm14586_vm2, %v10552_v15, %v463_v25 }
  0x94   :  { %v10635_v43 = vpop.permute.xlu1 %9237  ;;  %v10637_v44 = vpop.permute.xlu0 %9232  ;;  %v694_v57 = vsel %vm693_vm9, %v686_v63, %v571_v0  ;;  %v665_v0 = vsel %vm14586_vm2, %v10539_v10, %v462_v17  ;;  %vm14750_vm2 = vcmask 1041408  }
  0x95   :  { %v9235_v9 = vunpack.i.h.bf16 %v10637_v44  ;;  %v9234_v11 = vunpack.i.l.bf16 %v10637_v44  ;;  %v491_v26 = vsel %vm14589_vm0, %v9224_v39, %v9225_v50 }
  0x97   :  { %v600_v49 = vsel %vm14669_vm10, %v9234_v11, %v9235_v9 }
  0x98   :  { %v10651_v54 = vpop.permute.xlu1 %9247  ;;  %v10653_v55 = vpop.permute.xlu0 %9242  ;;  %v703_v36 = vsel %vm701_vm11, %v695_v13, %v600_v49  ;;  %v9239_v49 = vunpack.i.l.bf16 %v10635_v43  ;;  %v680_v13 = vsel %vm677_vm5, %v672_v29, %v517_v45  ;;  %v490_v29 = vsel %vm14589_vm0, %v9190_v46, %v9224_v39 }
  0x99   :  { %v9250_v18 = vunpack.i.h.bf16 %v10651_v54  ;;  %v9249_v8 = vunpack.i.l.bf16 %v10651_v54  ;;  %v9244_v48 = vunpack.i.l.bf16 %v10653_v55  ;;  %v9240_v46 = vunpack.i.h.bf16 %v10635_v43 }
  0x9a   :  { %v518_v10 = vsel %vm14749_vm4, %v9200_v2, %v9239_v49  ;;  %v673_v28 = vsel %vm14750_vm2, %v665_v0, %v490_v29 }
  0x9b   :  { %v628_v52 = vsel %vm14588_vm12, %v9249_v8, %v9250_v18  ;;  %v599_v37 = vsel %vm14669_vm10, %v9244_v48, %v9234_v11  ;;  %v9230_v48 = vunpack.i.h.bf16 %v10628_v34 }
  0x9c   :  { %v10675_v21 = vpop.permute.xlu1 %9257  ;;  %v10677_v24 = vpop.permute.xlu0 %9252  ;;  %v711_v27 = vsel %vm709_vm14, %v703_v36, %v628_v52  ;;  %v702_v36 = vsel %vm701_vm11, %v694_v57, %v599_v37 }
  0x9d   :  { %v9259_v51 = vunpack.i.l.bf16 %v10675_v21  ;;  %v9254_v60 = vunpack.i.l.bf16 %v10677_v24  ;;  %v9260_v17 = vunpack.i.h.bf16 %v10675_v21  ;;  %v9255_v43 = vunpack.i.h.bf16 %v10677_v24 }
  0x9e   :  { %v681_v21 = vsel %vm677_vm5, %v673_v28, %v518_v10 }
  0x9f   :  { %v627_v47 = vsel %vm14588_vm12, %v9259_v51, %v9249_v8  ;;  %v9245_v8 = vunpack.i.h.bf16 %v10653_v55  ;;  %v546_v31 = vsel %vm14670_vm6, %v9215_v59, %v9254_v60  ;;  %v547_v57 = vsel %vm14670_vm6, %v9254_v60, %v9255_v43 }
  0xa0   :  { %v10701_v53 = vpop.permute.xlu1 %456  ;;  %v10703_v56 = vpop.permute.xlu0 %9262  ;;  %v689_v24 = vsel %vm685_vm8, %v681_v21, %v546_v31 }
  0xa1   :  { %v9265_v61 = vunpack.i.h.bf16 %v10703_v56  ;;  %v9264_v7 = vunpack.i.l.bf16 %v10703_v56 }
  0xa3   :  { %v656_v40 = vsel %vm14668_vm13, %v9264_v7, %v9265_v61 }
  0xa4   :  { %v10735_v33 = vpop.permute.xlu1 %9272  ;;  %v10737_v11 = vpop.permute.xlu0 %9267  ;;  %v8119_v42 = vpack.c.bf16 %v656_v40, %v711_v27  ;;  %v710_v40 = vsel %vm709_vm14, %v702_v36, %v627_v47  ;;  %v573_v27 = vsel %vm14671_vm7, %v9220_v62, %v9230_v48 }
  0xa5   :  { %v9274_v52 = vunpack.i.l.bf16 %v10735_v33  ;;  %v9269_v34 = vunpack.i.l.bf16 %v10737_v11  ;;  %v9275_v25 = vunpack.i.h.bf16 %v10735_v33  ;;  %v519_v33 = vsel %vm14749_vm4, %v9239_v49, %v9240_v46 }
  0xa6   :  { %8121 = vmatprep.subr.msk.bf16.mxu1 %vm10729_vm3, %v8119_v42 }
  0xa7   :  { %v655_v51 = vsel %vm14668_vm13, %v9274_v52, %v9264_v7  ;;  %v545_v7 = vsel %vm14670_vm6, %v9205_v58, %v9215_v59  ;;  %v601_v58 = vsel %vm14669_vm10, %v9235_v9, %v9245_v8  ;;  %v574_v62 = vsel %vm14671_vm7, %v9230_v48, %v9269_v34 }
  0xa8   :  { %v10761_v45 = vpop.permute.xlu1 %9277  ;;  %v485_v37 = vpop.permute.xlu0 %484  ;;  %v8122_v55 = vpack.c.bf16 %v655_v51, %v710_v40  ;;  %v688_v2 = vsel %vm685_vm8, %v680_v13, %v545_v7  ;;  %v674_v9 = vsel %vm14750_vm2, %v666_v35, %v491_v26  ;;  %v629_v48 = vsel %vm14588_vm12, %v9250_v18, %v9260_v17 }
  0xa9   :  { %v9279_v15 = vunpack.i.l.bf16 %v10761_v45  ;;  %v696_v44 = vsel %vm693_vm9, %v688_v2, %v573_v27  ;;  %v697_v52 = vsel %vm693_vm9, %v689_v24, %v574_v62  ;;  %v464_v13 = vsel %vm14587_vm1, %v9210_v38, %v10701_v53 }
  0xaa   :  { %8124 = vmatpush1.bf16.msk.msra.mxu1 %vm10729_vm3, %v8122_v55  ;;  %v704_v47 = vsel %vm701_vm11, %v696_v44, %v601_v58  ;;  %v657_v54 = vsel %vm14668_vm13, %v9265_v61, %v9275_v25  ;;  %v9270_v18 = vunpack.i.h.bf16 %v10737_v11  ;;  %vm14751_vm2 = vcmask 1040384  }
  0xab   :  { %v602_v59 = vsel %vm14669_vm10, %v9245_v8, %v9279_v15  ;;  %v492_v8 = vsel %vm14589_vm0, %v9225_v50, %v485_v37  ;;  %v668_v30 = vsel %vm14751_vm2, %v10577_v19, %v10701_v53  ;;  %v712_v38 = vsel %vm709_vm14, %v704_v47, %v629_v48  ;;  %vm14752_vm1 = vmmov %vm14751_vm2 }
  0xac   :  { %v10796_v63 = vpop.permute.xlu1 %9282  ;;  %v513_v39 = vpop.permute.xlu0 %512  ;;  %v705_v49 = vsel %vm701_vm11, %v697_v52, %v602_v59  ;;  %v667_v61 = vsel %vm14752_vm1, %v10558_v16, %v464_v13  ;;  %v8128_v29 = vpack.c.bf16 %v657_v54, %v712_v38  ;;  %v9280_v55 = vunpack.i.h.bf16 %v10761_v45  ;;  %v10926_v38 = vld [vmem:[%s14576_s3 + $0x48] ss:$12 sps:$4 sm:$0xff]  }
  0xad   :  { %v9284_v42 = vunpack.i.l.bf16 %v10796_v63  ;;  %7515 = vmatmul.mubr.msk.f32.vlgmr.msra.gmra.mrb[0].mxu1 %vm722_vm15, %v10782_v32  ;;  %v520_v0 = vsel %vm14749_vm4, %v9240_v46, %v513_v39  ;;  %v575_v53 = vsel %vm14671_vm7, %v9269_v34, %v9270_v18  ;;  %v9285_v27 = vunpack.i.h.bf16 %v10796_v63 }
  0xae   :  { %875 = vmatprep.mubr.f32.mxu1 %v14595_v20  ;;  %v682_v34 = vsel %vm677_vm5, %v674_v9, %v519_v33  ;;  %v603_v2 = vsel %vm14669_vm10, %v9279_v15, %v9280_v55  ;;  %v14593_v54 = vmov 34  }
  0xaf   :  { %v630_v36 = vsel %vm14588_vm12, %v9260_v17, %v9284_v42  ;;  %vm14753_vm12 = vcmask 1041408   ;;  %v690_v62 = vsel %vm685_vm8, %v682_v34, %v547_v57  ;;  %9293 = vset.pattern.permute.xlu0 %v14593_v54 }
  0xb0   :  { %v649_v51 = vpop.permute.xlu1 %648  ;;  %v713_v60 = vsel %vm709_vm14, %v705_v49, %v630_v36  ;;  %v541_v40 = vpop.permute.xlu0 %540  ;;  %v676_v11 = vsel %vm14753_vm12, %v668_v30, %v485_v37  ;;  %vm14754_vm0 = vmmov %vm14753_vm12  ;;  %v698_v44 = vsel %vm693_vm9, %v690_v62, %v575_v53  ;;  %v14599_v49 = vmov 33   ;;  %v10921_v30 = vld [vmem:[%s14576_s3 + $0x4c] ss:$12 sps:$4 sm:$0xff]  }
  0xb1   :  { %v658_v56 = vsel %vm14668_vm13, %v9275_v25, %v649_v51  ;;  %v548_v35 = vsel %vm14670_vm6, %v9255_v43, %v541_v40  ;;  %v675_v7 = vsel %vm14754_vm0, %v667_v61, %v492_v8  ;;  %v684_v19 = vsel %vm677_vm5, %v676_v11, %v513_v39  ;;  %9292 = vset.pattern.permute.xlu1 %v14599_v49  ;;  %v10891_v8 = vld [vmem:[%s14576_s3] ss:$12 sps:$4 sm:$0xff]   ;;  %v10943_v61 = vld [vmem:[%s14576_s3 + $0x7c] ss:$12 sps:$4 sm:$0xff]   ;;  %v10950_v11 = vld [vmem:[%s14576_s3 + $0x78] ss:$12 sps:$4 sm:$0xff]  }
  0xb2   :  { %v8125_v50 = vpack.c.bf16 %v658_v56, %v713_v60  ;;  %v683_v10 = vsel %vm677_vm5, %v675_v7, %v520_v0  ;;  %v692_v16 = vsel %vm685_vm8, %v684_v19, %v541_v40  ;;  %v14597_v43 = vmov 0.0|0.0   ;;  %v10909_v60 = vld [vmem:[%s14576_s3 + $0x34] ss:$12 sps:$4 sm:$0xff]   ;;  %v10915_v40 = vld [vmem:[%s14576_s3 + $0x30] ss:$12 sps:$4 sm:$0xff]  }
  0xb3   :  { %v691_v46 = vsel %vm685_vm8, %v683_v10, %v548_v35  ;;  %vm14755_vm0 = vcmask 564224   ;;  %vm14674_vm5 = vmmov 0   ;;  %v706_v47 = vsel %vm701_vm11, %v698_v44, %v603_v2  ;;  %v10931_v0 = vld [vmem:[%s14576_s3 + $0x64] ss:$12 sps:$4 sm:$0xff]   ;;  %v10938_v56 = vld [vmem:[%s14576_s3 + $0x60] ss:$12 sps:$4 sm:$0xff]  }
  0xb4   :  { %v597_v26 = vpop.permute.xlu1 %596  ;;  %v569_v37 = vpop.permute.xlu0 %568  ;;  %8127 = vmatprep.subr.msk.bf16.mxu1 %vm10729_vm3, %v8125_v50  ;;  %v631_v39 = vsel %vm14755_vm0, %v9284_v42, %v9285_v27  ;;  %vm14756_vm1 = vmmov %vm14755_vm0  ;;  %v10955_v50 = vld [vmem:[%s14576_s3 + $0x94] ss:$12 sps:$4 sm:$0xff]   ;;  %v10962_v35 = vld [vmem:[%s14576_s3 + $0x90] ss:$12 sps:$4 sm:$0xff]   ;;  %vm14672_vm6 = vcmask 859136  }
  0xb5   :  { %v604_v17 = vsel %vm14669_vm10, %v9280_v55, %v597_v26  ;;  %v576_v31 = vsel %vm14671_vm7, %v9270_v18, %v569_v37  ;;  %v700_v28 = vsel %vm693_vm9, %v692_v16, %v569_v37  ;;  %8130 = vmatpush1.bf16.msk.msra.mxu1 %vm10729_vm3, %v8128_v29  ;;  %v714_v57 = vsel %vm709_vm14, %v706_v47, %v631_v39  ;;  %v10886_v18 = vld [vmem:[%s14576_s3 + $0x4] ss:$12 sps:$4 sm:$0xff]   ;;  %v10967_v29 = vld [vmem:[%s14576_s3 + $0xac] ss:$12 sps:$4 sm:$0xff]   ;;  %v10974_v55 = vld [vmem:[%s14576_s3 + $0xa8] ss:$12 sps:$4 sm:$0xff]  }
  0xb6   :  { %v699_v58 = vsel %vm693_vm9, %v691_v46, %v576_v31  ;;  %8137 = vmatprep.subr.bf16.mxu1 %v14597_v43  ;;  %v708_v25 = vsel %vm701_vm11, %v700_v28, %v597_v26  ;;  %v64_v7 = vld [vmem:[%s14577_s2] sm:$0xff]  ;;  %v65_v26 = vld [vmem:[%s14577_s2 + $0x8] sm:$0xff]  ;;  %vm14667_vm9 = vcmask 355328   ;;  %vm14831_vm10 = vcmask 1031168  }
  0xb7   :  { %v707_v63 = vsel %vm701_vm11, %v699_v58, %v604_v17  ;;  %v10983_v53 = vrot.slane %v64_v7, %v10520_v3  ;;  %v11008_v28 = vrot.slane %v65_v26, %v10520_v3  ;;  %v11015_v62 = vrot.slane %v65_v26, %v10544_v12 }
  0xb8   :  { %v9288_v21 = vpop.permute.xlu1 %9287  ;;  %v625_v59 = vpop.permute.xlu0 %624  ;;  %7518 = vmatmul.mubr.msk.f32.vlgmr.msra.gmra.mrb[2].mxu1 %vm722_vm15, %v10782_v32  ;;  %vm14676_vm7 = vcmask 850944  }
  0xb9   :  { %v9290_v9 = vunpack.i.h.bf16 %v9288_v21  ;;  %v9289_v24 = vunpack.i.l.bf16 %v9288_v21  ;;  %v632_v33 = vsel %vm14756_vm1, %v9285_v27, %v625_v59  ;;  %v716_v45 = vsel %vm709_vm14, %v708_v25, %v625_v59  ;;  %7920 = vmatprep.mubr.msk.f32.mxu1 %vm14674_vm5, %v14595_v20  ;;  %14757 = vst [vmem:[#allocation5_spill] sm:$0xff] %v10983_v53  ;;  %14762 = vst [vmem:[#allocation10_spill] sm:$0xff] %v11008_v28 }
  0xba   :  { %v715_v15 = vsel %vm709_vm14, %v707_v63, %v632_v33  ;;  %v10986_v27 = vrot.slane %v64_v7, %v10544_v12  ;;  %v11001_v17 = vrot.slane %v10983_v53, %v10520_v3  ;;  %14763 = vst [vmem:[#allocation11_spill] sm:$0xff] %v11015_v62  ;;  %v11019_v2 = vrot.slane %v11008_v28, %v10520_v3  ;;  %v11258_v28 = vld [vmem:[%s14576_s3 + $0x150] ss:$12 sps:$4 sm:$0xff]   ;;  %v11270_v53 = vld [vmem:[%s14576_s3 + $0x16c] ss:$12 sps:$4 sm:$0xff]  }
  0xbb   :  { %v8138_v48 = vpack.c.bf16 %v9290_v9, %v716_v45  ;;  %v660_v52 = vsel %vm14668_vm13, %v9289_v24, %v9290_v9  ;;  %v659_v42 = vsel %vm14668_vm13, %v649_v51, %v9289_v24  ;;  %v10903_v51 = vld [vmem:[%s14576_s3 + $0x18] ss:$12 sps:$4 sm:$0xff]   ;;  %v11028_v44 = vrot.slane %v11015_v62, %v10520_v3  ;;  %v66_v9 = vld [vmem:[%s14577_s2 + $0x10] sm:$0xff]  ;;  %14784 = vst [vmem:[#allocation31_spill] sm:$0xff] %v11258_v28 }
  0xbc   :  { %v8131_v13 = vpack.c.bf16 %v660_v52, %v715_v15  ;;  %v8134_v36 = vpack.c.bf16 %v659_v42, %v714_v57  ;;  %14758 = vst [vmem:[#allocation6_spill] sm:$0xff] %v10986_v27  ;;  %14760 = vst [vmem:[#allocation8_spill] sm:$0xff] %v11001_v17  ;;  %v11005_v31 = vrot.slane %v10986_v27, %v10520_v3  ;;  %v67_v24 = vld [vmem:[%s14577_s2 + $0x18] sm:$0xf]  ;;  %vm1244_vm1 = vcmask 179200  }
  0xbd   :  { %8140 = vmatpush3.bf16.msk.msra.mxu1 %vm10729_vm3, %v8138_v48  ;;  %14764 = vst [vmem:[#allocation12_spill] sm:$0xff] %v11019_v2  ;;  %14765 = vst [vmem:[#allocation13_spill] sm:$0xff] %v11028_v44  ;;  %v11044_v48 = vrot.slane %v66_v9, %v10520_v3  ;;  %v11047_v52 = vrot.slane %v67_v24, %v10520_v3  ;;  %v11252_v62 = vld [vmem:[%s14576_s3 + $0x158] ss:$12 sps:$4 sm:$0xff]   ;;  %vm14830_vm13 = vcmask 1039360  }
  0xbe   :  { %8133 = vmatprep.subr.msk.bf16.mxu0 %vm10729_vm3, %v8131_v13  ;;  %14761 = vst [vmem:[#allocation9_spill] sm:$0xff] %v11005_v31  ;;  %v11265_v27 = vld [vmem:[%s14576_s3 + $0x98] ss:$12 sps:$4 sm:$0xff]   ;;  %14785 = vst [vmem:[#allocation32_spill] sm:$0xff] %v11270_v53 }
  0xbf   :  { %8136 = vmatpush1.bf16.msk.msra.mxu0 %vm10729_vm3, %v8134_v36  ;;  %14766 = vst [vmem:[#allocation14_spill] sm:$0xff] %v11044_v48  ;;  %14767 = vst [vmem:[#allocation15_spill] sm:$0xff] %v11047_v52 }
  0xc0   :  { %7921 = vmatmul.mubr.msk.f32.vlgmr.msra.gmra.mrb[4].mxu1 %vm722_vm15, %v10782_v32  ;;  %8142 = vmatprep.subr.bf16.mxu0 %v10886_v18 }
  0xc2   :  { %7521 = vmatmul.mubr.msk.f32.vlgmr.msra.gmra.mrb[0].mxu0 %vm722_vm15, %v10782_v32  ;;  %v10897_v32 = vld [vmem:[%s14576_s3 + $0x1c] ss:$12 sps:$4 sm:$0xff]  }
  0xc3   :  { %8144 = vmatpush1.bf16.msra.mxu0 %v10891_v8 }
  0xc4   :  { %8146 = vmatprep.subr.bf16.mxu0 %v10897_v32 }
  0xc7   :  { %8148 = vmatpush1.bf16.msra.mxu0 %v10903_v51 }
  0xc8   :  { %8150 = vmatprep.subr.bf16.mxu0 %v10909_v60 }
  0xc9   :  { %v10988_v10 = vpop.permute.xlu0 %719 }
  0xca   :  { %14759 = vst [vmem:[#allocation7_spill] sm:$0xff] %v10988_v10 }
  0xcb   :  { %8152 = vmatpush1.bf16.msra.mxu0 %v10915_v40 }
  0xcc   :  { %8154 = vmatprep.subr.bf16.mxu0 %v10921_v30 }
  0xcf   :  { %8156 = vmatpush1.bf16.msra.mxu0 %v10926_v38 }
  0xd0   :  { %8158 = vmatprep.subr.bf16.mxu0 %v10931_v0 }
  0xd3   :  { %8160 = vmatpush1.bf16.msra.mxu0 %v10938_v56 }
  0xd4   :  { %8162 = vmatprep.subr.bf16.mxu0 %v10943_v61 }
  0xd7   :  { %8164 = vmatpush1.bf16.msra.mxu0 %v10950_v11 }
  0xd8   :  { %8166 = vmatprep.subr.bf16.mxu0 %v10955_v50 }
  0xdb   :  { %8168 = vmatpush1.bf16.msra.mxu0 %v10962_v35 }
  0xdc   :  { %8170 = vmatprep.subr.bf16.mxu0 %v10967_v29 }
  0xdf   :  { %8172 = vmatpush1.bf16.msra.mxu0 %v10974_v55 }
 0x180   :  { %v806_v19 = vpop.f32.mrb[0].mxu1 }
 0x181   :  { %v808_v16 = vpop.f32.mrb[1].mxu1  ;;  %v10994_v37 = vadd.f32 %v806_v19, %v10988_v10  ;;  %v11055_v19 = vrot.slane %v66_v9, %v10544_v12 }
 0x182   :  { %v10997_v46 = vadd.f32 %v808_v16, %v10988_v10 }
 0x183   :  { %v1090_v34 = vmul.f32 %v11001_v17, %v10994_v37  ;;  %14768 = vst [vmem:[#allocation16_spill] sm:$0xff] %v11055_v19 }
 0x184   :  { %v1091_v58 = vmul.f32 %v11005_v31, %v10997_v46 }
 0x185   :  { %v1113_v25 = vmul.f32 %v1090_v34, %v10994_v37  ;;  %v1097_v45 = vsel %vm685_vm8, %v1090_v34, 0.0 }
 0x186   :  { %v1114_v59 = vmul.f32 %v1091_v58, %v10997_v46  ;;  %v1098_v15 = vsel %vm685_vm8, %v1091_v58, 0.0  ;;  %v11060_v58 = vrot.slane %v11047_v52, %v10520_v3  ;;  %v11234_v52 = vld [vmem:[%s14576_s3 + $0x138] ss:$12 sps:$4 sm:$0xff]  }
 0x187   :  { %v1120_v42 = vsel %vm685_vm8, %v1113_v25, 0.0  ;;  %v1099_v7 = vadd.f32 %v1098_v15, %v1097_v45  ;;  %v11073_v45 = vrot.slane %v11055_v19, %v10520_v3  ;;  %14782 = vst [vmem:[#allocation29_spill] sm:$0xff] %v11234_v52  ;;  %v11241_v19 = vld [vmem:[%s14576_s3 + $0x80] ss:$12 sps:$4 sm:$0xff]  }
 0x188   :  { %v1121_v57 = vsel %vm685_vm8, %v1114_v59, 0.0  ;;  %14769 = vst [vmem:[#allocation17_spill] sm:$0xff] %v11060_v58 }
 0x189   :  { %v1122_v26 = vadd.f32 %v1121_v57, %v1120_v42  ;;  %14771 = vst [vmem:[#allocation19_spill] sm:$0xff] %v11073_v45 }
 0x18b   :  { %v877_v21 = vpop.f32.mrb[2].mxu1 }
 0x18c   :  { %v11024_v63 = vadd.f32 %v877_v21, %v10988_v10  ;;  %v879_v39 = vpop.f32.mrb[3].mxu1 }
 0x18d   :  { %v11037_v33 = vadd.f32 %v879_v39, %v10988_v10  ;;  %v11069_v39 = vrot.slane %v11044_v48, %v10520_v3  ;;  %v11246_v48 = vld [vmem:[%s14576_s3 + $0x154] ss:$12 sps:$4 sm:$0xff]  }
 0x18e   :  { %v1092_v47 = vmul.f32 %v11019_v2, %v11024_v63  ;;  %14783 = vst [vmem:[#allocation30_spill] sm:$0xff] %v11246_v48 }
 0x18f   :  { %v1093_v36 = vmul.f32 %v11028_v44, %v11037_v33  ;;  %14770 = vst [vmem:[#allocation18_spill] sm:$0xff] %v11069_v39 }
 0x190   :  { %v1115_v13 = vmul.f32 %v1092_v47, %v11024_v63  ;;  %v1100_v16 = vsel %vm685_vm8, %v1092_v47, 0.0 }
 0x191   :  { %v1116_v25 = vmul.f32 %v1093_v36, %v11037_v33  ;;  %v1101_v9 = vadd.f32 %v1100_v16, %v1099_v7  ;;  %v1102_v15 = vsel %vm685_vm8, %v1093_v36, 0.0 }
 0x192   :  { %v1123_v21 = vsel %vm685_vm8, %v1115_v13, 0.0 }
 0x193   :  { %v1019_v34 = vpop.f32.mrb[4].mxu1  ;;  %v1124_v57 = vadd.f32 %v1123_v21, %v1122_v26  ;;  %v1103_v36 = vadd.f32 %v1102_v15, %v1101_v9 }
 0x194   :  { %v11065_v59 = vadd.f32 %v1019_v34, %v10988_v10  ;;  %v7922_v12 = vpop.f32.mrb[5].mxu1  ;;  %v1125_v34 = vsel %vm685_vm8, %v1116_v25, 0.0 }
 0x195   :  { %v948_v24 = vpop.f32.mrb[0].mxu0 }
 0x196   :  { %v11077_v47 = vadd.f32 %v948_v24, %v10988_v10  ;;  %v950_v42 = vpop.f32.mrb[1].mxu0  ;;  %v1096_v16 = vmul.f32 %v11060_v58, %v11065_v59 }
 0x197   :  { %v11080_v13 = vadd.f32 %v950_v42, %v10988_v10  ;;  %v1126_v42 = vadd.f32 %v1125_v34, %v1124_v57  ;;  %v11101_v57 = vld [vmem:[%s14576_s3 + $0xc4] ss:$12 sps:$4 sm:$0xff]   ;;  %v11150_v34 = vld [vmem:[%s14576_s3 + $0xf4] ss:$12 sps:$4 sm:$0xff]  }
 0x198   :  { %v1094_v7 = vmul.f32 %v11069_v39, %v11077_v47  ;;  %v1119_v6 = vmul.f32 %v1096_v16, %v11065_v59  ;;  %v1109_v9 = vsel %vm14667_vm9, %v1096_v16, 0.0  ;;  %8174 = vmatprep.subr.bf16.mxu0 %v11101_v57  ;;  %14774 = vst [vmem:[#allocation22_spill] sm:$0xff] %v11150_v34  ;;  %v11155_v16 = vld [vmem:[%s14576_s3 + $0xf8] ss:$12 sps:$4 sm:$0xff]   ;;  %v11289_v10 = vld [vmem:[%s14576_s3 + $0xb0] ss:$12 sps:$4 sm:$0xff]  }
 0x199   :  { %v1095_v3 = vmul.f32 %v11073_v45, %v11080_v13 }
 0x19a   :  { %v1117_v12 = vmul.f32 %v1094_v7, %v11077_v47  ;;  %v1104_v24 = vsel %vm685_vm8, %v1094_v7, 0.0  ;;  %v1131_v7 = vsel %vm14667_vm9, %v1119_v6, 0.0  ;;  %v11116_v6 = vld [vmem:[%s14576_s3 + $0x8] ss:$12 sps:$4 sm:$0xff]   ;;  %vm1918_vm9 = vcmask 957440  }
 0x19b   :  { %v1118_v26 = vmul.f32 %v1095_v3, %v11080_v13  ;;  %v1105_v21 = vadd.f32 %v1104_v24, %v1103_v36  ;;  %v1106_v25 = vsel %vm685_vm8, %v1095_v3, 0.0  ;;  %v11161_v3 = vld [vmem:[%s14576_s3 + $0xf0] ss:$12 sps:$4 sm:$0xff]   ;;  %v11166_v36 = vld [vmem:[%s14576_s3 + $0x38] ss:$12 sps:$4 sm:$0xff]  }
 0x19c   :  { %v1127_v5 = vsel %vm685_vm8, %v1117_v12, 0.0  ;;  %14775 = vst [vmem:[#allocation23_spill] sm:$0xff] %v11161_v3  ;;  %v11175_v12 = vld [vmem:[%s14576_s3 + $0x10c] ss:$12 sps:$4 sm:$0xff]   ;;  %v11180_v24 = vld [vmem:[%s14576_s3 + $0x108] ss:$12 sps:$4 sm:$0xff]  }
 0x19d   :  { %v1107_v14 = vadd.f32 %v1106_v25, %v1105_v21  ;;  %v1128_v54 = vadd.f32 %v1127_v5, %v1126_v42  ;;  %v1129_v20 = vsel %vm685_vm8, %v1118_v26, 0.0  ;;  %v11106_v5 = vld [vmem:[%s14576_s3 + $0xc8] ss:$12 sps:$4 sm:$0xff]   ;;  %14776 = vst [vmem:[#allocation24_spill] sm:$0xff] %v11175_v12  ;;  %14777 = vst [vmem:[#allocation25_spill] sm:$0xff] %v11180_v24 }
 0x19e   :  { %8242 = vmatprep.subr.bf16.mxu1 %v11106_v5  ;;  %v11185_v26 = vld [vmem:[%s14576_s3 + $0x110] ss:$12 sps:$4 sm:$0xff]   ;;  %v11203_v25 = vld [vmem:[%s14576_s3 + $0x128] ss:$12 sps:$4 sm:$0xff]   ;;  %v11209_v42 = vld [vmem:[%s14576_s3 + $0x120] ss:$12 sps:$4 sm:$0xff]  }
 0x19f   :  { %v1110_v15 = vadd.f32 %v1109_v9, %v1107_v14  ;;  %v1130_v43 = vadd.f32 %v1129_v20, %v1128_v54  ;;  %v11111_v14 = vld [vmem:[%s14576_s3 + $0xc0] ss:$12 sps:$4 sm:$0xff]   ;;  %8244 = vmatpush3.bf16.msra.mxu1 %v11116_v6  ;;  %v11126_v20 = vld [vmem:[%s14576_s3 + $0xdc] ss:$12 sps:$4 sm:$0xff]   ;;  %v11196_v21 = vld [vmem:[%s14576_s3 + $0x124] ss:$12 sps:$4 sm:$0xff]  }
 0x1a0   :  { %8176 = vmatpush1.bf16.msra.mxu0 %v11111_v14  ;;  %14772 = vst [vmem:[#allocation20_spill] sm:$0xff] %v11126_v20  ;;  %v11141_v54 = vld [vmem:[%s14576_s3 + $0x20] ss:$12 sps:$4 sm:$0xff]   ;;  %14778 = vst [vmem:[#allocation26_spill] sm:$0xff] %v11196_v21  ;;  %v14780_v9 = vmov 33  }
 0x1a1   :  { %1111 = vadd.xlane.f32.xlu1 %v1110_v15  ;;  %v1132_v49 = vadd.f32 %v1131_v7, %v1130_v43  ;;  %v11131_v43 = vld [vmem:[%s14576_s3 + $0xe0] ss:$12 sps:$4 sm:$0xff]   ;;  %8178 = vmatprep.subr.bf16.mxu0 %v11126_v20  ;;  %14779 = vst [vmem:[#allocation27_spill] sm:$0xff] %v11209_v42  ;;  %v11217_v15 = vld [vmem:[%s14576_s3 + $0x68] ss:$12 sps:$4 sm:$0xff]  }
 0x1a2   :  { %8246 = vmatprep.subr.bf16.mxu1 %v11131_v43  ;;  %v11222_v7 = vld [vmem:[%s14576_s3 + $0x13c] ss:$12 sps:$4 sm:$0xff]  }
 0x1a3   :  { %1133 = vadd.xlane.f32.xlu0 %v1132_v49  ;;  %v11136_v49 = vld [vmem:[%s14576_s3 + $0xd8] ss:$12 sps:$4 sm:$0xff]   ;;  %8248 = vmatpush3.bf16.msra.mxu1 %v11141_v54  ;;  %14781 = vst [vmem:[#allocation28_spill] sm:$0xff] %v11222_v7 }
 0x1a4   :  { %14773 = vst [vmem:[#allocation21_spill] sm:$0xff] %v11136_v49  ;;  %8180 = vmatpush1.bf16.msra.mxu0 %v11136_v49  ;;  %8250 = vmatprep.subr.bf16.mxu1 %v11155_v16 }
 0x1a5   :  { %8182 = vmatprep.subr.bf16.mxu0 %v11150_v34 }
 0x1a7   :  { %8252 = vmatpush3.bf16.msra.mxu1 %v11166_v36 }
 0x1a8   :  { %8184 = vmatpush1.bf16.msra.mxu0 %v11161_v3  ;;  %8254 = vmatprep.subr.bf16.mxu1 %v11185_v26 }
 0x1a9   :  { %8186 = vmatprep.subr.bf16.mxu0 %v11175_v12 }
 0x1ac   :  { %8188 = vmatpush1.bf16.msra.mxu0 %v11180_v24 }
 0x1ad   :  { %8190 = vmatprep.subr.bf16.mxu0 %v11196_v21 }
 0x1b0   :  { %8192 = vmatpush1.bf16.msra.mxu0 %v11209_v42 }
 0x1b1   :  { %8194 = vmatprep.subr.bf16.mxu0 %v11222_v7 }
 0x1b2   :  { %1157 = vperm.xlu1 %9292, %v10609_v23  }
 0x1b4   :  { %8196 = vmatpush1.bf16.msra.mxu0 %v11234_v52 }
 0x1b5   :  { %8198 = vmatprep.subr.bf16.mxu0 %v11246_v48 }
 0x1b6   :  { %9334 = vset.pattern.permute.xlu1 %v14601_v22  ;;  %v11228_v22 = vld [vmem:[%s14576_s3 + $0x140] ss:$12 sps:$4 sm:$0xff]  }
 0x1b8   :  { %8200 = vmatpush1.bf16.msra.mxu0 %v11258_v28 }
 0x1b9   :  { %1168 = vperm.xlu0 %9293, %v10609_v23   ;;  %v11191_v23 = vld [vmem:[%s14576_s3 + $0x50] ss:$12 sps:$4 sm:$0xff]   ;;  %8202 = vmatprep.subr.bf16.mxu0 %v11270_v53 }
 0x1ba   :  { %8256 = vmatpush3.bf16.msra.mxu1 %v11191_v23 }
 0x1bb   :  { %8258 = vmatprep.subr.bf16.mxu1 %v11203_v25 }
 0x1bd   :  { %9335 = vset.pattern.permute.xlu0 %v14780_v9  ;;  %v11282_v9 = vld [vmem:[%s14576_s3 + $0x168] ss:$12 sps:$4 sm:$0xff]  }
 0x1be   :  { %8260 = vmatpush3.bf16.msra.mxu1 %v11217_v15  ;;  %14786 = vst [vmem:[#allocation33_spill] sm:$0xff] %v11282_v9  ;;  %8204 = vmatpush1.bf16.msra.mxu0 %v11282_v9 }
 0x1bf   :  { %8262 = vmatprep.subr.bf16.mxu1 %v11228_v22  ;;  %8206 = vmatprep.subr.bf16.mxu0 %v11297_v1 }
 0x1c2   :  { %8264 = vmatpush3.bf16.msra.mxu1 %v11241_v19 }
 0x1c3   :  { %8266 = vmatprep.subr.bf16.mxu1 %v11252_v62 }
 0x1c6   :  { %8268 = vmatpush3.bf16.msra.mxu1 %v11265_v27 }
 0x1c7   :  { %8270 = vmatprep.subr.bf16.mxu1 %v11276_v41 }
 0x1ca   :  { %8272 = vmatpush3.bf16.msra.mxu1 %v11289_v10 }
 0x1cb   :  { %8273 = vmatprep.subr.bf16.mxu1 %v14788_v4 }
 0x22e   :  { %v1112_v53 = vpop.xlane.xlu1 %1111 }
 0x22f   :  { %v11301_v28 = vmul.f32 0.0015432099, %v1112_v53 }
 0x230   :  { %v1134_v48 = vpop.xlane.xlu0 %1133 }
 0x231   :  { %v1136_v52 = vmul.f32 0.0015432099, %v1134_v48  ;;  %v1137_v7 = vmul.f32 %v11301_v28, %v11301_v28  ;;  %v1141_v24 = vsub.f32 %v10997_v46, %v11301_v28  ;;  %v1140_v12 = vsub.f32 %v10994_v37, %v11301_v28 }
 0x232   :  { %v1144_v1 = vsub.f32 %v11077_v47, %v11301_v28  ;;  %v1145_v53 = vsub.f32 %v11080_v13, %v11301_v28  ;;  %v11315_v3 = vpop.permute.xlu1 %1157 }
 0x233   :  { %v1138_v9 = vsub.f32 %v1136_v52, %v1137_v7  ;;  %14789 = vst [vmem:[#allocation35_spill] sm:$0xff] %v11315_v3  ;;  %v1143_v52 = vsub.f32 %v11037_v33, %v11301_v28 }
 0x235   :  { %v1139_v42 = vmax.f32 %v1138_v9, 0.0 }
 0x237   :  { %v1147_v21 = vadd.f32 1e-05, %v1139_v42 }
 0x238   :  { %v11325_v9 = vpop.permute.xlu0 %1168 }
 0x239   :  { %10400 = vrsqrt.f32 %v1147_v21  ;;  %v1146_v21 = vsub.f32 %v11065_v59, %v11301_v28  ;;  %14790 = vst [vmem:[#allocation36_spill] sm:$0xff] %v11325_v9 }
 0x243   :  { %v11313_v48 = vpop.eup %10400 }
 0x244   :  { %v1150_v46 = vmul.f32 %v11313_v48, %v1141_v24  ;;  %v1149_v37 = vmul.f32 %v11313_v48, %v1140_v12  ;;  %v1153_v42 = vmul.f32 %v11313_v48, %v1144_v1  ;;  %v1154_v47 = vmul.f32 %v11313_v48, %v1145_v53 }
 0x245   :  { %v1152_v13 = vmul.f32 %v11313_v48, %v1143_v52  ;;  %v1155_v7 = vmul.f32 %v11313_v48, %v1146_v21 }
 0x246   :  { %v1161_v34 = vmul.f32 %v11315_v3, %v1150_v46  ;;  %v1160_v33 = vmul.f32 %v11315_v3, %v1149_v37  ;;  %v1164_v59 = vmul.f32 %v11315_v3, %v1153_v42  ;;  %v1165_v24 = vmul.f32 %v11315_v3, %v1154_v47 }
 0x247   :  { %v1163_v12 = vmul.f32 %v11315_v3, %v1152_v13  ;;  %v1166_v1 = vmul.f32 %v11315_v3, %v1155_v7 }
 0x248   :  { %v1172_v53 = vadd.f32 %v11325_v9, %v1161_v34  ;;  %v1171_v49 = vadd.f32 %v11325_v9, %v1160_v33  ;;  %v1175_v52 = vadd.f32 %v11325_v9, %v1164_v59  ;;  %v1176_v21 = vadd.f32 %v11325_v9, %v1165_v24  ;;  %v11347_v24 = vld [vmem:[%s14576_s3 + $0x180] ss:$12 sps:$4 sm:$0xff]  }
 0x249   :  { %v1174_v46 = vadd.f32 %v11325_v9, %v1163_v12  ;;  %v1177_v37 = vadd.f32 %v11325_v9, %v1166_v1  ;;  %v11355_v1 = vld [vmem:[%s14576_s3 + $0x188] ss:$12 sps:$4 sm:$0xff]  }
 0x24a   :  { %vm1179_vm12 = vcmp.ge.f32.partialorder %v1172_v53, 0.0  ;;  %v1186_v42 = vmul.f32 0.1, %v1172_v53  ;;  %vm1178_vm14 = vcmp.ge.f32.partialorder %v1171_v49, 0.0  ;;  %v1185_v47 = vmul.f32 0.1, %v1171_v49 }
 0x24b   :  { %vm1182_vm2 = vcmp.ge.f32.partialorder %v1175_v52, 0.0  ;;  %vm1183_vm4 = vcmp.ge.f32.partialorder %v1176_v21, 0.0  ;;  %v1189_v13 = vmul.f32 0.1, %v1175_v52  ;;  %v1190_v7 = vmul.f32 0.1, %v1176_v21 }
 0x24c   :  { %v1193_v20 = vsel %vm1179_vm12, %v1172_v53, %v1186_v42  ;;  %v1192_v34 = vsel %vm1178_vm14, %v1171_v49, %v1185_v47  ;;  %vm1181_vm0 = vcmp.ge.f32.partialorder %v1174_v46, 0.0  ;;  %v1188_v33 = vmul.f32 0.1, %v1174_v46 }
 0x24d   :  { %v11342_v59 = vmul.f32 %v1193_v20, %v11005_v31  ;;  %v11350_v12 = vmul.f32 %v1192_v34, %v11001_v17  ;;  %v1196_v53 = vsel %vm1182_vm2, %v1175_v52, %v1189_v13  ;;  %v1197_v49 = vsel %vm1183_vm4, %v1176_v21, %v1190_v7  ;;  %v11368_v34 = vld [vmem:[%s14576_s3 + $0x19c] ss:$12 sps:$4 sm:$0xff]   ;;  %v11387_v13 = vld [vmem:[%s14576_s3 + $0x1a0] ss:$12 sps:$4 sm:$0xff]   ;;  %v11525_v17 = vld [vmem:[%s14576_s3 + $0x244] ss:$12 sps:$4 sm:$0xff]  }
 0x24e   :  { %v11358_v42 = vmul.f32 %v1196_v53, %v11069_v39  ;;  %v11361_v20 = vmul.f32 %v1197_v49, %v11073_v45  ;;  %v1195_v47 = vsel %vm1181_vm0, %v1174_v46, %v1188_v33  ;;  %v11382_v46 = vld [vmem:[%s14576_s3 + $0x198] ss:$12 sps:$4 sm:$0xff]   ;;  %v1191_v7 = vmul.f32 0.1, %v1177_v37  ;;  %v11395_v33 = vld [vmem:[%s14576_s3 + $0x1b4] ss:$12 sps:$4 sm:$0xff]  }
 0x24f   :  { %14791 = vst [vmem:[#allocation37_spill] sm:$0xff] %v11342_v59  ;;  %14792 = vst [vmem:[#allocation38_spill] sm:$0xff] %v11350_v12  ;;  %1320 = vmatprep.mubr.f32.mxu0 %v11342_v59  ;;  %1462 = vmatprep.mubr.f32.mxu1 %v11342_v59  ;;  %v11375_v21 = vmul.f32 %v1195_v47, %v11028_v44  ;;  %vm1184_vm12 = vcmp.ge.f32.partialorder %v1177_v37, 0.0  ;;  %v11406_v53 = vld [vmem:[%s14576_s3 + $0x1b0] ss:$12 sps:$4 sm:$0xff]   ;;  %vm14678_vm2 = vcmask 867328  }
 0x250   :  { %14793 = vst [vmem:[#allocation39_spill] sm:$0xff] %v11358_v42  ;;  %14794 = vst [vmem:[#allocation40_spill] sm:$0xff] %v11361_v20  ;;  %1321 = vmatmul.mubr.f32.vlgmr.msra.gmra.mrb[2].mxu0 %v11350_v12  ;;  %1463 = vmatmul.mubr.f32.vlgmr.msra.gmra.mrb[6].mxu1 %v11350_v12  ;;  %v9294_v52 = vpack.i.bf16 %v11361_v20, %v11358_v42  ;;  %v11411_v49 = vld [vmem:[%s14576_s3 + $0x1b8] ss:$12 sps:$4 sm:$0xff]   ;;  %v1198_v47 = vsel %vm1184_vm12, %v1177_v37, %v1191_v7  ;;  %v11430_v37 = vld [vmem:[%s14576_s3 + $0x1c8] ss:$12 sps:$4 sm:$0xff]  }
 0x251   :  { %14795 = vst [vmem:[#allocation41_spill] sm:$0xff] %v11375_v21  ;;  %8208 = vmatpush1.bf16.msra.mxu0 %v11347_v24  ;;  %8275 = vmatpush1.bf16.msra.mxu1 %v11355_v1  ;;  %v11423_v20 = vmul.f32 %v1198_v47, %v11060_v58  ;;  %v11435_v7 = vld [vmem:[%s14576_s3 + $0x1d0] ss:$12 sps:$4 sm:$0xff]   ;;  %v1142_v12 = vsub.f32 %v11024_v63, %v11301_v28  ;;  %v11472_v59 = vld [vmem:[%s14576_s3 + $0x1f8] ss:$12 sps:$4 sm:$0xff]   ;;  %14804 = vst [vmem:[#allocation50_spill] sm:$0xff] %v11525_v17 }
 0x252   :  { %9295 = vrot.lane.b32.xlu1 %v9294_v52, %s10451_s7  ;;  %7526 = vmatprep.mubr.msk.f32.mxu0 %vm1244_vm1, %v11375_v21  ;;  %v11419_v52 = vld [vmem:[%s14576_s3 + $0x1cc] ss:$12 sps:$4 sm:$0xff]   ;;  %v11443_v47 = vld [vmem:[%s14576_s3 + $0x1e4] ss:$12 sps:$4 sm:$0xff]   ;;  %v11463_v42 = vld [vmem:[%s14576_s3 + $0x1fc] ss:$12 sps:$4 sm:$0xff]  }
 0x253   :  { %7528 = vmatprep.mubr.msk.f32.mxu1 %vm1244_vm1, %v11375_v21  ;;  %8210 = vmatprep.subr.bf16.mxu0 %v11368_v34  ;;  %14796 = vst [vmem:[#allocation42_spill] sm:$0xff] %v11423_v20  ;;  %v11477_v58 = vld [vmem:[%s14576_s3 + $0x200] ss:$12 sps:$4 sm:$0xff]   ;;  %v1151_v45 = vmul.f32 %v11313_v48, %v1142_v12  ;;  %v11492_v63 = vld [vmem:[%s14576_s3 + $0x210] ss:$12 sps:$4 sm:$0xff]   ;;  %vm14677_vm4 = vcmask 506880  }
 0x254   :  { %8276 = vmatprep.subr.bf16.mxu1 %v14788_v4  ;;  %14797 = vst [vmem:[#allocation43_spill] sm:$0xff] %v11477_v58  ;;  %v11485_v28 = vld [vmem:[%s14576_s3 + $0x214] ss:$12 sps:$4 sm:$0xff]   ;;  %14799 = vst [vmem:[#allocation45_spill] sm:$0xff] %v11492_v63  ;;  %v11497_v48 = vld [vmem:[%s14576_s3 + $0x218] ss:$12 sps:$4 sm:$0xff]  }
 0x255   :  { %8212 = vmatpush1.bf16.msra.mxu0 %v11382_v46  ;;  %8278 = vmatpush1.bf16.msra.mxu1 %v11387_v13  ;;  %14798 = vst [vmem:[#allocation44_spill] sm:$0xff] %v11485_v28  ;;  %14800 = vst [vmem:[#allocation46_spill] sm:$0xff] %v11497_v48  ;;  %v1162_v12 = vmul.f32 %v11315_v3, %v1151_v45  ;;  %v11505_v39 = vld [vmem:[%s14576_s3 + $0x22c] ss:$12 sps:$4 sm:$0xff]   ;;  %v11512_v44 = vld [vmem:[%s14576_s3 + $0x228] ss:$12 sps:$4 sm:$0xff]  }
 0x256   :  { %1559 = vrot.lane.b32.xlu1 %v11375_v21, %s10451_s7  ;;  %8214 = vmatprep.subr.bf16.mxu0 %v11395_v33  ;;  %v11451_v21 = vld [vmem:[%s14576_s3 + $0x1e0] ss:$12 sps:$4 sm:$0xff]   ;;  %14801 = vst [vmem:[#allocation47_spill] sm:$0xff] %v11505_v39  ;;  %14802 = vst [vmem:[#allocation48_spill] sm:$0xff] %v11512_v44  ;;  %v11517_v45 = vld [vmem:[%s14576_s3 + $0x230] ss:$12 sps:$4 sm:$0xff]  }
 0x257   :  { %8279 = vmatprep.subr.bf16.mxu1 %v14788_v4  ;;  %14803 = vst [vmem:[#allocation49_spill] sm:$0xff] %v11517_v45  ;;  %v1173_v31 = vadd.f32 %v11325_v9, %v1162_v12  ;;  %v11530_v3 = vld [vmem:[%s14576_s3 + $0x258] sm:$0x77]  ;;  %v11537_v12 = vld [vmem:[%s14576_s3 + $0x240] ss:$12 sps:$4 sm:$0xff]   ;;  %vm1882_vm0 = vcmask 539648  }
 0x258   :  { %v11542_v9 = vld [vmem:[%s14576_s3 + $0x248] ss:$12 sps:$4 sm:$0xff]   ;;  %vm1889_vm12 = vcmask 97280  }
 0x259   :  { %8216 = vmatpush1.bf16.msra.mxu0 %v11406_v53  ;;  %8281 = vmatpush1.bf16.msra.mxu1 %v11411_v49  ;;  %vm1180_vm14 = vcmp.ge.f32.partialorder %v1173_v31, 0.0 }
 0x25a   :  { %1565 = vrot.lane.b32.xlu1 %v11423_v20, %s10451_s7  ;;  %8218 = vmatprep.subr.bf16.mxu0 %v11419_v52  ;;  %v11456_v20 = vld [vmem:[%s14576_s3 + $0x1e8] ss:$12 sps:$4 sm:$0xff]  }
 0x25b   :  { %8282 = vmatprep.subr.bf16.mxu1 %v14788_v4 }
 0x25d   :  { %8220 = vmatpush1.bf16.msra.mxu0 %v11430_v37  ;;  %8284 = vmatpush1.bf16.msra.mxu1 %v11435_v7 }
 0x25e   :  { %8222 = vmatprep.subr.bf16.mxu0 %v11443_v47  ;;  %8285 = vmatprep.subr.bf16.mxu1 %v14788_v4 }
 0x261   :  { %8224 = vmatpush1.bf16.msra.mxu0 %v11451_v21  ;;  %8287 = vmatpush1.bf16.msra.mxu1 %v11456_v20 }
 0x262   :  { %8226 = vmatprep.subr.bf16.mxu0 %v11463_v42  ;;  %8288 = vmatprep.subr.bf16.mxu1 %v14788_v4 }
 0x265   :  { %8228 = vmatpush1.bf16.msra.mxu0 %v11472_v59  ;;  %8290 = vmatpush1.bf16.msra.mxu1 %v11477_v58 }
 0x266   :  { %8230 = vmatprep.subr.bf16.mxu0 %v11485_v28  ;;  %8291 = vmatprep.subr.bf16.mxu1 %v14788_v4 }
 0x269   :  { %8232 = vmatpush1.bf16.msra.mxu0 %v11492_v63  ;;  %8293 = vmatpush1.bf16.msra.mxu1 %v11497_v48  ;;  %v321_v48 = vunpack.c.h.bf16 %v11530_v3 }
 0x26a   :  { %8234 = vmatprep.subr.bf16.mxu0 %v11505_v39  ;;  %8294 = vmatprep.subr.bf16.mxu1 %v14788_v4  ;;  %v1187_v39 = vmul.f32 0.1, %v1173_v31 }
 0x26c   :  { %v1194_v28 = vsel %vm1180_vm14, %v1173_v31, %v1187_v39  ;;  %v14822_v39 = vld [vmem:[#allocation44_spill] sm:$0xff]  ;;  %vm1894_vm14 = vcmask 130048  }
 0x26d   :  { %8236 = vmatpush1.bf16.msra.mxu0 %v11512_v44  ;;  %8296 = vmatpush1.bf16.msra.mxu1 %v11517_v45  ;;  %v11550_v45 = vld [vmem:[%s14576_s3 + $0x260] sm:$0x7]  ;;  %v320_v44 = vunpack.c.l.bf16 %v11530_v3  ;;  %v11561_v58 = vmul.f32 %v1194_v28, %v11019_v2  ;;  %s10452_s3 = smov 62  }
 0x26e   :  { %8238 = vmatprep.subr.bf16.mxu0 %v11525_v17  ;;  %8297 = vmatprep.subr.bf16.mxu1 %v14788_v4  ;;  %v322_v63 = vunpack.c.l.bf16 %v11550_v45  ;;  %v14805_v17 = vmov 0.0  }
 0x271   :  { %8240 = vmatpush1.bf16.msra.mxu0 %v11537_v12  ;;  %8299 = vmatpush1.bf16.msra.mxu1 %v11542_v9 }
 0x272   :  { %7524 = vmatprep.subr.msk.mxu0 %vm701_vm11, %v321_v48  ;;  %1504 = vmatprep.subr.mxu1 %v14805_v17 }
 0x275   :  { %7525 = vmatpush1.msk.msra.mxu0 %vm701_vm11, %v320_v44  ;;  %7527 = vmatpush1.msk.msra.mxu1 %vm701_vm11, %v322_v63 }
 0x276   :  { %1392 = vmatmul.mubr.f32.vlgmr.msra.gmra.mrb[2].mxu0 %v11561_v58  ;;  %1533 = vmatmul.mubr.f32.vlgmr.msra.gmra.mrb[8].mxu1 %v11561_v58 }
 0x277   :  { %8301 = vmatprep.subr.bf16.mxu1 %v10886_v18  ;;  %8401 = vmatprep.subr.bf16.mxu0 %v11106_v5  ;;  %v14807_v18 = vld [vmem:[#allocation21_spill] sm:$0xff]  ;;  %v14824_v5 = vld [vmem:[#allocation46_spill] sm:$0xff] }
 0x278   :  { %8303 = vmatpush1.bf16.msra.mxu1 %v10891_v8  ;;  %8403 = vmatpush3.bf16.msra.mxu0 %v11116_v6  ;;  %v14808_v8 = vld [vmem:[#allocation22_spill] sm:$0xff]  ;;  %v14826_v6 = vld [vmem:[#allocation48_spill] sm:$0xff] }
 0x279   :  { %8305 = vmatprep.subr.bf16.mxu1 %v10897_v32  ;;  %8405 = vmatprep.subr.bf16.mxu0 %v11131_v43  ;;  %v14809_v32 = vld [vmem:[#allocation23_spill] sm:$0xff]  ;;  %v14827_v43 = vld [vmem:[#allocation49_spill] sm:$0xff] }
 0x27c   :  { %8307 = vmatpush1.bf16.msra.mxu1 %v10903_v51  ;;  %8407 = vmatpush3.bf16.msra.mxu0 %v11141_v54  ;;  %v14810_v51 = vld [vmem:[#allocation24_spill] sm:$0xff]  ;;  %v14828_v54 = vld [vmem:[#allocation50_spill] sm:$0xff] }
 0x27d   :  { %8309 = vmatprep.subr.bf16.mxu1 %v10909_v60  ;;  %8409 = vmatprep.subr.bf16.mxu0 %v11155_v16  ;;  %v14812_v60 = vld [vmem:[#allocation26_spill] sm:$0xff] }
 0x280   :  { %8311 = vmatpush1.bf16.msra.mxu1 %v10915_v40  ;;  %8411 = vmatpush3.bf16.msra.mxu0 %v11166_v36  ;;  %v14813_v40 = vld [vmem:[#allocation27_spill] sm:$0xff] }
 0x281   :  { %8313 = vmatprep.subr.bf16.mxu1 %v10921_v30  ;;  %8413 = vmatprep.subr.bf16.mxu0 %v11185_v26  ;;  %v14814_v30 = vld [vmem:[#allocation28_spill] sm:$0xff] }
 0x284   :  { %8315 = vmatpush1.bf16.msra.mxu1 %v10926_v38  ;;  %8415 = vmatpush3.bf16.msra.mxu0 %v11191_v23  ;;  %v14815_v38 = vld [vmem:[#allocation29_spill] sm:$0xff] }
 0x285   :  { %8317 = vmatprep.subr.bf16.mxu1 %v10931_v0  ;;  %8417 = vmatprep.subr.bf16.mxu0 %v11203_v25  ;;  %v14816_v0 = vld [vmem:[#allocation30_spill] sm:$0xff] }
 0x288   :  { %8319 = vmatpush1.bf16.msra.mxu1 %v10938_v56  ;;  %8419 = vmatpush3.bf16.msra.mxu0 %v11217_v15  ;;  %v14817_v56 = vld [vmem:[#allocation31_spill] sm:$0xff] }
 0x289   :  { %8321 = vmatprep.subr.bf16.mxu1 %v10943_v61  ;;  %8421 = vmatprep.subr.bf16.mxu0 %v11228_v22  ;;  %v14806_v22 = vld [vmem:[#allocation20_spill] sm:$0xff] }
 0x28a   :  { %v14818_v61 = vld [vmem:[#allocation32_spill] sm:$0xff] }
 0x28c   :  { %8323 = vmatpush1.bf16.msra.mxu1 %v10950_v11  ;;  %8423 = vmatpush3.bf16.msra.mxu0 %v11241_v19  ;;  %v14819_v11 = vld [vmem:[#allocation33_spill] sm:$0xff]  ;;  %v14821_v19 = vld [vmem:[#allocation43_spill] sm:$0xff] }
 0x28d   :  { %8325 = vmatprep.subr.bf16.mxu1 %v10955_v50  ;;  %8425 = vmatprep.subr.bf16.mxu0 %v11252_v62  ;;  %v14820_v50 = vld [vmem:[#allocation34_spill] sm:$0xff] }
 0x290   :  { %8327 = vmatpush1.bf16.msra.mxu1 %v10962_v35  ;;  %8427 = vmatpush3.bf16.msra.mxu0 %v11265_v27 }
 0x291   :  { %8329 = vmatprep.subr.bf16.mxu1 %v10967_v29  ;;  %8429 = vmatprep.subr.bf16.mxu0 %v11276_v41  ;;  %v14811_v41 = vld [vmem:[#allocation25_spill] sm:$0xff] }
 0x294   :  { %8331 = vmatpush1.bf16.msra.mxu1 %v10974_v55  ;;  %8431 = vmatpush3.bf16.msra.mxu0 %v11289_v10 }
 0x295   :  { %8333 = vmatprep.subr.bf16.mxu1 %v11101_v57  ;;  %8432 = vmatprep.subr.bf16.mxu0 %v14788_v4  ;;  %v14823_v57 = vld [vmem:[#allocation45_spill] sm:$0xff] }
 0x298   :  { %8335 = vmatpush1.bf16.msra.mxu1 %v11111_v14  ;;  %v14825_v14 = vld [vmem:[#allocation47_spill] sm:$0xff] }
 0x299   :  { %8337 = vmatprep.subr.bf16.mxu1 %v14806_v22 }
 0x29c   :  { %8339 = vmatpush1.bf16.msra.mxu1 %v14807_v18 }
 0x29d   :  { %8341 = vmatprep.subr.bf16.mxu1 %v14808_v8 }
 0x2a0   :  { %8343 = vmatpush1.bf16.msra.mxu1 %v14809_v32 }
 0x2a1   :  { %8345 = vmatprep.subr.bf16.mxu1 %v14810_v51 }
 0x2a4   :  { %8347 = vmatpush1.bf16.msra.mxu1 %v14811_v41 }
 0x2a5   :  { %8349 = vmatprep.subr.bf16.mxu1 %v14812_v60 }
 0x2a8   :  { %8351 = vmatpush1.bf16.msra.mxu1 %v14813_v40 }
 0x2a9   :  { %8353 = vmatprep.subr.bf16.mxu1 %v14814_v30 }
 0x2ac   :  { %8355 = vmatpush1.bf16.msra.mxu1 %v14815_v38 }
 0x2ad   :  { %8357 = vmatprep.subr.bf16.mxu1 %v14816_v0 }
 0x2b0   :  { %8359 = vmatpush1.bf16.msra.mxu1 %v14817_v56 }
 0x2b1   :  { %8361 = vmatprep.subr.bf16.mxu1 %v14818_v61 }
 0x2b4   :  { %8363 = vmatpush1.bf16.msra.mxu1 %v14819_v11 }
 0x2b5   :  { %8365 = vmatprep.subr.bf16.mxu1 %v14820_v50 }
 0x2c4   :  { %v9296_v35 = vpop.permute.xlu1 %9295 }
 0x2c5   :  { %v9298_v29 = vunpack.i.h.bf16 %v9296_v35  ;;  %v9297_v55 = vunpack.i.l.bf16 %v9296_v35 }
 0x2c7   :  { %v1569_v27 = vsel %vm14678_vm2, %v9297_v55, %v9298_v29 }
 0x2c8   :  { %v1560_v10 = vpop.permute.xlu1 %1559  ;;  %1640 = vmatprep.mubr.f32.mxu1 %v1569_v27  ;;  %1782 = vmatprep.mubr.f32.mxu0 %v1569_v27 }
 0x2c9   :  { %v1568_v31 = vsel %vm14678_vm2, %v1560_v10, %v9297_v55  ;;  %v14829_v55 = vmov 34  }
 0x2ca   :  { %1641 = vmatmul.mubr.f32.vlgmr.msra.gmra.mrb[10].mxu1 %v1568_v31  ;;  %1783 = vmatmul.mubr.f32.vlgmr.msra.gmra.mrb[4].mxu0 %v1568_v31 }
 0x2cb   :  { %8367 = vmatpush1.bf16.msra.mxu1 %v11347_v24  ;;  %8434 = vmatpush1.bf16.msra.mxu0 %v11355_v1 }
 0x2cc   :  { %v1566_v62 = vpop.permute.xlu1 %1565  ;;  %8369 = vmatprep.subr.bf16.mxu1 %v11368_v34  ;;  %8435 = vmatprep.subr.bf16.mxu0 %v14788_v4 }
 0x2cd   :  { %7531 = vmatprep.mubr.msk.f32.mxu1 %vm1244_vm1, %v1566_v62  ;;  %7533 = vmatprep.mubr.msk.f32.mxu0 %vm1244_vm1, %v1566_v62  ;;  %v1570_v16 = vsel %vm14678_vm2, %v9298_v29, %v1566_v62  ;;  %v11703_v29 = vld [vmem:[%s14575_s1 + $0x28] sm:$0xff] }
 0x2cf   :  { %8371 = vmatpush1.bf16.msra.mxu1 %v11382_v46  ;;  %8437 = vmatpush1.bf16.msra.mxu0 %v11387_v13 }
 0x2d0   :  { %8373 = vmatprep.subr.bf16.mxu1 %v11395_v33  ;;  %8438 = vmatprep.subr.bf16.mxu0 %v14788_v4 }
 0x2d3   :  { %8375 = vmatpush1.bf16.msra.mxu1 %v11406_v53  ;;  %8440 = vmatpush1.bf16.msra.mxu0 %v11411_v49 }
 0x2d4   :  { %8377 = vmatprep.subr.bf16.mxu1 %v11419_v52  ;;  %8441 = vmatprep.subr.bf16.mxu0 %v14788_v4 }
 0x2d7   :  { %8379 = vmatpush1.bf16.msra.mxu1 %v11430_v37  ;;  %8443 = vmatpush1.bf16.msra.mxu0 %v11435_v7 }
 0x2d8   :  { %8381 = vmatprep.subr.bf16.mxu1 %v11443_v47  ;;  %8444 = vmatprep.subr.bf16.mxu0 %v14788_v4 }
 0x2db   :  { %8383 = vmatpush1.bf16.msra.mxu1 %v11451_v21  ;;  %8446 = vmatpush1.bf16.msra.mxu0 %v11456_v20 }
 0x2dc   :  { %8385 = vmatprep.subr.bf16.mxu1 %v11463_v42  ;;  %8447 = vmatprep.subr.bf16.mxu0 %v14788_v4 }
 0x2df   :  { %8387 = vmatpush1.bf16.msra.mxu1 %v11472_v59  ;;  %8449 = vmatpush1.bf16.msra.mxu0 %v14821_v19 }
 0x2e0   :  { %8389 = vmatprep.subr.bf16.mxu1 %v14822_v39  ;;  %8450 = vmatprep.subr.bf16.mxu0 %v14788_v4 }
 0x2e3   :  { %8391 = vmatpush1.bf16.msra.mxu1 %v14823_v57  ;;  %8452 = vmatpush1.bf16.msra.mxu0 %v14824_v5 }
 0x2e4   :  { %8393 = vmatprep.subr.bf16.mxu1 %v14825_v14  ;;  %8453 = vmatprep.subr.bf16.mxu0 %v14788_v4 }
 0x2e7   :  { %8395 = vmatpush1.bf16.msra.mxu1 %v14826_v6  ;;  %8455 = vmatpush1.bf16.msra.mxu0 %v14827_v43 }
 0x2e8   :  { %8397 = vmatprep.subr.bf16.mxu1 %v14828_v54  ;;  %8456 = vmatprep.subr.bf16.mxu0 %v14788_v4 }
 0x2eb   :  { %8399 = vmatpush1.bf16.msra.mxu1 %v11537_v12  ;;  %8458 = vmatpush1.bf16.msra.mxu0 %v11542_v9 }
 0x2ec   :  { %7529 = vmatprep.subr.msk.mxu1 %vm701_vm11, %v321_v48  ;;  %1824 = vmatprep.subr.mxu0 %v14805_v17 }
 0x2ef   :  { %7530 = vmatpush1.msk.msra.mxu1 %vm701_vm11, %v320_v44  ;;  %7532 = vmatpush1.msk.msra.mxu0 %vm701_vm11, %v322_v63 }
 0x2f0   :  { %1712 = vmatmul.mubr.f32.vlgmr.msra.gmra.mrb[10].mxu1 %v1570_v16  ;;  %1853 = vmatmul.mubr.f32.vlgmr.msra.gmra.mrb[6].mxu0 %v1570_v16 }
 0x2f1   :  { %2050 = vmatprep.mubr.f32.mxu0 %v14805_v17  ;;  %8467 = vmatprep.subr.bf16.mxu1 %v14788_v4 }
 0x2f2   :  { %7941 = vmatprep.mubr.msk.f32.mxu1 %vm14674_vm5, %v14805_v17 }
 0x323   :  { %v7701_v36 = vpop.f32.mrb[6].mxu1 }
 0x324   :  { %v7702_v26 = vpop.f32.mrb[7].mxu1 }
 0x325   :  { %v7703_v3 = vadd.f32 %v7702_v26, %v7701_v36 }
 0x349   :  { %v1393_v23 = vpop.f32.mrb[2].mxu0  ;;  %v1534_v44 = vpop.f32.mrb[8].mxu1 }
 0x34a   :  { %v1535_v25 = vadd.f32 %v7703_v3, %v1534_v44  ;;  %v1395_v15 = vpop.f32.mrb[3].mxu0  ;;  %v1536_v9 = vpop.f32.mrb[9].mxu1 }
 0x39d   :  { %v7736_v59 = vpop.f32.mrb[4].mxu0 }
 0x39e   :  { %v7737_v24 = vpop.f32.mrb[5].mxu0 }
 0x39f   :  { %v7738_v1 = vadd.f32 %v7737_v24, %v7736_v59 }
 0x3c3   :  { %v1713_v42 = vpop.f32.mrb[10].mxu1  ;;  %v1854_v20 = vpop.f32.mrb[6].mxu0 }
 0x3c4   :  { %v1855_v34 = vadd.f32 %v7738_v1, %v1854_v20  ;;  %v1715_v21 = vpop.f32.mrb[11].mxu1  ;;  %v1856_v46 = vpop.f32.mrb[7].mxu0 }
 0x3c5   :  { %1862 = vrot.lane.b32.xlu1 %v1715_v21, %s10452_s3 }
 0x3c9   :  { %1868 = vrot.lane.b32.xlu1 %v1855_v34, %s10452_s3 }
 0x3cd   :  { %1542 = vrot.lane.b32.xlu1 %v1395_v15, %s10452_s3 }
 0x3d1   :  { %1549 = vrot.lane.b32.xlu1 %v1535_v25, %s10452_s3 }
 0x3d5   :  { %1860 = vrot.lane.b32.xlu1 %v1713_v42, %s10452_s3 }
 0x3d9   :  { %1540 = vrot.lane.b32.xlu1 %v1393_v23, %s10452_s3 }
 0x437   :  { %v1863_v13 = vpop.permute.xlu1 %1862 }
 0x43b   :  { %v1869_v33 = vpop.permute.xlu1 %1868 }
 0x43c   :  { %v1870_v53 = vsel %vm14677_vm4, %v1863_v13, %v1869_v33 }
 0x43d   :  { %v1872_v49 = vmax.f32 %v1715_v21, %v1870_v53 }
 0x43f   :  { %1874 = vrot.lane.b32.xlu0 %v1872_v49, %s10453_s22  ;;  %v1543_v52 = vpop.permute.xlu1 %1542  ;;  %v11721_v49 = vld [vmem:[%s14575_s1 + $0x18] sm:$0xff] }
 0x443   :  { %v1550_v37 = vpop.permute.xlu1 %1549 }
 0x444   :  { %v1551_v7 = vsel %vm14677_vm4, %v1543_v52, %v1550_v37 }
 0x445   :  { %v1553_v47 = vmax.f32 %v1395_v15, %v1551_v7 }
 0x447   :  { %1555 = vrot.lane.b32.xlu0 %v1553_v47, %s10453_s22  ;;  %v1861_v28 = vpop.permute.xlu1 %1860 }
 0x448   :  { %v1864_v63 = vsel %vm14677_vm4, %v1861_v28, %v1863_v13 }
 0x449   :  { %v1866_v48 = vmax.f32 %v1713_v42, %v1864_v63 }
 0x44b   :  { %v1541_v22 = vpop.permute.xlu1 %1540 }
 0x44c   :  { %v1545_v18 = vsel %vm14677_vm4, %v1541_v22, %v1543_v52 }
 0x44d   :  { %v1547_v32 = vmax.f32 %v1393_v23, %v1545_v18  ;;  %v1973_v18 = vrot.slane %v11721_v49, 4  ;;  %v31_v49 = vld [vmem:[%s14575_s1 + $0x58] sm:$0xff] }
 0x4b1   :  { %v1875_v45 = vpop.permute.xlu0 %1874 }
 0x4b2   :  { %v1877_v12 = vmax.f32 %v1866_v48, %v1875_v45 }
 0x4b4   :  { %1879 = vrot.lane.b32.xlu1 %v1877_v12, %s10454_s30  ;;  %v10434_v12 = vld [vmem:[%s14575_s1] sm:$0xff] }
 0x4b5   :  { %v1972_v22 = vrot.slane %v10434_v12, 4  ;;  %v14840_v12 = vld [vmem:[#allocation36_spill] sm:$0xff] }
 0x4b9   :  { %v1556_v8 = vpop.permute.xlu0 %1555 }
 0x4ba   :  { %v1558_v51 = vmax.f32 %v1547_v32, %v1556_v8 }
 0x526   :  { %v1880_v41 = vpop.permute.xlu1 %1879 }
 0x527   :  { %1887 = vrot.lane.b32.xlu1 %v1880_v41, %s10455_s8  ;;  %v1883_v60 = vsel %vm1882_vm0, %v1558_v51, %v1880_v41  ;;  %v1974_v51 = vsel %vm685_vm8, %v1972_v22, %v1973_v18  ;;  %v2111_v22 = vrot.slane %v14840_v12, 4 }
 0x528   :  { %1885 = vrot.lane.b32.xlu0 %v1883_v60, %s10455_s8 }
 0x599   :  { %v1888_v40 = vpop.permute.xlu1 %1887 }
 0x59a   :  { %v1886_v30 = vpop.permute.xlu0 %1885 }
 0x59b   :  { %v1890_v38 = vsel %vm1889_vm12, %v1886_v30, %v1888_v40  ;;  %v1893_v0 = vsel %vm1889_vm12, 0.0, %v1886_v30  ;;  %v11748_v40 = vld [vmem:[%s14577_s2] sm:$0xff]  ;;  %v14832_v30 = vld [vmem:[#allocation3_spill] sm:$0xff]  ;;  %s10467_s2 = smov 118  }
 0x59c   :  { %v1895_v56 = vsel %vm1894_vm14, %v1890_v38, 0.0  ;;  %v1898_v61 = vrot.slane %v1893_v0, 4  ;;  %v2060_v38 = vrot.slane %v11748_v40, %v14832_v30 }
 0x59d   :  { %v9299_v11 = vpack.i.bf16 %v1895_v56, %v1893_v0  ;;  %v1899_v50 = vrot.slane %v1895_v56, 4 }
 0x59f   :  { %9300 = vrot.lane.b32.xlu1 %v9299_v11, %s10436_s0  ;;  %v9314_v35 = vpack.i.bf16 %v1899_v50, %v1898_v61  ;;  %v14835_v50 = vld [vmem:[#allocation7_spill] sm:$0xff] }
 0x5a1   :  { %9315 = vrot.lane.b32.xlu0 %v9314_v35, %s10437_s23 }
 0x5a3   :  { %9305 = vrot.lane.b32.xlu1 %v9299_v11, %s10456_s9 }
 0x5a5   :  { %9320 = vrot.lane.b32.xlu0 %v9314_v35, %s10457_s10 }
 0x5a7   :  { %9310 = vrot.lane.b32.xlu1 %v9299_v11, %s10451_s7 }
 0x5a9   :  { %9325 = vrot.lane.b32.xlu0 %v9314_v35, %s10458_s11 }
 0x5ab   :  { %1953 = vrot.lane.b32.xlu1 %v1893_v0, %s10459_s12 }
 0x5ad   :  { %9330 = vrot.lane.b32.xlu0 %v9314_v35, %s10460_s15  ;;  %v1975_v35 = vrot.slane %v14835_v50, 4 }
 0x5af   :  { %1969 = vperm.xlu1 %9334, %v11703_v29  }
 0x5b1   :  { %1955 = vrot.lane.b32.xlu0 %v1895_v56, %s10459_s12 }
 0x5b3   :  { %9336 = vset.pattern.permute.xlu1 %v14829_v55 }
 0x611   :  { %v9301_v27 = vpop.permute.xlu1 %9300 }
 0x612   :  { %v9303_v39 = vunpack.i.h.bf16 %v9301_v27  ;;  %v9302_v57 = vunpack.i.l.bf16 %v9301_v27  ;;  %v11758_v27 = vrot.slane %v2060_v38, %v14832_v30 }
 0x613   :  { %v9316_v10 = vpop.permute.xlu0 %9315 }
 0x614   :  { %v9318_v31 = vunpack.i.h.bf16 %v9316_v10  ;;  %v9317_v62 = vunpack.i.l.bf16 %v9316_v10  ;;  %v1911_v54 = vsel %vm14831_vm10, %v9302_v57, %v9303_v39  ;;  %vm14684_vm10 = vcmask 949248  }
 0x615   :  { %v9306_v19 = vpop.permute.xlu1 %9305 }
 0x616   :  { %v1904_v14 = vsel %vm14830_vm13, %v9317_v62, %v9318_v31  ;;  %v1960_v36 = vsel %vm685_vm8, %v1895_v56, %v9318_v31  ;;  %v9308_v1 = vunpack.i.h.bf16 %v9306_v19  ;;  %v9307_v42 = vunpack.i.l.bf16 %v9306_v19  ;;  %v14833_v56 = vld [vmem:[#allocation2_spill] sm:$0xff] }
 0x617   :  { %v9321_v5 = vpop.permute.xlu0 %9320  ;;  %v1959_v25 = vsel %vm685_vm8, %v1893_v0, %v1904_v14  ;;  %vm14683_vm13 = vcmask 941056   ;;  %v14834_v61 = vsub.s32 5, %v14833_v56 }
 0x618   :  { %v9323_v6 = vunpack.i.h.bf16 %v9321_v5  ;;  %v9322_v43 = vunpack.i.l.bf16 %v9321_v5  ;;  %v1927_v53 = vsel %vm14684_vm10, %v9307_v42, %v9308_v1 }
 0x619   :  { %v9311_v3 = vpop.permute.xlu1 %9310  ;;  %v2064_v11 = vrot.slane %v11748_v40, %v14834_v61 }
 0x61a   :  { %v1919_v16 = vsel %vm1918_vm9, %v9322_v43, %v9323_v6  ;;  %v1962_v26 = vsel %vm685_vm8, %v9303_v39, %v9323_v6  ;;  %v9313_v20 = vunpack.i.h.bf16 %v9311_v3  ;;  %v9312_v34 = vunpack.i.l.bf16 %v9311_v3 }
 0x61b   :  { %v9326_v23 = vpop.permute.xlu0 %9325  ;;  %v8459_v44 = vpack.c.bf16 %v1962_v26, %v1960_v36  ;;  %v1961_v15 = vsel %vm685_vm8, %v1911_v54, %v1919_v16  ;;  %v11764_v62 = vrot.slane %v2064_v11, %v14832_v30  ;;  %v14836_v3 = vmov 32  }
 0x61c   :  { %v9328_v9 = vunpack.i.h.bf16 %v9326_v23  ;;  %v9327_v59 = vunpack.i.l.bf16 %v9326_v23  ;;  %v8461_v24 = vpack.c.bf16 %v1961_v15, %v1959_v25  ;;  %v1942_v52 = vsel %vm14678_vm2, %v9312_v34, %v9313_v20  ;;  %v7633_v23 = vld [vmem:[%s14578_s5] sm:$0xff]   ;;  %v7662_v25 = vld [vmem:[%s14578_s5 + $0x18] sm:$0xff]  }
 0x61d   :  { %8460 = vmatprep.subr.bf16.mxu0 %v8459_v44  ;;  %v1954_v32 = vpop.permute.xlu1 %1953  ;;  %8469 = vmatpush3.bf16.msra.mxu1 %v7633_v23  ;;  %v7660_v44 = vld [vmem:[%s14578_s5 + $0x8] sm:$0xff]   ;;  %v11794_v15 = vld [vmem:[%s14578_s5 + $0x20] sm:$0xff]   ;;  %vm14685_vm2 = vcmask 588800  }
 0x61e   :  { %8462 = vmatpush1.bf16.msra.mxu0 %v8461_v24  ;;  %v1935_v46 = vsel %vm14683_vm13, %v9327_v59, %v9328_v9  ;;  %v1964_v7 = vsel %vm685_vm8, %v9308_v1, %v9328_v9  ;;  %8470 = vmatprep.subr.bf16.mxu1 %v14788_v4  ;;  %v11798_v9 = vunpack.c.l.bf16 %v11794_v15  ;;  %vm14842_vm13 = vmmov 1  }
 0x61f   :  { %v9331_v21 = vpop.permute.xlu0 %9330  ;;  %v1963_v63 = vsel %vm685_vm8, %v1927_v53, %v1935_v46 }
 0x620   :  { %v9333_v13 = vunpack.i.h.bf16 %v9331_v21  ;;  %v9332_v33 = vunpack.i.l.bf16 %v9331_v21 }
 0x621   :  { %8472 = vmatpush3.bf16.msra.mxu1 %v7660_v44 }
 0x622   :  { %v1950_v37 = vsel %vm14672_vm6, %v9332_v33, %v9333_v13  ;;  %v1966_v47 = vsel %vm685_vm8, %v9313_v20, %v9333_v13  ;;  %vm14673_vm6 = vcmask 293888   ;;  %8473 = vmatprep.subr.bf16.mxu1 %v14788_v4 }
 0x623   :  { %v8463_v28 = vpack.c.bf16 %v1966_v47, %v1964_v7  ;;  %v1965_v48 = vsel %vm685_vm8, %v1942_v52, %v1950_v37  ;;  %v1956_v8 = vpop.permute.xlu0 %1955 }
 0x624   :  { %v8465_v45 = vpack.c.bf16 %v1965_v48, %v1963_v63  ;;  %v1958_v41 = vsel %vm14676_vm7, %v1954_v32, %v1956_v8 }
 0x625   :  { %8464 = vmatprep.subr.bf16.mxu0 %v8463_v28  ;;  %v14839_v28 = vld [vmem:[#allocation35_spill] sm:$0xff] }
 0x626   :  { %8466 = vmatpush1.bf16.msra.mxu0 %v8465_v45  ;;  %v2102_v63 = vrot.slane %v14839_v28, 4 }
 0x627   :  { %7534 = vmatprep.subr.msk.mxu0 %vm685_vm8, %v1956_v8 }
 0x62a   :  { %7535 = vmatpush1.msk.msra.mxu0 %vm685_vm8, %v1958_v41 }
 0x62b   :  { %7536 = vmatmul.mubr.msk.f32.vlgmr.msra.gmra.mrb[8].mxu0 %vm14673_vm6, %v1974_v51  ;;  %8479 = vmatprep.subr.bf16.mxu0 %v14788_v4  ;;  %vm2077_vm6 = vcmask 31744  }
 0x62c   :  { %7962 = vmatprep.mubr.msk.f32.mxu0 %vm14674_vm5, %v14805_v17  ;;  %8481 = vmatpush3.bf16.msra.mxu0 %v7633_v23  ;;  %vm14837_vm5 = vcmask 1041408  }
 0x62d   :  { %8482 = vmatprep.subr.bf16.mxu0 %v14788_v4  ;;  %vm14838_vm7 = vmmov %vm14837_vm5 }
 0x62e   :  { %v11743_v60 = vpop.permute.xlu1 %1969 }
 0x62f   :  { %v1976_v0 = vrot.slane %v11743_v60, 4 }
 0x630   :  { %8484 = vmatpush3.bf16.msra.mxu0 %v7660_v44 }
 0x631   :  { %v1977_v10 = vsel %vm685_vm8, %v1975_v35, %v1976_v0  ;;  %8485 = vmatprep.subr.bf16.mxu0 %v14788_v4 }
 0x6fe   :  { %v2052_v31 = vpop.f32.mrb[8].mxu0 }
 0x6ff   :  { %v2053_v19 = vadd.f32 %v2052_v31, %v1977_v10  ;;  %v2054_v39 = vpop.f32.mrb[9].mxu0 }
 0x700   :  { %v2055_v57 = vadd.f32 %v2054_v39, %v1977_v10 }
 0x701   :  { %v2075_v5 = vmul.f32 %v11758_v27, %v2053_v19 }
 0x702   :  { %v2076_v14 = vmul.f32 %v11764_v62, %v2055_v57 }
 0x703   :  { %v2082_v16 = vmul.f32 %v2075_v5, %v2053_v19 }
 0x704   :  { %v2078_v6 = vsel %vm2077_vm6, %v2076_v14, 0.0  ;;  %v2083_v43 = vmul.f32 %v2076_v14, %v2055_v57 }
 0x705   :  { %v2079_v54 = vadd.f32 %v2078_v6, %v2075_v5 }
 0x706   :  { %v2084_v36 = vsel %vm2077_vm6, %v2083_v43, 0.0 }
 0x707   :  { %2080 = vadd.xlane.f32.xlu0 %v2079_v54  ;;  %v2085_v26 = vadd.f32 %v2084_v36, %v2082_v16 }
 0x709   :  { %2086 = vadd.xlane.f32.xlu1 %v2085_v26 }
 0x71a   :  { %2109 = vperm.xlu1 %9336, %v11703_v29  }
 0x71d   :  { %2100 = vperm.xlu0 %9335, %v11703_v29   ;;  %v7661_v29 = vld [vmem:[%s14578_s5 + $0x10] sm:$0xff]  }
 0x71e   :  { %9337 = vset.pattern.permute.xlu1 %v14836_v3  ;;  %8475 = vmatpush3.bf16.msra.mxu1 %v7661_v29 }
 0x71f   :  { %8487 = vmatpush3.bf16.msra.mxu0 %v7661_v29  ;;  %8476 = vmatprep.subr.bf16.mxu1 %v14788_v4 }
 0x720   :  { %8488 = vmatprep.subr.bf16.mxu0 %v14788_v4 }
 0x721   :  { %9338 = vset.pattern.permute.xlu0 %v14836_v3 }
 0x722   :  { %8478 = vmatpush3.bf16.msra.mxu1 %v7662_v25 }
 0x723   :  { %8490 = vmatpush3.bf16.msra.mxu0 %v7662_v25  ;;  %7939 = vmatprep.subr.mxu1 %v14805_v17 }
 0x724   :  { %7960 = vmatprep.subr.mxu0 %v14805_v17 }
 0x726   :  { %7940 = vmatpush3.msk.msra.mxu1 %vm14837_vm5, %v11798_v9 }
 0x727   :  { %7961 = vmatpush3.msk.msra.mxu0 %vm14838_vm7, %v11798_v9 }
 0x794   :  { %v2081_v59 = vpop.xlane.xlu0 %2080 }
 0x795   :  { %v2088_v24 = vmul.f32 0.013888889, %v2081_v59 }
 0x796   :  { %v2087_v1 = vpop.xlane.xlu1 %2086 }
 0x797   :  { %v2089_v42 = vmul.f32 0.013888889, %v2087_v1  ;;  %v2090_v20 = vmul.f32 %v2088_v24, %v2088_v24  ;;  %v2093_v52 = vsub.f32 %v2053_v19, %v2088_v24  ;;  %v2094_v37 = vsub.f32 %v2055_v57, %v2088_v24 }
 0x799   :  { %v2091_v34 = vsub.f32 %v2089_v42, %v2090_v20 }
 0x79a   :  { %v11808_v33 = vpop.permute.xlu1 %2109 }
 0x79b   :  { %v2092_v21 = vmax.f32 %v2091_v34, 0.0  ;;  %v2112_v47 = vrot.slane %v11808_v33, 4 }
 0x79c   :  { %v11806_v13 = vpop.permute.xlu0 %2100 }
 0x79d   :  { %v2095_v46 = vadd.f32 1e-05, %v2092_v21  ;;  %v2103_v53 = vrot.slane %v11806_v13, 4  ;;  %v2113_v41 = vsel %vm685_vm8, %v2111_v22, %v2112_v47  ;;  %v27_v21 = vld [vmem:[%s14575_s1 + $0x30] sm:$0xff] }
 0x79f   :  { %10402 = vrsqrt.f32 %v2095_v46  ;;  %v2104_v8 = vsel %vm685_vm8, %v2102_v63, %v2103_v53  ;;  %v2357_v46 = vrot.slane %v27_v21, 4 }
 0x7a9   :  { %v10403_v7 = vpop.eup %10402 }
 0x7aa   :  { %v2097_v48 = vmul.f32 %v10403_v7, %v2093_v52  ;;  %v2098_v45 = vmul.f32 %v10403_v7, %v2094_v37  ;;  %v2358_v52 = vsel %vm685_vm8, %v1973_v18, %v2357_v46  ;;  %v28_v37 = vld [vmem:[%s14575_s1 + $0x40] sm:$0xff]  ;;  %v14841_v7 = vmov 33  }
 0x7ac   :  { %v2106_v32 = vmul.f32 %v2104_v8, %v2097_v48  ;;  %v2107_v51 = vmul.f32 %v2104_v8, %v2098_v45 }
 0x7ae   :  { %v2115_v30 = vadd.f32 %v2113_v41, %v2106_v32  ;;  %v2116_v38 = vadd.f32 %v2113_v41, %v2107_v51  ;;  %v11872_v51 = vld [vmem:[%s14575_s1 + $0x48] sm:$0xff] }
 0x7b0   :  { %vm2117_vm7 = vcmp.ge.f32.partialorder %v2115_v30, 0.0  ;;  %v2119_v61 = vmul.f32 0.1, %v2115_v30  ;;  %vm2118_vm5 = vcmp.ge.f32.partialorder %v2116_v38, 0.0  ;;  %v2120_v11 = vmul.f32 0.1, %v2116_v38 }
 0x7b2   :  { %v2121_v50 = vsel %vm2117_vm7, %v2115_v30, %v2119_v61  ;;  %v2122_v35 = vsel %vm2118_vm5, %v2116_v38, %v2120_v11  ;;  %vm2312_vm7 = vcmask 162816   ;;  %vm2318_vm5 = vcmask 48128  }
 0x7b3   :  { %v11821_v10 = vmul.f32 %v2121_v50, %v11758_v27  ;;  %v11824_v31 = vmul.f32 %v2122_v35, %v11764_v62  ;;  %v2359_v38 = vrot.slane %v11872_v51, 4 }
 0x7b5   :  { %2221 = vrot.lane.b32.xlu1 %v11821_v10, %s10452_s3  ;;  %7942 = vmatmul.mubr.msk.f32.vlgmr.msra.gmra.mrb[12].mxu1 %vm1882_vm0, %v11821_v10  ;;  %v9717_v19 = vpack.i.bf16 %v11824_v31, %v11821_v10  ;;  %v2360_v11 = vsel %vm685_vm8, %v2357_v46, %v2359_v38 }
 0x7b6   :  { %7983 = vmatprep.mubr.msk.f32.mxu1 %vm14685_vm2, %v2358_v52 }
 0x7b9   :  { %2223 = vrot.lane.b32.xlu1 %v11824_v31, %s10452_s3 }
 0x827   :  { %v2222_v39 = vpop.permute.xlu1 %2221 }
 0x82b   :  { %v2224_v57 = vpop.permute.xlu1 %2223 }
 0x82c   :  { %v2225_v5 = vsel %vm14677_vm4, %v2222_v39, %v2224_v57  ;;  %vm2320_vm4 = vcmask 375808  }
 0x82d   :  { %7963 = vmatmul.mubr.msk.f32.vlgmr.msra.gmra.mrb[10].mxu0 %vm1882_vm0, %v2225_v5  ;;  %vm8492_vm10 = vmpackc.low %vm14842_vm13, %vm2320_vm4 }
 0x888   :  { %v2207_v14 = vpop.f32.mrb[12].mxu1 }
 0x889   :  { %v7943_v6 = vpop.f32.mrb[13].mxu1 }
 0x900   :  { %v2294_v43 = vpop.f32.mrb[10].mxu0 }
 0x901   :  { %2299 = vrot.lane.b32.xlu1 %v2294_v43, %s10461_s13  ;;  %v7964_v54 = vpop.f32.mrb[11].mxu0 }
 0x905   :  { %2212 = vrot.lane.b32.xlu1 %v2207_v14, %s10461_s13 }
 0x973   :  { %v2300_v16 = vpop.permute.xlu1 %2299 }
 0x974   :  { %v2302_v36 = vmax.f32 %v2294_v43, %v2300_v16 }
 0x976   :  { %2304 = vrot.lane.b32.xlu1 %v2302_v36, %s10462_s14 }
 0x977   :  { %v2213_v26 = vpop.permute.xlu1 %2212 }
 0x978   :  { %v2215_v23 = vmax.f32 %v2207_v14, %v2213_v26  ;;  %v14843_v14 = vsub.s32 2, %v14833_v56 }
 0x97a   :  { %2217 = vrot.lane.b32.xlu0 %v2215_v23, %s10462_s14  ;;  %s10468_s14 = smov 121   ;;  %v11889_v6 = vrot.slane %v11748_v40, %v14843_v14 }
 0x9e8   :  { %v2305_v44 = vpop.permute.xlu1 %2304 }
 0x9e9   :  { %v2307_v29 = vmax.f32 %v2302_v36, %v2305_v44 }
 0x9eb   :  { %2309 = vrot.lane.b32.xlu1 %v2307_v29, %s10463_s16 }
 0x9ec   :  { %v2218_v25 = vpop.permute.xlu0 %2217 }
 0x9ed   :  { %v2220_v59 = vmax.f32 %v2215_v23, %v2218_v25 }
 0xa5d   :  { %v2310_v24 = vpop.permute.xlu1 %2309 }
 0xa5e   :  { %v2313_v1 = vsel %vm2312_vm7, %v2220_v59, %v2310_v24 }
 0xa5f   :  { %2315 = vrot.lane.b32.xlu0 %v2313_v1, %s10464_s17  ;;  %v7651_v1 = vunpack.c.h.bf16 %v11794_v15 }
 0xa61   :  { %v2537_v21 = vrot.slane %v7651_v1, 2 }
 0xad1   :  { %v2316_v42 = vpop.permute.xlu0 %2315 }
 0xad2   :  { %v2319_v20 = vsel %vm2318_vm5, 0.0, %v2316_v42  ;;  %v11914_v42 = vld [vmem:[%s14578_s5 + $0x28] sm:$0xff]  }
 0xad3   :  { %v2321_v34 = vsel %vm2320_vm4, %v2319_v20, 0.0 }
 0xad4   :  { %2326 = vrot.lane.b32.xlu0 %v2321_v34, %s10436_s0  ;;  %2323 = vrot.lane.b32.xlu1 %v2321_v34, %s10437_s23 }
 0xad8   :  { %2332 = vrot.lane.b32.xlu0 %v2321_v34, %s10465_s18  ;;  %2329 = vrot.lane.b32.xlu1 %v2321_v34, %s10466_s19 }
 0xadc   :  { %2338 = vrot.lane.b32.xlu0 %v2321_v34, %s10467_s2  ;;  %2335 = vrot.lane.b32.xlu1 %v2321_v34, %s10468_s14 }
 0xae0   :  { %2344 = vrot.lane.b32.xlu0 %v2321_v34, %s10456_s9  ;;  %2341 = vrot.lane.b32.xlu1 %v2321_v34, %s10457_s10  ;;  %v7654_v34 = vunpack.c.l.bf16 %v11914_v42 }
 0xae2   :  { %v11920_v46 = vrot.slane %v7654_v34, 2 }
 0xae4   :  { %2349 = vperm.xlu1 %9337, %v28_v37   ;;  %2353 = vperm.xlu0 %9338, %v31_v49  }
 0xae8   :  { %9339 = vset.pattern.permute.xlu1 %v14841_v7  ;;  %9340 = vset.pattern.permute.xlu0 %v14841_v7 }
 0xae9   :  { %2487 = vperm.xlu1 %9339, %v28_v37  }
 0xaed   :  { %9341 = vset.pattern.permute.xlu1 %v14829_v55 }
 0xb46   :  { %v2327_v18 = vpop.permute.xlu0 %2326  ;;  %v2324_v28 = vpop.permute.xlu1 %2323 }
 0xb47   :  { %v8491_v63 = vpack.c.bf16 %v2324_v28, %v2319_v20  ;;  %v2536_v20 = vrot.slane %v11798_v9, 2 }
 0xb49   :  { %8493 = vmatprep.subr.msk.bf16.mxu1 %vm8492_vm10, %v8491_v63  ;;  %v2538_v52 = vsel %vm701_vm11, %v2536_v20, %v2537_v21 }
 0xb4a   :  { %v2333_v48 = vpop.permute.xlu0 %2332  ;;  %8496 = vmatpush3.bf16.msk.msra.mxu1 %vm8492_vm10, %v8491_v63  ;;  %v2330_v45 = vpop.permute.xlu1 %2329  ;;  %vm2453_vm10 = vcmask 326656  }
 0xb4b   :  { %v8497_v12 = vpack.c.bf16 %v2330_v45, %v2327_v18 }
 0xb4d   :  { %8498 = vmatprep.subr.bf16.mxu1 %v8497_v12 }
 0xb4e   :  { %8500 = vmatpush3.bf16.msra.mxu1 %v8497_v12  ;;  %v2336_v22 = vpop.permute.xlu1 %2335  ;;  %v2339_v32 = vpop.permute.xlu0 %2338 }
 0xb4f   :  { %v8501_v8 = vpack.c.bf16 %v2336_v22, %v2333_v48 }
 0xb51   :  { %8502 = vmatprep.subr.bf16.mxu1 %v8501_v8 }
 0xb52   :  { %8504 = vmatpush3.bf16.msra.mxu1 %v8501_v8  ;;  %v2342_v41 = vpop.permute.xlu1 %2341  ;;  %v2345_v61 = vpop.permute.xlu0 %2344 }
 0xb53   :  { %v8505_v30 = vpack.c.bf16 %v2342_v41, %v2339_v32 }
 0xb55   :  { %8506 = vmatprep.subr.bf16.mxu1 %v8505_v30 }
 0xb56   :  { %8508 = vmatpush3.bf16.msra.mxu1 %v8505_v30 }
 0xb57   :  { %7981 = vmatprep.subr.mxu1 %v2345_v61 }
 0xb5a   :  { %7982 = vmatpush3.msra.mxu1 %v2345_v61 }
 0xb5b   :  { %7984 = vmatmul.mubr.msk.f32.vlgmr.msra.gmra.mrb[14].mxu1 %vm14685_vm2, %v2360_v11  ;;  %8517 = vmatprep.subr.bf16.mxu1 %v14788_v4 }
 0xb63   :  { %v11880_v50 = vpop.permute.xlu0 %2353  ;;  %v2350_v35 = vpop.permute.xlu1 %2349 }
 0xb64   :  { %v2363_v39 = vrot.slane %v11880_v50, 4  ;;  %v2361_v57 = vrot.slane %v2350_v35, 4 }
 0xb66   :  { %v2364_v5 = vsel %vm685_vm8, %v2361_v57, %v2363_v39  ;;  %v2362_v16 = vsel %vm685_vm8, %v1976_v0, %v2361_v57 }
 0xb68   :  { %v2488_v48 = vpop.permute.xlu1 %2487 }
 0xc2e   :  { %v7985_v43 = vpop.f32.mrb[14].mxu1 }
 0xc2f   :  { %v11891_v54 = vadd.f32 %v7985_v43, %v2364_v5  ;;  %v2438_v36 = vpop.f32.mrb[15].mxu1 }
 0xc30   :  { %v11896_v26 = vadd.f32 %v2438_v36, %v2362_v16 }
 0xc31   :  { %v2452_v23 = vmul.f32 %v11889_v6, %v11891_v54 }
 0xc32   :  { %v2451_v44 = vmul.f32 %v11889_v6, %v11896_v26 }
 0xc33   :  { %v2457_v29 = vsel %vm2453_vm10, %v2452_v23, 0.0  ;;  %v2461_v25 = vmul.f32 %v2452_v23, %v11891_v54 }
 0xc34   :  { %2458 = vadd.xlane.f32.xlu0 %v2457_v29  ;;  %v2454_v59 = vsel %vm2453_vm10, %v2451_v44, 0.0  ;;  %v2460_v0 = vmul.f32 %v2451_v44, %v11896_v26 }
 0xc35   :  { %2455 = vadd.xlane.f32.xlu1 %v2454_v59  ;;  %v2465_v60 = vsel %vm2453_vm10, %v2461_v25, 0.0  ;;  %v2492_v25 = vrot.slane %v2488_v48, 4 }
 0xc36   :  { %v2462_v24 = vsel %vm2453_vm10, %v2460_v0, 0.0 }
 0xc38   :  { %2466 = vadd.xlane.f32.xlu0 %v2465_v60 }
 0xc46   :  { %2501 = vperm.xlu1 %9341, %v28_v37   ;;  %v2540_v37 = vsel %vm701_vm11, %v2537_v21, %v11920_v46 }
 0xc47   :  { %v8509_v15 = vpack.c.bf16 %v2540_v37, %v2538_v52  ;;  %v2493_v52 = vsel %vm685_vm8, %v2103_v53, %v2492_v25 }
 0xc49   :  { %8510 = vmatprep.subr.bf16.mxu0 %v8509_v15 }
 0xc4a   :  { %8512 = vmatpush3.bf16.msra.mxu0 %v8509_v15 }
 0xc4b   :  { %7990 = vmatprep.subr.msk.mxu0 %vm685_vm8, %v11920_v46 }
 0xc4e   :  { %2490 = vperm.xlu0 %9340, %v31_v49   ;;  %7991 = vmatpush3.msk.msra.mxu0 %vm685_vm8, %v11920_v46 }
 0xc4f   :  { %8514 = vmatprep.subr.bf16.mxu0 %v8509_v15 }
 0xc52   :  { %9412 = vset.pattern.permute.xlu0 %v14836_v3 }
 0xc6a   :  { %2463 = vadd.xlane.f32.xlu1 %v2462_v24 }
 0xc7b   :  { %2504 = vperm.xlu1 %9341, %v31_v49  }
 0xc7f   :  { %9413 = vset.pattern.permute.xlu1 %v14836_v3 }
 0xcc1   :  { %v2459_v9 = vpop.xlane.xlu0 %2458 }
 0xcc2   :  { %v2469_v18 = vmul.f32 0.083333336, %v2459_v9  ;;  %v2456_v12 = vpop.xlane.xlu1 %2455 }
 0xcc3   :  { %v2468_v41 = vmul.f32 0.083333336, %v2456_v12 }
 0xcc4   :  { %v2473_v63 = vmul.f32 %v2469_v18, %v2469_v18  ;;  %v2479_v36 = vsub.f32 %v11891_v54, %v2469_v18 }
 0xcc5   :  { %v2467_v49 = vpop.xlane.xlu0 %2466  ;;  %v2472_v61 = vmul.f32 %v2468_v41, %v2468_v41  ;;  %v2478_v1 = vsub.f32 %v11896_v26, %v2468_v41 }
 0xcc6   :  { %v2471_v28 = vmul.f32 0.083333336, %v2467_v49  ;;  %v2502_v32 = vpop.permute.xlu1 %2501 }
 0xcc7   :  { %v2506_v59 = vrot.slane %v2502_v32, 4 }
 0xcc8   :  { %v2475_v45 = vsub.f32 %v2471_v28, %v2473_v63 }
 0xcc9   :  { %v2507_v49 = vsel %vm685_vm8, %v2112_v47, %v2506_v59 }
 0xcca   :  { %v2477_v22 = vmax.f32 %v2475_v45, 0.0 }
 0xccc   :  { %v2481_v8 = vadd.f32 1e-05, %v2477_v22 }
 0xccd   :  { %v11929_v14 = vpop.permute.xlu0 %2490 }
 0xcce   :  { %10404 = vrsqrt.f32 %v2481_v8  ;;  %v2494_v23 = vrot.slane %v11929_v14, 4 }
 0xcd0   :  { %v2495_v60 = vsel %vm685_vm8, %v2492_v25, %v2494_v23 }
 0xcd8   :  { %v10405_v16 = vpop.eup %10404 }
 0xcd9   :  { %v2485_v29 = vmul.f32 %v10405_v16, %v2479_v36 }
 0xcdb   :  { %v2499_v24 = vmul.f32 %v2495_v60, %v2485_v29 }
 0xcf7   :  { %v2464_v30 = vpop.xlane.xlu1 %2463 }
 0xcf8   :  { %v2470_v11 = vmul.f32 0.083333336, %v2464_v30 }
 0xcfa   :  { %v2474_v35 = vsub.f32 %v2470_v11, %v2472_v61 }
 0xcfb   :  { %v11931_v43 = vpop.permute.xlu1 %2504 }
 0xcfc   :  { %v2476_v57 = vmax.f32 %v2474_v35, 0.0  ;;  %v2508_v44 = vrot.slane %v11931_v43, 4 }
 0xcfe   :  { %v2480_v5 = vadd.f32 1e-05, %v2476_v57  ;;  %v2509_v0 = vsel %vm685_vm8, %v2506_v59, %v2508_v44 }
 0xcff   :  { %v2513_v20 = vadd.f32 %v2509_v0, %v2499_v24 }
 0xd00   :  { %10406 = vrsqrt.f32 %v2480_v5 }
 0xd01   :  { %v2517_v37 = vmul.f32 0.1, %v2513_v20  ;;  %vm2515_vm11 = vcmp.ge.f32.partialorder %v2513_v20, 0.0 }
 0xd03   :  { %v2519_v28 = vsel %vm2515_vm11, %v2513_v20, %v2517_v37  ;;  %vm2978_vm11 = vcmask 146432  }
 0xd04   :  { %v11953_v45 = vmul.f32 %v2519_v28, %v11889_v6 }
 0xd0a   :  { %v10407_v54 = vpop.eup %10406 }
 0xd0b   :  { %v2484_v21 = vmul.f32 %v10407_v54, %v2478_v1 }
 0xd0d   :  { %v2498_v9 = vmul.f32 %v2493_v52, %v2484_v21 }
 0xd0f   :  { %v2512_v18 = vadd.f32 %v2507_v49, %v2498_v9 }
 0xd11   :  { %vm2514_vm2 = vcmp.ge.f32.partialorder %v2512_v18, 0.0  ;;  %v2516_v63 = vmul.f32 0.1, %v2512_v18 }
 0xd13   :  { %v2518_v48 = vsel %vm2514_vm2, %v2512_v18, %v2516_v63  ;;  %vm8519_vm2 = vmpackc.low %vm1244_vm1, %vm1244_vm1 }
 0xd14   :  { %v11950_v26 = vmul.f32 %v2518_v48, %v11889_v6 }
 0xd16   :  { %2644 = vrot.lane.b32.xlu1 %v11950_v26, %s10461_s13  ;;  %7992 = vmatprep.mubr.msk.f32.mxu0 %vm2312_vm7, %v11950_v26  ;;  %v9524_v13 = vpack.i.bf16 %v11953_v45, %v11950_v26 }
 0xd17   :  { %7993 = vmatmul.mubr.msk.f32.vlgmr.msra.gmra.mrb[12].mxu0 %vm2312_vm7, %v11953_v45 }
 0xd18   :  { %8516 = vmatpush3.bf16.msra.mxu0 %v8509_v15 }
 0xd19   :  { %7999 = vmatprep.subr.msk.mxu0 %vm685_vm8, %v11920_v46 }
 0xd1a   :  { %2646 = vrot.lane.b32.xlu1 %v11953_v45, %s10461_s13 }
 0xd1c   :  { %8000 = vmatpush3.msk.msra.mxu0 %vm685_vm8, %v11920_v46 }
 0xd88   :  { %v2645_v33 = vpop.permute.xlu1 %2644 }
 0xd89   :  { %8001 = vmatprep.mubr.msk.f32.mxu0 %vm2312_vm7, %v2645_v33 }
 0xd8c   :  { %v2647_v53 = vpop.permute.xlu1 %2646 }
 0xd8d   :  { %8002 = vmatmul.mubr.msk.f32.vlgmr.msra.gmra.mrb[14].mxu0 %vm2312_vm7, %v2647_v53 }
 0xdea   :  { %v7994_v47 = vpop.f32.mrb[12].mxu0 }
 0xdeb   :  { %v2615_v12 = vpop.f32.mrb[13].mxu0 }
 0xdec   :  { %v9347_v22 = vpack.i.bf16 %v7994_v47, %v2615_v12 }
 0xe60   :  { %v8003_v8 = vpop.f32.mrb[14].mxu0 }
 0xe61   :  { %v2718_v15 = vpop.f32.mrb[15].mxu0 }
 0xe62   :  { %v9342_v32 = vpack.i.bf16 %v8003_v8, %v2718_v15 }
 0xe64   :  { %9343 = vrot.lane.b32.xlu1 %v9342_v32, %s10469_s28 }
 0xe68   :  { %9348 = vrot.lane.b32.xlu1 %v9347_v22, %s10469_s28 }
 0xed6   :  { %v9344_v41 = vpop.permute.xlu1 %9343 }
 0xed7   :  { %v9346_v30 = vunpack.i.h.bf16 %v9344_v41  ;;  %v9345_v46 = vunpack.i.l.bf16 %v9344_v41 }
 0xed9   :  { %v2736_v61 = vmax.f32 %v8003_v8, %v9346_v30  ;;  %v2735_v11 = vmax.f32 %v2718_v15, %v9345_v46  ;;  %v11991_v46 = vld [vmem:[%s14575_s1 + $0x70] sm:$0xff] }
 0xeda   :  { %v9349_v35 = vpop.permute.xlu1 %9348 }
 0xedb   :  { %v9351_v57 = vunpack.i.h.bf16 %v9349_v35  ;;  %v9350_v5 = vunpack.i.l.bf16 %v9349_v35  ;;  %v9352_v16 = vpack.i.bf16 %v2736_v61, %v2735_v11 }
 0xedd   :  { %v2633_v36 = vmax.f32 %v7994_v47, %v9351_v57  ;;  %v2632_v29 = vmax.f32 %v2615_v12, %v9350_v5  ;;  %9353 = vrot.lane.b32.xlu1 %v9352_v16, %s10470_s29  ;;  %v12010_v16 = vld [vmem:[%s14575_s1 + $0x88] sm:$0xff] }
 0xedf   :  { %v9357_v25 = vpack.i.bf16 %v2633_v36, %v2632_v29 }
 0xee1   :  { %9358 = vrot.lane.b32.xlu1 %v9357_v25, %s10470_s29  ;;  %s10473_s29 = smov 125  }
 0xf4f   :  { %v9354_v59 = vpop.permute.xlu1 %9353 }
 0xf50   :  { %v9356_v60 = vunpack.i.h.bf16 %v9354_v59  ;;  %v9355_v0 = vunpack.i.l.bf16 %v9354_v59 }
 0xf52   :  { %v2746_v24 = vmax.f32 %v2736_v61, %v9356_v60  ;;  %v2745_v1 = vmax.f32 %v2735_v11, %v9355_v0  ;;  %v30_v61 = vld [vmem:[%s14575_s1 + $0x50] sm:$0xff]  ;;  %v12000_v11 = vld [vmem:[%s14575_s1 + $0x68] sm:$0xff] }
 0xf53   :  { %v9359_v54 = vpop.permute.xlu1 %9358  ;;  %v2846_v35 = vrot.slane %v30_v61, 4  ;;  %v2847_v57 = vrot.slane %v12000_v11, 4 }
 0xf54   :  { %v9362_v20 = vpack.i.bf16 %v2746_v24, %v2745_v1  ;;  %v9361_v21 = vunpack.i.h.bf16 %v9359_v54  ;;  %v9360_v52 = vunpack.i.l.bf16 %v9359_v54 }
 0xf55   :  { %v2848_v5 = vsel %vm685_vm8, %v2846_v35, %v2847_v57  ;;  %v32_v35 = vld [vmem:[%s14575_s1 + $0x60] sm:$0xff] }
 0xf56   :  { %9363 = vrot.lane.b32.xlu0 %v9362_v20, %s10471_s20  ;;  %v2643_v9 = vmax.f32 %v2633_v36, %v9361_v21  ;;  %v2642_v49 = vmax.f32 %v2632_v29, %v9360_v52  ;;  %s10474_s20 = smov 120   ;;  %7552 = vmatprep.mubr.msk.f32.mxu1 %vm1894_vm14, %v2848_v5  ;;  %v12015_v36 = vld [vmem:[%s14575_s1 + $0xb8] sm:$0xff]  ;;  %v12022_v29 = vld [vmem:[%s14575_s1 + $0xa0] sm:$0xff] }
 0xfc8   :  { %v9364_v37 = vpop.permute.xlu0 %9363 }
 0xfc9   :  { %v9366_v18 = vunpack.i.h.bf16 %v9364_v37  ;;  %v9365_v28 = vunpack.i.l.bf16 %v9364_v37 }
 0xfcb   :  { %v2756_v63 = vsel %vm722_vm15, %v2643_v9, %v9366_v18  ;;  %v2755_v48 = vsel %vm722_vm15, %v2642_v49, %v9365_v28 }
 0xfcc   :  { %v9367_v33 = vpack.i.bf16 %v2756_v63, %v2755_v48 }
 0xfce   :  { %9368 = vrot.lane.b32.xlu1 %v9367_v33, %s10472_s21 }
0x1040   :  { %v9369_v53 = vpop.permute.xlu1 %9368 }
0x1041   :  { %v9371_v47 = vunpack.i.h.bf16 %v9369_v53  ;;  %v9370_v12 = vunpack.i.l.bf16 %v9369_v53 }
0x1043   :  { %v2766_v22 = vsel %vm2077_vm6, 0.0, %v9371_v47  ;;  %v2765_v8 = vsel %vm2077_vm6, 0.0, %v9370_v12 }
0x1044   :  { %v2768_v15 = vsel %vm1244_vm1, %v2766_v22, 0.0  ;;  %v2767_v32 = vsel %vm1244_vm1, %v2765_v8, 0.0  ;;  %v8518_v41 = vpack.c.bf16 %v2766_v22, %v2765_v8 }
0x1045   :  { %v9377_v30 = vpack.i.bf16 %v2768_v15, %v2767_v32 }
0x1046   :  { %8520 = vmatpush1.bf16.msk.msra.mxu1 %vm8519_vm2, %v8518_v41  ;;  %vm14845_vm2 = vcmask 1041408  }
0x1047   :  { %9378 = vrot.lane.b32.xlu1 %v9377_v30, %s10436_s0  ;;  %9373 = vrot.lane.b32.xlu0 %v9377_v30, %s10437_s23 }
0x1048   :  { %8521 = vmatprep.subr.bf16.mxu1 %v14788_v4 }
0x104b   :  { %9388 = vrot.lane.b32.xlu1 %v9377_v30, %s10453_s22  ;;  %9383 = vrot.lane.b32.xlu0 %v9377_v30, %s10473_s29 }
0x104f   :  { %9398 = vrot.lane.b32.xlu1 %v9377_v30, %s10465_s18  ;;  %9393 = vrot.lane.b32.xlu0 %v9377_v30, %s10466_s19 }
0x1053   :  { %9408 = vrot.lane.b32.xlu1 %v9377_v30, %s10474_s20  ;;  %9403 = vrot.lane.b32.xlu0 %v9377_v30, %s10468_s14  ;;  %s14893_s20 = smov 68  }
0x1057   :  { %2821 = vperm.xlu0 %9412, %v11991_v46   ;;  %2825 = vperm.xlu1 %9413, %v12010_v16  }
0x105b   :  { %2833 = vperm.xlu0 %9412, %v12015_v36   ;;  %2829 = vperm.xlu1 %9413, %v12022_v29  }
0x105f   :  { %9414 = vset.pattern.permute.xlu0 %v14841_v7  ;;  %9415 = vset.pattern.permute.xlu1 %v14841_v7 }
0x10b9   :  { %v9379_v25 = vpop.permute.xlu1 %9378  ;;  %v9374_v59 = vpop.permute.xlu0 %9373 }
0x10ba   :  { %v9376_v60 = vunpack.i.h.bf16 %v9374_v59  ;;  %v9375_v0 = vunpack.i.l.bf16 %v9374_v59  ;;  %v9381_v24 = vunpack.i.h.bf16 %v9379_v25  ;;  %v9380_v1 = vunpack.i.l.bf16 %v9379_v25 }
0x10bc   :  { %v8522_v20 = vpack.c.bf16 %v9376_v60, %v9375_v0  ;;  %v8525_v21 = vpack.c.bf16 %v9381_v24, %v9380_v1  ;;  %v36_v60 = vld [vmem:[%s14575_s1 + $0x80] sm:$0xff]  ;;  %v2844_v0 = vrot.slane %v32_v35, 4  ;;  %v35_v1 = vld [vmem:[%s14575_s1 + $0x78] sm:$0xff] }
0x10bd   :  { %v9384_v54 = vpop.permute.xlu0 %9383  ;;  %v9389_v9 = vpop.permute.xlu1 %9388  ;;  %v2851_v24 = vrot.slane %v36_v60, 4 }
0x10be   :  { %8523 = vmatpush1.bf16.msra.mxu1 %v8522_v20  ;;  %v9386_v52 = vunpack.i.h.bf16 %v9384_v54  ;;  %v9385_v37 = vunpack.i.l.bf16 %v9384_v54  ;;  %v9391_v49 = vunpack.i.h.bf16 %v9389_v9  ;;  %v9390_v18 = vunpack.i.l.bf16 %v9389_v9  ;;  %v39_v54 = vld [vmem:[%s14575_s1 + $0x98] sm:$0xff] }
0x10bf   :  { %8524 = vmatprep.subr.bf16.mxu1 %v14788_v4  ;;  %v2855_v9 = vrot.slane %v39_v54, 4 }
0x10c0   :  { %v8528_v28 = vpack.c.bf16 %v9386_v52, %v9385_v37  ;;  %v8531_v48 = vpack.c.bf16 %v9391_v49, %v9390_v18  ;;  %v2849_v52 = vrot.slane %v35_v1, 4  ;;  %v2852_v37 = vsel %vm685_vm8, %v2847_v57, %v2851_v24  ;;  %v38_v49 = vld [vmem:[%s14575_s1 + $0x90] sm:$0xff] }
0x10c1   :  { %v9394_v63 = vpop.permute.xlu0 %9393  ;;  %v9399_v47 = vpop.permute.xlu1 %9398  ;;  %v12058_v18 = vld [vmem:[%s14575_s1 + $0xb0] sm:$0xff]  ;;  %v2856_v11 = vsel %vm685_vm8, %v2851_v24, %v2855_v9 }
0x10c2   :  { %8526 = vmatpush1.bf16.msra.mxu1 %v8525_v21  ;;  %v9396_v33 = vunpack.i.h.bf16 %v9394_v63  ;;  %v9395_v53 = vunpack.i.l.bf16 %v9394_v63  ;;  %v9401_v12 = vunpack.i.h.bf16 %v9399_v47  ;;  %v9400_v22 = vunpack.i.l.bf16 %v9399_v47 }
0x10c3   :  { %8527 = vmatprep.subr.bf16.mxu1 %v14788_v4  ;;  %v2845_v21 = vsel %vm685_vm8, %v2359_v38, %v2844_v0  ;;  %v2850_v51 = vsel %vm685_vm8, %v2844_v0, %v2849_v52  ;;  %v2853_v38 = vrot.slane %v38_v49, 4  ;;  %v2859_v57 = vrot.slane %v12058_v18, 4  ;;  %v12257_v18 = vld [vmem:[%s14575_s1 + $0xe8] sm:$0xff] }
0x10c4   :  { %v8534_v8 = vpack.c.bf16 %v9396_v33, %v9395_v53  ;;  %v8537_v32 = vpack.c.bf16 %v9401_v12, %v9400_v22 }
0x10c5   :  { %v9404_v15 = vpop.permute.xlu0 %9403  ;;  %v9409_v61 = vpop.permute.xlu1 %9408  ;;  %v2854_v63 = vsel %vm685_vm8, %v2849_v52, %v2853_v38  ;;  %v2860_v33 = vsel %vm685_vm8, %v2855_v9, %v2859_v57 }
0x10c6   :  { %8529 = vmatpush1.bf16.msra.mxu1 %v8528_v28  ;;  %v9406_v41 = vunpack.i.h.bf16 %v9404_v15  ;;  %v9405_v30 = vunpack.i.l.bf16 %v9404_v15  ;;  %v9411_v5 = vunpack.i.h.bf16 %v9409_v61  ;;  %v9410_v25 = vunpack.i.l.bf16 %v9409_v61  ;;  %v12067_v28 = vld [vmem:[%s14575_s1 + $0xa8] sm:$0xff] }
0x10c7   :  { %8530 = vmatprep.subr.bf16.mxu1 %v14788_v4 }
0x10c8   :  { %v8540_v59 = vpack.c.bf16 %v9406_v41, %v9405_v30  ;;  %v8543_v20 = vpack.c.bf16 %v9411_v5, %v9410_v25 }
0x10ca   :  { %8532 = vmatpush1.bf16.msra.mxu1 %v8531_v48  ;;  %v2857_v48 = vrot.slane %v12067_v28, 4 }
0x10cb   :  { %8533 = vmatprep.subr.bf16.mxu1 %v14788_v4 }
0x10cc   :  { %v2858_v53 = vsel %vm685_vm8, %v2853_v38, %v2857_v48 }
0x10ce   :  { %8535 = vmatpush1.bf16.msra.mxu1 %v8534_v8  ;;  %v14844_v8 = vsub.s32 3, %v14833_v56 }
0x10cf   :  { %8536 = vmatprep.subr.bf16.mxu1 %v14788_v4 }
0x10d0   :  { %v12082_v15 = vrot.slane %v11748_v40, %v14844_v8 }
0x10d2   :  { %8538 = vmatpush1.bf16.msra.mxu1 %v8537_v32 }
0x10d3   :  { %8539 = vmatprep.subr.bf16.mxu1 %v14788_v4 }
0x10d6   :  { %8541 = vmatpush1.bf16.msra.mxu1 %v8540_v59  ;;  %v2822_v47 = vpop.permute.xlu0 %2821  ;;  %v2826_v22 = vpop.permute.xlu1 %2825 }
0x10d7   :  { %8542 = vmatprep.subr.bf16.mxu1 %v14788_v4  ;;  %v2865_v12 = vrot.slane %v2822_v47, 4  ;;  %v2867_v32 = vrot.slane %v2826_v22, 4 }
0x10d9   :  { %v2866_v41 = vsel %vm685_vm8, %v2363_v39, %v2865_v12  ;;  %v2868_v59 = vsel %vm685_vm8, %v2865_v12, %v2867_v32 }
0x10da   :  { %8544 = vmatpush1.bf16.msra.mxu1 %v8543_v20  ;;  %v2830_v5 = vpop.permute.xlu1 %2829  ;;  %v12092_v0 = vpop.permute.xlu0 %2833 }
0x10db   :  { %v2869_v1 = vrot.slane %v2830_v5, 4 }
0x10dd   :  { %2950 = vmatmul.mubr.f32.vlgmr.msra.gmra.mrb[16].mxu1 %v2845_v21  ;;  %v2871_v21 = vrot.slane %v12092_v0, 4  ;;  %v2870_v52 = vsel %vm685_vm8, %v2867_v32, %v2869_v1 }
0x10de   :  { %7553 = vmatprep.mubr.msk.f32.mxu1 %vm1894_vm14, %v2852_v37 }
0x10e1   :  { %2955 = vmatmul.mubr.f32.gmra.mrb[18].mxu1 %v2850_v51 }
0x10e2   :  { %7554 = vmatprep.mubr.msk.f32.mxu1 %vm1894_vm14, %v2856_v11 }
0x10e5   :  { %2960 = vmatmul.mubr.f32.gmra.mrb[20].mxu1 %v2854_v63 }
0x10e6   :  { %7555 = vmatprep.mubr.msk.f32.mxu1 %vm1894_vm14, %v2860_v33  ;;  %v2872_v33 = vsel %vm685_vm8, %v2869_v1, %v2871_v21 }
0x10e9   :  { %2965 = vmatmul.mubr.f32.gmra.mrb[22].mxu1 %v2858_v53 }
0x11b0   :  { %v2951_v30 = vpop.f32.mrb[16].mxu1 }
0x11b1   :  { %v12087_v61 = vadd.f32 %v2951_v30, %v2866_v41  ;;  %v2953_v35 = vpop.f32.mrb[17].mxu1  ;;  %v7655_v41 = vunpack.c.h.bf16 %v11914_v42  ;;  %v3116_v30 = vrot.slane %v7654_v34, 6 }
0x11b3   :  { %v2974_v25 = vmul.f32 %v12082_v15, %v12087_v61 }
0x11b4   :  { %v2956_v60 = vpop.f32.mrb[18].mxu1 }
0x11b5   :  { %v12094_v40 = vadd.f32 %v2956_v60, %v2868_v59  ;;  %v2958_v24 = vpop.f32.mrb[19].mxu1  ;;  %v2979_v50 = vsel %vm2978_vm11, %v2974_v25, 0.0  ;;  %v2991_v39 = vmul.f32 %v2974_v25, %v12087_v61 }
0x11b6   :  { %2980 = vadd.xlane.f32.xlu1 %v2979_v50 }
0x11b7   :  { %v2995_v20 = vsel %vm2978_vm11, %v2991_v39, 0.0  ;;  %v2975_v54 = vmul.f32 %v12082_v15, %v12094_v40 }
0x11b8   :  { %v2961_v37 = vpop.f32.mrb[20].mxu1  ;;  %2996 = vadd.xlane.f32.xlu0 %v2995_v20 }
0x11b9   :  { %v12103_v9 = vadd.f32 %v2961_v37, %v2870_v52  ;;  %v2963_v49 = vpop.f32.mrb[21].mxu1  ;;  %v2992_v51 = vmul.f32 %v2975_v54, %v12094_v40  ;;  %v2982_v38 = vsel %vm2978_vm11, %v2975_v54, 0.0 }
0x11bb   :  { %v2998_v11 = vsel %vm2978_vm11, %v2992_v51, 0.0  ;;  %v2976_v63 = vmul.f32 %v12082_v15, %v12103_v9 }
0x11bc   :  { %v2966_v53 = vpop.f32.mrb[22].mxu1  ;;  %2983 = vadd.xlane.f32.xlu0 %v2982_v38  ;;  %2999 = vadd.xlane.f32.xlu1 %v2998_v11 }
0x11bd   :  { %v12113_v47 = vadd.f32 %v2966_v53, %v2872_v33  ;;  %v2968_v12 = vpop.f32.mrb[23].mxu1  ;;  %v2985_v22 = vsel %vm2978_vm11, %v2976_v63, 0.0  ;;  %v2993_v8 = vmul.f32 %v2976_v63, %v12103_v9 }
0x11bf   :  { %v3001_v32 = vsel %vm2978_vm11, %v2993_v8, 0.0  ;;  %v2977_v34 = vmul.f32 %v12082_v15, %v12113_v47 }
0x11c0   :  { %2986 = vadd.xlane.f32.xlu0 %v2985_v22 }
0x11c1   :  { %v2994_v25 = vmul.f32 %v2977_v34, %v12113_v47 }
0x11c3   :  { %v3004_v59 = vsel %vm2978_vm11, %v2994_v25, 0.0 }
0x11c4   :  { %3002 = vadd.xlane.f32.xlu0 %v3001_v32 }
0x11cd   :  { %3047 = vperm.xlu1 %9415, %v12010_v16  }
0x11d1   :  { %9416 = vset.pattern.permute.xlu1 %v14829_v55 }
0x11d2   :  { %3072 = vperm.xlu1 %9416, %v11991_v46  }
0x11d6   :  { %3075 = vperm.xlu1 %9416, %v12010_v16  }
0x11da   :  { %3044 = vperm.xlu0 %9414, %v11991_v46   ;;  %9417 = vset.pattern.permute.xlu1 %v14841_v7  ;;  %v3117_v46 = vrot.slane %v7655_v41, 6 }
0x11db   :  { %3050 = vperm.xlu1 %9417, %v12022_v29  }
0x11dc   :  { %v3118_v16 = vsel %vm14845_vm2, %v3116_v30, %v3117_v46 }
0x11dd   :  { %v12135_v35 = vpack.c.bf16 %v3117_v46, %v3118_v16 }
0x11de   :  { %9519 = vset.pattern.permute.xlu0 %v14836_v3 }
0x11df   :  { %3053 = vperm.xlu1 %9417, %v12015_v36   ;;  %8547 = vmatprep.subr.msk.bf16.mxu0 %vm10729_vm3, %v12135_v35 }
0x11e0   :  { %8550 = vmatpush3.bf16.msk.msra.mxu0 %vm10729_vm3, %v12135_v35 }
0x11e1   :  { %8553 = vmatprep.subr.msk.bf16.mxu0 %vm10729_vm3, %v12135_v35 }
0x11e3   :  { %9418 = vset.pattern.permute.xlu1 %v14829_v55 }
0x11e4   :  { %3078 = vperm.xlu1 %9418, %v12022_v29   ;;  %v2988_v29 = vsel %vm2978_vm11, %v2977_v34, 0.0 }
0x1208   :  { %2989 = vadd.xlane.f32.xlu1 %v2988_v29 }
0x120c   :  { %3005 = vadd.xlane.f32.xlu1 %v3004_v59 }
0x121d   :  { %3081 = vperm.xlu1 %9418, %v12015_v36  }
0x1221   :  { %9520 = vset.pattern.permute.xlu1 %v14836_v3 }
0x1243   :  { %v2981_v60 = vpop.xlane.xlu1 %2980 }
0x1244   :  { %v3007_v24 = vmul.f32 0.5, %v2981_v60 }
0x1245   :  { %v2997_v50 = vpop.xlane.xlu0 %2996 }
0x1246   :  { %v3015_v39 = vmul.f32 %v3007_v24, %v3007_v24  ;;  %v3011_v1 = vmul.f32 0.5, %v2997_v50  ;;  %v3027_v50 = vsub.f32 %v12087_v61, %v3007_v24 }
0x1248   :  { %v3019_v20 = vsub.f32 %v3011_v1, %v3015_v39 }
0x1249   :  { %v2984_v54 = vpop.xlane.xlu0 %2983  ;;  %v3000_v52 = vpop.xlane.xlu1 %2999 }
0x124a   :  { %v3023_v37 = vmax.f32 %v3019_v20, 0.0  ;;  %v3008_v49 = vmul.f32 0.5, %v2984_v54  ;;  %v3012_v11 = vmul.f32 0.5, %v3000_v52 }
0x124c   :  { %v3031_v51 = vadd.f32 1e-05, %v3023_v37  ;;  %v3016_v38 = vmul.f32 %v3008_v49, %v3008_v49 }
0x124d   :  { %v2987_v63 = vpop.xlane.xlu0 %2986  ;;  %v3048_v33 = vpop.permute.xlu1 %3047 }
0x124e   :  { %10408 = vrsqrt.f32 %v3031_v51  ;;  %v3020_v53 = vsub.f32 %v3012_v11, %v3016_v38  ;;  %v3009_v12 = vmul.f32 0.5, %v2987_v63  ;;  %v3028_v51 = vsub.f32 %v12094_v40, %v3008_v49 }
0x124f   :  { %v3057_v63 = vrot.slane %v3048_v33, 4 }
0x1250   :  { %v3024_v22 = vmax.f32 %v3020_v53, 0.0  ;;  %v3017_v46 = vmul.f32 %v3009_v12, %v3009_v12  ;;  %v3029_v49 = vsub.f32 %v12103_v9, %v3009_v12 }
0x1251   :  { %v3003_v8 = vpop.xlane.xlu0 %3002  ;;  %v3073_v32 = vpop.permute.xlu1 %3072 }
0x1252   :  { %v3032_v30 = vadd.f32 1e-05, %v3024_v22  ;;  %v3013_v16 = vmul.f32 0.5, %v3003_v8  ;;  %v3083_v1 = vrot.slane %v3073_v32, 4 }
0x1254   :  { %10410 = vrsqrt.f32 %v3032_v30  ;;  %v3021_v34 = vsub.f32 %v3013_v16, %v3017_v46  ;;  %v3084_v53 = vsel %vm685_vm8, %v2508_v44, %v3083_v1 }
0x1255   :  { %v3076_v29 = vpop.permute.xlu1 %3075 }
0x1256   :  { %v3025_v25 = vmax.f32 %v3021_v34, 0.0  ;;  %v3085_v61 = vrot.slane %v3076_v29, 4 }
0x1258   :  { %v10409_v59 = vpop.eup %10408  ;;  %v3033_v60 = vadd.f32 1e-05, %v3025_v25 }
0x1259   :  { %v3045_v39 = vpop.permute.xlu0 %3044  ;;  %v3039_v52 = vmul.f32 %v10409_v59, %v3027_v50 }
0x125a   :  { %10412 = vrsqrt.f32 %v3033_v60  ;;  %v3055_v20 = vrot.slane %v3045_v39, 4  ;;  %v3051_v54 = vpop.permute.xlu1 %3050 }
0x125b   :  { %v3059_v40 = vrot.slane %v3051_v54, 4 }
0x125c   :  { %v3056_v37 = vsel %vm685_vm8, %v2494_v23, %v3055_v20  ;;  %v3058_v32 = vsel %vm685_vm8, %v3055_v20, %v3057_v63  ;;  %v3086_v23 = vsel %vm685_vm8, %v3083_v1, %v3085_v61 }
0x125d   :  { %v3067_v38 = vmul.f32 %v3056_v37, %v3039_v52  ;;  %v3060_v59 = vsel %vm685_vm8, %v3057_v63, %v3059_v40 }
0x125e   :  { %v10411_v11 = vpop.eup %10410  ;;  %v12161_v24 = vpop.permute.xlu1 %3053 }
0x125f   :  { %v3040_v22 = vmul.f32 %v10411_v11, %v3028_v51  ;;  %v3095_v8 = vadd.f32 %v3084_v53, %v3067_v38 }
0x1261   :  { %v3068_v30 = vmul.f32 %v3058_v32, %v3040_v22  ;;  %vm3099_vm11 = vcmp.ge.f32.partialorder %v3095_v8, 0.0  ;;  %v3103_v14 = vmul.f32 0.1, %v3095_v8 }
0x1263   :  { %v3096_v33 = vadd.f32 %v3086_v23, %v3068_v30  ;;  %v3079_v46 = vpop.permute.xlu1 %3078  ;;  %v3107_v43 = vsel %vm3099_vm11, %v3095_v8, %v3103_v14 }
0x1264   :  { %v10413_v16 = vpop.eup %10412  ;;  %v3087_v44 = vrot.slane %v3079_v46, 4  ;;  %v3111_v34 = vmul.f32 %v3107_v43, %v12082_v15 }
0x1265   :  { %v3041_v29 = vmul.f32 %v10413_v16, %v3029_v49  ;;  %vm3100_vm2 = vcmp.ge.f32.partialorder %v3096_v33, 0.0  ;;  %v3104_v25 = vmul.f32 0.1, %v3096_v33 }
0x1266   :  { %3219 = vrot.lane.b32.xlu0 %v3111_v34, %s10469_s28  ;;  %8008 = vmatprep.mubr.msk.f32.mxu0 %vm722_vm15, %v3111_v34  ;;  %v3088_v9 = vsel %vm685_vm8, %v3085_v61, %v3087_v44 }
0x1267   :  { %v3069_v60 = vmul.f32 %v3060_v59, %v3041_v29  ;;  %v3108_v50 = vsel %vm3100_vm2, %v3096_v33, %v3104_v25  ;;  %vm12263_vm2 = vmpackc.low %vm2320_vm4, %vm2320_vm4 }
0x1268   :  { %v3112_v12 = vmul.f32 %v3108_v50, %v12082_v15 }
0x1269   :  { %v3097_v39 = vadd.f32 %v3088_v9, %v3069_v60 }
0x126a   :  { %3221 = vrot.lane.b32.xlu1 %v3112_v12, %s10469_s28  ;;  %8009 = vmatmul.mubr.msk.f32.vlgmr.msra.gmra.mrb[16].mxu0 %vm722_vm15, %v3112_v12 }
0x126b   :  { %v3105_v1 = vmul.f32 0.1, %v3097_v39  ;;  %vm3101_vm11 = vcmp.ge.f32.partialorder %v3097_v39, 0.0  ;;  %8556 = vmatpush3.bf16.msk.msra.mxu0 %vm10729_vm3, %v12135_v35  ;;  %v3061_v35 = vrot.slane %v12161_v24, 4 }
0x126d   :  { %v3109_v20 = vsel %vm3101_vm11, %v3097_v39, %v3105_v1  ;;  %v3062_v14 = vsel %vm685_vm8, %v3059_v40, %v3061_v35 }
0x126e   :  { %v3113_v54 = vmul.f32 %v3109_v20, %v12082_v15 }
0x1270   :  { %3223 = vrot.lane.b32.xlu0 %v3113_v54, %s10469_s28  ;;  %8011 = vmatprep.mubr.msk.f32.mxu0 %vm722_vm15, %v3113_v54 }
0x1295   :  { %v2990_v52 = vpop.xlane.xlu1 %2989 }
0x1296   :  { %v3010_v37 = vmul.f32 0.5, %v2990_v52 }
0x1298   :  { %v3018_v38 = vmul.f32 %v3010_v37, %v3010_v37  ;;  %v3030_v5 = vsub.f32 %v12113_v47, %v3010_v37 }
0x1299   :  { %v3006_v51 = vpop.xlane.xlu1 %3005 }
0x129a   :  { %v3014_v11 = vmul.f32 0.5, %v3006_v51 }
0x129c   :  { %v3022_v63 = vsub.f32 %v3014_v11, %v3018_v38 }
0x129d   :  { %v12180_v22 = vpop.permute.xlu1 %3081 }
0x129e   :  { %v3026_v53 = vmax.f32 %v3022_v63, 0.0  ;;  %v3089_v32 = vrot.slane %v12180_v22, 4 }
0x12a0   :  { %v3034_v61 = vadd.f32 1e-05, %v3026_v53  ;;  %v3090_v49 = vsel %vm685_vm8, %v3087_v44, %v3089_v32 }
0x12a2   :  { %10414 = vrsqrt.f32 %v3034_v61 }
0x12ac   :  { %v10415_v8 = vpop.eup %10414 }
0x12ad   :  { %v3042_v30 = vmul.f32 %v10415_v8, %v3030_v5 }
0x12af   :  { %v3070_v23 = vmul.f32 %v3062_v14, %v3042_v30 }
0x12b1   :  { %v3098_v33 = vadd.f32 %v3090_v49, %v3070_v23 }
0x12b3   :  { %v3106_v46 = vmul.f32 0.1, %v3098_v33  ;;  %vm3102_vm3 = vcmp.ge.f32.partialorder %v3098_v33, 0.0 }
0x12b5   :  { %v3110_v43 = vsel %vm3102_vm3, %v3098_v33, %v3106_v46 }
0x12b6   :  { %v3114_v16 = vmul.f32 %v3110_v43, %v12082_v15 }
0x12b8   :  { %3225 = vrot.lane.b32.xlu1 %v3114_v16, %s10469_s28  ;;  %8012 = vmatmul.mubr.msk.f32.gmra.mrb[18].mxu0 %vm722_vm15, %v3114_v16 }
0x12d8   :  { %v3220_v47 = vpop.permute.xlu0 %3219 }
0x12d9   :  { %8018 = vmatprep.mubr.msk.f32.mxu0 %vm722_vm15, %v3220_v47 }
0x12dc   :  { %v3222_v34 = vpop.permute.xlu1 %3221 }
0x12dd   :  { %8019 = vmatmul.mubr.msk.f32.vlgmr.msra.gmra.mrb[20].mxu0 %vm722_vm15, %v3222_v34 }
0x12e2   :  { %v3224_v40 = vpop.permute.xlu0 %3223 }
0x12e3   :  { %8021 = vmatprep.mubr.msk.f32.mxu0 %vm722_vm15, %v3224_v40 }
0x132a   :  { %v3226_v44 = vpop.permute.xlu1 %3225 }
0x132b   :  { %8022 = vmatmul.mubr.msk.f32.gmra.mrb[22].mxu0 %vm722_vm15, %v3226_v44  ;;  %vm3499_vm15 = vcmask 261120  }
0x133d   :  { %v8010_v29 = vpop.f32.mrb[16].mxu0 }
0x133e   :  { %v3200_v25 = vpop.f32.mrb[17].mxu0 }
0x138b   :  { %v8013_v59 = vpop.f32.mrb[18].mxu0 }
0x138c   :  { %v3210_v15 = vpop.f32.mrb[19].mxu0 }
0x13b0   :  { %v8020_v60 = vpop.f32.mrb[20].mxu0 }
0x13b1   :  { %v3301_v50 = vpop.f32.mrb[21].mxu0 }
0x13b2   :  { %v9419_v9 = vpack.i.bf16 %v8020_v60, %v3301_v50 }
0x13b4   :  { %9420 = vrot.lane.b32.xlu0 %v9419_v9, %s10463_s16  ;;  %v12227_v9 = vld [vmem:[%s14575_s1 + $0xd0] sm:$0xff] }
0x13fe   :  { %v8023_v12 = vpop.f32.mrb[22].mxu0 }
0x13ff   :  { %v3311_v39 = vpop.f32.mrb[23].mxu0 }
0x1400   :  { %v9424_v1 = vpack.i.bf16 %v8023_v12, %v3311_v39  ;;  %v3480_v12 = vrot.slane %v12015_v36, 4  ;;  %v3481_v39 = vrot.slane %v12227_v9, 4 }
0x1402   :  { %9425 = vrot.lane.b32.xlu1 %v9424_v1, %s10463_s16  ;;  %v12236_v1 = vld [vmem:[%s14575_s1 + $0xc8] sm:$0xff]  ;;  %v3482_v36 = vsel %vm685_vm8, %v3480_v12, %v3481_v39 }
0x1403   :  { %8032 = vmatprep.mubr.msk.f32.mxu1 %vm3499_vm15, %v3482_v36 }
0x1426   :  { %v9421_v20 = vpop.permute.xlu0 %9420 }
0x1427   :  { %v9423_v54 = vunpack.i.h.bf16 %v9421_v20  ;;  %v9422_v52 = vunpack.i.l.bf16 %v9421_v20  ;;  %v3478_v20 = vrot.slane %v12236_v1, 4 }
0x1429   :  { %v3337_v37 = vsel %vm2312_vm7, %v8010_v29, %v9423_v54  ;;  %v3336_v51 = vsel %vm2312_vm7, %v3200_v25, %v9422_v52  ;;  %v3479_v54 = vsel %vm685_vm8, %v2859_v57, %v3478_v20 }
0x142a   :  { %v9429_v38 = vpack.i.bf16 %v3337_v37, %v3336_v51  ;;  %3568 = vmatprep.mubr.f32.mxu0 %v3479_v54 }
0x142c   :  { %9430 = vrot.lane.b32.xlu0 %v9429_v38, %s10464_s17 }
0x1474   :  { %v9426_v11 = vpop.permute.xlu1 %9425 }
0x1475   :  { %v9428_v63 = vunpack.i.h.bf16 %v9426_v11  ;;  %v9427_v53 = vunpack.i.l.bf16 %v9426_v11 }
0x1477   :  { %v3339_v61 = vsel %vm2312_vm7, %v8013_v59, %v9428_v63  ;;  %v3338_v5 = vsel %vm2312_vm7, %v3210_v15, %v9427_v53 }
0x1478   :  { %v9434_v8 = vpack.i.bf16 %v3339_v61, %v3338_v5 }
0x147a   :  { %9435 = vrot.lane.b32.xlu1 %v9434_v8, %s10464_s17 }
0x149e   :  { %v9431_v30 = vpop.permute.xlu0 %9430 }
0x149f   :  { %v9433_v14 = vunpack.i.h.bf16 %v9431_v30  ;;  %v9432_v23 = vunpack.i.l.bf16 %v9431_v30 }
0x14a1   :  { %v3357_v49 = vsel %vm2318_vm5, 0.0, %v9433_v14  ;;  %v3356_v33 = vsel %vm2318_vm5, 0.0, %v9432_v23 }
0x14a2   :  { %v3361_v46 = vsel %vm2320_vm4, %v3357_v49, 0.0  ;;  %v3360_v43 = vsel %vm2320_vm4, %v3356_v33, 0.0  ;;  %v8559_v16 = vpack.c.bf16 %v3357_v49, %v3356_v33 }
0x14a3   :  { %v9439_v47 = vpack.i.bf16 %v3361_v46, %v3360_v43 }
0x14a5   :  { %9440 = vrot.lane.b32.xlu0 %v9439_v47, %s10465_s18 }
0x14a9   :  { %9450 = vrot.lane.b32.xlu0 %v9439_v47, %s10468_s14 }
0x14ec   :  { %v9436_v34 = vpop.permute.xlu1 %9435 }
0x14ed   :  { %v9438_v40 = vunpack.i.h.bf16 %v9436_v34  ;;  %v9437_v44 = vunpack.i.l.bf16 %v9436_v34 }
0x14ef   :  { %v3359_v29 = vsel %vm2318_vm5, 0.0, %v9438_v40  ;;  %v3358_v25 = vsel %vm2318_vm5, 0.0, %v9437_v44 }
0x14f0   :  { %v3363_v59 = vsel %vm2320_vm4, %v3359_v29, 0.0  ;;  %v3362_v15 = vsel %vm2320_vm4, %v3358_v25, 0.0  ;;  %v8564_v60 = vpack.c.bf16 %v3359_v29, %v3358_v25 }
0x14f1   :  { %v9459_v50 = vpack.i.bf16 %v3363_v59, %v3362_v15 }
0x14f3   :  { %9460 = vrot.lane.b32.xlu0 %v9459_v50, %s10468_s14  ;;  %9445 = vrot.lane.b32.xlu1 %v9459_v50, %s10465_s18 }
0x14f7   :  { %9465 = vrot.lane.b32.xlu0 %v9439_v47, %s10467_s2  ;;  %9455 = vrot.lane.b32.xlu1 %v9439_v47, %s10437_s23 }
0x14fb   :  { %9480 = vrot.lane.b32.xlu0 %v9459_v50, %s10467_s2  ;;  %9470 = vrot.lane.b32.xlu1 %v9459_v50, %s10437_s23 }
0x14ff   :  { %9485 = vrot.lane.b32.xlu0 %v9439_v47, %s10457_s10  ;;  %9475 = vrot.lane.b32.xlu1 %v9439_v47, %s10436_s0 }
0x1503   :  { %9500 = vrot.lane.b32.xlu0 %v9459_v50, %s10457_s10  ;;  %9490 = vrot.lane.b32.xlu1 %v9459_v50, %s10436_s0 }
0x1507   :  { %9510 = vrot.lane.b32.xlu0 %v9439_v47, %s10456_s9  ;;  %9495 = vrot.lane.b32.xlu1 %v9439_v47, %s10466_s19 }
0x150b   :  { %3466 = vperm.xlu0 %9519, %v12227_v9   ;;  %9505 = vrot.lane.b32.xlu1 %v9459_v50, %s10466_s19 }
0x150f   :  { %9515 = vrot.lane.b32.xlu1 %v9459_v50, %s10456_s9  ;;  %9521 = vset.pattern.permute.xlu0 %v14841_v7 }
0x1513   :  { %3470 = vperm.xlu1 %9520, %v12257_v18  }
0x1517   :  { %v9441_v57 = vpop.permute.xlu0 %9440  ;;  %9522 = vset.pattern.permute.xlu1 %v14841_v7 }
0x1518   :  { %v9443_v52 = vunpack.i.h.bf16 %v9441_v57  ;;  %v9442_v37 = vunpack.i.l.bf16 %v9441_v57 }
0x151a   :  { %v8557_v51 = vpack.c.bf16 %v9443_v52, %v9442_v37 }
0x151b   :  { %v9451_v11 = vpop.permute.xlu0 %9450 }
0x151c   :  { %8558 = vmatprep.subr.bf16.mxu0 %v8557_v51  ;;  %v9453_v63 = vunpack.i.h.bf16 %v9451_v11  ;;  %v9452_v53 = vunpack.i.l.bf16 %v9451_v11 }
0x151d   :  { %8561 = vmatpush3.bf16.msk.msra.mxu0 %vm12263_vm2, %v8559_v16 }
0x151e   :  { %v8567_v33 = vpack.c.bf16 %v9453_v63, %v9452_v53 }
0x1565   :  { %v9461_v61 = vpop.permute.xlu0 %9460  ;;  %v9446_v5 = vpop.permute.xlu1 %9445 }
0x1566   :  { %v9448_v8 = vunpack.i.h.bf16 %v9446_v5  ;;  %v9447_v30 = vunpack.i.l.bf16 %v9446_v5  ;;  %v9463_v46 = vunpack.i.h.bf16 %v9461_v61  ;;  %v9462_v43 = vunpack.i.l.bf16 %v9461_v61 }
0x1568   :  { %v8562_v14 = vpack.c.bf16 %v9448_v8, %v9447_v30  ;;  %v8571_v50 = vpack.c.bf16 %v9463_v46, %v9462_v43 }
0x1569   :  { %v9466_v23 = vpop.permute.xlu0 %9465  ;;  %v9456_v49 = vpop.permute.xlu1 %9455 }
0x156a   :  { %v9458_v47 = vunpack.i.h.bf16 %v9456_v49  ;;  %v9457_v34 = vunpack.i.l.bf16 %v9456_v49  ;;  %8563 = vmatprep.subr.bf16.mxu0 %v8562_v14  ;;  %v9468_v40 = vunpack.i.h.bf16 %v9466_v23  ;;  %v9467_v44 = vunpack.i.l.bf16 %v9466_v23 }
0x156b   :  { %8566 = vmatpush3.bf16.msk.msra.mxu0 %vm12263_vm2, %v8564_v60 }
0x156c   :  { %v8569_v16 = vpack.c.bf16 %v9458_v47, %v9457_v34  ;;  %8568 = vmatprep.subr.bf16.mxu0 %v8567_v33  ;;  %v8575_v57 = vpack.c.bf16 %v9468_v40, %v9467_v44 }
0x156d   :  { %v9481_v29 = vpop.permute.xlu0 %9480  ;;  %v9471_v25 = vpop.permute.xlu1 %9470 }
0x156e   :  { %v9473_v59 = vunpack.i.h.bf16 %v9471_v25  ;;  %v9472_v15 = vunpack.i.l.bf16 %v9471_v25  ;;  %v9483_v52 = vunpack.i.h.bf16 %v9481_v29  ;;  %v9482_v37 = vunpack.i.l.bf16 %v9481_v29 }
0x156f   :  { %8570 = vmatpush3.bf16.msra.mxu0 %v8569_v16 }
0x1570   :  { %v8573_v12 = vpack.c.bf16 %v9473_v59, %v9472_v15  ;;  %8572 = vmatprep.subr.bf16.mxu0 %v8571_v50  ;;  %v8579_v14 = vpack.c.bf16 %v9483_v52, %v9482_v37  ;;  %v44_v59 = vld [vmem:[%s14575_s1 + $0xc0] sm:$0xff] }
0x1571   :  { %v9486_v54 = vpop.permute.xlu0 %9485  ;;  %v9476_v36 = vpop.permute.xlu1 %9475  ;;  %v12277_v50 = vld [vmem:[%s14575_s1 + $0xe0] sm:$0xff] }
0x1572   :  { %v9478_v51 = vunpack.i.h.bf16 %v9476_v36  ;;  %v9477_v11 = vunpack.i.l.bf16 %v9476_v36  ;;  %v9488_v63 = vunpack.i.h.bf16 %v9486_v54  ;;  %v9487_v53 = vunpack.i.l.bf16 %v9486_v54 }
0x1573   :  { %8574 = vmatpush3.bf16.msra.mxu0 %v8573_v12  ;;  %v3485_v37 = vrot.slane %v12277_v50, 4 }
0x1574   :  { %v8577_v60 = vpack.c.bf16 %v9478_v51, %v9477_v11  ;;  %8576 = vmatprep.subr.bf16.mxu0 %v8575_v57  ;;  %v8583_v47 = vpack.c.bf16 %v9488_v63, %v9487_v53  ;;  %v3476_v57 = vrot.slane %v44_v59, 4  ;;  %v12283_v51 = vld [vmem:[%s14575_s1 + $0xd8] sm:$0xff] }
0x1575   :  { %v9501_v61 = vpop.permute.xlu0 %9500  ;;  %v9491_v5 = vpop.permute.xlu1 %9490 }
0x1576   :  { %v9493_v8 = vunpack.i.h.bf16 %v9491_v5  ;;  %v9492_v30 = vunpack.i.l.bf16 %v9491_v5  ;;  %v9503_v49 = vunpack.i.h.bf16 %v9501_v61  ;;  %v9502_v33 = vunpack.i.l.bf16 %v9501_v61 }
0x1577   :  { %8578 = vmatpush3.bf16.msra.mxu0 %v8577_v60  ;;  %v3477_v53 = vsel %vm685_vm8, %v2857_v48, %v3476_v57  ;;  %v3483_v61 = vrot.slane %v12283_v51, 4  ;;  %v3487_v5 = vrot.slane %v12257_v18, 4 }
0x1578   :  { %v8581_v23 = vpack.c.bf16 %v9493_v8, %v9492_v30  ;;  %8580 = vmatprep.subr.bf16.mxu0 %v8579_v14  ;;  %v8587_v36 = vpack.c.bf16 %v9503_v49, %v9502_v33  ;;  %v3486_v30 = vsel %vm685_vm8, %v3478_v20, %v3485_v37 }
0x1579   :  { %v9511_v46 = vpop.permute.xlu0 %9510  ;;  %v9496_v43 = vpop.permute.xlu1 %9495  ;;  %v3484_v28 = vsel %vm685_vm8, %v3476_v57, %v3483_v61  ;;  %v3488_v48 = vsel %vm685_vm8, %v3481_v39, %v3487_v5 }
0x157a   :  { %v9513_v34 = vunpack.i.h.bf16 %v9511_v46  ;;  %v9512_v16 = vunpack.i.l.bf16 %v9511_v46  ;;  %v9498_v40 = vunpack.i.h.bf16 %v9496_v43  ;;  %v9497_v44 = vunpack.i.l.bf16 %v9496_v43 }
0x157b   :  { %8582 = vmatpush3.bf16.msra.mxu0 %v8581_v23 }
0x157c   :  { %v8585_v29 = vpack.c.bf16 %v9498_v40, %v9497_v44  ;;  %8584 = vmatprep.subr.bf16.mxu0 %v8583_v47  ;;  %v8591_v25 = vpack.c.bf16 %v9513_v34, %v9512_v16 }
0x157d   :  { %v9506_v15 = vpop.permute.xlu1 %9505 }
0x157e   :  { %v9508_v12 = vunpack.i.h.bf16 %v9506_v15  ;;  %v9507_v54 = vunpack.i.l.bf16 %v9506_v15  ;;  %8592 = vmatprep.subr.bf16.mxu1 %v8591_v25 }
0x157f   :  { %8586 = vmatpush3.bf16.msra.mxu0 %v8585_v29  ;;  %8594 = vmatpush3.bf16.msra.mxu1 %v8591_v25 }
0x1580   :  { %v8589_v52 = vpack.c.bf16 %v9508_v12, %v9507_v54  ;;  %8588 = vmatprep.subr.bf16.mxu0 %v8587_v36 }
0x1581   :  { %v9516_v11 = vpop.permute.xlu1 %9515 }
0x1582   :  { %v9518_v60 = vunpack.i.h.bf16 %v9516_v11  ;;  %v9517_v63 = vunpack.i.l.bf16 %v9516_v11 }
0x1583   :  { %8590 = vmatpush3.bf16.msra.mxu0 %v8589_v52 }
0x1584   :  { %v8595_v8 = vpack.c.bf16 %v9518_v60, %v9517_v63 }
0x1586   :  { %3569 = vmatmul.mubr.f32.vlgmr.msra.gmra.mrb[24].mxu0 %v3477_v53  ;;  %8596 = vmatprep.subr.bf16.mxu1 %v8595_v8 }
0x1587   :  { %8598 = vmatpush3.bf16.msra.mxu1 %v8595_v8  ;;  %3573 = vmatprep.mubr.f32.mxu0 %v3486_v30 }
0x158a   :  { %3574 = vmatmul.mubr.f32.gmra.mrb[26].mxu0 %v3484_v28  ;;  %8033 = vmatmul.mubr.msk.f32.vlgmr.msra.gmra.mrb[24].mxu1 %vm3499_vm15, %v3488_v48  ;;  %v3467_v1 = vpop.permute.xlu0 %3466 }
0x158b   :  { %v3493_v14 = vrot.slane %v3467_v1, 4 }
0x158d   :  { %v3494_v43 = vsel %vm685_vm8, %v2871_v21, %v3493_v14 }
0x1592   :  { %v12304_v23 = vpop.permute.xlu1 %3470 }
0x1593   :  { %v3495_v46 = vrot.slane %v12304_v23, 4 }
0x1595   :  { %v3496_v25 = vsel %vm685_vm8, %v3493_v14, %v3495_v46 }
0x1659   :  { %v7824_v20 = vpop.f32.mrb[24].mxu0 }
0x165a   :  { %v7825_v49 = vpop.f32.mrb[25].mxu0 }
0x165b   :  { %v7826_v33 = vadd.f32 %v7825_v49, %v7824_v20 }
0x165d   :  { %v7827_v47 = vpop.f32.mrb[26].mxu0  ;;  %v8034_v34 = vpop.f32.mrb[24].mxu1  ;;  %v3571_v16 = vadd.f32 %v7826_v33, %v3494_v43 }
0x165e   :  { %v7828_v39 = vpop.f32.mrb[27].mxu0  ;;  %v3645_v40 = vpop.f32.mrb[25].mxu1 }
0x165f   :  { %v7829_v44 = vadd.f32 %v7828_v39, %v7827_v47  ;;  %v3646_v29 = vadd.f32 %v3645_v40, %v3571_v16 }
0x1661   :  { %v3576_v59 = vadd.f32 %v7829_v44, %v3496_v25  ;;  %v3654_v15 = vmul.f32 %v3646_v29, %v11889_v6 }
0x1663   :  { %v12314_v12 = vadd.f32 %v8034_v34, %v3576_v59  ;;  %v3656_v0 = vsel %vm2453_vm10, %v3654_v15, 0.0  ;;  %v3662_v54 = vmul.f32 %v3654_v15, %v3646_v29 }
0x1664   :  { %3657 = vadd.xlane.f32.xlu1 %v3656_v0 }
0x1665   :  { %v3664_v21 = vsel %vm2453_vm10, %v3662_v54, 0.0  ;;  %v3655_v36 = vmul.f32 %v12314_v12, %v11889_v6 }
0x1666   :  { %3665 = vadd.xlane.f32.xlu0 %v3664_v21 }
0x1667   :  { %v3659_v57 = vsel %vm2453_vm10, %v3655_v36, 0.0  ;;  %v3663_v52 = vmul.f32 %v3655_v36, %v12314_v12 }
0x1669   :  { %v3667_v11 = vsel %vm2453_vm10, %v3663_v52, 0.0 }
0x166a   :  { %3660 = vadd.xlane.f32.xlu0 %v3659_v57 }
0x1675   :  { %3692 = vperm.xlu1 %9522, %v12257_v18  }
0x1679   :  { %9523 = vset.pattern.permute.xlu1 %v14829_v55 }
0x167a   :  { %3703 = vperm.xlu1 %9523, %v12227_v9  }
0x1680   :  { %3689 = vperm.xlu0 %9521, %v12227_v9  }
0x1684   :  { %9615 = vset.pattern.permute.xlu0 %v14836_v3 }
0x169e   :  { %3668 = vadd.xlane.f32.xlu1 %v3667_v11 }
0x16af   :  { %3706 = vperm.xlu1 %9523, %v12257_v18  }
0x16b3   :  { %9525 = vrot.lane.b32.xlu1 %v9524_v13, %s10464_s17 }
0x16b4   :  { %9614 = vset.pattern.permute.xlu1 %v14836_v3 }
0x16f1   :  { %v3658_v60 = vpop.xlane.xlu1 %3657 }
0x16f2   :  { %v3670_v63 = vmul.f32 0.083333336, %v3658_v60 }
0x16f3   :  { %v3666_v53 = vpop.xlane.xlu0 %3665 }
0x16f4   :  { %v3674_v9 = vmul.f32 %v3670_v63, %v3670_v63  ;;  %v3672_v8 = vmul.f32 0.083333336, %v3666_v53  ;;  %v3680_v40 = vsub.f32 %v3646_v29, %v3670_v63 }
0x16f5   :  { %v12334_v48 = vpop.permute.xlu1 %3692 }
0x16f6   :  { %v3676_v30 = vsub.f32 %v3672_v8, %v3674_v9 }
0x16f7   :  { %v3661_v14 = vpop.xlane.xlu0 %3660 }
0x16f8   :  { %v3678_v28 = vmax.f32 %v3676_v30, 0.0  ;;  %v3671_v49 = vmul.f32 0.083333336, %v3661_v14 }
0x16f9   :  { %v3704_v20 = vpop.permute.xlu1 %3703 }
0x16fa   :  { %v3682_v1 = vadd.f32 1e-05, %v3678_v28  ;;  %v3675_v43 = vmul.f32 %v3671_v49, %v3671_v49  ;;  %v3708_v36 = vrot.slane %v3704_v20, 4  ;;  %v3681_v9 = vsub.f32 %v12314_v12, %v3671_v49 }
0x16fb   :  { %v3696_v28 = vrot.slane %v12334_v48, 4 }
0x16fc   :  { %10416 = vrsqrt.f32 %v3682_v1  ;;  %v3709_v53 = vsel %vm685_vm8, %v3089_v32, %v3708_v36 }
0x16ff   :  { %v3690_v34 = vpop.permute.xlu0 %3689 }
0x1700   :  { %v3694_v25 = vrot.slane %v3690_v34, 4 }
0x1702   :  { %v3695_v11 = vsel %vm685_vm8, %v3061_v35, %v3694_v25  ;;  %v3697_v24 = vsel %vm685_vm8, %v3694_v25, %v3696_v28 }
0x1706   :  { %v10417_v16 = vpop.eup %10416 }
0x1707   :  { %v3686_v0 = vmul.f32 %v10417_v16, %v3680_v40 }
0x1709   :  { %v3700_v63 = vmul.f32 %v3695_v11, %v3686_v0  ;;  %v12386_v11 = vld [vmem:[%s14575_s1 + $0x100] sm:$0xff] }
0x170b   :  { %v3714_v8 = vadd.f32 %v3709_v53, %v3700_v63  ;;  %v3852_v63 = vrot.slane %v12386_v11, 4  ;;  %v12394_v53 = vld [vmem:[%s14575_s1 + $0xf8] sm:$0xff] }
0x170d   :  { %v3718_v35 = vmul.f32 0.1, %v3714_v8  ;;  %vm3716_vm11 = vcmp.ge.f32.partialorder %v3714_v8, 0.0 }
0x170f   :  { %v3720_v49 = vsel %vm3716_vm11, %v3714_v8, %v3718_v35  ;;  %vm8650_vm11 = vmpackc.low %vm1894_vm14, %vm1894_vm14 }
0x172b   :  { %v3669_v33 = vpop.xlane.xlu1 %3668 }
0x172c   :  { %v3673_v26 = vmul.f32 0.083333336, %v3669_v33 }
0x172e   :  { %v3677_v45 = vsub.f32 %v3673_v26, %v3675_v43  ;;  %v3722_v43 = vmul.f32 %v3720_v49, %v11889_v6 }
0x172f   :  { %v12336_v13 = vpop.permute.xlu1 %3706 }
0x1730   :  { %v3679_v47 = vmax.f32 %v3677_v45, 0.0  ;;  %v3710_v1 = vrot.slane %v12336_v13, 4 }
0x1732   :  { %v3683_v39 = vadd.f32 1e-05, %v3679_v47  ;;  %v3711_v22 = vsel %vm685_vm8, %v3708_v36, %v3710_v1 }
0x1733   :  { %v9526_v44 = vpop.permute.xlu1 %9525 }
0x1734   :  { %10418 = vrsqrt.f32 %v3683_v39  ;;  %v9528_v59 = vunpack.i.h.bf16 %v9526_v44  ;;  %v9527_v15 = vunpack.i.l.bf16 %v9526_v44 }
0x1736   :  { %v12339_v54 = vsel %vm2318_vm5, 0.0, %v9528_v59  ;;  %v12342_v21 = vsel %vm2318_vm5, 0.0, %v9527_v15 }
0x1737   :  { %v2533_v57 = vsel %vm2320_vm4, %v12339_v54, 0.0  ;;  %v2532_v52 = vsel %vm2320_vm4, %v12342_v21, 0.0  ;;  %v8604_v29 = vpack.c.bf16 %v12339_v54, %v12342_v21 }
0x1738   :  { %v9549_v60 = vpack.i.bf16 %v2533_v57, %v2532_v52 }
0x173e   :  { %v10419_v30 = vpop.eup %10418 }
0x173f   :  { %v3687_v14 = vmul.f32 %v10419_v30, %v3681_v9  ;;  %v3850_v9 = vrot.slane %v12394_v53, 4  ;;  %v3853_v30 = vsel %vm685_vm8, %v3487_v5, %v3852_v63 }
0x1740   :  { %8043 = vmatprep.mubr.msk.f32.mxu1 %vm3499_vm15, %v3853_v30 }
0x1741   :  { %v3701_v20 = vmul.f32 %v3697_v24, %v3687_v14  ;;  %v3851_v8 = vsel %vm685_vm8, %v3485_v37, %v3850_v9  ;;  %v12413_v14 = vld [vmem:[%s14575_s1 + $0x118] sm:$0xff] }
0x1742   :  { %3938 = vmatprep.mubr.f32.mxu0 %v3851_v8 }
0x1743   :  { %v3715_v32 = vadd.f32 %v3711_v22, %v3701_v20 }
0x1745   :  { %vm3717_vm3 = vcmp.ge.f32.partialorder %v3715_v32, 0.0  ;;  %v3719_v12 = vmul.f32 0.1, %v3715_v32 }
0x1747   :  { %v3721_v33 = vsel %vm3717_vm3, %v3715_v32, %v3719_v12 }
0x1748   :  { %v3723_v26 = vmul.f32 %v3721_v33, %v11889_v6 }
0x174a   :  { %v9529_v45 = vpack.i.bf16 %v3723_v26, %v3722_v43 }
0x174c   :  { %9530 = vrot.lane.b32.xlu1 %v9529_v45, %s10464_s17 }
0x1750   :  { %9535 = vrot.lane.b32.xlu1 %v9549_v60, %s10437_s23 }
0x17be   :  { %v9531_v47 = vpop.permute.xlu1 %9530 }
0x17bf   :  { %v9533_v34 = vunpack.i.h.bf16 %v9531_v47  ;;  %v9532_v16 = vunpack.i.l.bf16 %v9531_v47 }
0x17c1   :  { %v3733_v39 = vsel %vm2318_vm5, 0.0, %v9533_v34  ;;  %v3732_v40 = vsel %vm2318_vm5, 0.0, %v9532_v16 }
0x17c2   :  { %v3735_v44 = vsel %vm2320_vm4, %v3733_v39, 0.0  ;;  %v3734_v25 = vsel %vm2320_vm4, %v3732_v40, 0.0  ;;  %v8601_v59 = vpack.c.bf16 %v3733_v39, %v3732_v40  ;;  %v9536_v15 = vpop.permute.xlu1 %9535  ;;  %vm14849_vm4 = vcmask 1040384  }
0x17c3   :  { %v9538_v0 = vunpack.i.h.bf16 %v9536_v15  ;;  %v9537_v36 = vunpack.i.l.bf16 %v9536_v15  ;;  %v9574_v57 = vpack.i.bf16 %v3735_v44, %v3734_v25  ;;  %vm14850_vm5 = vmmov %vm14849_vm4 }
0x17c5   :  { %9575 = vrot.lane.b32.xlu0 %v9574_v57, %s10436_s0  ;;  %9540 = vrot.lane.b32.xlu1 %v9574_v57, %s10456_s9  ;;  %v8609_v52 = vpack.c.bf16 %v9538_v0, %v9537_v36 }
0x17c9   :  { %9580 = vrot.lane.b32.xlu0 %v9574_v57, %s10466_s19  ;;  %9545 = vrot.lane.b32.xlu1 %v9574_v57, %s10437_s23 }
0x17cd   :  { %9585 = vrot.lane.b32.xlu0 %v9574_v57, %s10465_s18  ;;  %9550 = vrot.lane.b32.xlu1 %v9549_v60, %s10436_s0 }
0x17d1   :  { %9590 = vrot.lane.b32.xlu0 %v9574_v57, %s10468_s14  ;;  %9555 = vrot.lane.b32.xlu1 %v9549_v60, %s10466_s19 }
0x17d5   :  { %9595 = vrot.lane.b32.xlu0 %v9574_v57, %s10467_s2  ;;  %9560 = vrot.lane.b32.xlu1 %v9549_v60, %s10465_s18 }
0x17d9   :  { %9600 = vrot.lane.b32.xlu0 %v9574_v57, %s10457_s10  ;;  %9565 = vrot.lane.b32.xlu1 %v9549_v60, %s10468_s14 }
0x17dd   :  { %9570 = vrot.lane.b32.xlu1 %v9549_v60, %s10467_s2  ;;  %9610 = vrot.lane.b32.xlu0 %v9536_v15, %s10457_s10 }
0x17e1   :  { %9605 = vrot.lane.b32.xlu1 %v9549_v60, %s10457_s10  ;;  %3842 = vperm.xlu0 %9615, %v12413_v14  }
0x17e5   :  { %3838 = vperm.xlu1 %9614, %v12386_v11   ;;  %9617 = vset.pattern.permute.xlu0 %v14841_v7 }
0x17e9   :  { %9616 = vset.pattern.permute.xlu1 %v14841_v7 }
0x17ea   :  { %4059 = vperm.xlu1 %9616, %v12386_v11  }
0x17ee   :  { %9618 = vset.pattern.permute.xlu1 %v14829_v55 }
0x1837   :  { %v9576_v18 = vpop.permute.xlu0 %9575  ;;  %v9541_v50 = vpop.permute.xlu1 %9540 }
0x1838   :  { %v9543_v37 = vunpack.i.h.bf16 %v9541_v50  ;;  %v9542_v5 = vunpack.i.l.bf16 %v9541_v50  ;;  %v9578_v12 = vunpack.i.h.bf16 %v9576_v18  ;;  %v9577_v49 = vunpack.i.l.bf16 %v9576_v18 }
0x183a   :  { %v8599_v24 = vpack.c.bf16 %v9543_v37, %v9542_v5  ;;  %v8611_v47 = vpack.c.bf16 %v9578_v12, %v9577_v49 }
0x183b   :  { %v9581_v35 = vpop.permute.xlu0 %9580  ;;  %v9546_v20 = vpop.permute.xlu1 %9545 }
0x183c   :  { %v9548_v60 = vunpack.i.h.bf16 %v9546_v20  ;;  %v9547_v22 = vunpack.i.l.bf16 %v9546_v20  ;;  %8600 = vmatprep.subr.bf16.mxu0 %v8599_v24  ;;  %v9583_v34 = vunpack.i.h.bf16 %v9581_v35  ;;  %v9582_v16 = vunpack.i.l.bf16 %v9581_v35 }
0x183d   :  { %8603 = vmatpush3.bf16.msk.msra.mxu0 %vm12263_vm2, %v8601_v59 }
0x183e   :  { %v8607_v32 = vpack.c.bf16 %v9548_v60, %v9547_v22  ;;  %8606 = vmatprep.subr.msk.bf16.mxu0 %vm12263_vm2, %v8604_v29  ;;  %v8615_v38 = vpack.c.bf16 %v9583_v34, %v9582_v16 }
0x183f   :  { %v9586_v33 = vpop.permute.xlu0 %9585  ;;  %v9551_v43 = vpop.permute.xlu1 %9550 }
0x1840   :  { %v9553_v26 = vunpack.i.h.bf16 %v9551_v43  ;;  %v9552_v45 = vunpack.i.l.bf16 %v9551_v43  ;;  %v9588_v54 = vunpack.i.h.bf16 %v9586_v33  ;;  %v9587_v21 = vunpack.i.l.bf16 %v9586_v33  ;;  %v50_v43 = vld [vmem:[%s14575_s1 + $0xf0] sm:$0xff] }
0x1841   :  { %8608 = vmatpush3.bf16.msra.mxu0 %v8607_v32 }
0x1842   :  { %8610 = vmatprep.subr.bf16.mxu0 %v8609_v52  ;;  %v8613_v59 = vpack.c.bf16 %v9553_v26, %v9552_v45  ;;  %v8619_v52 = vpack.c.bf16 %v9588_v54, %v9587_v21 }
0x1843   :  { %v9591_v39 = vpop.permute.xlu0 %9590  ;;  %v9556_v40 = vpop.permute.xlu1 %9555 }
0x1844   :  { %v9558_v44 = vunpack.i.h.bf16 %v9556_v40  ;;  %v9557_v25 = vunpack.i.l.bf16 %v9556_v40  ;;  %v9593_v8 = vunpack.i.h.bf16 %v9591_v39  ;;  %v9592_v30 = vunpack.i.l.bf16 %v9591_v39  ;;  %v12435_v39 = vld [vmem:[%s14575_s1 + $0x110] sm:$0xff] }
0x1845   :  { %8612 = vmatpush3.bf16.msra.mxu0 %v8611_v47  ;;  %v3856_v21 = vrot.slane %v12435_v39, 4 }
0x1846   :  { %8614 = vmatprep.subr.bf16.mxu0 %v8613_v59  ;;  %v8617_v57 = vpack.c.bf16 %v9558_v44, %v9557_v25  ;;  %v8623_v35 = vpack.c.bf16 %v9593_v8, %v9592_v30 }
0x1847   :  { %v9596_v29 = vpop.permute.xlu0 %9595  ;;  %v9561_v15 = vpop.permute.xlu1 %9560  ;;  %v3857_v8 = vsel %vm685_vm8, %v3850_v9, %v3856_v21 }
0x1848   :  { %v9563_v0 = vunpack.i.h.bf16 %v9561_v15  ;;  %v9562_v36 = vunpack.i.l.bf16 %v9561_v15  ;;  %v9598_v20 = vunpack.i.h.bf16 %v9596_v29  ;;  %v9597_v60 = vunpack.i.l.bf16 %v9596_v29  ;;  %v12441_v29 = vld [vmem:[%s14575_s1 + $0x108] sm:$0xff] }
0x1849   :  { %8616 = vmatpush3.bf16.msra.mxu0 %v8615_v38  ;;  %v3848_v38 = vrot.slane %v50_v43, 4 }
0x184a   :  { %8618 = vmatprep.subr.bf16.mxu0 %v8617_v57  ;;  %v8621_v24 = vpack.c.bf16 %v9563_v0, %v9562_v36  ;;  %v8627_v26 = vpack.c.bf16 %v9598_v20, %v9597_v60  ;;  %v3854_v57 = vrot.slane %v12441_v29, 4 }
0x184b   :  { %v9601_v18 = vpop.permute.xlu0 %9600  ;;  %v9566_v50 = vpop.permute.xlu1 %9565  ;;  %v3849_v36 = vsel %vm685_vm8, %v3483_v61, %v3848_v38 }
0x184c   :  { %v9568_v37 = vunpack.i.h.bf16 %v9566_v50  ;;  %v9567_v5 = vunpack.i.l.bf16 %v9566_v50  ;;  %v9603_v45 = vunpack.i.h.bf16 %v9601_v18  ;;  %v9602_v47 = vunpack.i.l.bf16 %v9601_v18 }
0x184d   :  { %8620 = vmatpush3.bf16.msra.mxu0 %v8619_v52  ;;  %v3858_v52 = vrot.slane %v12413_v14, 4  ;;  %v3855_v51 = vsel %vm685_vm8, %v3848_v38, %v3854_v57  ;;  %v4097_v38 = vrot.slane %v7655_v41, 7 }
0x184e   :  { %8622 = vmatprep.subr.bf16.mxu0 %v8621_v24  ;;  %v8625_v33 = vpack.c.bf16 %v9568_v37, %v9567_v5  ;;  %v8631_v15 = vpack.c.bf16 %v9603_v45, %v9602_v47 }
0x184f   :  { %v9571_v22 = vpop.permute.xlu1 %9570  ;;  %v9611_v49 = vpop.permute.xlu0 %9610  ;;  %v3859_v61 = vsel %vm685_vm8, %v3852_v63, %v3858_v52 }
0x1850   :  { %v9573_v32 = vunpack.i.h.bf16 %v9571_v22  ;;  %v9572_v12 = vunpack.i.l.bf16 %v9571_v22  ;;  %v9613_v34 = vunpack.i.h.bf16 %v9611_v49  ;;  %v9612_v40 = vunpack.i.l.bf16 %v9611_v49 }
0x1851   :  { %8624 = vmatpush3.bf16.msra.mxu0 %v8623_v35 }
0x1852   :  { %8626 = vmatprep.subr.bf16.mxu0 %v8625_v33  ;;  %v8629_v59 = vpack.c.bf16 %v9573_v32, %v9572_v12  ;;  %v8637_v0 = vpack.c.bf16 %v9613_v34, %v9612_v40 }
0x1853   :  { %v9606_v16 = vpop.permute.xlu1 %9605 }
0x1854   :  { %v9608_v44 = vunpack.i.h.bf16 %v9606_v16  ;;  %v9607_v25 = vunpack.i.l.bf16 %v9606_v16 }
0x1855   :  { %8628 = vmatpush3.bf16.msra.mxu0 %v8627_v26 }
0x1856   :  { %8630 = vmatprep.subr.bf16.mxu0 %v8629_v59  ;;  %v8633_v54 = vpack.c.bf16 %v9608_v44, %v9607_v25  ;;  %v7665_v44 = vld [vmem:[%s14578_s5 + $0x30] sm:$0xff]  }
0x1857   :  { %v7658_v25 = vunpack.c.l.bf16 %v7665_v44  ;;  %v7659_v59 = vunpack.c.h.bf16 %v7665_v44 }
0x1858   :  { %8634 = vmatprep.subr.bf16.mxu1 %v8633_v54 }
0x1859   :  { %8632 = vmatpush3.bf16.msra.mxu0 %v8631_v15  ;;  %8636 = vmatpush3.bf16.msra.mxu1 %v8633_v54  ;;  %v4098_v54 = vrot.slane %v7658_v25, 7  ;;  %v4100_v15 = vrot.slane %v7659_v59, 7 }
0x185a   :  { %8638 = vmatprep.subr.bf16.mxu1 %v8637_v0 }
0x185c   :  { %3939 = vmatmul.mubr.f32.vlgmr.msra.gmra.mrb[28].mxu0 %v3849_v36 }
0x185d   :  { %8640 = vmatpush3.bf16.msra.mxu1 %v8637_v0  ;;  %3943 = vmatprep.mubr.f32.mxu0 %v3857_v8  ;;  %v4101_v0 = vsel %vm14850_vm5, %v4098_v54, %v4100_v15 }
0x1860   :  { %3944 = vmatmul.mubr.f32.gmra.mrb[30].mxu0 %v3855_v51  ;;  %8044 = vmatmul.mubr.msk.f32.vlgmr.msra.gmra.mrb[26].mxu1 %vm3499_vm15, %v3859_v61  ;;  %v12460_v53 = vpop.permute.xlu0 %3842 }
0x1861   :  { %v3866_v5 = vrot.slane %v12460_v53, 4 }
0x1864   :  { %v3839_v30 = vpop.permute.xlu1 %3838 }
0x1865   :  { %v3864_v18 = vrot.slane %v3839_v30, 4 }
0x1867   :  { %v3865_v24 = vsel %vm685_vm8, %v3495_v46, %v3864_v18  ;;  %v3867_v49 = vsel %vm685_vm8, %v3864_v18, %v3866_v5 }
0x1869   :  { %v4060_v42 = vpop.permute.xlu1 %4059 }
0x192f   :  { %v7868_v50 = vpop.f32.mrb[28].mxu0 }
0x1930   :  { %v7869_v9 = vpop.f32.mrb[29].mxu0 }
0x1931   :  { %v7870_v37 = vadd.f32 %v7869_v9, %v7868_v50 }
0x1933   :  { %v7871_v35 = vpop.f32.mrb[30].mxu0  ;;  %v8045_v20 = vpop.f32.mrb[26].mxu1  ;;  %v3941_v60 = vadd.f32 %v7870_v37, %v3865_v24 }
0x1934   :  { %v7872_v63 = vpop.f32.mrb[31].mxu0  ;;  %v4015_v22 = vpop.f32.mrb[27].mxu1 }
0x1935   :  { %v7873_v32 = vadd.f32 %v7872_v63, %v7871_v35  ;;  %v12466_v12 = vadd.f32 %v4015_v22, %v3941_v60 }
0x1937   :  { %v3946_v33 = vadd.f32 %v7873_v32, %v3867_v49  ;;  %v4024_v43 = vmul.f32 %v12466_v12, %v11889_v6 }
0x1939   :  { %v12473_v26 = vadd.f32 %v8045_v20, %v3946_v33  ;;  %v4026_v23 = vsel %vm2453_vm10, %v4024_v43, 0.0  ;;  %v4032_v46 = vmul.f32 %v4024_v43, %v12466_v12  ;;  %v4064_v43 = vrot.slane %v4060_v42, 4 }
0x193a   :  { %4027 = vadd.xlane.f32.xlu1 %v4026_v23 }
0x193b   :  { %v4025_v45 = vmul.f32 %v12473_v26, %v11889_v6  ;;  %v4034_v34 = vsel %vm2453_vm10, %v4032_v46, 0.0 }
0x193d   :  { %v4029_v47 = vsel %vm2453_vm10, %v4025_v45, 0.0  ;;  %v4033_v16 = vmul.f32 %v4025_v45, %v12473_v26 }
0x193e   :  { %4030 = vadd.xlane.f32.xlu0 %v4029_v47  ;;  %4035 = vadd.xlane.f32.xlu1 %v4034_v34 }
0x193f   :  { %v4037_v40 = vsel %vm2453_vm10, %v4033_v16, 0.0  ;;  %vm14851_vm10 = vmmov %vm14849_vm4 }
0x1942   :  { %4038 = vadd.xlane.f32.xlu0 %v4037_v40  ;;  %v4065_v40 = vsel %vm685_vm8, %v3696_v28, %v4064_v43 }
0x194f   :  { %4073 = vperm.xlu1 %9618, %v12386_v11   ;;  %v4099_v11 = vsel %vm14849_vm4, %v4097_v38, %v4098_v54  ;;  %vm14854_vm4 = vcmask 1039360  }
0x1950   :  { %vm14855_vm5 = vmmov %vm14854_vm4 }
0x1953   :  { %4076 = vperm.xlu1 %9618, %v12413_v14  }
0x1957   :  { %9715 = vset.pattern.permute.xlu1 %v14841_v7  ;;  %v8641_v7 = vpack.c.bf16 %v4101_v0, %v4099_v11 }
0x1958   :  { %4062 = vperm.xlu0 %9617, %v12413_v14   ;;  %v391_v14 = vld [vmem:[%s14578_s5 + $0x38] sm:$0x3]  ;;  %s14890_s5 = smov 99  }
0x1959   :  { %v406_v36 = vunpack.c.l.bf16 %v391_v14  ;;  %8642 = vmatprep.subr.bf16.mxu1 %v8641_v7 }
0x195a   :  { %8644 = vmatpush3.bf16.msra.mxu1 %v8641_v7 }
0x195b   :  { %v4102_v52 = vrot.slane %v406_v36, 7 }
0x195c   :  { %9714 = vset.pattern.permute.xlu0 %v14836_v3 }
0x195d   :  { %v4103_v8 = vsel %vm14851_vm10, %v4100_v15, %v4102_v52  ;;  %vm14856_vm10 = vcmask 1031168  }
0x195e   :  { %8050 = vmatprep.subr.msk.mxu1 %vm685_vm8, %v4103_v8 }
0x195f   :  { %8051 = vmatpush3.msk.msra.mxu1 %vm685_vm8, %v4103_v8 }
0x1960   :  { %8646 = vmatprep.subr.bf16.mxu1 %v8641_v7 }
0x19c7   :  { %v4028_v41 = vpop.xlane.xlu1 %4027 }
0x19c8   :  { %v4040_v51 = vmul.f32 0.083333336, %v4028_v41 }
0x19ca   :  { %v4044_v18 = vmul.f32 %v4040_v51, %v4040_v51  ;;  %v4050_v23 = vsub.f32 %v12466_v12, %v4040_v51 }
0x19cb   :  { %v4031_v61 = vpop.xlane.xlu0 %4030  ;;  %v4036_v30 = vpop.xlane.xlu1 %4035 }
0x19cc   :  { %v4041_v50 = vmul.f32 0.083333336, %v4031_v61  ;;  %v4042_v9 = vmul.f32 0.083333336, %v4036_v30 }
0x19ce   :  { %v4046_v37 = vsub.f32 %v4042_v9, %v4044_v18  ;;  %v4045_v35 = vmul.f32 %v4041_v50, %v4041_v50  ;;  %v4051_v25 = vsub.f32 %v12473_v26, %v4041_v50 }
0x19cf   :  { %v4039_v24 = vpop.xlane.xlu0 %4038  ;;  %v4074_v33 = vpop.permute.xlu1 %4073 }
0x19d0   :  { %v4048_v20 = vmax.f32 %v4046_v37, 0.0  ;;  %v4043_v60 = vmul.f32 0.083333336, %v4039_v24  ;;  %v4078_v47 = vrot.slane %v4074_v33, 4 }
0x19d2   :  { %v4052_v63 = vadd.f32 1e-05, %v4048_v20  ;;  %v4047_v22 = vsub.f32 %v4043_v60, %v4045_v35  ;;  %v4079_v12 = vsel %vm685_vm8, %v3710_v1, %v4078_v47 }
0x19d3   :  { %v12504_v16 = vpop.permute.xlu1 %4076 }
0x19d4   :  { %10420 = vrsqrt.f32 %v4052_v63  ;;  %v4049_v32 = vmax.f32 %v4047_v22, 0.0  ;;  %v4080_v54 = vrot.slane %v12504_v16, 4 }
0x19d6   :  { %v4053_v49 = vadd.f32 1e-05, %v4049_v32  ;;  %v4081_v26 = vsel %vm685_vm8, %v4078_v47, %v4080_v54 }
0x19d7   :  { %v12502_v46 = vpop.permute.xlu0 %4062 }
0x19d8   :  { %10422 = vrsqrt.f32 %v4053_v49  ;;  %v4066_v44 = vrot.slane %v12502_v46, 4 }
0x19da   :  { %v4067_v48 = vsel %vm685_vm8, %v4064_v43, %v4066_v44 }
0x19de   :  { %v10421_v45 = vpop.eup %10420 }
0x19df   :  { %v4056_v34 = vmul.f32 %v10421_v45, %v4050_v23 }
0x19e1   :  { %v4070_v59 = vmul.f32 %v4065_v40, %v4056_v34 }
0x19e2   :  { %v10423_v38 = vpop.eup %10422 }
0x19e3   :  { %v4084_v15 = vadd.f32 %v4079_v12, %v4070_v59  ;;  %v4057_v11 = vmul.f32 %v10423_v38, %v4051_v25 }
0x19e5   :  { %v4088_v0 = vmul.f32 0.1, %v4084_v15  ;;  %v4071_v28 = vmul.f32 %v4067_v48, %v4057_v11  ;;  %vm4086_vm15 = vcmp.ge.f32.partialorder %v4084_v15, 0.0  ;;  %v12567_v11 = vld [vmem:[%s14575_s1 + $0x128] sm:$0xff] }
0x19e6   :  { %v4426_v48 = vrot.slane %v12567_v11, 4 }
0x19e7   :  { %v4085_v14 = vadd.f32 %v4081_v26, %v4071_v28  ;;  %v4090_v36 = vsel %vm4086_vm15, %v4084_v15, %v4088_v0  ;;  %v12582_v28 = vld [vmem:[%s14575_s1 + $0x130] sm:$0xff]  ;;  %vm14857_vm15 = vmmov %vm14856_vm10 }
0x19e8   :  { %v4092_v13 = vmul.f32 %v4090_v36, %v11889_v6  ;;  %v4427_v0 = vsel %vm685_vm8, %v3856_v21, %v4426_v48 }
0x19e9   :  { %v4089_v1 = vmul.f32 0.1, %v4085_v14  ;;  %vm4087_vm2 = vcmp.ge.f32.partialorder %v4085_v14, 0.0 }
0x19ea   :  { %4189 = vrot.lane.b32.xlu1 %v4092_v13, %s10461_s13  ;;  %8052 = vmatprep.mubr.msk.f32.mxu1 %vm2312_vm7, %v4092_v13 }
0x19eb   :  { %v4091_v52 = vsel %vm4087_vm2, %v4085_v14, %v4089_v1  ;;  %vm14858_vm2 = vcmask 949248  }
0x19ec   :  { %v4093_v42 = vmul.f32 %v4091_v52, %v11889_v6 }
0x19ee   :  { %4191 = vrot.lane.b32.xlu1 %v4093_v42, %s10461_s13  ;;  %8053 = vmatmul.mubr.msk.f32.vlgmr.msra.gmra.mrb[28].mxu1 %vm2312_vm7, %v4093_v42  ;;  %s14892_s13 = smov 97  }
0x19ef   :  { %8648 = vmatpush3.bf16.msra.mxu1 %v8641_v7 }
0x19f0   :  { %8059 = vmatprep.subr.msk.mxu1 %vm685_vm8, %v4103_v8 }
0x19f3   :  { %8060 = vmatpush3.msk.msra.mxu1 %vm685_vm8, %v4103_v8 }
0x1a5c   :  { %v4190_v41 = vpop.permute.xlu1 %4189 }
0x1a5d   :  { %8061 = vmatprep.mubr.msk.f32.mxu1 %vm2312_vm7, %v4190_v41 }
0x1a60   :  { %v4192_v51 = vpop.permute.xlu1 %4191 }
0x1a61   :  { %8062 = vmatmul.mubr.msk.f32.vlgmr.msra.gmra.mrb[30].mxu1 %vm2312_vm7, %v4192_v51  ;;  %vm12540_vm7 = vmneg %vm1889_vm12 }
0x1a62   :  { %vm8653_vm3 = vmpackc.low %vm12540_vm7, %vm12540_vm7  ;;  %7590 = vmatprep.mubr.msk.f32.mxu1 %vm1894_vm14, %v4427_v0 }
0x1ac1   :  { %v8054_v61 = vpop.f32.mrb[28].mxu1 }
0x1ac2   :  { %v4180_v30 = vpop.f32.mrb[29].mxu1 }
0x1b34   :  { %v8063_v18 = vpop.f32.mrb[30].mxu1 }
0x1b35   :  { %v4263_v50 = vpop.f32.mrb[31].mxu1 }
0x1b36   :  { %v9619_v6 = vpack.i.bf16 %v8063_v18, %v4263_v50 }
0x1b38   :  { %9620 = vrot.lane.b32.xlu1 %v9619_v6, %s10454_s30  ;;  %s14891_s30 = smov 70  }
0x1baa   :  { %v9621_v9 = vpop.permute.xlu1 %9620 }
0x1bab   :  { %v9623_v37 = vunpack.i.h.bf16 %v9621_v9  ;;  %v9622_v7 = vunpack.i.l.bf16 %v9621_v9 }
0x1bad   :  { %v4280_v24 = vsel %vm1882_vm0, %v4180_v30, %v9622_v7  ;;  %v4281_v8 = vsel %vm1882_vm0, %v8054_v61, %v9623_v37 }
0x1bae   :  { %v9624_v35 = vpack.i.bf16 %v9622_v7, %v4280_v24  ;;  %v9629_v20 = vpack.i.bf16 %v9623_v37, %v4281_v8 }
0x1bb0   :  { %9625 = vrot.lane.b32.xlu1 %v9624_v35, %s10455_s8 }
0x1bb4   :  { %9630 = vrot.lane.b32.xlu1 %v9629_v20, %s10455_s8 }
0x1c22   :  { %v9626_v60 = vpop.permute.xlu1 %9625 }
0x1c23   :  { %v9628_v63 = vunpack.i.h.bf16 %v9626_v60  ;;  %v9627_v22 = vunpack.i.l.bf16 %v9626_v60 }
0x1c25   :  { %v4292_v32 = vsel %vm1889_vm12, %v9627_v22, %v9628_v63  ;;  %v4298_v49 = vsel %vm1889_vm12, 0.0, %v9627_v22 }
0x1c26   :  { %v4300_v33 = vsel %vm1894_vm14, %v4292_v32, 0.0  ;;  %v9631_v43 = vpop.permute.xlu1 %9630 }
0x1c27   :  { %v9633_v23 = vunpack.i.h.bf16 %v9631_v43  ;;  %v9632_v45 = vunpack.i.l.bf16 %v9631_v43  ;;  %v9669_v47 = vpack.i.bf16 %v4300_v33, %v4298_v49 }
0x1c29   :  { %v4293_v40 = vsel %vm1889_vm12, %v9632_v45, %v9633_v23  ;;  %v4299_v25 = vsel %vm1889_vm12, 0.0, %v9632_v45  ;;  %9670 = vrot.lane.b32.xlu0 %v9669_v47, %s10437_s23  ;;  %v8652_v12 = vpack.c.bf16 %v9632_v45, %v9627_v22 }
0x1c2a   :  { %v4301_v59 = vsel %vm1894_vm14, %v4293_v40, 0.0  ;;  %v8649_v38 = vpack.c.bf16 %v4293_v40, %v4292_v32 }
0x1c2b   :  { %v9634_v15 = vpack.i.bf16 %v4301_v59, %v4299_v25 }
0x1c2c   :  { %8651 = vmatprep.subr.msk.bf16.mxu1 %vm8650_vm11, %v8649_v38  ;;  %vm14859_vm11 = vmmov %vm14858_vm2 }
0x1c2d   :  { %9635 = vrot.lane.b32.xlu1 %v9634_v15, %s10437_s23  ;;  %8654 = vmatpush1.bf16.msk.msra.mxu1 %vm8653_vm3, %v8652_v12  ;;  %vm14860_vm3 = vcmask 941056  }
0x1c2e   :  { %9675 = vrot.lane.b32.xlu0 %v9669_v47, %s10436_s0 }
0x1c31   :  { %9640 = vrot.lane.b32.xlu1 %v9634_v15, %s10436_s0 }
0x1c32   :  { %9680 = vrot.lane.b32.xlu0 %v9669_v47, %s10457_s10 }
0x1c35   :  { %9645 = vrot.lane.b32.xlu1 %v9634_v15, %s10457_s10 }
0x1c36   :  { %9685 = vrot.lane.b32.xlu0 %v9669_v47, %s10456_s9 }
0x1c39   :  { %9650 = vrot.lane.b32.xlu1 %v9634_v15, %s10456_s9 }
0x1c3a   :  { %9690 = vrot.lane.b32.xlu0 %v9669_v47, %s10458_s11 }
0x1c3d   :  { %9655 = vrot.lane.b32.xlu1 %v9634_v15, %s10458_s11 }
0x1c3e   :  { %9695 = vrot.lane.b32.xlu0 %v9669_v47, %s10451_s7 }
0x1c41   :  { %9660 = vrot.lane.b32.xlu1 %v9634_v15, %s10451_s7 }
0x1c42   :  { %9700 = vrot.lane.b32.xlu0 %v9669_v47, %s10460_s15 }
0x1c45   :  { %9665 = vrot.lane.b32.xlu1 %v9634_v15, %s10460_s15 }
0x1c46   :  { %9705 = vrot.lane.b32.xlu0 %v9669_v47, %s10459_s12 }
0x1c49   :  { %9710 = vrot.lane.b32.xlu1 %v9634_v15, %s10459_s12 }
0x1c4a   :  { %4420 = vperm.xlu0 %9714, %v12582_v28  }
0x1c4e   :  { %9716 = vset.pattern.permute.xlu0 %v14829_v55 }
0x1c9b   :  { %v9671_v39 = vpop.permute.xlu0 %9670 }
0x1c9c   :  { %v9673_v26 = vunpack.i.h.bf16 %v9671_v39  ;;  %v9672_v21 = vunpack.i.l.bf16 %v9671_v39 }
0x1c9e   :  { %v4314_v52 = vsel %vm14854_vm4, %v9672_v21, %v9673_v26  ;;  %vm14861_vm4 = vmmov %vm14860_vm3 }
0x1c9f   :  { %v9636_v14 = vpop.permute.xlu1 %9635 }
0x1ca0   :  { %v9638_v36 = vunpack.i.h.bf16 %v9636_v14  ;;  %v9637_v13 = vunpack.i.l.bf16 %v9636_v14  ;;  %v9676_v1 = vpop.permute.xlu0 %9675 }
0x1ca1   :  { %v9678_v41 = vunpack.i.h.bf16 %v9676_v1  ;;  %v9677_v51 = vunpack.i.l.bf16 %v9676_v1 }
0x1ca2   :  { %v4315_v42 = vsel %vm14855_vm5, %v9637_v13, %v9638_v36  ;;  %v8655_v61 = vpack.c.bf16 %v9638_v36, %v9673_v26  ;;  %vm14862_vm5 = vcmask 867328  }
0x1ca3   :  { %v9641_v30 = vpop.permute.xlu1 %9640  ;;  %v8657_v18 = vpack.c.bf16 %v4315_v42, %v4314_v52  ;;  %v4328_v24 = vsel %vm14856_vm10, %v9677_v51, %v9678_v41  ;;  %vm14863_vm10 = vmmov %vm14862_vm5 }
0x1ca4   :  { %v9643_v50 = vunpack.i.h.bf16 %v9641_v30  ;;  %v9642_v6 = vunpack.i.l.bf16 %v9641_v30  ;;  %v9681_v9 = vpop.permute.xlu0 %9680  ;;  %8656 = vmatprep.subr.bf16.mxu1 %v8655_v61 }
0x1ca5   :  { %v9683_v37 = vunpack.i.h.bf16 %v9681_v9  ;;  %v9682_v7 = vunpack.i.l.bf16 %v9681_v9  ;;  %8658 = vmatpush1.bf16.msra.mxu1 %v8657_v18 }
0x1ca6   :  { %v4329_v35 = vsel %vm14857_vm15, %v9642_v6, %v9643_v50  ;;  %v8659_v8 = vpack.c.bf16 %v9643_v50, %v9678_v41  ;;  %vm14864_vm15 = vcmask 859136  }
0x1ca7   :  { %v9646_v20 = vpop.permute.xlu1 %9645  ;;  %v8661_v60 = vpack.c.bf16 %v4329_v35, %v4328_v24  ;;  %v4342_v49 = vsel %vm1918_vm9, %v9682_v7, %v9683_v37 }
0x1ca8   :  { %v9648_v63 = vunpack.i.h.bf16 %v9646_v20  ;;  %v9647_v22 = vunpack.i.l.bf16 %v9646_v20  ;;  %v9686_v32 = vpop.permute.xlu0 %9685  ;;  %8660 = vmatprep.subr.bf16.mxu1 %v8659_v8 }
0x1ca9   :  { %8662 = vmatpush1.bf16.msra.mxu1 %v8661_v60  ;;  %v9688_v43 = vunpack.i.h.bf16 %v9686_v32  ;;  %v9687_v23 = vunpack.i.l.bf16 %v9686_v32 }
0x1caa   :  { %v4343_v33 = vsel %vm1918_vm9, %v9647_v22, %v9648_v63  ;;  %v8663_v45 = vpack.c.bf16 %v9648_v63, %v9683_v37 }
0x1cab   :  { %v9651_v47 = vpop.permute.xlu1 %9650  ;;  %v8665_v40 = vpack.c.bf16 %v4343_v33, %v4342_v49  ;;  %v4356_v0 = vsel %vm14858_vm2, %v9687_v23, %v9688_v43  ;;  %vm14865_vm2 = vmmov %vm14864_vm15 }
0x1cac   :  { %v9653_v25 = vunpack.i.h.bf16 %v9651_v47  ;;  %v9652_v59 = vunpack.i.l.bf16 %v9651_v47  ;;  %v9691_v38 = vpop.permute.xlu0 %9690  ;;  %8664 = vmatprep.subr.bf16.mxu1 %v8663_v45  ;;  %v12604_v47 = vld [vmem:[%s14575_s1 + $0x120] sm:$0xff] }
0x1cad   :  { %v9693_v12 = vunpack.i.h.bf16 %v9691_v38  ;;  %v9692_v15 = vunpack.i.l.bf16 %v9691_v38  ;;  %8666 = vmatpush1.bf16.msra.mxu1 %v8665_v40 }
0x1cae   :  { %v4357_v39 = vsel %vm14859_vm11, %v9652_v59, %v9653_v25  ;;  %v8667_v26 = vpack.c.bf16 %v9653_v25, %v9688_v43  ;;  %vm14866_vm11 = vcmask 850944  }
0x1caf   :  { %v9656_v21 = vpop.permute.xlu1 %9655  ;;  %v8669_v14 = vpack.c.bf16 %v4357_v39, %v4356_v0  ;;  %v4370_v52 = vsel %vm14860_vm3, %v9692_v15, %v9693_v12  ;;  %vm14867_vm3 = vmmov %vm14866_vm11 }
0x1cb0   :  { %v9658_v36 = vunpack.i.h.bf16 %v9656_v21  ;;  %v9657_v13 = vunpack.i.l.bf16 %v9656_v21  ;;  %v9696_v1 = vpop.permute.xlu0 %9695  ;;  %8668 = vmatprep.subr.bf16.mxu1 %v8667_v26 }
0x1cb1   :  { %8670 = vmatpush1.bf16.msra.mxu1 %v8669_v14  ;;  %v9698_v41 = vunpack.i.h.bf16 %v9696_v1  ;;  %v9697_v51 = vunpack.i.l.bf16 %v9696_v1 }
0x1cb2   :  { %v4371_v42 = vsel %vm14861_vm4, %v9657_v13, %v9658_v36  ;;  %v8671_v61 = vpack.c.bf16 %v9658_v36, %v9693_v12  ;;  %v4424_v12 = vrot.slane %v12604_v47, 4 }
0x1cb3   :  { %v9661_v30 = vpop.permute.xlu1 %9660  ;;  %v8673_v18 = vpack.c.bf16 %v4371_v42, %v4370_v52  ;;  %v4384_v24 = vsel %vm14862_vm5, %v9697_v51, %v9698_v41 }
0x1cb4   :  { %v9663_v50 = vunpack.i.h.bf16 %v9661_v30  ;;  %v9662_v6 = vunpack.i.l.bf16 %v9661_v30  ;;  %v9701_v9 = vpop.permute.xlu0 %9700  ;;  %8672 = vmatprep.subr.bf16.mxu1 %v8671_v61  ;;  %v4425_v21 = vsel %vm685_vm8, %v3854_v57, %v4424_v12 }
0x1cb5   :  { %v9703_v37 = vunpack.i.h.bf16 %v9701_v9  ;;  %v9702_v7 = vunpack.i.l.bf16 %v9701_v9  ;;  %8674 = vmatpush1.bf16.msra.mxu1 %v8673_v18 }
0x1cb6   :  { %v4385_v35 = vsel %vm14863_vm10, %v9662_v6, %v9663_v50  ;;  %v8675_v8 = vpack.c.bf16 %v9663_v50, %v9698_v41  ;;  %vm8688_vm10 = vmpackc.low %vm14842_vm13, %vm1894_vm14 }
0x1cb7   :  { %v9666_v20 = vpop.permute.xlu1 %9665  ;;  %v8677_v60 = vpack.c.bf16 %v4385_v35, %v4384_v24  ;;  %v4398_v49 = vsel %vm14864_vm15, %v9702_v7, %v9703_v37 }
0x1cb8   :  { %v9668_v63 = vunpack.i.h.bf16 %v9666_v20  ;;  %v9667_v22 = vunpack.i.l.bf16 %v9666_v20  ;;  %v9706_v32 = vpop.permute.xlu0 %9705  ;;  %8676 = vmatprep.subr.bf16.mxu1 %v8675_v8 }
0x1cb9   :  { %8678 = vmatpush1.bf16.msra.mxu1 %v8677_v60  ;;  %v9708_v43 = vunpack.i.h.bf16 %v9706_v32  ;;  %v9707_v23 = vunpack.i.l.bf16 %v9706_v32 }
0x1cba   :  { %v4399_v33 = vsel %vm14865_vm2, %v9667_v22, %v9668_v63  ;;  %v8679_v45 = vpack.c.bf16 %v9668_v63, %v9703_v37  ;;  %vm8691_vm2 = vmpackc.low %vm14842_vm13, %vm12540_vm7 }
0x1cbb   :  { %v9711_v40 = vpop.permute.xlu1 %9710  ;;  %v8681_v25 = vpack.c.bf16 %v4399_v33, %v4398_v49  ;;  %v4412_v15 = vsel %vm14866_vm11, %v9707_v23, %v9708_v43  ;;  %vm14870_vm11 = vcmask 1031168  }
0x1cbc   :  { %v9713_v59 = vunpack.i.h.bf16 %v9711_v40  ;;  %v9712_v38 = vunpack.i.l.bf16 %v9711_v40  ;;  %8680 = vmatprep.subr.bf16.mxu1 %v8679_v45 }
0x1cbd   :  { %8682 = vmatpush1.bf16.msra.mxu1 %v8681_v25 }
0x1cbe   :  { %v4413_v0 = vsel %vm14867_vm3, %v9712_v38, %v9713_v59  ;;  %v8683_v39 = vpack.c.bf16 %v9713_v59, %v9708_v43  ;;  %vm14871_vm3 = vcmask 949248  }
0x1cbf   :  { %v8685_v26 = vpack.c.bf16 %v4413_v0, %v4412_v15 }
0x1cc0   :  { %8684 = vmatprep.subr.bf16.mxu1 %v8683_v39 }
0x1cc1   :  { %8686 = vmatpush1.bf16.msra.mxu1 %v8685_v26 }
0x1cc4   :  { %4499 = vmatmul.mubr.f32.vlgmr.msra.gmra.mrb[32].mxu1 %v4425_v21 }
0x1cc5   :  { %4892 = vmatprep.mubr.f32.mxu1 %v14805_v17 }
0x1cc9   :  { %v12615_v14 = vpop.permute.xlu0 %4420 }
0x1cca   :  { %v4429_v36 = vrot.slane %v12615_v14, 4 }
0x1ccc   :  { %v4430_v13 = vsel %vm685_vm8, %v3866_v5, %v4429_v36 }
0x1d97   :  { %v4500_v1 = vpop.f32.mrb[32].mxu1 }
0x1d98   :  { %v4501_v52 = vadd.f32 %v4500_v1, %v4430_v13  ;;  %v4502_v42 = vpop.f32.mrb[33].mxu1 }
0x1d99   :  { %v4503_v41 = vadd.f32 %v4502_v42, %v4430_v13 }
0x1d9a   :  { %v4505_v29 = vmul.f32 %v4501_v52, %v11758_v27 }
0x1d9b   :  { %v4506_v57 = vmul.f32 %v4503_v41, %v11764_v62 }
0x1d9c   :  { %v4511_v30 = vmul.f32 %v4505_v29, %v4501_v52 }
0x1d9d   :  { %v4512_v51 = vmul.f32 %v4506_v57, %v4503_v41  ;;  %v4507_v61 = vsel %vm2077_vm6, %v4506_v57, 0.0 }
0x1d9e   :  { %v4508_v18 = vadd.f32 %v4507_v61, %v4505_v29 }
0x1d9f   :  { %v4513_v50 = vsel %vm2077_vm6, %v4512_v51, 0.0 }
0x1da0   :  { %4509 = vadd.xlane.f32.xlu1 %v4508_v18  ;;  %v4514_v6 = vadd.f32 %v4513_v50, %v4511_v30  ;;  %v12680_v30 = vld [vmem:[%s14575_s1 + $0x148] sm:$0xff] }
0x1da2   :  { %4515 = vadd.xlane.f32.xlu0 %v4514_v6 }
0x1db1   :  { %4529 = vperm.xlu1 %9715, %v12582_v28  }
0x1db5   :  { %9718 = vrot.lane.b32.xlu1 %v9717_v19, %s10455_s8 }
0x1db8   :  { %4537 = vperm.xlu0 %9716, %v12582_v28  }
0x1dbc   :  { %9807 = vset.pattern.permute.xlu0 %v14836_v3 }
0x1e2d   :  { %v4510_v53 = vpop.xlane.xlu1 %4509 }
0x1e2e   :  { %v4517_v5 = vmul.f32 0.013888889, %v4510_v53 }
0x1e2f   :  { %v4516_v9 = vpop.xlane.xlu0 %4515 }
0x1e30   :  { %v4518_v37 = vmul.f32 0.013888889, %v4516_v9  ;;  %v4519_v7 = vmul.f32 %v4517_v5, %v4517_v5  ;;  %v4522_v33 = vsub.f32 %v4501_v52, %v4517_v5  ;;  %v4523_v43 = vsub.f32 %v4503_v41, %v4517_v5  ;;  %v60_v5 = vld [vmem:[%s14575_s1 + $0x140] sm:$0xff] }
0x1e31   :  { %v12634_v24 = vpop.permute.xlu1 %4529  ;;  %v4687_v9 = vrot.slane %v60_v5, 4 }
0x1e32   :  { %v4520_v35 = vsub.f32 %v4518_v37, %v4519_v7  ;;  %v4531_v49 = vrot.slane %v12634_v24, 4 }
0x1e33   :  { %v4688_v7 = vsel %vm685_vm8, %v4426_v48, %v4687_v9 }
0x1e34   :  { %v4521_v8 = vmax.f32 %v4520_v35, 0.0  ;;  %v4532_v59 = vsel %vm685_vm8, %v4066_v44, %v4531_v49  ;;  %7597 = vmatprep.mubr.msk.f32.mxu0 %vm1894_vm14, %v4688_v7 }
0x1e35   :  { %v9719_v20 = vpop.permute.xlu1 %9718 }
0x1e36   :  { %v4524_v60 = vadd.f32 1e-05, %v4521_v8  ;;  %v9721_v63 = vunpack.i.h.bf16 %v9719_v20  ;;  %v12636_v22 = vunpack.i.l.bf16 %v9719_v20 }
0x1e37   :  { %v12646_v32 = vpop.permute.xlu0 %4537 }
0x1e38   :  { %10424 = vrsqrt.f32 %v4524_v60  ;;  %v12640_v10 = vsel %vm1889_vm12, %v12636_v22, %v9721_v63  ;;  %v2134_v31 = vsel %vm1889_vm12, 0.0, %v12636_v22  ;;  %v4539_v45 = vrot.slane %v12646_v32, 4 }
0x1e39   :  { %v2135_v19 = vsel %vm1894_vm14, %v12640_v10, 0.0 }
0x1e3a   :  { %v9777_v28 = vpack.i.bf16 %v2135_v19, %v2134_v31  ;;  %v4540_v0 = vsel %vm685_vm8, %v4080_v54, %v4539_v45 }
0x1e42   :  { %v10425_v23 = vpop.eup %10424 }
0x1e43   :  { %v4526_v40 = vmul.f32 %v10425_v23, %v4522_v33  ;;  %v4527_v25 = vmul.f32 %v10425_v23, %v4523_v43 }
0x1e45   :  { %v4534_v38 = vmul.f32 %v4532_v59, %v4526_v40  ;;  %v4535_v15 = vmul.f32 %v4532_v59, %v4527_v25 }
0x1e47   :  { %v4542_v39 = vadd.f32 %v4540_v0, %v4534_v38  ;;  %v4543_v26 = vadd.f32 %v4540_v0, %v4535_v15 }
0x1e49   :  { %vm4544_vm4 = vcmp.ge.f32.partialorder %v4542_v39, 0.0  ;;  %vm4545_vm5 = vcmp.ge.f32.partialorder %v4543_v26, 0.0  ;;  %v4546_v21 = vmul.f32 0.1, %v4542_v39  ;;  %v4547_v13 = vmul.f32 0.1, %v4543_v26 }
0x1e4b   :  { %v4548_v1 = vsel %vm4544_vm4, %v4542_v39, %v4546_v21  ;;  %v4549_v52 = vsel %vm4545_vm5, %v4543_v26, %v4547_v13  ;;  %vm14872_vm4 = vcmask 941056   ;;  %vm14873_vm5 = vcmask 867328  }
0x1e4c   :  { %v4550_v46 = vmul.f32 %v4548_v1, %v11758_v27  ;;  %v4551_v44 = vmul.f32 %v4549_v52, %v11764_v62 }
0x1e4e   :  { %v9722_v42 = vpack.i.bf16 %v4551_v44, %v4550_v46 }
0x1e50   :  { %9723 = vrot.lane.b32.xlu1 %v9722_v42, %s10455_s8 }
0x1e54   :  { %9728 = vrot.lane.b32.xlu1 %v9777_v28, %s10437_s23 }
0x1ec2   :  { %v9724_v16 = vpop.permute.xlu1 %9723 }
0x1ec3   :  { %v9726_v41 = vunpack.i.h.bf16 %v9724_v16  ;;  %v9725_v54 = vunpack.i.l.bf16 %v9724_v16 }
0x1ec5   :  { %v4558_v29 = vsel %vm1889_vm12, %v9725_v54, %v9726_v41  ;;  %v4561_v57 = vsel %vm1889_vm12, 0.0, %v9725_v54  ;;  %vm14868_vm12 = vcmask 1039360  }
0x1ec6   :  { %v4562_v51 = vsel %vm1894_vm14, %v4558_v29, 0.0  ;;  %v9729_v18 = vpop.permute.xlu1 %9728  ;;  %vm14869_vm15 = vmmov %vm14868_vm12 }
0x1ec7   :  { %v9757_v61 = vpack.i.bf16 %v4562_v51, %v4561_v57  ;;  %v12686_v50 = vunpack.i.h.bf16 %v9729_v18  ;;  %v9730_v6 = vunpack.i.l.bf16 %v9729_v18 }
0x1ec9   :  { %9758 = vrot.lane.b32.xlu0 %v9757_v61, %s10451_s7  ;;  %9733 = vrot.lane.b32.xlu1 %v9757_v61, %s10437_s23  ;;  %v12691_v53 = vsel %vm14868_vm12, %v9730_v6, %v12686_v50  ;;  %vm14874_vm12 = vcmask 859136  }
0x1eca   :  { %v9802_v37 = vpack.i.bf16 %v12686_v50, %v12691_v53 }
0x1ecd   :  { %9768 = vrot.lane.b32.xlu0 %v9757_v61, %s10459_s12  ;;  %9738 = vrot.lane.b32.xlu1 %v9757_v61, %s10436_s0 }
0x1ed1   :  { %9778 = vrot.lane.b32.xlu0 %v9777_v28, %s10457_s10  ;;  %9743 = vrot.lane.b32.xlu1 %v9757_v61, %s10457_s10 }
0x1ed5   :  { %9788 = vrot.lane.b32.xlu0 %v9777_v28, %s10458_s11  ;;  %9748 = vrot.lane.b32.xlu1 %v9757_v61, %s10456_s9 }
0x1ed9   :  { %9798 = vrot.lane.b32.xlu0 %v9777_v28, %s10460_s15  ;;  %9753 = vrot.lane.b32.xlu1 %v9757_v61, %s10458_s11 }
0x1edd   :  { %4681 = vperm.xlu0 %9807, %v12680_v30   ;;  %9763 = vrot.lane.b32.xlu1 %v9757_v61, %s10460_s15 }
0x1ee1   :  { %9773 = vrot.lane.b32.xlu1 %v9777_v28, %s10436_s0  ;;  %9808 = vset.pattern.permute.xlu0 %v14829_v55 }
0x1ee5   :  { %9783 = vrot.lane.b32.xlu1 %v9777_v28, %s10456_s9 }
0x1ee9   :  { %9793 = vrot.lane.b32.xlu1 %v9777_v28, %s10451_s7 }
0x1eed   :  { %9803 = vrot.lane.b32.xlu1 %v9802_v37, %s10460_s15 }
0x1f3b   :  { %v9734_v35 = vpop.permute.xlu1 %9733  ;;  %v9759_v59 = vpop.permute.xlu0 %9758 }
0x1f3c   :  { %v9736_v8 = vunpack.i.h.bf16 %v9734_v35  ;;  %v9735_v20 = vunpack.i.l.bf16 %v9734_v35  ;;  %v9761_v1 = vunpack.i.h.bf16 %v9759_v59  ;;  %v9760_v46 = vunpack.i.l.bf16 %v9759_v59 }
0x1f3e   :  { %v8687_v60 = vpack.c.bf16 %v9736_v8, %v4558_v29  ;;  %v4569_v63 = vsel %vm14869_vm15, %v9735_v20, %v9736_v8  ;;  %v4604_v18 = vsel %vm14873_vm5, %v9760_v46, %v9761_v1  ;;  %vm14875_vm15 = vcmask 850944  }
0x1f3f   :  { %v8690_v11 = vpack.c.bf16 %v4569_v63, %v9725_v54  ;;  %v9739_v31 = vpop.permute.xlu1 %9738  ;;  %v9769_v52 = vpop.permute.xlu0 %9768 }
0x1f40   :  { %8689 = vmatprep.subr.msk.bf16.mxu0 %vm8688_vm10, %v8687_v60  ;;  %v9741_v48 = vunpack.i.h.bf16 %v9739_v31  ;;  %v9740_v19 = vunpack.i.l.bf16 %v9739_v31  ;;  %v9771_v29 = vunpack.i.h.bf16 %v9769_v52  ;;  %v9770_v57 = vunpack.i.l.bf16 %v9769_v52  ;;  %vm8706_vm10 = vmpackc.low %vm1894_vm14, %vm14842_vm13 }
0x1f41   :  { %8692 = vmatpush1.bf16.msk.msra.mxu0 %vm8691_vm2, %v8690_v11  ;;  %vm8709_vm2 = vmpackc.low %vm12540_vm7, %vm14842_vm13 }
0x1f42   :  { %v4576_v23 = vsel %vm14870_vm11, %v9740_v19, %v9741_v48  ;;  %v4618_v35 = vsel %vm14875_vm15, %v9770_v57, %v9771_v29  ;;  %v8705_v8 = vpack.c.bf16 %v12640_v10, %v9771_v29  ;;  %vm14876_vm14 = vmmov %vm14871_vm3 }
0x1f43   :  { %v9744_v28 = vpop.permute.xlu1 %9743  ;;  %v9779_v9 = vpop.permute.xlu0 %9778  ;;  %v8708_v63 = vpack.c.bf16 %v12636_v22, %v4618_v35  ;;  %vm14877_vm7 = vmmov %vm14873_vm5 }
0x1f44   :  { %v9746_v33 = vunpack.i.h.bf16 %v9744_v28  ;;  %v9745_v43 = vunpack.i.l.bf16 %v9744_v28  ;;  %v9781_v10 = vunpack.i.h.bf16 %v9779_v9 }
0x1f46   :  { %v4583_v40 = vsel %vm1918_vm9, %v9745_v43, %v9746_v33  ;;  %v8693_v25 = vpack.c.bf16 %v9746_v33, %v9741_v48  ;;  %v9780_v43 = vunpack.i.l.bf16 %v9779_v9 }
0x1f47   :  { %v9749_v38 = vpop.permute.xlu1 %9748  ;;  %v8695_v15 = vpack.c.bf16 %v4583_v40, %v4576_v23  ;;  %v9789_v33 = vpop.permute.xlu0 %9788 }
0x1f48   :  { %8694 = vmatprep.subr.bf16.mxu0 %v8693_v25  ;;  %v9751_v0 = vunpack.i.h.bf16 %v9749_v38  ;;  %v9750_v39 = vunpack.i.l.bf16 %v9749_v38  ;;  %v4641_v38 = vsel %vm1918_vm9, %v9780_v43, %v9781_v10  ;;  %vm14879_vm9 = vmmov %vm14874_vm12  ;;  %v12813_v43 = vld [vmem:[%s14579_s4 + $0x40] ss:$16 sps:$4 sm:$0xff]  }
0x1f49   :  { %8696 = vmatpush1.bf16.msra.mxu0 %v8695_v15  ;;  %v9791_v15 = vunpack.i.h.bf16 %v9789_v33 }
0x1f4a   :  { %v4590_v44 = vsel %vm14871_vm3, %v9750_v39, %v9751_v0  ;;  %vm14878_vm3 = vmmov %vm14872_vm4 }
0x1f4b   :  { %v9754_v26 = vpop.permute.xlu1 %9753 }
0x1f4c   :  { %v9756_v21 = vunpack.i.h.bf16 %v9754_v26  ;;  %v9755_v13 = vunpack.i.l.bf16 %v9754_v26 }
0x1f4e   :  { %v4597_v42 = vsel %vm14872_vm4, %v9755_v13, %v9756_v21  ;;  %v8697_v16 = vpack.c.bf16 %v9756_v21, %v9751_v0  ;;  %v9790_v0 = vunpack.i.l.bf16 %v9789_v33  ;;  %vm14880_vm4 = vmmov %vm14879_vm9  ;;  %v12800_v33 = vld [vmem:[%s14579_s4 + $0x28] ss:$16 sps:$4 sm:$0xff]  }
0x1f4f   :  { %v9764_v41 = vpop.permute.xlu1 %9763  ;;  %v8699_v54 = vpack.c.bf16 %v4597_v42, %v4590_v44  ;;  %v59_v42 = vld [vmem:[%s14575_s1 + $0x138] sm:$0xff] }
0x1f50   :  { %v9766_v51 = vunpack.i.h.bf16 %v9764_v41  ;;  %v9765_v61 = vunpack.i.l.bf16 %v9764_v41  ;;  %8698 = vmatprep.subr.bf16.mxu0 %v8697_v16  ;;  %v12735_v29 = vrot.slane %v59_v42, 4 }
0x1f51   :  { %8700 = vmatpush1.bf16.msra.mxu0 %v8699_v54 }
0x1f52   :  { %v4611_v6 = vsel %vm14874_vm12, %v9765_v61, %v9766_v51  ;;  %v8701_v5 = vpack.c.bf16 %v9766_v51, %v9761_v1  ;;  %v4686_v61 = vsel %vm685_vm8, %v4424_v12, %v12735_v29 }
0x1f53   :  { %v9774_v37 = vpop.permute.xlu1 %9773  ;;  %v8703_v7 = vpack.c.bf16 %v4611_v6, %v4604_v18 }
0x1f54   :  { %v9776_v20 = vunpack.i.h.bf16 %v9774_v37  ;;  %v9775_v60 = vunpack.i.l.bf16 %v9774_v37  ;;  %8702 = vmatprep.subr.bf16.mxu0 %v8701_v5 }
0x1f55   :  { %8704 = vmatpush1.bf16.msra.mxu0 %v8703_v7 }
0x1f56   :  { %8707 = vmatprep.subr.msk.bf16.mxu0 %vm8706_vm10, %v8705_v8  ;;  %v4634_v31 = vsel %vm14870_vm11, %v9775_v60, %v9776_v20  ;;  %v8711_v28 = vpack.c.bf16 %v9776_v20, %v12686_v50  ;;  %v9799_v50 = vpop.permute.xlu0 %9798 }
0x1f57   :  { %v9784_v11 = vpop.permute.xlu1 %9783  ;;  %v8713_v40 = vpack.c.bf16 %v4634_v31, %v12691_v53  ;;  %v4655_v53 = vsel %vm14878_vm3, %v9790_v0, %v9791_v15  ;;  %v9801_v46 = vunpack.i.h.bf16 %v9799_v50  ;;  %v9800_v44 = vunpack.i.l.bf16 %v9799_v50  ;;  %v12770_v31 = vld [vmem:[%s14579_s4] ss:$16 sps:$4 sm:$0xff]   ;;  %v12860_v0 = vld [vmem:[%s14579_s4 + $0x68] ss:$16 sps:$4 sm:$0xff]  }
0x1f58   :  { %v9786_v48 = vunpack.i.h.bf16 %v9784_v11  ;;  %v9785_v19 = vunpack.i.l.bf16 %v9784_v11  ;;  %v10376_v11 = vld [vmem:[%s14579_s4 + $0x4] ss:$16 sps:$4 sm:$0xff]  }
0x1f59   :  { %8710 = vmatpush1.bf16.msk.msra.mxu0 %vm8709_vm2, %v8708_v63  ;;  %v4673_v57 = vsel %vm14880_vm4, %v9800_v44, %v9801_v46  ;;  %8728 = vmatprep.subr.bf16.mxu1 %v10376_v11  ;;  %vm1242_vm4 = vcmask 605184  }
0x1f5a   :  { %8712 = vmatprep.subr.bf16.mxu0 %v8711_v28  ;;  %v4648_v34 = vsel %vm14876_vm14, %v9785_v19, %v9786_v48  ;;  %v8715_v22 = vpack.c.bf16 %v9786_v48, %v9781_v10  ;;  %v10379_v48 = vld [vmem:[%s14579_s4 + $0xc] ss:$16 sps:$4 sm:$0xff]   ;;  %8730 = vmatpush1.bf16.msra.mxu1 %v12770_v31  ;;  %v12795_v28 = vld [vmem:[%s14579_s4 + $0x20] ss:$16 sps:$4 sm:$0xff]   ;;  %v12807_v10 = vld [vmem:[%s14579_s4 + $0x44] ss:$16 sps:$4 sm:$0xff]  }
0x1f5b   :  { %v9794_v23 = vpop.permute.xlu1 %9793  ;;  %v8717_v26 = vpack.c.bf16 %v4648_v34, %v4641_v38  ;;  %v12789_v19 = vld [vmem:[%s14579_s4 + $0x2c] ss:$16 sps:$4 sm:$0xff]   ;;  %v12830_v34 = vld [vmem:[%s14579_s4 + $0x48] ss:$16 sps:$4 sm:$0xff]  }
0x1f5c   :  { %v9796_v25 = vunpack.i.h.bf16 %v9794_v23  ;;  %v9795_v59 = vunpack.i.l.bf16 %v9794_v23  ;;  %v4682_v18 = vpop.permute.xlu0 %4681  ;;  %v12818_v23 = vld [vmem:[%s14579_s4 + $0x4c] ss:$16 sps:$4 sm:$0xff]  }
0x1f5d   :  { %8714 = vmatpush1.bf16.msra.mxu0 %v8713_v40  ;;  %v12743_v6 = vrot.slane %v4682_v18, 4  ;;  %v12824_v40 = vld [vmem:[%s14579_s4 + $0x64] ss:$16 sps:$4 sm:$0xff]   ;;  %v12852_v38 = vld [vmem:[%s14579_s4 + $0x88] sm:$0x11] }
0x1f5e   :  { %8716 = vmatprep.subr.bf16.mxu0 %v8715_v22  ;;  %v4662_v21 = vsel %vm14877_vm7, %v9795_v59, %v9796_v25  ;;  %v8719_v52 = vpack.c.bf16 %v9796_v25, %v9791_v15  ;;  %v12836_v25 = vld [vmem:[%s14579_s4 + $0x6c] ss:$16 sps:$4 sm:$0xff]   ;;  %v12841_v59 = vld [vmem:[%s14579_s4 + $0x80] sm:$0x11]  ;;  %v376_v50 = vunpack.c.h.bf16 %v12852_v38 }
0x1f5f   :  { %v9804_v39 = vpop.permute.xlu1 %9803  ;;  %v8721_v16 = vpack.c.bf16 %v4662_v21, %v4655_v53  ;;  %v4691_v5 = vsel %vm685_vm8, %v4429_v36, %v12743_v6  ;;  %v12847_v22 = vld [vmem:[%s14579_s4 + $0x60] ss:$16 sps:$4 sm:$0xff]   ;;  %v374_v15 = vunpack.c.h.bf16 %v12841_v59 }
0x1f60   :  { %v9806_v13 = vunpack.i.h.bf16 %v9804_v39  ;;  %v9805_v1 = vunpack.i.l.bf16 %v9804_v39  ;;  %v373_v39 = vunpack.c.l.bf16 %v12841_v59 }
0x1f61   :  { %8718 = vmatpush1.bf16.msra.mxu0 %v8717_v26  ;;  %v375_v26 = vunpack.c.l.bf16 %v12852_v38 }
0x1f62   :  { %8720 = vmatprep.subr.bf16.mxu0 %v8719_v52  ;;  %v4674_v41 = vsel %vm14879_vm9, %v9805_v1, %v9806_v13  ;;  %v8723_v54 = vpack.c.bf16 %v9806_v13, %v9801_v46  ;;  %vm14889_vm9 = vcmask 506880  }
0x1f63   :  { %v8725_v51 = vpack.c.bf16 %v4674_v41, %v4673_v57 }
0x1f65   :  { %8722 = vmatpush1.bf16.msra.mxu0 %v8721_v16 }
0x1f66   :  { %8724 = vmatprep.subr.bf16.mxu0 %v8723_v54 }
0x1f69   :  { %8726 = vmatpush1.bf16.msra.mxu0 %v8725_v51 }
0x1f6a   :  { %8744 = vmatprep.subr.bf16.mxu0 %v10379_v48 }
0x1f6c   :  { %4760 = vmatmul.mubr.f32.vlgmr.msra.gmra.mrb[32].mxu0 %v4686_v61 }
0x1f6d   :  { %4963 = vmatprep.mubr.f32.mxu0 %v14805_v17 }
0x203f   :  { %v4761_v9 = vpop.f32.mrb[32].mxu0 }
0x2040   :  { %v12749_v37 = vadd.f32 %v4761_v9, %v4691_v5  ;;  %v4763_v7 = vpop.f32.mrb[33].mxu0 }
0x2041   :  { %v12751_v35 = vadd.f32 %v4763_v7, %v4691_v5 }
0x2042   :  { %v4766_v47 = vmul.f32 %v12749_v37, %v11758_v27 }
0x2043   :  { %v4767_v12 = vmul.f32 %v12751_v35, %v11764_v62 }
0x2044   :  { %v4772_v14 = vmul.f32 %v4766_v47, %v12749_v37 }
0x2045   :  { %v4773_v8 = vmul.f32 %v4767_v12, %v12751_v35  ;;  %v4768_v20 = vsel %vm2077_vm6, %v4767_v12, 0.0 }
0x2046   :  { %v4769_v60 = vadd.f32 %v4768_v20, %v4766_v47 }
0x2047   :  { %v4774_v36 = vsel %vm2077_vm6, %v4773_v8, 0.0  ;;  %vm14881_vm6 = vcmask 1041408  }
0x2048   :  { %4770 = vadd.xlane.f32.xlu1 %v4769_v60  ;;  %v4775_v63 = vadd.f32 %v4774_v36, %v4772_v14  ;;  %vm14882_vm5 = vmmov %vm14881_vm6 }
0x2049   :  { %vm14883_vm12 = vmmov %vm14882_vm5 }
0x204a   :  { %4776 = vadd.xlane.f32.xlu0 %v4775_v63  ;;  %vm14884_vm10 = vmmov %vm14882_vm5 }
0x204b   :  { %vm14885_vm11 = vmmov %vm14882_vm5 }
0x204c   :  { %vm14886_vm14 = vmmov %vm14882_vm5 }
0x204d   :  { %vm14887_vm7 = vmmov %vm14882_vm5 }
0x204e   :  { %vm14888_vm3 = vmmov %vm14882_vm5 }
0x2059   :  { %4790 = vperm.xlu1 %9715, %v12680_v30  }
0x2060   :  { %4798 = vperm.xlu0 %9808, %v12680_v30   ;;  %v12778_v30 = vld [vmem:[%s14579_s4 + $0x8] ss:$16 sps:$4 sm:$0xff]  }
0x2061   :  { %8746 = vmatpush1.bf16.msra.mxu0 %v12778_v30 }
0x2062   :  { %8748 = vmatprep.subr.bf16.mxu0 %v12789_v19 }
0x2064   :  { %10169 = vset.pattern.permute.xlu0 %v14836_v3  ;;  %v12784_v3 = vld [vmem:[%s14579_s4 + $0x24] ss:$16 sps:$4 sm:$0xff]   ;;  %s10475_s4 = smov 30  }
0x2065   :  { %8732 = vmatprep.subr.bf16.mxu1 %v12784_v3  ;;  %8750 = vmatpush1.bf16.msra.mxu0 %v12800_v33 }
0x2066   :  { %8734 = vmatpush1.bf16.msra.mxu1 %v12795_v28  ;;  %8752 = vmatprep.subr.bf16.mxu0 %v12818_v23 }
0x2067   :  { %8736 = vmatprep.subr.bf16.mxu1 %v12807_v10 }
0x2069   :  { %8754 = vmatpush1.bf16.msra.mxu0 %v12830_v34 }
0x206a   :  { %8738 = vmatpush1.bf16.msra.mxu1 %v12813_v43  ;;  %8756 = vmatprep.subr.bf16.mxu0 %v12836_v25 }
0x206b   :  { %8740 = vmatprep.subr.bf16.mxu1 %v12824_v40 }
0x206d   :  { %8758 = vmatpush1.bf16.msra.mxu0 %v12860_v0 }
0x206e   :  { %8742 = vmatpush1.bf16.msra.mxu1 %v12847_v22  ;;  %7601 = vmatprep.subr.msk.mxu0 %vm14882_vm5, %v376_v50  ;;  %vm14896_vm5 = vcmask 809984  }
0x206f   :  { %7598 = vmatprep.subr.msk.mxu1 %vm14881_vm6, %v374_v15 }
0x2071   :  { %7602 = vmatpush1.msk.msra.mxu0 %vm14884_vm10, %v375_v26 }
0x2072   :  { %7599 = vmatpush1.msk.msra.mxu1 %vm14883_vm12, %v373_v39  ;;  %8776 = vmatprep.subr.bf16.mxu0 %v10379_v48 }
0x2073   :  { %8760 = vmatprep.subr.bf16.mxu1 %v10376_v11 }
0x20d5   :  { %v4771_v21 = vpop.xlane.xlu1 %4770 }
0x20d6   :  { %v4778_v13 = vmul.f32 0.013888889, %v4771_v21 }
0x20d7   :  { %v4777_v1 = vpop.xlane.xlu0 %4776 }
0x20d8   :  { %v4779_v52 = vmul.f32 0.013888889, %v4777_v1  ;;  %v4780_v53 = vmul.f32 %v4778_v13, %v4778_v13  ;;  %v4783_v57 = vsub.f32 %v12749_v37, %v4778_v13  ;;  %v4784_v51 = vsub.f32 %v12751_v35, %v4778_v13 }
0x20d9   :  { %v4791_v16 = vpop.permute.xlu1 %4790 }
0x20da   :  { %v4781_v46 = vsub.f32 %v4779_v52, %v4780_v53  ;;  %v12878_v54 = vrot.slane %v4791_v16, 4 }
0x20dc   :  { %v4782_v44 = vmax.f32 %v4781_v46, 0.0  ;;  %v4793_v7 = vsel %vm685_vm8, %v4531_v49, %v12878_v54 }
0x20de   :  { %v4785_v42 = vadd.f32 1e-05, %v4782_v44 }
0x20df   :  { %v4799_v41 = vpop.permute.xlu0 %4798 }
0x20e0   :  { %10426 = vrsqrt.f32 %v4785_v42  ;;  %v12882_v18 = vrot.slane %v4799_v41, 4 }
0x20e2   :  { %v4801_v8 = vsel %vm685_vm8, %v4539_v45, %v12882_v18 }
0x20ea   :  { %v10427_v61 = vpop.eup %10426 }
0x20eb   :  { %v4787_v5 = vmul.f32 %v10427_v61, %v4783_v57  ;;  %v4788_v9 = vmul.f32 %v10427_v61, %v4784_v51 }
0x20ed   :  { %v4795_v47 = vmul.f32 %v4793_v7, %v4787_v5  ;;  %v4796_v12 = vmul.f32 %v4793_v7, %v4788_v9 }
0x20ef   :  { %v4803_v37 = vadd.f32 %v4801_v8, %v4795_v47  ;;  %v4804_v20 = vadd.f32 %v4801_v8, %v4796_v12 }
0x20f1   :  { %vm4805_vm15 = vcmp.ge.f32.partialorder %v4803_v37, 0.0  ;;  %v4807_v35 = vmul.f32 0.1, %v4803_v37  ;;  %v4808_v14 = vmul.f32 0.1, %v4804_v20  ;;  %vm4806_vm2 = vcmp.ge.f32.partialorder %v4804_v20, 0.0 }
0x20f3   :  { %v4809_v60 = vsel %vm4805_vm15, %v4803_v37, %v4807_v35  ;;  %v4810_v63 = vsel %vm4806_vm2, %v4804_v20, %v4808_v14  ;;  %vm14898_vm15 = vcmask 1031168   ;;  %vm14899_vm2 = vcmask 793600  }
0x20f4   :  { %v4811_v36 = vmul.f32 %v4809_v60, %v11758_v27  ;;  %v4812_v24 = vmul.f32 %v4810_v63, %v11764_v62 }
0x20f6   :  { %4971 = vrot.lane.b32.xlu1 %v4811_v36, %s10452_s3  ;;  %7600 = vmatmul.mubr.msk.f32.vlgmr.msra.gmra.mrb[34].mxu1 %vm1882_vm0, %v4811_v36 }
0x20f7   :  { %7603 = vmatmul.mubr.msk.f32.vlgmr.msra.gmra.mrb[34].mxu0 %vm1882_vm0, %v4811_v36  ;;  %8762 = vmatpush1.bf16.msra.mxu1 %v12770_v31 }
0x20f8   :  { %8778 = vmatpush1.bf16.msra.mxu0 %v12778_v30  ;;  %8764 = vmatprep.subr.bf16.mxu1 %v12784_v3 }
0x20f9   :  { %8780 = vmatprep.subr.bf16.mxu0 %v12789_v19  ;;  %5042 = vmatprep.mubr.f32.mxu1 %v14805_v17 }
0x20fa   :  { %4973 = vrot.lane.b32.xlu1 %v4812_v24, %s10452_s3  ;;  %5113 = vmatprep.mubr.f32.mxu0 %v14805_v17  ;;  %s10476_s3 = smov 22  }
0x20fb   :  { %8766 = vmatpush1.bf16.msra.mxu1 %v12795_v28 }
0x20fc   :  { %8782 = vmatpush1.bf16.msra.mxu0 %v12800_v33  ;;  %8768 = vmatprep.subr.bf16.mxu1 %v12807_v10 }
0x20fd   :  { %8784 = vmatprep.subr.bf16.mxu0 %v12818_v23 }
0x20ff   :  { %8770 = vmatpush1.bf16.msra.mxu1 %v12813_v43 }
0x2100   :  { %8786 = vmatpush1.bf16.msra.mxu0 %v12830_v34  ;;  %8772 = vmatprep.subr.bf16.mxu1 %v12824_v40 }
0x2101   :  { %8788 = vmatprep.subr.bf16.mxu0 %v12836_v25 }
0x2103   :  { %8774 = vmatpush1.bf16.msra.mxu1 %v12847_v22 }
0x2104   :  { %8790 = vmatpush1.bf16.msra.mxu0 %v12860_v0  ;;  %7604 = vmatprep.subr.msk.mxu1 %vm14885_vm11, %v374_v15  ;;  %vm14900_vm11 = vmmov %vm14896_vm5 }
0x2105   :  { %7607 = vmatprep.subr.msk.mxu0 %vm14886_vm14, %v376_v50  ;;  %vm14901_vm14 = vmmov %vm14898_vm15 }
0x2107   :  { %7605 = vmatpush1.msk.msra.mxu1 %vm14887_vm7, %v373_v39  ;;  %vm14902_vm7 = vcmask 801792  }
0x2108   :  { %7608 = vmatpush1.msk.msra.mxu0 %vm14888_vm3, %v375_v26  ;;  %vm14903_vm3 = vcmask 564224  }
0x2168   :  { %v4972_v27 = vpop.permute.xlu1 %4971 }
0x216c   :  { %v4974_v62 = vpop.permute.xlu1 %4973 }
0x216d   :  { %v4975_v32 = vsel %vm14889_vm9, %v4972_v27, %v4974_v62  ;;  %vm14904_vm9 = vmmov %vm14899_vm2 }
0x216e   :  { %7606 = vmatmul.mubr.msk.f32.vlgmr.msra.gmra.mrb[36].mxu1 %vm1882_vm0, %v4975_v32  ;;  %7609 = vmatmul.mubr.msk.f32.vlgmr.msra.gmra.mrb[36].mxu0 %vm1882_vm0, %v4975_v32  ;;  %vm1227_vm0 = vcmask 244736  }
0x216f   :  { %5455 = vmatprep.mubr.f32.mxu1 %v14805_v17  ;;  %5526 = vmatprep.mubr.f32.mxu0 %v14805_v17  ;;  %vm7610_vm6 = vmneg %vm1227_vm0 }
0x2170   :  { %vm8794_vm10 = vmpackc.low %vm14842_vm13, %vm7610_vm6  ;;  %vm14906_vm6 = vcmask 572416  }
0x21c9   :  { %v4894_v49 = vpop.f32.mrb[34].mxu1 }
0x21ca   :  { %v4965_v45 = vpop.f32.mrb[34].mxu0  ;;  %v4896_v11 = vpop.f32.mrb[35].mxu1 }
0x21cb   :  { %v4967_v31 = vpop.f32.mrb[35].mxu0  ;;  %5143 = vrot.lane.b32.xlu0 %v4896_v11, %s10475_s4 }
0x223d   :  { %v5144_v22 = vpop.permute.xlu0 %5143 }
0x2241   :  { %v5044_v48 = vpop.f32.mrb[36].mxu1  ;;  %v5115_v30 = vpop.f32.mrb[36].mxu0 }
0x2242   :  { %v5117_v3 = vpop.f32.mrb[37].mxu0  ;;  %5124 = vrot.lane.b32.xlu1 %v5044_v48, %s10476_s3  ;;  %v5046_v19 = vpop.f32.mrb[37].mxu1 }
0x2246   :  { %5126 = vrot.lane.b32.xlu1 %v5046_v19, %s10476_s3 }
0x224a   :  { %5128 = vrot.lane.b32.xlu1 %v5115_v30, %s10476_s3 }
0x224e   :  { %5130 = vrot.lane.b32.xlu1 %v5117_v3, %s10476_s3 }
0x2252   :  { %5141 = vrot.lane.b32.xlu1 %v4894_v49, %s10475_s4 }
0x2256   :  { %5145 = vrot.lane.b32.xlu1 %v4965_v45, %s10475_s4 }
0x22b4   :  { %v5125_v28 = vpop.permute.xlu1 %5124 }
0x22b5   :  { %v5136_v33 = vsel %vm1244_vm1, %v4967_v31, %v5125_v28 }
0x22b6   :  { %5147 = vrot.lane.b32.xlu0 %v5136_v33, %s10475_s4 }
0x22b8   :  { %v5127_v10 = vpop.permute.xlu1 %5126 }
0x22b9   :  { %v5132_v43 = vsel %vm1244_vm1, %v5125_v28, %v5127_v10 }
0x22ba   :  { %5149 = vrot.lane.b32.xlu1 %v5132_v43, %s10475_s4 }
0x22bc   :  { %v5129_v23 = vpop.permute.xlu1 %5128 }
0x22bd   :  { %v5133_v40 = vsel %vm1244_vm1, %v5127_v10, %v5129_v23 }
0x22be   :  { %5151 = vrot.lane.b32.xlu0 %v5133_v40, %s10475_s4 }
0x22c0   :  { %v5131_v34 = vpop.permute.xlu1 %5130 }
0x22c1   :  { %v5134_v25 = vsel %vm1244_vm1, %v5129_v23, %v5131_v34  ;;  %vm14895_vm1 = vcmask 1039360  }
0x22c2   :  { %5153 = vrot.lane.b32.xlu1 %v5134_v25, %s10475_s4  ;;  %vm14897_vm12 = vmmov %vm14895_vm1 }
0x22c4   :  { %v12940_v59 = vpop.permute.xlu1 %5141 }
0x22c5   :  { %v5155_v15 = vsel %vm1227_vm0, %v12940_v59, %v5144_v22  ;;  %v5168_v39 = vsel %vm1227_vm0, 0.0, %v12940_v59 }
0x22c8   :  { %v5146_v38 = vpop.permute.xlu1 %5145 }
0x22c9   :  { %v12945_v0 = vsel %vm1227_vm0, %v5144_v22, %v5146_v38 }
0x22ca   :  { %v9814_v50 = vpack.i.bf16 %v12945_v0, %v5155_v15 }
0x22cc   :  { %9815 = vrot.lane.b32.xlu1 %v9814_v50, %s10436_s0  ;;  %9810 = vrot.lane.b32.xlu0 %v9814_v50, %s10437_s23 }
0x22d0   :  { %9825 = vrot.lane.b32.xlu1 %v9814_v50, %s10439_s25  ;;  %9820 = vrot.lane.b32.xlu0 %v9814_v50, %s14890_s5 }
0x22d4   :  { %9835 = vrot.lane.b32.xlu1 %v9814_v50, %s14891_s30  ;;  %9830 = vrot.lane.b32.xlu0 %v9814_v50, %s14892_s13 }
0x22d8   :  { %5365 = vrot.lane.b32.xlu1 %v12945_v0, %s14893_s20  ;;  %9840 = vrot.lane.b32.xlu0 %v9814_v50, %s14894_s24 }
0x22dc   :  { %5363 = vrot.lane.b32.xlu0 %v5155_v15, %s14893_s20 }
0x22e0   :  { %5361 = vrot.lane.b32.xlu0 %v5168_v39, %s14893_s20 }
0x2328   :  { %v5148_v26 = vpop.permute.xlu0 %5147 }
0x2329   :  { %v12962_v21 = vsel %vm1227_vm0, %v5146_v38, %v5148_v26 }
0x232a   :  { %v9844_v13 = vpack.i.bf16 %v12962_v21, %v5168_v39 }
0x232c   :  { %9845 = vrot.lane.b32.xlu1 %v9844_v13, %s10437_s23  ;;  %9855 = vrot.lane.b32.xlu0 %v9844_v13, %s14890_s5  ;;  %v5150_v52 = vpop.permute.xlu1 %5149 }
0x232d   :  { %v12975_v46 = vsel %vm1227_vm0, %v5148_v26, %v5150_v52 }
0x2330   :  { %v5152_v1 = vpop.permute.xlu0 %5151  ;;  %9850 = vrot.lane.b32.xlu1 %v9844_v13, %s10436_s0  ;;  %9865 = vrot.lane.b32.xlu0 %v9844_v13, %s14892_s13 }
0x2331   :  { %v12970_v53 = vsel %vm1227_vm0, %v5150_v52, %v5152_v1 }
0x2332   :  { %v9879_v44 = vpack.i.bf16 %v12970_v53, %v12975_v46 }
0x2334   :  { %9860 = vrot.lane.b32.xlu1 %v9844_v13, %s10439_s25  ;;  %9875 = vrot.lane.b32.xlu0 %v9844_v13, %s14894_s24  ;;  %v5154_v61 = vpop.permute.xlu1 %5153 }
0x2335   :  { %v12999_v5 = vsel %vm1227_vm0, %v5152_v1, %v5154_v61 }
0x2336   :  { %v5169_v9 = vsel %vm1242_vm4, %v12999_v5, 0.0 }
0x2337   :  { %v9899_v7 = vpack.i.bf16 %v5169_v9, %v12970_v53 }
0x2338   :  { %9870 = vrot.lane.b32.xlu1 %v9844_v13, %s14891_s30  ;;  %9880 = vrot.lane.b32.xlu0 %v9879_v44, %s10437_s23 }
0x233c   :  { %5367 = vrot.lane.b32.xlu1 %v12962_v21, %s14893_s20  ;;  %9890 = vrot.lane.b32.xlu0 %v9879_v44, %s14890_s5 }
0x233e   :  { %v12984_v42 = vpop.permute.xlu0 %9810  ;;  %v13020_v12 = vpop.permute.xlu1 %9815 }
0x233f   :  { %v9813_v16 = vunpack.i.h.bf16 %v12984_v42  ;;  %v9812_v41 = vunpack.i.l.bf16 %v12984_v42  ;;  %v9818_v27 = vunpack.i.h.bf16 %v13020_v12  ;;  %v9817_v62 = vunpack.i.l.bf16 %v13020_v12 }
0x2340   :  { %9885 = vrot.lane.b32.xlu1 %v9879_v44, %s10436_s0  ;;  %5288 = vrot.lane.b32.xlu0 %v12975_v46, %s14892_s13 }
0x2341   :  { %v5187_v57 = vsel %vm14895_vm1, %v9812_v41, %v9813_v16  ;;  %v5214_v23 = vsel %vm14898_vm15, %v9817_v62, %v9818_v27  ;;  %vm14905_vm1 = vmmov %vm14902_vm7 }
0x2342   :  { %v8791_v51 = vpack.c.bf16 %v5187_v57, %v5155_v15  ;;  %v13018_v47 = vpop.permute.xlu0 %9820  ;;  %v13024_v37 = vpop.permute.xlu1 %9825 }
0x2343   :  { %v9823_v63 = vunpack.i.h.bf16 %v13018_v47  ;;  %v9822_v24 = vunpack.i.l.bf16 %v13018_v47  ;;  %v9828_v19 = vunpack.i.h.bf16 %v13024_v37  ;;  %v9827_v28 = vunpack.i.l.bf16 %v13024_v37 }
0x2344   :  { %8792 = vmatprep.subr.bf16.mxu1 %v8791_v51  ;;  %5261 = vrot.lane.b32.xlu1 %v12975_v46, %s10439_s25 }
0x2345   :  { %5342 = vrot.lane.b32.xlu0 %v12975_v46, %s14894_s24  ;;  %v5241_v48 = vsel %vm14896_vm5, %v9822_v24, %v9823_v63  ;;  %v5268_v44 = vsel %vm14902_vm7, %v9827_v28, %v9828_v19  ;;  %vm14907_vm5 = vmmov %vm14897_vm12  ;;  %vm14913_vm7 = vcmask 588800  }
0x2346   :  { %v13022_v8 = vpop.permute.xlu0 %9830  ;;  %v13028_v35 = vpop.permute.xlu1 %9835  ;;  %v8796_v34 = vpack.c.bf16 %v5241_v48, %v5214_v23  ;;  %vm14910_vm15 = vmmov %vm14907_vm5 }
0x2347   :  { %v9833_v11 = vunpack.i.h.bf16 %v13022_v8  ;;  %v9832_v31 = vunpack.i.l.bf16 %v13022_v8  ;;  %v9838_v39 = vunpack.i.h.bf16 %v13028_v35  ;;  %v9837_v26 = vunpack.i.l.bf16 %v13028_v35 }
0x2348   :  { %5315 = vrot.lane.b32.xlu1 %v12975_v46, %s14891_s30 }
0x2349   :  { %5369 = vrot.lane.b32.xlu0 %v12975_v46, %s14893_s20 }
0x234a   :  { %v13026_v20 = vpop.permute.xlu0 %9840  ;;  %v13032_v60 = vpop.permute.xlu1 %5365 }
0x234b   :  { %v9843_v25 = vunpack.i.h.bf16 %v13026_v20  ;;  %v9842_v22 = vunpack.i.l.bf16 %v13026_v20 }
0x234c   :  { %5184 = vrot.lane.b32.xlu1 %v5169_v9, %s10437_s23 }
0x234d   :  { %5238 = vrot.lane.b32.xlu0 %v5169_v9, %s14890_s5  ;;  %v5349_v61 = vsel %vm14903_vm3, %v9842_v22, %v9843_v25 }
0x234e   :  { %v13030_v14 = vpop.permute.xlu0 %5363 }
0x2350   :  { %5211 = vrot.lane.b32.xlu1 %v5169_v9, %s10436_s0 }
0x2351   :  { %9900 = vrot.lane.b32.xlu0 %v9899_v7, %s14892_s13 }
0x2352   :  { %v13034_v36 = vpop.permute.xlu0 %5361 }
0x2354   :  { %9895 = vrot.lane.b32.xlu1 %v9899_v7, %s10439_s25 }
0x2355   :  { %9910 = vrot.lane.b32.xlu0 %v9899_v7, %s14894_s24 }
0x2358   :  { %9905 = vrot.lane.b32.xlu1 %v9899_v7, %s14891_s30 }
0x2359   :  { %5373 = vrot.lane.b32.xlu0 %v5169_v9, %s14893_s20 }
0x235c   :  { %5371 = vrot.lane.b32.xlu1 %v12970_v53, %s14893_s20 }
0x239e   :  { %v13040_v32 = vpop.permute.xlu0 %9855  ;;  %v9846_v49 = vpop.permute.xlu1 %9845 }
0x239f   :  { %v9847_v45 = vunpack.i.l.bf16 %v9846_v49  ;;  %v9857_v30 = vunpack.i.l.bf16 %v13040_v32  ;;  %v9848_v51 = vunpack.i.h.bf16 %v9846_v49  ;;  %v5322_v49 = vsel %vm14906_vm6, %v9837_v26, %v9838_v39 }
0x23a1   :  { %v5186_v3 = vsel %vm14897_vm12, %v9847_v45, %v9812_v41  ;;  %v5240_v38 = vsel %vm14900_vm11, %v9857_v30, %v9822_v24  ;;  %vm14908_vm12 = vmmov %vm14903_vm3 }
0x23a2   :  { %v8793_v33 = vpack.c.bf16 %v5186_v3, %v12940_v59  ;;  %v13054_v10 = vpop.permute.xlu0 %9865  ;;  %v13056_v43 = vpop.permute.xlu1 %9850  ;;  %v5295_v59 = vsel %vm14899_vm2, %v9832_v31, %v9833_v11  ;;  %vm14911_vm2 = vcmask 556032   ;;  %vm14914_vm3 = vmmov %vm14901_vm14 }
0x23a3   :  { %v9852_v40 = vunpack.i.l.bf16 %v13056_v43  ;;  %v9867_v15 = vunpack.i.l.bf16 %v13054_v10  ;;  %v8800_v57 = vpack.c.bf16 %v5295_v59, %v5268_v44  ;;  %v9853_v42 = vunpack.i.h.bf16 %v13056_v43  ;;  %vm14912_vm11 = vmmov %vm14911_vm2 }
0x23a4   :  { %8795 = vmatpush1.bf16.msk.msra.mxu1 %vm8794_vm10, %v8793_v33  ;;  %v8804_v33 = vpack.c.bf16 %v5349_v61, %v5322_v49  ;;  %vm14909_vm10 = vmmov %vm14906_vm6  ;;  %vm14917_vm6 = vcmask 793600  }
0x23a5   :  { %v5213_v50 = vsel %vm14901_vm14, %v9852_v40, %v9817_v62  ;;  %8797 = vmatprep.subr.bf16.mxu1 %v8796_v34  ;;  %v5294_v9 = vsel %vm14904_vm9, %v9867_v15, %v9832_v31  ;;  %v5188_v31 = vsel %vm14907_vm5, %v9813_v16, %v9848_v51  ;;  %v5376_v16 = vsel %vm14911_vm2, %v13030_v14, %v13032_v60 }
0x23a6   :  { %v13072_v13 = vpop.permute.xlu0 %9875  ;;  %v9861_v1 = vpop.permute.xlu1 %9860  ;;  %v8798_v52 = vpack.c.bf16 %v5240_v38, %v5213_v50  ;;  %v8810_v50 = vpack.c.bf16 %v5188_v31, %v12945_v0  ;;  %v5375_v0 = vsel %vm14912_vm11, %v13034_v36, %v13030_v14  ;;  %v5215_v43 = vsel %vm14901_vm14, %v9818_v27, %v9853_v42 }
0x23a7   :  { %v9862_v41 = vunpack.i.l.bf16 %v9861_v1  ;;  %v9877_v7 = vunpack.i.l.bf16 %v13072_v13  ;;  %vm14915_vm9 = vcmask 809984   ;;  %vm14918_vm5 = vcmask 801792  }
0x23a8   :  { %8799 = vmatpush1.bf16.msra.mxu1 %v8798_v52  ;;  %vm14922_vm2 = vcmask 572416  }
0x23a9   :  { %v5267_v24 = vsel %vm14905_vm1, %v9862_v41, %v9827_v28  ;;  %8801 = vmatprep.subr.bf16.mxu1 %v8800_v57  ;;  %v5348_v28 = vsel %vm14908_vm12, %v9877_v7, %v9842_v22  ;;  %v9863_v41 = vunpack.i.h.bf16 %v9861_v1  ;;  %v9868_v57 = vunpack.i.h.bf16 %v13054_v10  ;;  %vm14916_vm1 = vmmov %vm14915_vm9 }
0x23aa   :  { %v13083_v62 = vpop.permute.xlu0 %9880  ;;  %v9871_v45 = vpop.permute.xlu1 %9870  ;;  %v8802_v48 = vpack.c.bf16 %v5294_v9, %v5267_v24  ;;  %vm14919_vm12 = vmmov %vm14918_vm5  ;;  %v9878_v7 = vunpack.i.h.bf16 %v13072_v13 }
0x23ab   :  { %v9882_v30 = vunpack.i.l.bf16 %v13083_v62  ;;  %v9872_v3 = vunpack.i.l.bf16 %v9871_v45  ;;  %v5269_v47 = vsel %vm14919_vm12, %v9828_v19, %v9863_v41  ;;  %v9873_v9 = vunpack.i.h.bf16 %v9871_v45  ;;  %vm14923_vm11 = vmmov %vm14922_vm2 }
0x23ac   :  { %8803 = vmatpush1.bf16.msra.mxu1 %v8802_v48  ;;  %v9883_v48 = vunpack.i.h.bf16 %v13083_v62 }
0x23ad   :  { %v5321_v23 = vsel %vm14909_vm10, %v9872_v3, %v9837_v26  ;;  %8805 = vmatprep.subr.bf16.mxu1 %v8804_v33  ;;  %v5189_v40 = vsel %vm14910_vm15, %v9848_v51, %v9882_v30  ;;  %v9858_v26 = vunpack.i.h.bf16 %v13040_v32  ;;  %vm14920_vm10 = vmmov %vm14917_vm6  ;;  %vm14921_vm15 = vcmask 564224  }
0x23ae   :  { %v13095_v34 = vpop.permute.xlu0 %9890  ;;  %v13097_v59 = vpop.permute.xlu1 %5367  ;;  %v8806_v38 = vpack.c.bf16 %v5348_v28, %v5321_v23  ;;  %v8808_v15 = vpack.c.bf16 %v5189_v40, %v12962_v21  ;;  %v5296_v24 = vsel %vm14920_vm10, %v9833_v11, %v9868_v57  ;;  %v5323_v8 = vsel %vm14923_vm11, %v9838_v39, %v9873_v9  ;;  %vm14924_vm14 = vmmov %vm14921_vm15 }
0x23af   :  { %v9892_v22 = vunpack.i.l.bf16 %v13095_v34  ;;  %v5242_v14 = vsel %vm14916_vm1, %v9823_v63, %v9858_v26  ;;  %v8818_v45 = vpack.c.bf16 %v5296_v24, %v5269_v47  ;;  %v5350_v11 = vsel %vm14924_vm14, %v9843_v25, %v9878_v7 }
0x23b0   :  { %8807 = vmatpush1.bf16.msra.mxu1 %v8806_v38  ;;  %8809 = vmatprep.subr.bf16.mxu0 %v8808_v15  ;;  %v8814_v61 = vpack.c.bf16 %v5242_v14, %v5215_v43  ;;  %v8822_v40 = vpack.c.bf16 %v5350_v11, %v5323_v8  ;;  %v9893_v38 = vunpack.i.h.bf16 %v13095_v34  ;;  %vm14928_vm1 = vcmask 1031168  }
0x23b1   :  { %5407 = vmatprep.subr.mxu1 %v5376_v16  ;;  %8811 = vmatpush1.bf16.msra.mxu0 %v8810_v50  ;;  %v5243_v51 = vsel %vm14915_vm9, %v9858_v26, %v9892_v22  ;;  %vm14927_vm9 = vcmask 556032   ;;  %vm14934_vm11 = vcmask 793600   ;;  %vm14936_vm14 = vcmask 801792  }
0x23b2   :  { %v13107_v52 = vpop.permute.xlu0 %5288  ;;  %v9886_v44 = vpop.permute.xlu1 %9885  ;;  %vm14932_vm10 = vmmov %vm14927_vm9 }
0x23b3   :  { %v9887_v21 = vunpack.i.l.bf16 %v9886_v44  ;;  %v5297_v27 = vsel %vm14917_vm6, %v9868_v57, %v13107_v52  ;;  %v9888_v33 = vunpack.i.h.bf16 %v9886_v44  ;;  %vm14929_vm6 = vcmask 809984  }
0x23b4   :  { %5408 = vmatpush1.msra.mxu1 %v5375_v0  ;;  %vm14931_vm12 = vmmov %vm14929_vm6  ;;  %v5377_v16 = vsel %vm14932_vm10, %v13032_v60, %v13097_v59 }
0x23b5   :  { %7612 = vmatmul.mubr.msk.f32.vlgmr.msra.gmra.mrb[38].mxu1 %vm14913_vm7, %v12735_v29  ;;  %v5216_v32 = vsel %vm14914_vm3, %v9853_v42, %v9887_v21  ;;  %vm14925_vm7 = vcmask 1039360   ;;  %v5217_v39 = vsel %vm14928_vm1, %v9887_v21, %v9888_v33 }
0x23b6   :  { %v13123_v36 = vpop.permute.xlu1 %5261  ;;  %v8812_v12 = vpack.c.bf16 %v5243_v51, %v5216_v32  ;;  %5597 = vmatprep.mubr.f32.mxu1 %v14805_v17  ;;  %v5190_v62 = vsel %vm14925_vm7, %v9882_v30, %v9883_v48  ;;  %vm14926_vm3 = vmmov %vm14925_vm7 }
0x23b7   :  { %v13128_v10 = vpop.permute.xlu0 %5342  ;;  %v5270_v1 = vsel %vm14918_vm5, %v9863_v41, %v13123_v36  ;;  %v8826_v25 = vpack.c.bf16 %v5190_v62, %v12975_v46  ;;  %vm14930_vm5 = vmmov %vm14928_vm1  ;;  %vm14940_vm1 = vcmask 572416  }
0x23b8   :  { %8813 = vmatprep.subr.bf16.mxu0 %v8812_v12  ;;  %v8816_v63 = vpack.c.bf16 %v5297_v27, %v5270_v1  ;;  %v5351_v37 = vsel %vm14921_vm15, %v9878_v7, %v13128_v10  ;;  %vm8842_vm15 = vmpackc.low %vm14842_vm13, %vm1242_vm4  ;;  %vm14935_vm13 = vmmov 0  }
0x23b9   :  { %8815 = vmatpush1.bf16.msra.mxu0 %v8814_v61  ;;  %vm14937_vm7 = vmmov %vm14936_vm14 }
0x23ba   :  { %v13140_v49 = vpop.permute.xlu1 %5315  ;;  %8817 = vmatprep.subr.bf16.mxu0 %v8816_v63 }
0x23bb   :  { %v13144_v3 = vpop.permute.xlu0 %5369  ;;  %v5324_v19 = vsel %vm14922_vm2, %v9873_v9, %v13140_v49  ;;  %vm14933_vm2 = vcmask 588800  }
0x23bc   :  { %v8820_v13 = vpack.c.bf16 %v5351_v37, %v5324_v19  ;;  %v5378_v20 = vsel %vm14927_vm9, %v13097_v59, %v13144_v3  ;;  %vm14939_vm9 = vcmask 564224  }
0x23bd   :  { %8819 = vmatpush1.bf16.msra.mxu0 %v8818_v45 }
0x23be   :  { %v5185_v31 = vpop.permute.xlu1 %5184  ;;  %8821 = vmatprep.subr.bf16.mxu0 %v8820_v13 }
0x23bf   :  { %v5239_v28 = vpop.permute.xlu0 %5238  ;;  %v5191_v23 = vsel %vm14926_vm3, %v9883_v48, %v5185_v31  ;;  %v8841_v0 = vpack.c.bf16 %v5185_v31, %v12999_v5  ;;  %vm14938_vm3 = vmmov %vm14934_vm11 }
0x23c0   :  { %v8824_v35 = vpack.c.bf16 %v5191_v23, %v12970_v53  ;;  %v5245_v15 = vsel %vm14929_vm6, %v9893_v38, %v5239_v28  ;;  %v5244_v53 = vsel %vm14931_vm12, %v9892_v22, %v9893_v38  ;;  %vm14941_vm6 = vmmov %vm14940_vm1 }
0x23c1   :  { %8823 = vmatpush1.bf16.msra.mxu0 %v8822_v40  ;;  %v8830_v44 = vpack.c.bf16 %v5244_v53, %v5217_v39  ;;  %vm14943_vm12 = vmmov %vm14932_vm10  ;;  %v14946_v40 = vld [vmem:[#allocation9_spill] sm:$0xff] }
0x23c2   :  { %v5212_v30 = vpop.permute.xlu1 %5211  ;;  %5478 = vmatprep.subr.mxu0 %v5378_v20  ;;  %8825 = vmatprep.subr.bf16.mxu1 %v8824_v35 }
0x23c3   :  { %v9901_v50 = vpop.permute.xlu0 %9900  ;;  %v5218_v42 = vsel %vm14930_vm5, %v9888_v33, %v5212_v30  ;;  %8827 = vmatpush1.bf16.msra.mxu1 %v8826_v25  ;;  %v8845_v14 = vpack.c.bf16 %v5239_v28, %v5212_v30  ;;  %vm14942_vm5 = vmmov %vm14939_vm9  ;;  %v14945_v28 = vld [vmem:[#allocation8_spill] sm:$0xff]  ;;  %v14947_v30 = vld [vmem:[#allocation13_spill] sm:$0xff] }
0x23c4   :  { %v9902_v34 = vunpack.i.l.bf16 %v9901_v50  ;;  %v8828_v26 = vpack.c.bf16 %v5245_v15, %v5218_v42  ;;  %v9903_v46 = vunpack.i.h.bf16 %v9901_v50 }
0x23c5   :  { %5479 = vmatpush1.msra.mxu0 %v5377_v16 }
0x23c6   :  { %v9896_v21 = vpop.permute.xlu1 %9895  ;;  %7613 = vmatmul.mubr.msk.f32.vlgmr.msra.gmra.mrb[38].mxu0 %vm14933_vm2, %v12735_v29  ;;  %8829 = vmatprep.subr.bf16.mxu1 %v8828_v26  ;;  %v5298_v60 = vsel %vm14934_vm11, %v13107_v52, %v9902_v34  ;;  %v5299_v51 = vsel %vm14938_vm3, %v9902_v34, %v9903_v46  ;;  %vm14951_vm11 = vcmask 355328  }
0x23c7   :  { %v9911_v22 = vpop.permute.xlu0 %9910  ;;  %v9898_v43 = vunpack.i.h.bf16 %v9896_v21  ;;  %v9897_v41 = vunpack.i.l.bf16 %v9896_v21  ;;  %8840 = vmatprep.subr.bf16.mxu0 %v14788_v4  ;;  %8831 = vmatpush1.bf16.msra.mxu1 %v8830_v44 }
0x23c8   :  { %v9912_v59 = vunpack.i.l.bf16 %v9911_v22  ;;  %8843 = vmatpush3.bf16.msk.msra.mxu0 %vm8842_vm15, %v8841_v0  ;;  %8082 = vmatprep.mubr.msk.f32.mxu0 %vm14935_vm13, %v14805_v17  ;;  %v9913_v5 = vunpack.i.h.bf16 %v9911_v22  ;;  %vm14944_vm15 = vmmov %vm14933_vm2 }
0x23c9   :  { %v5271_v57 = vsel %vm14936_vm14, %v13123_v36, %v9897_v41  ;;  %8844 = vmatprep.subr.bf16.mxu0 %v14788_v4  ;;  %v5272_v32 = vsel %vm14937_vm7, %v9897_v41, %v9898_v43  ;;  %v8848_v7 = vpack.c.bf16 %v9903_v46, %v9898_v43  ;;  %vm14952_vm14 = vmmov %vm14951_vm11 }
0x23ca   :  { %v9906_v12 = vpop.permute.xlu1 %9905  ;;  %v8832_v27 = vpack.c.bf16 %v5299_v51, %v5272_v32  ;;  %v8834_v1 = vpack.c.bf16 %v5298_v60, %v5271_v57  ;;  %v5352_v47 = vsel %vm14939_vm9, %v13128_v10, %v9912_v59  ;;  %v5353_v63 = vsel %vm14942_vm5, %v9912_v59, %v9913_v5  ;;  %v14948_v32 = vld [vmem:[#allocation18_spill] sm:$0xff] }
0x23cb   :  { %v9908_v52 = vunpack.i.h.bf16 %v9906_v12  ;;  %v9907_v61 = vunpack.i.l.bf16 %v9906_v12  ;;  %v5374_v19 = vpop.permute.xlu0 %5373 }
0x23cc   :  { %8846 = vmatpush3.bf16.msra.mxu0 %v8845_v14  ;;  %8833 = vmatprep.subr.bf16.mxu1 %v8832_v27  ;;  %v14949_v27 = vld [vmem:[#allocation19_spill] sm:$0xff] }
0x23cd   :  { %v5325_v36 = vsel %vm14940_vm1, %v13140_v49, %v9907_v61  ;;  %8835 = vmatpush1.bf16.msra.mxu1 %v8834_v1  ;;  %8847 = vmatprep.subr.bf16.mxu0 %v14788_v4  ;;  %v5326_v9 = vsel %vm14941_vm6, %v9907_v61, %v9908_v52  ;;  %v8851_v49 = vpack.c.bf16 %v9913_v5, %v9908_v52 }
0x23ce   :  { %v5372_v24 = vpop.permute.xlu1 %5371  ;;  %v8836_v48 = vpack.c.bf16 %v5353_v63, %v5326_v9  ;;  %v8838_v37 = vpack.c.bf16 %v5352_v47, %v5325_v36 }
0x23cf   :  { %v5380_v10 = vsel %vm14943_vm12, %v5372_v24, %v5374_v19  ;;  %v5379_v45 = vsel %vm14932_vm10, %v13144_v3, %v5372_v24  ;;  %vm14968_vm10 = vcmask 801792  }
0x23d0   :  { %8849 = vmatpush3.bf16.msra.mxu0 %v8848_v7  ;;  %8837 = vmatprep.subr.bf16.mxu1 %v8836_v48  ;;  %v14950_v7 = vld [vmem:[#allocation17_spill] sm:$0xff] }
0x23d1   :  { %8839 = vmatpush1.bf16.msra.mxu1 %v8838_v37  ;;  %8850 = vmatprep.subr.bf16.mxu0 %v14788_v4 }
0x23d2   :  { %5549 = vmatprep.subr.mxu1 %v5380_v10 }
0x23d4   :  { %8852 = vmatpush3.bf16.msra.mxu0 %v8851_v49 }
0x23d5   :  { %5550 = vmatpush1.msra.mxu1 %v5379_v45  ;;  %8080 = vmatprep.subr.mxu0 %v14805_v17 }
0x23d6   :  { %7614 = vmatmul.mubr.msk.f32.vlgmr.msra.gmra.mrb[40].mxu1 %vm14944_vm15, %v12735_v29  ;;  %vm14971_vm15 = vcmask 572416  }
0x23d7   :  { %6418 = vmatprep.mubr.f32.mxu1 %v14805_v17 }
0x23d8   :  { %8081 = vmatpush3.msra.mxu0 %v5374_v19 }
0x23d9   :  { %8083 = vmatmul.mubr.msk.f32.vlgmr.msra.gmra.mrb[40].mxu0 %vm14933_vm2, %v12735_v29  ;;  %vm14972_vm2 = vcmask 809984  }
0x23da   :  { %6489 = vmatprep.mubr.f32.mxu0 %v14805_v17 }
0x2488   :  { %v5457_v8 = vpop.f32.mrb[38].mxu1 }
0x2489   :  { %v5459_v13 = vpop.f32.mrb[39].mxu1  ;;  %v13203_v11 = vadd.f32 %v5457_v8, %v12743_v6 }
0x248a   :  { %v13206_v3 = vadd.f32 %v5459_v13, %v12743_v6 }
0x248b   :  { %v5674_v23 = vmul.f32 %v13203_v11, %v14945_v28 }
0x248c   :  { %v5675_v29 = vmul.f32 %v13206_v3, %v14946_v40 }
0x248d   :  { %v5696_v20 = vmul.f32 %v5674_v23, %v13203_v11  ;;  %v5681_v50 = vsel %vm685_vm8, %v5674_v23, 0.0 }
0x248e   :  { %v5697_v25 = vmul.f32 %v5675_v29, %v13206_v3  ;;  %v5682_v42 = vsel %vm685_vm8, %v5675_v29, 0.0  ;;  %v14953_v29 = vld [vmem:[#allocation37_spill] sm:$0xff] }
0x248f   :  { %v5703_v53 = vsel %vm685_vm8, %v5696_v20, 0.0  ;;  %v5683_v26 = vadd.f32 %v5682_v42, %v5681_v50  ;;  %v14955_v20 = vld [vmem:[#allocation39_spill] sm:$0xff] }
0x2490   :  { %v5704_v34 = vsel %vm685_vm8, %v5697_v25, 0.0  ;;  %v14956_v25 = vld [vmem:[#allocation41_spill] sm:$0xff] }
0x2491   :  { %v5705_v0 = vadd.f32 %v5704_v34, %v5703_v53 }
0x2499   :  { %v5528_v62 = vpop.f32.mrb[38].mxu0 }
0x249a   :  { %v5530_v33 = vpop.f32.mrb[39].mxu0  ;;  %v13209_v31 = vadd.f32 %v5528_v62, %v12743_v6 }
0x249b   :  { %v13218_v35 = vadd.f32 %v5530_v33, %v12743_v6 }
0x249c   :  { %v5676_v38 = vmul.f32 %v13209_v31, %v11019_v2 }
0x249d   :  { %v5677_v15 = vmul.f32 %v13218_v35, %v14947_v30 }
0x249e   :  { %v5698_v39 = vmul.f32 %v5676_v38, %v13209_v31  ;;  %v5684_v16 = vsel %vm685_vm8, %v5676_v38, 0.0  ;;  %v14954_v38 = vld [vmem:[#allocation38_spill] sm:$0xff] }
0x249f   :  { %v5699_v44 = vmul.f32 %v5677_v15, %v13218_v35  ;;  %v5685_v21 = vadd.f32 %v5684_v16, %v5683_v26  ;;  %v5686_v41 = vsel %vm685_vm8, %v5677_v15, 0.0  ;;  %v14958_v15 = vld [vmem:[#allocation40_spill] sm:$0xff] }
0x24a0   :  { %v5706_v46 = vsel %vm685_vm8, %v5698_v39, 0.0  ;;  %v14957_v39 = vld [vmem:[#allocation42_spill] sm:$0xff] }
0x24a1   :  { %v5707_v43 = vadd.f32 %v5706_v46, %v5705_v0  ;;  %v5708_v5 = vsel %vm685_vm8, %v5699_v44, 0.0  ;;  %v5687_v12 = vadd.f32 %v5686_v41, %v5685_v21 }
0x24a3   :  { %v5709_v47 = vadd.f32 %v5708_v5, %v5707_v43 }
0x24a9   :  { %v5599_v22 = vpop.f32.mrb[40].mxu1 }
0x24aa   :  { %v13234_v60 = vadd.f32 %v5599_v22, %v12743_v6  ;;  %v5601_v59 = vpop.f32.mrb[41].mxu1 }
0x24ab   :  { %v13238_v57 = vadd.f32 %v5601_v59, %v12743_v6 }
0x24ac   :  { %v5678_v51 = vmul.f32 %v13234_v60, %v14948_v32  ;;  %v5670_v14 = vpop.f32.mrb[40].mxu0 }
0x24ad   :  { %v5679_v1 = vmul.f32 %v13238_v57, %v14949_v27  ;;  %v13245_v52 = vadd.f32 %v5670_v14, %v12743_v6  ;;  %v8084_v61 = vpop.f32.mrb[41].mxu0 }
0x24ae   :  { %v5688_v36 = vsel %vm685_vm8, %v5678_v51, 0.0  ;;  %v5700_v9 = vmul.f32 %v5678_v51, %v13234_v60 }
0x24af   :  { %v5701_v63 = vmul.f32 %v5679_v1, %v13238_v57  ;;  %v5680_v24 = vmul.f32 %v13245_v52, %v14950_v7  ;;  %v5689_v48 = vadd.f32 %v5688_v36, %v5687_v12  ;;  %v5690_v37 = vsel %vm685_vm8, %v5679_v1, 0.0 }
0x24b0   :  { %v5710_v19 = vsel %vm685_vm8, %v5700_v9, 0.0 }
0x24b1   :  { %v5702_v10 = vmul.f32 %v5680_v24, %v13245_v52  ;;  %v5691_v6 = vadd.f32 %v5690_v37, %v5689_v48  ;;  %v5711_v49 = vadd.f32 %v5710_v19, %v5709_v47  ;;  %v5692_v45 = vsel %vm14951_vm11, %v5680_v24, 0.0 }
0x24b2   :  { %v5712_v8 = vsel %vm685_vm8, %v5701_v63, 0.0  ;;  %vm14974_vm11 = vcmask 793600  }
0x24b3   :  { %v5693_v13 = vadd.f32 %v5692_v45, %v5691_v6  ;;  %v5713_v62 = vadd.f32 %v5712_v8, %v5711_v49  ;;  %v5714_v33 = vsel %vm14952_vm14, %v5702_v10, 0.0  ;;  %vm14977_vm14 = vcmask 1039360  }
0x24b5   :  { %5694 = vadd.xlane.f32.xlu1 %v5693_v13  ;;  %v5715_v23 = vadd.f32 %v5714_v33, %v5713_v62 }
0x24b7   :  { %5716 = vadd.xlane.f32.xlu0 %v5715_v23 }
0x24c6   :  { %1215 = vrot.lane.b32.xlu1 %v14953_v29, %s10475_s4 }
0x24ca   :  { %1217 = vrot.lane.b32.xlu1 %v11561_v58, %s10475_s4 }
0x24cd   :  { %1213 = vrot.lane.b32.xlu0 %v14954_v38, %s10475_s4 }
0x24ce   :  { %1221 = vrot.lane.b32.xlu1 %v14955_v20, %s10475_s4 }
0x24d1   :  { %1219 = vrot.lane.b32.xlu0 %v14956_v25, %s10475_s4 }
0x24d2   :  { %1225 = vrot.lane.b32.xlu1 %v14957_v39, %s10475_s4 }
0x24d5   :  { %1223 = vrot.lane.b32.xlu0 %v14958_v15, %s10475_s4 }
0x2542   :  { %v5695_v50 = vpop.xlane.xlu1 %5694 }
0x2543   :  { %v13272_v42 = vmul.f32 0.0015432099, %v5695_v50 }
0x2544   :  { %v5717_v53 = vpop.xlane.xlu0 %5716 }
0x2545   :  { %v5719_v58 = vmul.f32 0.0015432099, %v5717_v53  ;;  %v5720_v34 = vmul.f32 %v13272_v42, %v13272_v42  ;;  %v5723_v6 = vsub.f32 %v13203_v11, %v13272_v42  ;;  %v5724_v49 = vsub.f32 %v13206_v3, %v13272_v42 }
0x2546   :  { %v1216_v16 = vpop.permute.xlu1 %1215  ;;  %v5725_v8 = vsub.f32 %v13209_v31, %v13272_v42  ;;  %v5726_v13 = vsub.f32 %v13218_v35, %v13272_v42  ;;  %v5727_v3 = vsub.f32 %v13234_v60, %v13272_v42  ;;  %v5728_v38 = vsub.f32 %v13238_v57, %v13272_v42 }
0x2547   :  { %v5721_v26 = vsub.f32 %v5719_v58, %v5720_v34  ;;  %v5729_v53 = vsub.f32 %v13245_v52, %v13272_v42 }
0x2548   :  { %v1214_v46 = vpop.permute.xlu0 %1213 }
0x2549   :  { %v5722_v44 = vmax.f32 %v5721_v26, 0.0  ;;  %v13277_v0 = vsel %vm1227_vm0, %v1214_v46, %v1216_v16  ;;  %v13291_v51 = vsel %vm1227_vm0, 0.0, %v1214_v46 }
0x254a   :  { %v13280_v21 = vrot.slane %v13277_v0, 4  ;;  %v1218_v22 = vpop.permute.xlu1 %1217  ;;  %v13305_v47 = vrot.slane %v13291_v51, 4 }
0x254b   :  { %v5730_v43 = vadd.f32 1e-05, %v5722_v44  ;;  %v13283_v41 = vsel %vm1227_vm0, %v1216_v16, %v1218_v22 }
0x254c   :  { %v13286_v59 = vrot.slane %v13283_v41, 4  ;;  %v1220_v5 = vpop.permute.xlu0 %1219  ;;  %6280 = vrot.lane.b32.xlu0 %v13280_v21, %s10437_s23  ;;  %v9914_v62 = vpack.i.bf16 %v13291_v51, %v13283_v41 }
0x254d   :  { %10428 = vrsqrt.f32 %v5730_v43  ;;  %v13294_v14 = vsel %vm1227_vm0, %v1218_v22, %v1220_v5 }
0x254e   :  { %14959 = vst [vmem:[#allocation20_spill] sm:$0xff] %v13286_v59  ;;  %v13297_v12 = vrot.slane %v13294_v14, 4  ;;  %6282 = vrot.lane.b32.xlu1 %v13286_v59, %s10437_s23  ;;  %v1222_v1 = vpop.permute.xlu1 %1221  ;;  %v9919_v31 = vpack.i.bf16 %v13305_v47, %v13286_v59 }
0x254f   :  { %v13302_v61 = vsel %vm1227_vm0, %v1220_v5, %v1222_v1 }
0x2550   :  { %v1224_v36 = vpop.permute.xlu0 %1223  ;;  %6284 = vrot.lane.b32.xlu0 %v13297_v12, %s10437_s23  ;;  %v13313_v63 = vrot.slane %v13302_v61, 4  ;;  %v9924_v15 = vpack.i.bf16 %v13302_v61, %v13294_v14 }
0x2551   :  { %v13310_v9 = vsel %vm1227_vm0, %v1222_v1, %v1224_v36 }
0x2552   :  { %14960 = vst [vmem:[#allocation21_spill] sm:$0xff] %v13313_v63  ;;  %6278 = vrot.lane.b32.xlu1 %v13305_v47, %s10437_s23  ;;  %v1226_v24 = vpop.permute.xlu1 %1225  ;;  %v13319_v37 = vrot.slane %v13310_v9, 4  ;;  %v9929_v50 = vpack.i.bf16 %v13313_v63, %v13297_v12 }
0x2553   :  { %v1233_v48 = vsel %vm1227_vm0, %v1224_v36, %v1226_v24 }
0x2554   :  { %14961 = vst [vmem:[#allocation22_spill] sm:$0xff] %v13319_v37  ;;  %v13322_v19 = vsel %vm1242_vm4, %v1233_v48, 0.0  ;;  %6286 = vrot.lane.b32.xlu0 %v13313_v63, %s10437_s23 }
0x2555   :  { %v13327_v10 = vrot.slane %v13322_v19, 4 }
0x2556   :  { %6288 = vrot.lane.b32.xlu1 %v13319_v37, %s10437_s23 }
0x2557   :  { %14962 = vst [vmem:[#allocation23_spill] sm:$0xff] %v13327_v10  ;;  %v10429_v45 = vpop.eup %10428 }
0x2558   :  { %6290 = vrot.lane.b32.xlu0 %v13327_v10, %s10437_s23  ;;  %v5732_v33 = vmul.f32 %v10429_v45, %v5723_v6  ;;  %v5733_v23 = vmul.f32 %v10429_v45, %v5724_v49  ;;  %v5734_v29 = vmul.f32 %v10429_v45, %v5725_v8  ;;  %v5735_v11 = vmul.f32 %v10429_v45, %v5726_v13 }
0x2559   :  { %v5736_v25 = vmul.f32 %v10429_v45, %v5727_v3  ;;  %v5737_v39 = vmul.f32 %v10429_v45, %v5728_v38  ;;  %v5738_v22 = vmul.f32 %v10429_v45, %v5729_v53 }
0x255a   :  { %9915 = vrot.lane.b32.xlu1 %v9914_v62, %s10437_s23  ;;  %v5740_v35 = vmul.f32 %v5732_v33, %v12878_v54  ;;  %v5741_v20 = vmul.f32 %v5733_v23, %v12878_v54  ;;  %v5742_v60 = vmul.f32 %v5734_v29, %v12878_v54  ;;  %v5743_v57 = vmul.f32 %v5735_v11, %v12878_v54 }
0x255b   :  { %v5744_v16 = vmul.f32 %v5736_v25, %v12878_v54  ;;  %v5745_v26 = vmul.f32 %v5737_v39, %v12878_v54  ;;  %v5746_v24 = vmul.f32 %v5738_v22, %v12878_v54 }
0x255c   :  { %9920 = vrot.lane.b32.xlu0 %v9919_v31, %s10436_s0  ;;  %v5748_v58 = vadd.f32 %v5740_v35, %v12882_v18  ;;  %v5749_v34 = vadd.f32 %v5741_v20, %v12882_v18  ;;  %v5750_v46 = vadd.f32 %v5742_v60, %v12882_v18  ;;  %v5751_v44 = vadd.f32 %v5743_v57, %v12882_v18 }
0x255d   :  { %v5752_v52 = vadd.f32 %v5744_v16, %v12882_v18  ;;  %v5753_v42 = vadd.f32 %v5745_v26, %v12882_v18  ;;  %v5754_v33 = vadd.f32 %v5746_v24, %v12882_v18 }
0x255e   :  { %9925 = vrot.lane.b32.xlu1 %v9924_v15, %s10437_s23  ;;  %v5762_v43 = vmul.f32 0.1, %v5748_v58  ;;  %v5763_v5 = vmul.f32 0.1, %v5749_v34  ;;  %vm5755_vm7 = vcmp.ge.f32.partialorder %v5748_v58, 0.0  ;;  %vm5756_vm3 = vcmp.ge.f32.partialorder %v5749_v34, 0.0 }
0x255f   :  { %v5764_v1 = vmul.f32 0.1, %v5750_v46  ;;  %v5765_v36 = vmul.f32 0.1, %v5751_v44  ;;  %vm5757_vm9 = vcmp.ge.f32.partialorder %v5750_v46, 0.0  ;;  %vm5758_vm1 = vcmp.ge.f32.partialorder %v5751_v44, 0.0 }
0x2560   :  { %9930 = vrot.lane.b32.xlu0 %v9929_v50, %s10436_s0  ;;  %v5769_v48 = vsel %vm5755_vm7, %v5748_v58, %v5762_v43  ;;  %v5770_v6 = vsel %vm5756_vm3, %v5749_v34, %v5763_v5  ;;  %v5766_v49 = vmul.f32 0.1, %v5752_v52  ;;  %v5767_v45 = vmul.f32 0.1, %v5753_v42  ;;  %vm14980_vm7 = vmmov %vm14977_vm14 }
0x2561   :  { %vm5759_vm6 = vcmp.ge.f32.partialorder %v5752_v52, 0.0  ;;  %vm5760_vm5 = vcmp.ge.f32.partialorder %v5753_v42, 0.0  ;;  %v5771_v8 = vsel %vm5757_vm9, %v5750_v46, %v5764_v1  ;;  %v5772_v13 = vsel %vm5758_vm1, %v5751_v44, %v5765_v36  ;;  %vm14981_vm3 = vmmov %vm14980_vm7 }
0x2562   :  { %9935 = vrot.lane.b32.xlu1 %v9914_v62, %s14890_s5  ;;  %v5776_v54 = vmul.f32 %v5769_v48, %v14945_v28  ;;  %v5773_v23 = vsel %vm5759_vm6, %v5752_v52, %v5766_v49  ;;  %v5774_v29 = vsel %vm5760_vm5, %v5753_v42, %v5767_v45  ;;  %v5778_v11 = vmul.f32 %v5771_v8, %v11019_v2  ;;  %vm14982_vm9 = vmmov %vm14981_vm3 }
0x2563   :  { %v5779_v3 = vmul.f32 %v5772_v13, %v14947_v30  ;;  %v5768_v38 = vmul.f32 0.1, %v5754_v33  ;;  %v5780_v18 = vmul.f32 %v5773_v23, %v14948_v32  ;;  %v5781_v35 = vmul.f32 %v5774_v29, %v14949_v27  ;;  %vm14983_vm1 = vmmov %vm14981_vm3 }
0x2564   :  { %9940 = vrot.lane.b32.xlu0 %v9919_v31, %s10439_s25  ;;  %vm5761_vm12 = vcmp.ge.f32.partialorder %v5754_v33, 0.0  ;;  %vm14984_vm6 = vmmov %vm14983_vm1 }
0x2565   :  { %v9974_v20 = vpack.i.bf16 %v5779_v3, %v5778_v11  ;;  %v5775_v25 = vsel %vm5761_vm12, %v5754_v33, %v5768_v38  ;;  %v9979_v39 = vpack.i.bf16 %v5781_v35, %v5780_v18  ;;  %vm14987_vm5 = vmmov %vm14983_vm1  ;;  %vm14988_vm12 = vcmask 1031168  }
0x2566   :  { %9945 = vrot.lane.b32.xlu1 %v9914_v62, %s14892_s13  ;;  %v5777_v62 = vmul.f32 %v5770_v6, %v14946_v40  ;;  %v5782_v60 = vmul.f32 %v5775_v25, %v14950_v7 }
0x2568   :  { %9950 = vrot.lane.b32.xlu0 %v9919_v31, %s14891_s30  ;;  %v9969_v31 = vpack.i.bf16 %v5777_v62, %v5776_v54 }
0x256a   :  { %9955 = vrot.lane.b32.xlu1 %v9924_v15, %s14890_s5 }
0x256c   :  { %9960 = vrot.lane.b32.xlu0 %v9929_v50, %s10439_s25 }
0x256e   :  { %9965 = vrot.lane.b32.xlu1 %v9924_v15, %s14892_s13 }
0x2570   :  { %9970 = vrot.lane.b32.xlu0 %v9969_v31, %s10475_s4 }
0x2572   :  { %9975 = vrot.lane.b32.xlu1 %v9974_v20, %s10475_s4 }
0x2574   :  { %9980 = vrot.lane.b32.xlu0 %v9979_v39, %s10475_s4 }
0x2576   :  { %5802 = vrot.lane.b32.xlu1 %v5782_v60, %s10475_s4 }
0x2578   :  { %9985 = vrot.lane.b32.xlu0 %v9929_v50, %s14891_s30 }
0x25be   :  { %v13392_v15 = vpop.permute.xlu0 %6280 }
0x25c0   :  { %v13394_v57 = vpop.permute.xlu1 %6282 }
0x25c2   :  { %v13396_v53 = vpop.permute.xlu0 %6284 }
0x25c4   :  { %v13398_v58 = vpop.permute.xlu1 %6278 }
0x25c6   :  { %v13400_v34 = vpop.permute.xlu0 %6286 }
0x25c8   :  { %v13402_v16 = vpop.permute.xlu1 %6288 }
0x25ca   :  { %v13404_v26 = vpop.permute.xlu0 %6290 }
0x25cc   :  { %v13406_v46 = vpop.permute.xlu1 %9915 }
0x25ce   :  { %v13408_v44 = vpop.permute.xlu0 %9920 }
0x25d0   :  { %v13410_v22 = vpop.permute.xlu1 %9925 }
0x25d1   :  { %14963 = vst [vmem:[#allocation24_spill] sm:$0xff] %v13410_v22 }
0x25d2   :  { %v13412_v50 = vpop.permute.xlu0 %9930 }
0x25d3   :  { %14964 = vst [vmem:[#allocation25_spill] sm:$0xff] %v13412_v50 }
0x25d4   :  { %v13414_v43 = vpop.permute.xlu1 %9935 }
0x25d6   :  { %v13416_v5 = vpop.permute.xlu0 %9940 }
0x25d7   :  { %v14692_v24 = vunpack.i.l.bf16 %v13416_v5 }
0x25d8   :  { %v13418_v52 = vpop.permute.xlu1 %9945 }
0x25da   :  { %v13420_v42 = vpop.permute.xlu0 %9950 }
0x25dc   :  { %v13422_v1 = vpop.permute.xlu1 %9955 }
0x25dd   :  { %14965 = vst [vmem:[#allocation26_spill] sm:$0xff] %v13422_v1  ;;  %v15005_v63 = vunpack.i.h.bf16 %v13422_v1  ;;  %v15006_v4 = vunpack.i.l.bf16 %v13422_v1 }
0x25de   :  { %v13424_v36 = vpop.permute.xlu0 %9960 }
0x25df   :  { %14966 = vst [vmem:[#allocation27_spill] sm:$0xff] %v13424_v36  ;;  %v14693_v48 = vunpack.i.l.bf16 %v13424_v36 }
0x25e0   :  { %v13428_v6 = vpop.permute.xlu1 %9965 }
0x25e1   :  { %14967 = vst [vmem:[#allocation28_spill] sm:$0xff] %v13428_v6  ;;  %v6157_v49 = vsel %vm14968_vm10, %v14692_v24, %v14693_v48  ;;  %v14701_v24 = vunpack.i.l.bf16 %v13418_v52  ;;  %v14973_v7 = vunpack.i.l.bf16 %v13428_v6  ;;  %vm14989_vm10 = vmmov %vm14972_vm2  ;;  %v15009_v28 = vunpack.i.l.bf16 %v13428_v6 }
0x25e2   :  { %v9971_v45 = vpop.permute.xlu0 %9970 }
0x25e3   :  { %v9973_v8 = vunpack.i.h.bf16 %v9971_v45  ;;  %v9972_v13 = vunpack.i.l.bf16 %v9971_v45  ;;  %v6184_v27 = vsel %vm14974_vm11, %v14701_v24, %v14973_v7  ;;  %v14714_v24 = vunpack.i.h.bf16 %v13410_v22  ;;  %vm14995_vm11 = vmmov %vm14983_vm1 }
0x25e4   :  { %v9976_v33 = vpop.permute.xlu1 %9975 }
0x25e5   :  { %v9978_v54 = vunpack.i.h.bf16 %v9976_v33  ;;  %v9977_v62 = vunpack.i.l.bf16 %v9976_v33  ;;  %v13436_v23 = vsel %vm1227_vm0, %v9972_v13, %v9973_v8  ;;  %v13439_v11 = vsel %vm1227_vm0, 0.0, %v9972_v13 }
0x25e6   :  { %v9981_v29 = vpop.permute.xlu0 %9980  ;;  %v14706_v13 = vunpack.i.l.bf16 %v13422_v1 }
0x25e7   :  { %v13442_v3 = vsel %vm1227_vm0, %v9973_v8, %v9977_v62  ;;  %v13445_v38 = vsel %vm1227_vm0, %v9977_v62, %v9978_v54  ;;  %v9982_v31 = vunpack.i.l.bf16 %v9981_v29  ;;  %v14699_v8 = vunpack.i.l.bf16 %v13420_v42 }
0x25e8   :  { %v9994_v18 = vpack.i.bf16 %v13445_v38, %v13439_v11  ;;  %v9989_v35 = vpack.i.bf16 %v13442_v3, %v13436_v23  ;;  %v5823_v45 = vrot.slane %v13442_v3, 4  ;;  %v14700_v62 = vunpack.i.l.bf16 %v13414_v43  ;;  %v5803_v30 = vpop.permute.xlu1 %5802 }
0x25e9   :  { %v13452_v20 = vsel %vm1227_vm0, %v9978_v54, %v9982_v31  ;;  %v5822_v54 = vrot.slane %v13436_v23, 4  ;;  %v9983_v32 = vunpack.i.h.bf16 %v9981_v29 }
0x25ea   :  { %14969 = vst [vmem:[#allocation29_spill] sm:$0xff] %v13452_v20  ;;  %v13454_v25 = vpop.permute.xlu0 %9985  ;;  %9995 = vrot.lane.b32.xlu1 %v9994_v18, %s10436_s0  ;;  %9990 = vrot.lane.b32.xlu0 %v9989_v35, %s10436_s0  ;;  %v9999_v60 = vpack.i.bf16 %v13280_v21, %v13452_v20  ;;  %v6130_v33 = vsel %vm14972_vm2, %v14700_v62, %v14706_v13  ;;  %vm14993_vm2 = vmmov %vm14988_vm12 }
0x25eb   :  { %14970 = vst [vmem:[#allocation30_spill] sm:$0xff] %v13454_v25  ;;  %v14707_v39 = vunpack.i.l.bf16 %v13454_v25  ;;  %v10054_v56 = vpack.i.bf16 %v5823_v45, %v5822_v54  ;;  %v13488_v45 = vsel %vm685_vm8, %v6130_v33, %v6157_v49  ;;  %v6294_v62 = vsel %vm14977_vm14, %v13394_v57, %v13396_v53  ;;  %vm14996_vm14 = vmmov %vm14983_vm1 }
0x25ec   :  { %14975 = vst [vmem:[#allocation31_spill] sm:$0xff] %v13488_v45  ;;  %v5809_v7 = vsel %vm1227_vm0, %v9983_v32, %v5803_v30  ;;  %v13502_v29 = vsel %vm1227_vm0, %v9982_v31, %v9983_v32  ;;  %v6295_v32 = vsel %vm14980_vm7, %v13396_v53, %v13400_v34  ;;  %vm15001_vm7 = vcmask 572416  }
0x25ed   :  { %v6211_v48 = vsel %vm14971_vm15, %v14699_v8, %v14707_v39  ;;  %14978 = vst [vmem:[#allocation33_spill] sm:$0xff] %v13502_v29  ;;  %v13505_v49 = vsel %vm1242_vm4, %v5809_v7, 0.0  ;;  %v10044_v53 = vpack.i.bf16 %v13502_v29, %v13452_v20  ;;  %v6296_v7 = vsel %vm14983_vm1, %v13400_v34, %v13402_v16  ;;  %vm14992_vm15 = vmmov %vm14988_vm12 }
0x25ee   :  { %10040 = vrot.lane.b32.xlu1 %v9994_v18, %s14893_s20  ;;  %10000 = vrot.lane.b32.xlu0 %v9999_v60, %s10436_s0  ;;  %v13491_v54 = vsel %vm685_vm8, %v6184_v27, %v6211_v48  ;;  %14979 = vst [vmem:[#allocation34_spill] sm:$0xff] %v13505_v49  ;;  %v6307_v27 = vsel %vm685_vm8, %v13283_v41, %v6294_v62  ;;  %v5825_v41 = vrot.slane %v13452_v20, 4  ;;  %v9932_v8 = vunpack.i.l.bf16 %v13412_v50 }
0x25ef   :  { %14976 = vst [vmem:[#allocation32_spill] sm:$0xff] %v13491_v54  ;;  %v10074_v30 = vpack.i.bf16 %v13505_v49, %v13502_v29  ;;  %v6308_v48 = vsel %vm685_vm8, %v13294_v14, %v6295_v32  ;;  %v5821_v14 = vrot.slane %v13439_v11, 4  ;;  %v6292_v62 = vsel %vm14982_vm9, %v13398_v58, %v13392_v15  ;;  %vm15007_vm9 = vmmov %vm14989_vm10 }
0x25f0   :  { %v10084_v31 = vpack.i.bf16 %v13277_v0, %v5825_v41  ;;  %v5827_v58 = vrot.slane %v13505_v49, 4  ;;  %v6311_v32 = vsel %vm685_vm8, %v13322_v19, %v13404_v26  ;;  %v9923_v39 = vunpack.i.h.bf16 %v13408_v44 }
0x25f1   :  { %vm15010_vm1 = vcmask 793600  }
0x25f2   :  { %10005 = vrot.lane.b32.xlu0 %v9989_v35, %s10439_s25  ;;  %10055 = vrot.lane.b32.xlu1 %v10054_v56, %s10437_s23 }
0x25f6   :  { %10010 = vrot.lane.b32.xlu0 %v9989_v35, %s14891_s30  ;;  %10060 = vrot.lane.b32.xlu1 %v10054_v56, %s14890_s5 }
0x25fa   :  { %10015 = vrot.lane.b32.xlu0 %v9994_v18, %s10439_s25  ;;  %6323 = vrot.lane.b32.xlu1 %v6307_v27, %s14894_s24  ;;  %v6297_v27 = vsel %vm14984_vm6, %v13402_v16, %v13404_v26  ;;  %vm15011_vm6 = vmmov %vm14993_vm2 }
0x25fe   :  { %10020 = vrot.lane.b32.xlu0 %v9994_v18, %s14891_s30  ;;  %10075 = vrot.lane.b32.xlu1 %v10074_v30, %s10439_s25  ;;  %v5824_v18 = vrot.slane %v13445_v38, 4 }
0x2602   :  { %10025 = vrot.lane.b32.xlu0 %v9999_v60, %s10439_s25  ;;  %10080 = vrot.lane.b32.xlu1 %v10074_v30, %s14891_s30 }
0x2606   :  { %10030 = vrot.lane.b32.xlu0 %v9999_v60, %s14891_s30  ;;  %6325 = vrot.lane.b32.xlu1 %v6308_v48, %s14894_s24  ;;  %v10064_v60 = vpack.i.bf16 %v5824_v18, %v5821_v14 }
0x260a   :  { %10035 = vrot.lane.b32.xlu0 %v9989_v35, %s14893_s20  ;;  %10085 = vrot.lane.b32.xlu1 %v10084_v31, %s10437_s23  ;;  %v6293_v35 = vsel %vm14981_vm3, %v13392_v15, %v13394_v57  ;;  %v6305_v57 = vsel %vm685_vm8, %v13291_v51, %v6292_v62  ;;  %v6309_v15 = vsel %vm685_vm8, %v13302_v61, %v6296_v7  ;;  %vm15004_vm3 = vcmask 801792  }
0x260b   :  { %v6306_v33 = vsel %vm685_vm8, %v13277_v0, %v6293_v35  ;;  %v10124_v51 = vpack.i.bf16 %v13322_v19, %v13310_v9  ;;  %v10139_v61 = vpack.i.bf16 %v13327_v10, %v13319_v37 }
0x260e   :  { %10045 = vrot.lane.b32.xlu0 %v10044_v53, %s14893_s20  ;;  %10090 = vrot.lane.b32.xlu1 %v10084_v31, %s14890_s5 }
0x2612   :  { %10050 = vrot.lane.b32.xlu0 %v10074_v30, %s10436_s0  ;;  %10095 = vrot.lane.b32.xlu1 %v10054_v56, %s14892_s13  ;;  %v6310_v30 = vsel %vm685_vm8, %v13310_v9, %v6297_v27 }
0x2616   :  { %10065 = vrot.lane.b32.xlu0 %v10064_v60, %s10437_s23  ;;  %10100 = vrot.lane.b32.xlu1 %v10054_v56, %s14894_s24  ;;  %v5826_v56 = vrot.slane %v13502_v29, 4 }
0x2618   :  { %v10119_v0 = vpack.i.bf16 %v5826_v56, %v5825_v41  ;;  %v10144_v34 = vpack.i.bf16 %v5827_v58, %v5826_v56  ;;  %v13591_v41 = vld [vmem:[%s14575_s1 + $0x160] sm:$0x1f] }
0x2619   :  { %14985 = vst [vmem:[#allocation43_spill] sm:$0xff] %v13591_v41 }
0x261a   :  { %10070 = vrot.lane.b32.xlu0 %v10064_v60, %s14890_s5  ;;  %10105 = vrot.lane.b32.xlu1 %v10064_v60, %s14892_s13 }
0x261e   :  { %6321 = vrot.lane.b32.xlu0 %v6306_v33, %s14894_s24  ;;  %10110 = vrot.lane.b32.xlu1 %v10064_v60, %s14894_s24 }
0x2622   :  { %6319 = vrot.lane.b32.xlu0 %v6305_v57, %s14894_s24  ;;  %10115 = vrot.lane.b32.xlu1 %v10084_v31, %s14892_s13 }
0x2626   :  { %6327 = vrot.lane.b32.xlu0 %v6309_v15, %s14894_s24  ;;  %10120 = vrot.lane.b32.xlu1 %v10119_v0, %s14894_s24 }
0x262a   :  { %10125 = vrot.lane.b32.xlu0 %v10124_v51, %s10437_s23  ;;  %6029 = vrot.lane.b32.xlu1 %v13505_v49, %s14893_s20 }
0x262e   :  { %10145 = vrot.lane.b32.xlu0 %v10144_v34, %s14892_s13  ;;  %10130 = vrot.lane.b32.xlu1 %v10144_v34, %s10437_s23 }
0x2632   :  { %6002 = vrot.lane.b32.xlu0 %v5827_v58, %s14894_s24  ;;  %10135 = vrot.lane.b32.xlu1 %v10144_v34, %s14890_s5 }
0x2636   :  { %10150 = vrot.lane.b32.xlu0 %v10124_v51, %s14890_s5  ;;  %10140 = vrot.lane.b32.xlu1 %v10139_v61, %s10436_s0 }
0x263a   :  { %10160 = vrot.lane.b32.xlu0 %v10124_v51, %s14892_s13  ;;  %10155 = vrot.lane.b32.xlu1 %v10139_v61, %s10439_s25 }
0x263e   :  { %6329 = vrot.lane.b32.xlu0 %v6310_v30, %s14894_s24  ;;  %10165 = vrot.lane.b32.xlu1 %v10139_v61, %s14891_s30 }
0x2642   :  { %6331 = vrot.lane.b32.xlu1 %v6311_v32, %s14894_s24  ;;  %6348 = vperm.xlu0 %10169, %v13591_v41  }
0x2646   :  { %10170 = vset.pattern.permute.xlu0 %v14829_v55 }
0x265c   :  { %v13596_v9 = vpop.permute.xlu1 %9995  ;;  %v13598_v16 = vpop.permute.xlu0 %9990 }
0x265d   :  { %v9993_v14 = vunpack.i.h.bf16 %v13598_v16  ;;  %v9992_v55 = vunpack.i.l.bf16 %v13598_v16  ;;  %v14708_v16 = vunpack.i.h.bf16 %v13412_v50  ;;  %v13714_v50 = vsel %vm15007_vm9, %v15006_v4, %v15005_v63 }
0x265f   :  { %v5870_v57 = vsel %vm14988_vm12, %v9992_v55, %v9993_v14  ;;  %vm15014_vm12 = vmmov %vm14993_vm2 }
0x2660   :  { %v13600_v48 = vpop.permute.xlu1 %10040  ;;  %v13602_v31 = vpop.permute.xlu0 %10000 }
0x2661   :  { %14986 = vst [vmem:[#allocation44_spill] sm:$0xff] %v13602_v31  ;;  %v10003_v2 = vunpack.i.h.bf16 %v13602_v31  ;;  %v10042_v4 = vunpack.i.l.bf16 %v13600_v48 }
0x2663   :  { %v13732_v63 = vsel %vm15014_vm12, %v9923_v39, %v10003_v2 }
0x2664   :  { %v13604_v19 = vpop.permute.xlu0 %10005  ;;  %v13606_v26 = vpop.permute.xlu1 %10055 }
0x2665   :  { %v14704_v53 = vunpack.i.h.bf16 %v13606_v26  ;;  %v14705_v18 = vunpack.i.l.bf16 %v13606_v26 }
0x2667   :  { %v5843_v33 = vsel %vm14987_vm5, %v14705_v18, %v14704_v53  ;;  %vm15012_vm5 = vmmov %vm14993_vm2 }
0x2668   :  { %v13612_v60 = vpop.permute.xlu0 %10010  ;;  %v13614_v35 = vpop.permute.xlu1 %10060  ;;  %v6223_v58 = vsel %vm685_vm8, %v13436_v23, %v5843_v33  ;;  %v9927_v23 = vunpack.i.l.bf16 %v13410_v22 }
0x2669   :  { %v14702_v62 = vunpack.i.h.bf16 %v13614_v35  ;;  %v14703_v56 = vunpack.i.l.bf16 %v13614_v35  ;;  %v10012_v10 = vunpack.i.l.bf16 %v13612_v60 }
0x266a   :  { %v6077_v13 = vsel %vm14995_vm11, %v9927_v23, %v14714_v24  ;;  %v10008_v24 = vunpack.i.h.bf16 %v13604_v19  ;;  %vm15021_vm11 = vmmov %vm15001_vm7 }
0x266b   :  { %v5897_v7 = vsel %vm14989_vm10, %v14703_v56, %v14702_v62  ;;  %vm15016_vm10 = vmmov %vm14993_vm2 }
0x266c   :  { %v13629_v0 = vpop.permute.xlu0 %10015  ;;  %v13631_v15 = vpop.permute.xlu1 %6323  ;;  %v6230_v51 = vsel %vm685_vm8, %v5870_v57, %v5897_v7  ;;  %v9922_v7 = vunpack.i.l.bf16 %v13408_v44  ;;  %v9943_v44 = vunpack.i.h.bf16 %v13416_v5 }
0x266d   :  { %14990 = vst [vmem:[#allocation45_spill] sm:$0xff] %v13631_v15  ;;  %v8853_v34 = vpack.c.bf16 %v6230_v51, %v6223_v58  ;;  %v6104_v58 = vsel %vm14992_vm15, %v9932_v8, %v14708_v16  ;;  %v14715_v51 = vunpack.i.l.bf16 %v13406_v46  ;;  %vm15018_vm15 = vmmov %vm14993_vm2 }
0x266e   :  { %v13673_v62 = vsel %vm685_vm8, %v6077_v13, %v6104_v58  ;;  %v9953_v13 = vunpack.i.h.bf16 %v13420_v42  ;;  %v14999_v58 = vunpack.i.h.bf16 %v13454_v25 }
0x266f   :  { %8854 = vmatprep.subr.bf16.mxu1 %v8853_v34  ;;  %v6103_v34 = vsel %vm14993_vm2, %v9922_v7, %v9932_v8  ;;  %v6076_v16 = vsel %vm14996_vm14, %v14715_v51, %v9927_v23  ;;  %14997 = vst [vmem:[#allocation48_spill] sm:$0xff] %v13673_v62  ;;  %v9998_v23 = vunpack.i.h.bf16 %v13596_v9  ;;  %v9997_v8 = vunpack.i.l.bf16 %v13596_v9  ;;  %vm15019_vm2 = vmmov %vm15004_vm3 }
0x2670   :  { %v13636_v61 = vpop.permute.xlu0 %10020  ;;  %v13638_v27 = vpop.permute.xlu1 %10075  ;;  %v13679_v40 = vsel %vm685_vm8, %v6076_v16, %v6103_v34  ;;  %v15000_v51 = vunpack.i.l.bf16 %v13454_v25  ;;  %v10007_v9 = vunpack.i.l.bf16 %v13604_v19  ;;  %v15002_v25 = vunpack.i.h.bf16 %v13424_v36  ;;  %vm15022_vm14 = vmmov %vm15019_vm2 }
0x2671   :  { %14998 = vst [vmem:[#allocation49_spill] sm:$0xff] %v13679_v40  ;;  %v10017_v16 = vunpack.i.l.bf16 %v13629_v0  ;;  %v15008_v19 = vunpack.i.h.bf16 %v13428_v6  ;;  %v10022_v6 = vunpack.i.l.bf16 %v13636_v61  ;;  %vm15026_vm9 = vmmov %vm15019_vm2 }
0x2672   :  { %v6212_v56 = vsel %vm15001_vm7, %v15000_v51, %v14999_v58  ;;  %v15003_v51 = vunpack.i.l.bf16 %v13424_v36  ;;  %v13722_v36 = vsel %vm15011_vm6, %v9993_v14, %v9998_v23  ;;  %vm15024_vm7 = vmmov %vm15019_vm2 }
0x2673   :  { %v6185_v49 = vsel %vm15010_vm1, %v15009_v28, %v15008_v19  ;;  %v15020_v19 = vunpack.i.h.bf16 %v13612_v60  ;;  %v13750_v1 = vsel %vm15022_vm14, %v10017_v16, %v10007_v9  ;;  %v15027_v16 = vunpack.i.l.bf16 %v13416_v5  ;;  %vm15028_vm1 = vmmov %vm15019_vm2 }
0x2674   :  { %v13640_v30 = vpop.permute.xlu0 %10025  ;;  %v13642_v32 = vpop.permute.xlu1 %10080  ;;  %v13706_v58 = vsel %vm15004_vm3, %v15003_v51, %v15002_v25  ;;  %v5869_v25 = vsel %vm15012_vm5, %v9997_v8, %v9992_v55  ;;  %v13727_v37 = vsel %vm685_vm8, %v6185_v49, %v6212_v56  ;;  %v13740_v55 = vsel %vm15016_vm10, %v10003_v2, %v9922_v7  ;;  %vm15025_vm3 = vmmov %vm15021_vm11 }
0x2675   :  { %15013 = vst [vmem:[#allocation50_spill] sm:$0xff] %v13727_v37  ;;  %v15017_v8 = vunpack.i.l.bf16 %v13602_v31  ;;  %v5924_v56 = vsel %vm15019_vm2, %v10007_v9, %v10008_v24  ;;  %v5978_v39 = vsel %vm15021_vm11, %v10012_v10, %v15020_v19  ;;  %v10028_v51 = vunpack.i.h.bf16 %v13640_v30  ;;  %vm15030_vm6 = vmmov %vm15025_vm3 }
0x2676   :  { %v15023_v7 = vunpack.i.h.bf16 %v13629_v0  ;;  %v13765_v9 = vsel %vm15025_vm3, %v10022_v6, %v10012_v10  ;;  %vm15031_vm5 = vcmask 556032   ;;  %vm15035_vm10 = vcmask 793600  }
0x2677   :  { %v5872_v49 = vsel %vm15018_vm15, %v9998_v23, %v15017_v8  ;;  %v13774_v17 = vsel %vm15026_vm9, %v9943_v44, %v10028_v51  ;;  %v13779_v10 = vsel %vm15028_vm1, %v10028_v51, %v15027_v16  ;;  %vm15033_vm12 = vmmov %vm15031_vm5  ;;  %v15036_v5 = vunpack.i.l.bf16 %v13606_v26 }
0x2678   :  { %v13648_v33 = vpop.permute.xlu0 %10030  ;;  %v13650_v57 = vpop.permute.xlu1 %6325  ;;  %v13758_v29 = vsel %vm15024_vm7, %v10008_v24, %v15023_v7  ;;  %vm15037_vm15 = vcmask 1039360   ;;  %vm15045_vm7 = vcmask 564224   ;;  %vm15049_vm9 = vcmask 809984  }
0x2679   :  { %14991 = vst [vmem:[#allocation46_spill] sm:$0xff] %v13650_v57  ;;  %v15029_v6 = vunpack.i.h.bf16 %v13648_v33  ;;  %vm15039_vm2 = vmmov %vm15037_vm15 }
0x267a   :  { %vm15041_vm11 = vmmov %vm15039_vm2 }
0x267b   :  { %v13784_v45 = vsel %vm15030_vm6, %v9953_v13, %v15029_v6  ;;  %v15040_v13 = vunpack.i.h.bf16 %v13406_v46  ;;  %v15042_v6 = vunpack.i.l.bf16 %v13406_v46  ;;  %vm15043_vm14 = vmmov %vm15039_vm2 }
0x267c   :  { %v13660_v53 = vpop.permute.xlu0 %10035  ;;  %v13662_v18 = vpop.permute.xlu1 %10085  ;;  %vm15047_vm3 = vmmov %vm15039_vm2 }
0x267d   :  { %14994 = vst [vmem:[#allocation47_spill] sm:$0xff] %v13662_v18  ;;  %v10037_v2 = vunpack.i.l.bf16 %v13660_v53  ;;  %v10088_v22 = vunpack.i.h.bf16 %v13662_v18  ;;  %v15038_v16 = vunpack.i.l.bf16 %v13662_v18  ;;  %vm15051_vm1 = vmmov %vm15049_vm9 }
0x267e   :  { %vm15053_vm6 = vmmov %vm15051_vm1 }
0x267f   :  { %v6031_v31 = vsel %vm15031_vm5, %v10042_v4, %v10037_v2  ;;  %v6074_v4 = vsel %vm15041_vm11, %v15040_v13, %v10088_v22  ;;  %vm15054_vm5 = vmmov %vm15035_vm10 }
0x2680   :  { %v13693_v34 = vpop.permute.xlu0 %10045  ;;  %v13695_v41 = vpop.permute.xlu1 %10090  ;;  %vm15064_vm11 = vmmov %vm15054_vm5 }
0x2681   :  { %v10093_v46 = vunpack.i.h.bf16 %v13695_v41 }
0x2684   :  { %v13735_v28 = vpop.permute.xlu0 %10050  ;;  %v13737_v14 = vpop.permute.xlu1 %10095 }
0x2685   :  { %15015 = vst [vmem:[#allocation3_spill] sm:$0xff] %v13735_v28  ;;  %v10097_v19 = vunpack.i.l.bf16 %v13737_v14  ;;  %v15034_v40 = vunpack.i.h.bf16 %v13737_v14 }
0x2687   :  { %v5951_v44 = vsel %vm15035_vm10, %v10097_v19, %v15034_v40  ;;  %vm15057_vm10 = vmmov %vm15051_vm1 }
0x2688   :  { %v10066_v54 = vpop.permute.xlu0 %10065  ;;  %v13769_v20 = vpop.permute.xlu1 %10100 }
0x2689   :  { %v10068_v24 = vunpack.i.h.bf16 %v10066_v54  ;;  %v10067_v7 = vunpack.i.l.bf16 %v10066_v54  ;;  %v10102_v8 = vunpack.i.l.bf16 %v13769_v20  ;;  %v15032_v54 = vunpack.i.h.bf16 %v13660_v53 }
0x268a   :  { %v15044_v40 = vunpack.i.h.bf16 %v13769_v20 }
0x268b   :  { %v6032_v23 = vsel %vm15033_vm12, %v10037_v2, %v15032_v54  ;;  %v5842_v51 = vsel %vm15037_vm15, %v10067_v7, %v15036_v5  ;;  %v5845_v57 = vsel %vm15039_vm2, %v10068_v24, %v15038_v16  ;;  %v6075_v2 = vsel %vm15043_vm14, %v10088_v22, %v15042_v6  ;;  %vm15055_vm12 = vmmov %vm15045_vm7 }
0x268c   :  { %v6005_v59 = vsel %vm15045_vm7, %v10102_v8, %v15044_v40  ;;  %v10071_v62 = vpop.permute.xlu0 %10070  ;;  %v13809_v7 = vpop.permute.xlu1 %10105  ;;  %v15046_v5 = vunpack.i.h.bf16 %v13606_v26  ;;  %v6222_v22 = vsel %vm685_vm8, %v13439_v11, %v5842_v51  ;;  %v6225_v6 = vsel %vm685_vm8, %v13445_v38, %v5845_v57  ;;  %vm15059_vm15 = vmmov %vm15051_vm1 }
0x268d   :  { %v10073_v18 = vunpack.i.h.bf16 %v10071_v62  ;;  %v10072_v28 = vunpack.i.l.bf16 %v10071_v62  ;;  %v10107_v13 = vunpack.i.l.bf16 %v13809_v7  ;;  %v6237_v40 = vsel %vm685_vm8, %v5924_v56, %v5951_v44  ;;  %vm15066_vm14 = vmmov %vm15054_vm5 }
0x268e   :  { %v5844_v16 = vsel %vm15047_vm3, %v15046_v5, %v10068_v24  ;;  %v15048_v54 = vunpack.i.l.bf16 %v13614_v35  ;;  %v15050_v24 = vunpack.i.h.bf16 %v13614_v35  ;;  %v15052_v5 = vunpack.i.l.bf16 %v13695_v41 }
0x268f   :  { %v6244_v15 = vsel %vm685_vm8, %v5978_v39, %v6005_v59  ;;  %v5950_v56 = vsel %vm15054_vm5, %v10107_v13, %v10097_v19  ;;  %v6251_v39 = vsel %vm685_vm8, %v6032_v23, %v13280_v21  ;;  %v15056_v19 = vunpack.i.h.bf16 %v13414_v43 }
0x2690   :  { %v5896_v26 = vsel %vm15049_vm9, %v10072_v28, %v15048_v54  ;;  %v5898_v62 = vsel %vm15051_vm1, %v15050_v24, %v10073_v18  ;;  %v5899_v37 = vsel %vm15053_vm6, %v10073_v18, %v15052_v5  ;;  %v13831_v11 = vpop.permute.xlu0 %6321  ;;  %v10111_v51 = vpop.permute.xlu1 %10110  ;;  %v6224_v28 = vsel %vm685_vm8, %v13442_v3, %v5844_v16  ;;  %vm15070_vm9 = vmmov %vm15054_vm5 }
0x2691   :  { %v6229_v38 = vsel %vm685_vm8, %v5869_v25, %v5896_v26  ;;  %v6232_v57 = vsel %vm685_vm8, %v5872_v49, %v5899_v37  ;;  %v6231_v35 = vsel %vm685_vm8, %v13722_v36, %v5898_v62  ;;  %v10112_v44 = vunpack.i.l.bf16 %v10111_v51 }
0x2692   :  { %v8855_v54 = vpack.c.bf16 %v6229_v38, %v6222_v22  ;;  %v8869_v18 = vpack.c.bf16 %v6232_v57, %v6225_v6  ;;  %v8857_v24 = vpack.c.bf16 %v6244_v15, %v6237_v40  ;;  %v8871_v59 = vpack.c.bf16 %v6231_v35, %v6224_v28 }
0x2693   :  { %v6250_v25 = vsel %vm685_vm8, %v6031_v31, %v13305_v47  ;;  %v10027_v37 = vunpack.i.l.bf16 %v13640_v30  ;;  %v6004_v3 = vsel %vm15055_vm12, %v10112_v44, %v10102_v8  ;;  %v6258_v36 = vsel %vm685_vm8, %v6075_v2, %v13740_v55  ;;  %vm15077_vm12 = vmmov %vm15045_vm7 }
0x2694   :  { %8856 = vmatpush1.bf16.msra.mxu1 %v8855_v54  ;;  %8870 = vmatprep.subr.bf16.mxu0 %v8869_v18  ;;  %v6257_v49 = vsel %vm685_vm8, %v6074_v4, %v13732_v63  ;;  %v10032_v15 = vunpack.i.l.bf16 %v13648_v33  ;;  %v6128_v21 = vsel %vm15057_vm10, %v15056_v19, %v10093_v46  ;;  %v13854_v23 = vpop.permute.xlu0 %6319  ;;  %v13856_v47 = vpop.permute.xlu1 %10115  ;;  %v6236_v31 = vsel %vm685_vm8, %v13750_v1, %v5950_v56 }
0x2695   :  { %8858 = vmatprep.subr.bf16.mxu1 %v8857_v24  ;;  %8872 = vmatpush1.bf16.msra.mxu0 %v8871_v59  ;;  %v6243_v55 = vsel %vm685_vm8, %v13765_v9, %v6004_v3  ;;  %v15058_v63 = vunpack.i.l.bf16 %v13414_v43  ;;  %v10113_v4 = vunpack.i.h.bf16 %v10111_v51  ;;  %v10118_v2 = vunpack.i.h.bf16 %v13856_v47 }
0x2696   :  { %v8859_v16 = vpack.c.bf16 %v6243_v55, %v6236_v31  ;;  %v15060_v13 = vunpack.i.l.bf16 %v13420_v42  ;;  %v15061_v22 = vunpack.i.h.bf16 %v13648_v33  ;;  %vm15062_vm2 = vcmask 572416  }
0x2697   :  { %v6129_v8 = vsel %vm15059_vm15, %v10093_v46, %v15058_v63  ;;  %v10047_v40 = vunpack.i.l.bf16 %v13693_v34  ;;  %v10117_v1 = vunpack.i.l.bf16 %v13856_v47  ;;  %v8861_v26 = vpack.c.bf16 %v6258_v36, %v6251_v39  ;;  %vm15073_vm1 = vmmov %vm15062_vm2 }
0x2698   :  { %v6210_v6 = vsel %vm15062_vm2, %v15061_v22, %v15060_v13  ;;  %v10108_v9 = vunpack.i.h.bf16 %v13809_v7  ;;  %v15063_v43 = vunpack.i.h.bf16 %v13418_v52  ;;  %v15065_v62 = vunpack.i.l.bf16 %v13418_v52  ;;  %8860 = vmatpush1.bf16.msra.mxu1 %v8859_v16  ;;  %v13880_v51 = vpop.permute.xlu0 %6327  ;;  %v13882_v38 = vpop.permute.xlu1 %10120  ;;  %vm15075_vm6 = vmmov %vm15073_vm1 }
0x2699   :  { %v8863_v42 = vpack.c.bf16 %v6257_v49, %v6250_v25  ;;  %8862 = vmatprep.subr.bf16.mxu1 %v8861_v26  ;;  %v6265_v57 = vsel %vm685_vm8, %v6129_v8, %v13779_v10  ;;  %v6264_v28 = vsel %vm685_vm8, %v6128_v21, %v13774_v17  ;;  %v15067_v35 = vunpack.i.h.bf16 %v13769_v20  ;;  %vm15084_vm2 = vmmov %vm15045_vm7 }
0x269a   :  { %v6182_v46 = vsel %vm15064_vm11, %v15063_v43, %v10118_v2  ;;  %v6183_v5 = vsel %vm15066_vm14, %v10118_v2, %v15065_v62  ;;  %v10122_v44 = vunpack.i.l.bf16 %v13882_v38  ;;  %v10078_v24 = vunpack.i.h.bf16 %v13638_v27 }
0x269b   :  { %v6272_v7 = vsel %vm685_vm8, %v6183_v5, %v6210_v6  ;;  %v6271_v52 = vsel %vm685_vm8, %v6182_v46, %v13784_v45  ;;  %v6006_v56 = vsel %vm15045_vm7, %v15067_v35, %v10113_v4  ;;  %v10077_v10 = vunpack.i.l.bf16 %v13638_v27  ;;  %v15085_v5 = vld [vmem:[#allocation50_spill] sm:$0xff]  ;;  %vm15091_vm7 = vmmov %vm15073_vm1 }
0x269c   :  { %v8865_v54 = vpack.c.bf16 %v6272_v7, %v6265_v57  ;;  %v8867_v18 = vpack.c.bf16 %v6271_v52, %v6264_v28  ;;  %v15068_v59 = vunpack.i.h.bf16 %v13600_v48  ;;  %vm15069_vm3 = vcmask 556032   ;;  %8864 = vmatpush1.bf16.msra.mxu1 %v8863_v42  ;;  %v13925_v63 = vpop.permute.xlu0 %10125  ;;  %v15086_v42 = vld [vmem:[#allocation3_spill] sm:$0xff]  ;;  %v15088_v28 = vld [vmem:[#allocation20_spill] sm:$0xff] }
0x269d   :  { %v5953_v20 = vsel %vm15070_vm9, %v10108_v9, %v10117_v1  ;;  %v15071_v45 = vunpack.i.h.bf16 %v13636_v61  ;;  %v15072_v39 = vunpack.i.h.bf16 %v13612_v60  ;;  %v15076_v49 = vunpack.i.h.bf16 %v13737_v14  ;;  %v13927_v61 = vpop.permute.xlu1 %6029  ;;  %vm15082_vm15 = vmmov %vm15069_vm3 }
0x269e   :  { %v6034_v17 = vsel %vm15069_vm3, %v15068_v59, %v10047_v40  ;;  %v6007_v21 = vsel %vm15077_vm12, %v10113_v4, %v10122_v44  ;;  %v15078_v31 = vunpack.i.h.bf16 %v13629_v0  ;;  %vm15079_vm10 = vcmask 801792   ;;  %8866 = vmatprep.subr.bf16.mxu1 %v8865_v54  ;;  %vm15093_vm3 = vmmov %vm15084_vm2 }
0x269f   :  { %v5979_v25 = vsel %vm15073_vm1, %v15072_v39, %v15071_v45  ;;  %v15074_v3 = vmov %v15071_v45  ;;  %v5952_v19 = vsel %vm15054_vm5, %v15076_v49, %v10108_v9  ;;  %v10083_v55 = vunpack.i.h.bf16 %v13642_v32  ;;  %vm15089_vm11 = vmmov %vm15079_vm10  ;;  %v15098_v49 = vld [vmem:[#allocation44_spill] sm:$0xff] }
0x26a0   :  { %v5980_v36 = vsel %vm15075_vm6, %v15074_v3, %v10032_v15  ;;  %v5926_v60 = vsel %vm15079_vm10, %v15078_v31, %v10027_v37  ;;  %v6245_v8 = vsel %vm685_vm8, %v5979_v25, %v6006_v56  ;;  %v10082_v4 = vunpack.i.l.bf16 %v13642_v32  ;;  %8868 = vmatpush1.bf16.msra.mxu1 %v8867_v18  ;;  %vm15090_vm14 = vmmov %vm15079_vm10  ;;  %v15097_v3 = vld [vmem:[#allocation49_spill] sm:$0xff] }
0x26a1   :  { %v6246_v14 = vsel %vm685_vm8, %v5980_v36, %v6007_v21  ;;  %v15080_v2 = vmov %v15068_v59  ;;  %v15081_v16 = vunpack.i.h.bf16 %v13660_v53  ;;  %v6239_v13 = vsel %vm685_vm8, %v5926_v60, %v5953_v20  ;;  %v15083_v53 = vld [vmem:[#allocation45_spill] sm:$0xff]  ;;  %v10131_v7 = vpop.permute.xlu1 %10130  ;;  %v13972_v59 = vld [vmem:[%s14575_s1 + $0x150] sm:$0x1f]  ;;  %vm15094_vm9 = vmmov %vm15084_vm2 }
0x26a2   :  { %v6253_v22 = vsel %vm685_vm8, %v6034_v17, %v13297_v12  ;;  %v10123_v6 = vunpack.i.h.bf16 %v13882_v38  ;;  %v8873_v26 = vpack.c.bf16 %v6246_v14, %v6239_v13  ;;  %v6238_v9 = vsel %vm685_vm8, %v13758_v29, %v5952_v19  ;;  %v13953_v29 = vpop.permute.xlu0 %10145  ;;  %v15092_v17 = vld [vmem:[#allocation46_spill] sm:$0xff]  ;;  %vm15095_vm1 = vmmov %vm15084_vm2  ;;  %v15104_v19 = vld [vmem:[#allocation47_spill] sm:$0xff] }
0x26a3   :  { %v6033_v0 = vsel %vm15082_vm15, %v15081_v16, %v15080_v2  ;;  %v6267_v43 = vsel %vm685_vm8, %v13714_v50, %v13706_v58  ;;  %v10048_v48 = vunpack.i.h.bf16 %v13693_v34  ;;  %v6334_v46 = vsel %vm15084_vm2, %v13831_v11, %v15083_v53  ;;  %v15087_v50 = vld [vmem:[#allocation48_spill] sm:$0xff]  ;;  %vm15096_vm5 = vmmov %vm15082_vm15 }
0x26a4   :  { %v8875_v62 = vpack.c.bf16 %v6245_v8, %v6238_v9  ;;  %v8881_v12 = vpack.c.bf16 %v15085_v5, %v6267_v43  ;;  %v10053_v38 = vunpack.i.h.bf16 %v15086_v42  ;;  %v10052_v57 = vunpack.i.l.bf16 %v15086_v42  ;;  %8874 = vmatprep.subr.bf16.mxu0 %v8873_v26  ;;  %6370 = vmatprep.subr.mxu1 %v6334_v46  ;;  %vm15102_vm15 = vmmov %vm15095_vm1 }
0x26a5   :  { %v8877_v58 = vpack.c.bf16 %v15087_v50, %v6253_v22  ;;  %v6252_v52 = vsel %vm685_vm8, %v6033_v0, %v15088_v28  ;;  %v5928_v35 = vsel %vm15089_vm11, %v10077_v10, %v10078_v24  ;;  %v13964_v56 = vsel %vm15090_vm14, %v10027_v37, %v10077_v10  ;;  %v10136_v34 = vpop.permute.xlu1 %10135 }
0x26a6   :  { %v10132_v54 = vunpack.i.l.bf16 %v10131_v7  ;;  %8876 = vmatpush1.bf16.msra.mxu0 %v8875_v62  ;;  %v5982_v18 = vsel %vm15091_vm7, %v10082_v4, %v10083_v55  ;;  %v6335_v20 = vsel %vm15093_vm3, %v15083_v53, %v15092_v17  ;;  %v6333_v30 = vsel %vm15094_vm9, %v13854_v23, %v13831_v11  ;;  %vm15109_vm7 = vmmov %vm15095_vm1 }
0x26a7   :  { %v6008_v37 = vsel %vm15095_vm1, %v10122_v44, %v10123_v6  ;;  %v10133_v10 = vunpack.i.h.bf16 %v10131_v7  ;;  %8878 = vmatprep.subr.bf16.mxu0 %v8877_v58  ;;  %v5981_v45 = vsel %vm15075_vm6, %v10032_v15, %v10082_v4  ;;  %v13987_v39 = vsel %vm15096_vm5, %v10047_v40, %v10048_v48  ;;  %6371 = vmatpush1.msra.mxu1 %v6333_v30  ;;  %v6003_v44 = vpop.permute.xlu0 %6002  ;;  %vm15110_vm3 = vmmov %vm15096_vm5  ;;  %v15118_v7 = vld [vmem:[#allocation31_spill] sm:$0xff]  ;;  %v15120_v58 = vld [vmem:[#allocation33_spill] sm:$0xff] }
0x26a8   :  { %v10147_v25 = vunpack.i.l.bf16 %v13953_v29  ;;  %v8879_v36 = vpack.c.bf16 %v15097_v3, %v6252_v52  ;;  %v15099_v11 = vunpack.i.l.bf16 %v15098_v49  ;;  %vm15100_vm12 = vcmask 1031168   ;;  %v15121_v52 = vld [vmem:[#allocation24_spill] sm:$0xff]  ;;  %v15124_v30 = vld [vmem:[#allocation22_spill] sm:$0xff] }
0x26a9   :  { %vm15101_vm10 = vmmov %vm15100_vm12  ;;  %v10148_v15 = vunpack.i.h.bf16 %v13953_v29  ;;  %v6336_v40 = vsel %vm15102_vm15, %v15092_v17, %v13880_v51  ;;  %vm15103_vm2 = vcmask 588800   ;;  %v15105_v21 = vunpack.i.l.bf16 %v15104_v19  ;;  %v10141_v5 = vpop.permute.xlu1 %10140  ;;  %v15117_v29 = vld [vmem:[#allocation32_spill] sm:$0xff]  ;;  %v15126_v3 = vld [vmem:[#allocation34_spill] sm:$0xff] }
0x26aa   :  { %v5873_v23 = vsel %vm15100_vm12, %v15099_v11, %v10052_v57  ;;  %v5874_v33 = vsel %vm15101_vm10, %v10052_v57, %v10053_v38  ;;  %7617 = vmatmul.mubr.msk.f32.vlgmr.msra.gmra.mrb[42].mxu1 %vm15103_vm2, %v13972_v59  ;;  %vm15106_vm11 = vcmask 1039360   ;;  %v10138_v60 = vunpack.i.h.bf16 %v10136_v34  ;;  %8880 = vmatpush1.bf16.msra.mxu0 %v8879_v36 }
0x26ab   :  { %v5846_v31 = vsel %vm15106_vm11, %v15105_v21, %v10132_v54  ;;  %v10137_v14 = vunpack.i.l.bf16 %v10136_v34  ;;  %v14007_v8 = vsel %vm685_vm8, %v5981_v45, %v6008_v37  ;;  %v15107_v4 = vmov 0.0   ;;  %vm15108_vm14 = vmmov %vm15106_vm11  ;;  %8882 = vmatprep.subr.bf16.mxu0 %v8881_v12  ;;  %v14024_v62 = vpop.permute.xlu0 %10150  ;;  %v15116_v12 = vld [vmem:[#allocation29_spill] sm:$0xff] }
0x26ac   :  { %6560 = vmatprep.mubr.f32.mxu1 %v15107_v4  ;;  %v10128_v2 = vunpack.i.h.bf16 %v13925_v63  ;;  %v10127_v16 = vunpack.i.l.bf16 %v13925_v63  ;;  %v5847_v0 = vsel %vm15108_vm14, %v10132_v54, %v10133_v10  ;;  %v6009_v13 = vsel %vm15109_vm7, %v10123_v6, %v6003_v44  ;;  %vm15123_vm12 = vmmov %vm15106_vm11 }
0x26ad   :  { %v6036_v22 = vsel %vm15110_vm3, %v10048_v48, %v13927_v61  ;;  %vm15111_vm9 = vcmask 793600   ;;  %v15112_v9 = vunpack.i.l.bf16 %v13695_v41  ;;  %vm15113_vm1 = vcmask 809984   ;;  %vm15125_vm10 = vmmov %vm15106_vm11  ;;  %v10156_v21 = vpop.permute.xlu1 %10155 }
0x26ae   :  { %v5954_v26 = vsel %vm15111_vm9, %v10117_v1, %v10147_v25  ;;  %vm15114_vm6 = vmmov %vm15113_vm1  ;;  %v6226_v48 = vsel %vm685_vm8, %v15116_v12, %v5846_v31  ;;  %v6248_v1 = vsel %vm685_vm8, %v5982_v18, %v6009_v13  ;;  %v10143_v57 = vunpack.i.h.bf16 %v10141_v5 }
0x26af   :  { %v5900_v43 = vsel %vm15113_vm1, %v15112_v9, %v10137_v14  ;;  %v5901_v53 = vsel %vm15114_vm6, %v10137_v14, %v10138_v60  ;;  %vm15115_vm5 = vmmov %vm15111_vm9  ;;  %v10142_v41 = vunpack.i.l.bf16 %v10141_v5  ;;  %v15119_v50 = vpack.c.bf16 %v15117_v29, %v15118_v7  ;;  %v10161_v19 = vpop.permute.xlu0 %10160  ;;  %v15134_v9 = vld [vmem:[#allocation27_spill] sm:$0xff]  ;;  %v15138_v5 = vld [vmem:[#allocation26_spill] sm:$0xff] }
0x26b0   :  { %v5955_v46 = vsel %vm15115_vm5, %v10147_v25, %v10148_v15  ;;  %v6234_v6 = vsel %vm685_vm8, %v5874_v33, %v5901_v53  ;;  %v6233_v47 = vsel %vm685_vm8, %v5873_v23, %v5900_v43  ;;  %v6227_v28 = vsel %vm685_vm8, %v15120_v58, %v5847_v0  ;;  %v15127_v23 = vld [vmem:[#allocation25_spill] sm:$0xff]  ;;  %vm15140_vm3 = vmmov %vm15113_vm1 }
0x26b1   :  { %8884 = vmatpush1.bf16.msra.mxu0 %v15119_v50  ;;  %v15122_v54 = vunpack.i.h.bf16 %v15121_v52  ;;  %v6255_v37 = vsel %vm685_vm8, %v6036_v22, %v15124_v30  ;;  %v8885_v45 = vpack.c.bf16 %v6234_v6, %v6227_v28  ;;  %v8887_v25 = vpack.c.bf16 %v6233_v47, %v6226_v48  ;;  %v15133_v22 = vld [vmem:[#allocation21_spill] sm:$0xff]  ;;  %vm15141_vm9 = vmmov %vm15113_vm1  ;;  %v15146_v50 = vld [vmem:[#allocation30_spill] sm:$0xff] }
0x26b2   :  { %6441 = vmatprep.subr.mxu0 %v6336_v40  ;;  %v6079_v18 = vsel %vm15125_vm10, %v10127_v16, %v10128_v2  ;;  %v6228_v36 = vsel %vm685_vm8, %v15126_v3, %v10133_v10  ;;  %v6235_v49 = vsel %vm685_vm8, %v10053_v38, %v10138_v60  ;;  %v6241_v11 = vsel %vm685_vm8, %v5928_v35, %v5955_v46  ;;  %vm15144_vm1 = vmmov %vm15115_vm5 }
0x26b3   :  { %v6078_v17 = vsel %vm15123_vm12, %v15122_v54, %v10127_v16  ;;  %v15128_v33 = vunpack.i.h.bf16 %v15127_v23  ;;  %vm15129_vm15 = vcmask 1031168   ;;  %8886 = vmatprep.subr.bf16.mxu1 %v8885_v45  ;;  %v8889_v31 = vpack.c.bf16 %v6248_v1, %v6241_v11  ;;  %v15142_v1 = vld [vmem:[#allocation28_spill] sm:$0xff]  ;;  %vm15145_vm6 = vmmov %vm15144_vm1 }
0x26b4   :  { %vm15130_vm2 = vmmov %vm15129_vm15  ;;  %v6240_v14 = vsel %vm685_vm8, %v13964_v56, %v5954_v26  ;;  %v6242_v42 = vsel %vm685_vm8, %v10078_v24, %v10148_v15  ;;  %v6249_v38 = vsel %vm685_vm8, %v10083_v55, %v6003_v44  ;;  %v10158_v35 = vunpack.i.h.bf16 %v10156_v21  ;;  %8888 = vmatpush1.bf16.msra.mxu1 %v8887_v25  ;;  %v10166_v15 = vpop.permute.xlu1 %10165 }
0x26b5   :  { %v6105_v34 = vsel %vm15129_vm15, %v15128_v33, %v10142_v41  ;;  %v6106_v40 = vsel %vm15130_vm2, %v10142_v41, %v10143_v57  ;;  %v10157_v10 = vunpack.i.l.bf16 %v10156_v21  ;;  %6442 = vmatpush1.msra.mxu0 %v6335_v20  ;;  %v8902_v60 = vpack.c.bf16 %v6235_v49, %v6228_v36  ;;  %8890 = vmatprep.subr.bf16.mxu1 %v8889_v31  ;;  %v6330_v36 = vpop.permute.xlu0 %6329  ;;  %v15155_v31 = vld [vmem:[#allocation8_spill] sm:$0xff] }
0x26b6   :  { %v10153_v16 = vunpack.i.h.bf16 %v14024_v62  ;;  %v10152_v0 = vunpack.i.l.bf16 %v14024_v62  ;;  %v15131_v13 = vmov 0.0|0.0   ;;  %v6262_v27 = vsel %vm685_vm8, %v6079_v18, %v6106_v40 }
0x26b7   :  { %8901 = vmatprep.subr.bf16.mxu0 %v15131_v13  ;;  %v10163_v56 = vunpack.i.h.bf16 %v10161_v19  ;;  %v10162_v24 = vunpack.i.l.bf16 %v10161_v19  ;;  %vm15132_vm11 = vcmask 588800   ;;  %v8891_v32 = vpack.c.bf16 %v14007_v8, %v6240_v14 }
0x26b8   :  { %7618 = vmatmul.mubr.msk.f32.vlgmr.msra.gmra.mrb[42].mxu0 %vm15132_vm11, %v13972_v59  ;;  %v6261_v55 = vsel %vm685_vm8, %v6078_v17, %v6105_v34  ;;  %v8905_v20 = vpack.c.bf16 %v6249_v38, %v6242_v42  ;;  %v8893_v44 = vpack.c.bf16 %v6262_v27, %v6255_v37  ;;  %v6254_v26 = vsel %vm685_vm8, %v13987_v39, %v15133_v22  ;;  %v15150_v17 = vld [vmem:[#allocation23_spill] sm:$0xff]  ;;  %v6332_v18 = vpop.permute.xlu1 %6331  ;;  %vm15153_vm2 = vmmov %vm15132_vm11  ;;  %v15156_v42 = vld [vmem:[#allocation9_spill] sm:$0xff] }
0x26b9   :  { %8903 = vmatpush3.bf16.msra.mxu0 %v8902_v60  ;;  %8103 = vmatprep.mubr.msk.f32.mxu0 %vm14935_vm13, %v15107_v4  ;;  %v15135_v43 = vunpack.i.h.bf16 %v15134_v9  ;;  %vm15136_vm14 = vcmask 801792   ;;  %v10168_v8 = vunpack.i.h.bf16 %v10166_v15  ;;  %v10167_v62 = vunpack.i.l.bf16 %v10166_v15  ;;  %vm15154_vm11 = vmmov %vm15153_vm2 }
0x26ba   :  { %vm15137_vm7 = vmmov %vm15136_vm14  ;;  %8892 = vmatpush1.bf16.msra.mxu1 %v8891_v32  ;;  %8904 = vmatprep.subr.bf16.mxu0 %v15131_v13  ;;  %v15139_v6 = vunpack.i.h.bf16 %v15138_v5  ;;  %v6133_v39 = vsel %vm15141_vm9, %v10152_v0, %v10153_v16  ;;  %v6263_v48 = vsel %vm685_vm8, %v10128_v2, %v10143_v57  ;;  %v8895_v47 = vpack.c.bf16 %v6261_v55, %v6254_v26 }
0x26bb   :  { %v6159_v53 = vsel %vm15136_vm14, %v15135_v43, %v10157_v10  ;;  %v6160_v46 = vsel %vm15137_vm7, %v10157_v10, %v10158_v35  ;;  %8894 = vmatprep.subr.bf16.mxu1 %v8893_v44  ;;  %v15143_v41 = vunpack.i.h.bf16 %v15142_v1  ;;  %v6187_v7 = vsel %vm15145_vm6, %v10162_v24, %v10163_v56  ;;  %v15158_v44 = vld [vmem:[#allocation13_spill] sm:$0xff]  ;;  %v15159_v1 = vld [vmem:[#allocation18_spill] sm:$0xff] }
0x26bc   :  { %v6132_v12 = vsel %vm15140_vm3, %v15139_v6, %v10152_v0  ;;  %v15147_v58 = vunpack.i.h.bf16 %v15146_v50  ;;  %vm15148_vm5 = vcmask 572416   ;;  %v6269_v54 = vsel %vm685_vm8, %v6133_v39, %v6160_v46  ;;  %v15157_v0 = vld [vmem:[#allocation12_spill] sm:$0xff]  ;;  %v15160_v50 = vld [vmem:[#allocation19_spill] sm:$0xff] }
0x26bd   :  { %v6186_v29 = vsel %vm15144_vm1, %v15143_v41, %v10162_v24  ;;  %vm15149_vm12 = vmmov %vm15148_vm5  ;;  %8906 = vmatpush3.bf16.msra.mxu0 %v8905_v20  ;;  %v6268_v2 = vsel %vm685_vm8, %v6132_v12, %v6159_v53  ;;  %v6256_v30 = vsel %vm685_vm8, %v13927_v61, %v15150_v17  ;;  %v6277_v3 = vsel %vm685_vm8, %v10163_v56, %v10168_v8  ;;  %v15161_v17 = vld [vmem:[#allocation17_spill] sm:$0xff] }
0x26be   :  { %v6213_v28 = vsel %vm15148_vm5, %v15147_v58, %v10167_v62  ;;  %v6214_v52 = vsel %vm15149_vm12, %v10167_v62, %v10168_v8  ;;  %8896 = vmatpush1.bf16.msra.mxu1 %v8895_v47  ;;  %8907 = vmatprep.subr.bf16.mxu0 %v15131_v13  ;;  %v8908_v25 = vpack.c.bf16 %v6263_v48, %v6256_v30  ;;  %vm15151_vm10 = vcmask 564224  }
0x26bf   :  { %v6276_v63 = vsel %vm685_vm8, %v6187_v7, %v6214_v52  ;;  %v6275_v57 = vsel %vm685_vm8, %v6186_v29, %v6213_v28  ;;  %v6270_v49 = vsel %vm685_vm8, %v10153_v16, %v10158_v35  ;;  %v6338_v11 = vsel %vm15151_vm10, %v6330_v36, %v6332_v18  ;;  %vm15152_vm15 = vmmov %vm15151_vm10 }
0x26c0   :  { %v8897_v37 = vpack.c.bf16 %v6276_v63, %v6269_v54  ;;  %v8899_v45 = vpack.c.bf16 %v6275_v57, %v6268_v2  ;;  %v8911_v61 = vpack.c.bf16 %v6277_v3, %v6270_v49  ;;  %v6337_v23 = vsel %vm15152_vm15, %v13880_v51, %v6330_v36 }
0x26c1   :  { %8909 = vmatpush3.bf16.msra.mxu0 %v8908_v25  ;;  %v14116_v40 = vpop.permute.xlu0 %6348  ;;  %vm15162_vm14 = vcmask 355328   ;;  %vm15167_vm15 = vcmask 809984  }
0x26c2   :  { %8898 = vmatprep.subr.bf16.mxu1 %v8897_v37  ;;  %8910 = vmatprep.subr.bf16.mxu0 %v15131_v13  ;;  %vm15163_vm7 = vmmov %vm15162_vm14 }
0x26c3   :  { %8900 = vmatpush1.bf16.msra.mxu1 %v8899_v45 }
0x26c4   :  { %6512 = vmatprep.subr.mxu1 %v6338_v11 }
0x26c5   :  { %8912 = vmatpush3.bf16.msra.mxu0 %v8911_v61 }
0x26c6   :  { %8101 = vmatprep.subr.mxu0 %v15107_v4 }
0x26c7   :  { %6513 = vmatpush1.msra.mxu1 %v6337_v23 }
0x26c8   :  { %7619 = vmatmul.mubr.msk.f32.vlgmr.msra.gmra.mrb[44].mxu1 %vm15153_vm2, %v13972_v59 }
0x26c9   :  { %7117 = vmatprep.mubr.f32.mxu1 %v15107_v4  ;;  %8102 = vmatpush3.msra.mxu0 %v6332_v18 }
0x26ca   :  { %8104 = vmatmul.mubr.msk.f32.vlgmr.msra.gmra.mrb[44].mxu0 %vm15154_vm11, %v13972_v59 }
0x26cb   :  { %7188 = vmatprep.mubr.f32.mxu0 %v15107_v4 }
0x277d   :  { %v6420_v33 = vpop.f32.mrb[42].mxu1 }
0x277e   :  { %v6422_v34 = vpop.f32.mrb[43].mxu1  ;;  %v14119_v51 = vadd.f32 %v6420_v33, %v14116_v40 }
0x277f   :  { %v14122_v19 = vadd.f32 %v6422_v34, %v14116_v40 }
0x2780   :  { %v6637_v14 = vmul.f32 %v14119_v51, %v15155_v31 }
0x2781   :  { %v6638_v38 = vmul.f32 %v14122_v19, %v15156_v42 }
0x2782   :  { %v6659_v60 = vmul.f32 %v6637_v14, %v14119_v51  ;;  %v6644_v24 = vsel %vm685_vm8, %v6637_v14, 0.0 }
0x2783   :  { %v6660_v16 = vmul.f32 %v6638_v38, %v14122_v19  ;;  %v6645_v32 = vsel %vm685_vm8, %v6638_v38, 0.0 }
0x2784   :  { %v6666_v55 = vsel %vm685_vm8, %v6659_v60, 0.0  ;;  %v6646_v26 = vadd.f32 %v6645_v32, %v6644_v24 }
0x2785   :  { %v6667_v20 = vsel %vm685_vm8, %v6660_v16, 0.0 }
0x2786   :  { %v6668_v9 = vadd.f32 %v6667_v20, %v6666_v55 }
0x278b   :  { %v6491_v21 = vpop.f32.mrb[42].mxu0 }
0x278c   :  { %v14129_v35 = vadd.f32 %v6491_v21, %v14116_v40  ;;  %v6493_v10 = vpop.f32.mrb[43].mxu0  ;;  %v15164_v21 = vld [vmem:[#allocation43_spill] sm:$0xff] }
0x278d   :  { %v14136_v56 = vadd.f32 %v6493_v10, %v14116_v40 }
0x278e   :  { %v6639_v27 = vmul.f32 %v14129_v35, %v15157_v0 }
0x278f   :  { %v6640_v22 = vmul.f32 %v14136_v56, %v15158_v44 }
0x2790   :  { %v6661_v15 = vmul.f32 %v6639_v27, %v14129_v35  ;;  %v6647_v43 = vsel %vm685_vm8, %v6639_v27, 0.0 }
0x2791   :  { %v6662_v46 = vmul.f32 %v6640_v22, %v14136_v56  ;;  %v6648_v8 = vadd.f32 %v6647_v43, %v6646_v26  ;;  %v6649_v6 = vsel %vm685_vm8, %v6640_v22, 0.0 }
0x2792   :  { %v6669_v53 = vsel %vm685_vm8, %v6661_v15, 0.0 }
0x2793   :  { %v6670_v5 = vadd.f32 %v6669_v53, %v6668_v9  ;;  %v6671_v48 = vsel %vm685_vm8, %v6662_v46, 0.0  ;;  %v6650_v7 = vadd.f32 %v6649_v6, %v6648_v8 }
0x2795   :  { %v6672_v54 = vadd.f32 %v6671_v48, %v6670_v5 }
0x279b   :  { %v6562_v62 = vpop.f32.mrb[44].mxu1 }
0x279c   :  { %v6563_v12 = vadd.f32 %v6562_v62, %v14116_v40  ;;  %v6564_v39 = vpop.f32.mrb[45].mxu1 }
0x279d   :  { %v14152_v47 = vadd.f32 %v6564_v39, %v14116_v40  ;;  %v6633_v29 = vpop.f32.mrb[44].mxu0 }
0x279e   :  { %v6641_v41 = vmul.f32 %v6563_v12, %v15159_v1  ;;  %v14158_v28 = vadd.f32 %v6633_v29, %v14116_v40  ;;  %v8105_v52 = vpop.f32.mrb[45].mxu0 }
0x279f   :  { %v6642_v58 = vmul.f32 %v14152_v47, %v15160_v50 }
0x27a0   :  { %v6651_v63 = vsel %vm685_vm8, %v6641_v41, 0.0  ;;  %v6663_v2 = vmul.f32 %v6641_v41, %v6563_v12  ;;  %v6643_v30 = vmul.f32 %v14158_v28, %v15161_v17 }
0x27a1   :  { %v6664_v57 = vmul.f32 %v6642_v58, %v14152_v47  ;;  %v6652_v37 = vadd.f32 %v6651_v63, %v6650_v7  ;;  %v6653_v45 = vsel %vm685_vm8, %v6642_v58, 0.0 }
0x27a2   :  { %v6673_v25 = vsel %vm685_vm8, %v6663_v2, 0.0  ;;  %v6665_v18 = vmul.f32 %v6643_v30, %v14158_v28  ;;  %v6655_v49 = vsel %vm15162_vm14, %v6643_v30, 0.0 }
0x27a3   :  { %v6654_v3 = vadd.f32 %v6653_v45, %v6652_v37  ;;  %v6674_v36 = vadd.f32 %v6673_v25, %v6672_v54  ;;  %v6675_v11 = vsel %vm685_vm8, %v6664_v57, 0.0 }
0x27a4   :  { %v6677_v33 = vsel %vm15163_vm7, %v6665_v18, 0.0 }
0x27a5   :  { %v6656_v61 = vadd.f32 %v6655_v49, %v6654_v3  ;;  %v6676_v23 = vadd.f32 %v6675_v11, %v6674_v36 }
0x27a7   :  { %6657 = vadd.xlane.f32.xlu1 %v6656_v61  ;;  %v6678_v34 = vadd.f32 %v6677_v33, %v6676_v23 }
0x27a9   :  { %6679 = vadd.xlane.f32.xlu0 %v6678_v34 }
0x27b8   :  { %6703 = vperm.xlu1 %9715, %v15164_v21  }
0x27bf   :  { %6714 = vperm.xlu0 %10170, %v15164_v21  }
0x2834   :  { %v6658_v14 = vpop.xlane.xlu1 %6657 }
0x2835   :  { %v6681_v38 = vmul.f32 0.0015432099, %v6658_v14 }
0x2836   :  { %v6680_v10 = vpop.xlane.xlu0 %6679 }
0x2837   :  { %v6682_v60 = vmul.f32 0.0015432099, %v6680_v10  ;;  %v6683_v16 = vmul.f32 %v6681_v38, %v6681_v38  ;;  %v6686_v55 = vsub.f32 %v14119_v51, %v6681_v38  ;;  %v6687_v20 = vsub.f32 %v14122_v19, %v6681_v38 }
0x2838   :  { %v6688_v15 = vsub.f32 %v14129_v35, %v6681_v38  ;;  %v6689_v26 = vsub.f32 %v14136_v56, %v6681_v38  ;;  %v14176_v46 = vpop.permute.xlu1 %6703  ;;  %v6690_v19 = vsub.f32 %v6563_v12, %v6681_v38  ;;  %v6691_v58 = vsub.f32 %v14152_v47, %v6681_v38 }
0x2839   :  { %v6684_v27 = vsub.f32 %v6682_v60, %v6683_v16  ;;  %v6692_v37 = vsub.f32 %v14158_v28, %v6681_v38 }
0x283b   :  { %v6685_v24 = vmax.f32 %v6684_v27, 0.0 }
0x283d   :  { %v6693_v32 = vadd.f32 1e-05, %v6685_v24 }
0x283e   :  { %v14178_v8 = vpop.permute.xlu0 %6714 }
0x283f   :  { %10430 = vrsqrt.f32 %v6693_v32 }
0x2849   :  { %v10431_v22 = vpop.eup %10430 }
0x284a   :  { %v6695_v9 = vmul.f32 %v10431_v22, %v6686_v55  ;;  %v6696_v43 = vmul.f32 %v10431_v22, %v6687_v20  ;;  %v6697_v53 = vmul.f32 %v10431_v22, %v6688_v15  ;;  %v6698_v62 = vmul.f32 %v10431_v22, %v6689_v26 }
0x284b   :  { %v6699_v48 = vmul.f32 %v10431_v22, %v6690_v19  ;;  %v6700_v63 = vmul.f32 %v10431_v22, %v6691_v58  ;;  %v6701_v25 = vmul.f32 %v10431_v22, %v6692_v37 }
0x284c   :  { %v6706_v5 = vmul.f32 %v14176_v46, %v6695_v9  ;;  %v6707_v6 = vmul.f32 %v14176_v46, %v6696_v43  ;;  %v6708_v51 = vmul.f32 %v14176_v46, %v6697_v53  ;;  %v6709_v56 = vmul.f32 %v14176_v46, %v6698_v62 }
0x284d   :  { %v6710_v30 = vmul.f32 %v14176_v46, %v6699_v48  ;;  %v6712_v28 = vmul.f32 %v14176_v46, %v6701_v25 }
0x284e   :  { %v6717_v35 = vadd.f32 %v14178_v8, %v6706_v5  ;;  %v6718_v39 = vadd.f32 %v14178_v8, %v6707_v6  ;;  %v6719_v7 = vadd.f32 %v14178_v8, %v6708_v51  ;;  %v6720_v57 = vadd.f32 %v14178_v8, %v6709_v56 }
0x284f   :  { %v6721_v3 = vadd.f32 %v14178_v8, %v6710_v30  ;;  %v6723_v34 = vadd.f32 %v14178_v8, %v6712_v28 }
0x2850   :  { %vm6724_vm3 = vcmp.ge.f32.partialorder %v6717_v35, 0.0  ;;  %v6731_v41 = vmul.f32 0.1, %v6717_v35  ;;  %v6732_v29 = vmul.f32 0.1, %v6718_v39  ;;  %vm6725_vm9 = vcmp.ge.f32.partialorder %v6718_v39, 0.0 }
0x2851   :  { %v6733_v2 = vmul.f32 0.1, %v6719_v7  ;;  %vm6726_vm1 = vcmp.ge.f32.partialorder %v6719_v7, 0.0  ;;  %v6734_v47 = vmul.f32 0.1, %v6720_v57  ;;  %vm6727_vm6 = vcmp.ge.f32.partialorder %v6720_v57, 0.0 }
0x2852   :  { %v6738_v52 = vsel %vm6724_vm3, %v6717_v35, %v6731_v41  ;;  %v6739_v12 = vsel %vm6725_vm9, %v6718_v39, %v6732_v29  ;;  %v6735_v11 = vmul.f32 0.1, %v6721_v3  ;;  %vm6728_vm5 = vcmp.ge.f32.partialorder %v6721_v3, 0.0 }
0x2853   :  { %v6745_v54 = vmul.f32 %v6738_v52, %v15155_v31  ;;  %v6746_v45 = vmul.f32 %v6739_v12, %v15156_v42  ;;  %v6740_v18 = vsel %vm6726_vm1, %v6719_v7, %v6733_v2  ;;  %v6711_v31 = vmul.f32 %v14176_v46, %v6700_v63 }
0x2854   :  { %v6747_v36 = vmul.f32 %v6740_v18, %v15157_v0  ;;  %v6741_v49 = vsel %vm6727_vm6, %v6720_v57, %v6734_v47  ;;  %v6742_v23 = vsel %vm6728_vm5, %v6721_v3, %v6735_v11  ;;  %v6737_v14 = vmul.f32 0.1, %v6723_v34 }
0x2855   :  { %6759 = vrot.lane.b32.xlu1 %v6745_v54, %s10475_s4  ;;  %v6722_v61 = vadd.f32 %v14178_v8, %v6711_v31  ;;  %v6748_v42 = vmul.f32 %v6741_v49, %v15158_v44  ;;  %v6749_v0 = vmul.f32 %v6742_v23, %v15159_v1  ;;  %vm6730_vm10 = vcmp.ge.f32.partialorder %v6723_v34, 0.0 }
0x2856   :  { %v6744_v10 = vsel %vm6730_vm10, %v6723_v34, %v6737_v14  ;;  %vm15173_vm9 = vcmask 801792   ;;  %vm15174_vm1 = vcmask 572416   ;;  %vm15178_vm10 = vcmask 793600  }
0x2857   :  { %v6736_v33 = vmul.f32 0.1, %v6722_v61  ;;  %vm6729_vm12 = vcmp.ge.f32.partialorder %v6722_v61, 0.0  ;;  %v6751_v44 = vmul.f32 %v6744_v10, %v15161_v17  ;;  %vm15175_vm6 = vmmov %vm15173_vm9 }
0x2858   :  { %vm15176_vm5 = vmmov %vm15175_vm6 }
0x2859   :  { %6761 = vrot.lane.b32.xlu1 %v6746_v45, %s10475_s4  ;;  %v6743_v21 = vsel %vm6729_vm12, %v6722_v61, %v6736_v33  ;;  %vm15177_vm12 = vmmov %vm15174_vm1 }
0x285a   :  { %v6750_v38 = vmul.f32 %v6743_v21, %v15160_v50 }
0x285d   :  { %6763 = vrot.lane.b32.xlu1 %v6747_v36, %s10475_s4 }
0x2861   :  { %6765 = vrot.lane.b32.xlu1 %v6748_v42, %s10475_s4 }
0x2865   :  { %6767 = vrot.lane.b32.xlu1 %v6749_v0, %s10475_s4 }
0x2869   :  { %6769 = vrot.lane.b32.xlu1 %v6750_v38, %s10475_s4 }
0x286d   :  { %6771 = vrot.lane.b32.xlu1 %v6751_v44, %s10475_s4 }
0x28c7   :  { %v6760_v60 = vpop.permute.xlu1 %6759 }
0x28c8   :  { %v14220_v55 = vsel %vm1227_vm0, 0.0, %v6760_v60 }
0x28c9   :  { %v6790_v41 = vrot.slane %v14220_v55, 4 }
0x28cb   :  { %v6762_v16 = vpop.permute.xlu1 %6761 }
0x28cc   :  { %v14211_v24 = vsel %vm1227_vm0, %v6760_v60, %v6762_v16 }
0x28cd   :  { %v6791_v51 = vrot.slane %v14211_v24, 4 }
0x28cf   :  { %v6764_v27 = vpop.permute.xlu1 %6763 }
0x28d0   :  { %v14214_v1 = vsel %vm1227_vm0, %v6762_v16, %v6764_v27 }
0x28d1   :  { %v10171_v32 = vpack.i.bf16 %v14214_v1, %v14211_v24  ;;  %v6792_v5 = vrot.slane %v14214_v1, 4 }
0x28d3   :  { %10172 = vrot.lane.b32.xlu0 %v10171_v32, %s10436_s0  ;;  %v6766_v50 = vpop.permute.xlu1 %6765  ;;  %v10216_v19 = vpack.i.bf16 %v6792_v5, %v6791_v51 }
0x28d4   :  { %v14223_v17 = vsel %vm1227_vm0, %v6764_v27, %v6766_v50 }
0x28d5   :  { %v10176_v20 = vpack.i.bf16 %v14223_v17, %v14220_v55  ;;  %v6793_v48 = vrot.slane %v14223_v17, 4 }
0x28d7   :  { %10177 = vrot.lane.b32.xlu1 %v10176_v20, %s10436_s0  ;;  %v6768_v15 = vpop.permute.xlu1 %6767  ;;  %v10256_v29 = vpack.i.bf16 %v6793_v48, %v6790_v41 }
0x28d8   :  { %v14231_v26 = vsel %vm1227_vm0, %v6766_v50, %v6768_v15 }
0x28d9   :  { %v6794_v39 = vrot.slane %v14231_v26, 4 }
0x28db   :  { %6988 = vrot.lane.b32.xlu1 %v14211_v24, %s14893_s20  ;;  %v6770_v22 = vpop.permute.xlu1 %6769 }
0x28dc   :  { %v14234_v9 = vsel %vm1227_vm0, %v6768_v15, %v6770_v22 }
0x28dd   :  { %v10181_v43 = vpack.i.bf16 %v14234_v9, %v14231_v26  ;;  %v6795_v35 = vrot.slane %v14234_v9, 4 }
0x28df   :  { %6986 = vrot.lane.b32.xlu1 %v14220_v55, %s14893_s20  ;;  %10182 = vrot.lane.b32.xlu0 %v10181_v43, %s10436_s0  ;;  %v6772_v53 = vpop.permute.xlu1 %6771  ;;  %v10236_v56 = vpack.i.bf16 %v6795_v35, %v6794_v39 }
0x28e0   :  { %v6778_v62 = vsel %vm1227_vm0, %v6770_v22, %v6772_v53  ;;  %vm15165_vm0 = vcmask 1039360  }
0x28e1   :  { %v14244_v6 = vsel %vm1242_vm4, %v6778_v62, 0.0  ;;  %vm15166_vm4 = vcmask 1031168  }
0x28e2   :  { %v6796_v7 = vrot.slane %v14244_v6, 4  ;;  %vm15168_vm2 = vmmov %vm15166_vm4 }
0x28e3   :  { %10187 = vrot.lane.b32.xlu0 %v10171_v32, %s10439_s25  ;;  %6836 = vrot.lane.b32.xlu1 %v14244_v6, %s10436_s0  ;;  %vm15169_vm11 = vmmov %vm15168_vm2 }
0x28e4   :  { %vm15170_vm14 = vmmov %vm15168_vm2 }
0x28e5   :  { %vm15171_vm7 = vmmov %vm15168_vm2 }
0x28e6   :  { %vm15172_vm3 = vmmov %vm15168_vm2 }
0x28e7   :  { %10192 = vrot.lane.b32.xlu0 %v10171_v32, %s14891_s30  ;;  %10217 = vrot.lane.b32.xlu1 %v10216_v19, %s10437_s23 }
0x28eb   :  { %10197 = vrot.lane.b32.xlu0 %v10176_v20, %s10439_s25  ;;  %10222 = vrot.lane.b32.xlu1 %v10216_v19, %s14890_s5 }
0x28ef   :  { %10202 = vrot.lane.b32.xlu0 %v10176_v20, %s14891_s30  ;;  %10237 = vrot.lane.b32.xlu1 %v10236_v56, %s10437_s23 }
0x28f3   :  { %10207 = vrot.lane.b32.xlu0 %v10181_v43, %s10439_s25  ;;  %10242 = vrot.lane.b32.xlu1 %v10236_v56, %s14890_s5 }
0x28f7   :  { %10212 = vrot.lane.b32.xlu0 %v10181_v43, %s14891_s30  ;;  %10247 = vrot.lane.b32.xlu1 %v10216_v19, %s14892_s13 }
0x28fb   :  { %6990 = vrot.lane.b32.xlu0 %v14214_v1, %s14893_s20  ;;  %10252 = vrot.lane.b32.xlu1 %v10216_v19, %s14894_s24 }
0x28ff   :  { %6890 = vrot.lane.b32.xlu0 %v14244_v6, %s10439_s25  ;;  %10257 = vrot.lane.b32.xlu1 %v10256_v29, %s14892_s13 }
0x2903   :  { %10227 = vrot.lane.b32.xlu0 %v10256_v29, %s10437_s23  ;;  %10262 = vrot.lane.b32.xlu1 %v10256_v29, %s14894_s24 }
0x2907   :  { %10232 = vrot.lane.b32.xlu0 %v10256_v29, %s14890_s5  ;;  %10267 = vrot.lane.b32.xlu1 %v10236_v56, %s14892_s13 }
0x290b   :  { %10272 = vrot.lane.b32.xlu1 %v10236_v56, %s14894_s24  ;;  %6809 = vrot.lane.b32.xlu0 %v6796_v7, %s10437_s23 }
0x290f   :  { %6917 = vrot.lane.b32.xlu1 %v6796_v7, %s14892_s13  ;;  %6863 = vrot.lane.b32.xlu0 %v6796_v7, %s14890_s5 }
0x2913   :  { %6971 = vrot.lane.b32.xlu1 %v6796_v7, %s14894_s24  ;;  %6944 = vrot.lane.b32.xlu0 %v14244_v6, %s14891_s30 }
0x2917   :  { %6994 = vrot.lane.b32.xlu1 %v14231_v26, %s14893_s20  ;;  %6992 = vrot.lane.b32.xlu0 %v14223_v17, %s14893_s20 }
0x291b   :  { %6998 = vrot.lane.b32.xlu1 %v14244_v6, %s14893_s20  ;;  %6996 = vrot.lane.b32.xlu0 %v14234_v9, %s14893_s20 }
0x2945   :  { %v10173_v52 = vpop.permute.xlu0 %10172 }
0x2946   :  { %v10175_v18 = vunpack.i.h.bf16 %v10173_v52  ;;  %v10174_v47 = vunpack.i.l.bf16 %v10173_v52 }
0x2948   :  { %v6839_v61 = vsel %vm15166_vm4, %v10174_v47, %v10175_v18  ;;  %vm15180_vm4 = vmmov %vm15174_vm1 }
0x2949   :  { %v10178_v58 = vpop.permute.xlu1 %10177 }
0x294a   :  { %v10180_v44 = vunpack.i.h.bf16 %v10178_v58  ;;  %v10179_v32 = vunpack.i.l.bf16 %v10178_v58 }
0x294c   :  { %v14337_v27 = vsel %vm15168_vm2, %v10175_v18, %v10180_v44  ;;  %v6838_v41 = vsel %vm15169_vm11, %v10179_v32, %v10174_v47  ;;  %vm15182_vm2 = vmmov %vm15176_vm5 }
0x294d   :  { %v14290_v54 = vpop.permute.xlu1 %6988  ;;  %vm15183_vm11 = vmmov %vm15178_vm10 }
0x2951   :  { %v10183_v63 = vpop.permute.xlu0 %10182  ;;  %v14292_v12 = vpop.permute.xlu1 %6986 }
0x2952   :  { %v10184_v50 = vunpack.i.l.bf16 %v10183_v63 }
0x2954   :  { %v6841_v52 = vsel %vm15170_vm14, %v10180_v44, %v10184_v50 }
0x2955   :  { %v10188_v2 = vpop.permute.xlu0 %10187  ;;  %v14294_v57 = vpop.permute.xlu1 %6836 }
0x2956   :  { %v10190_v20 = vunpack.i.h.bf16 %v10188_v2  ;;  %v10189_v15 = vunpack.i.l.bf16 %v10188_v2 }
0x2958   :  { %v6893_v18 = vsel %vm15173_vm9, %v10189_v15, %v10190_v20 }
0x2959   :  { %v14296_v30 = vpop.permute.xlu0 %10192  ;;  %v14298_v37 = vpop.permute.xlu1 %10217 }
0x295a   :  { %v10220_v45 = vunpack.i.h.bf16 %v14298_v37  ;;  %v10219_v25 = vunpack.i.l.bf16 %v14298_v37  ;;  %v10195_v22 = vunpack.i.h.bf16 %v14296_v30  ;;  %v10194_v43 = vunpack.i.l.bf16 %v14296_v30 }
0x295c   :  { %v6812_v11 = vsel %vm15165_vm0, %v10219_v25, %v10220_v45  ;;  %v6947_v47 = vsel %vm15174_vm1, %v10194_v43, %v10195_v22  ;;  %vm15179_vm0 = vcmask 564224   ;;  %vm15189_vm1 = vcmask 809984  }
0x295d   :  { %v10198_v3 = vpop.permute.xlu0 %10197  ;;  %v14302_v31 = vpop.permute.xlu1 %10222  ;;  %v7007_v34 = vsel %vm685_vm8, %v14211_v24, %v6812_v11  ;;  %v10185_v24 = vunpack.i.h.bf16 %v10183_v63  ;;  %vm15187_vm9 = vmmov %vm15179_vm0 }
0x295e   :  { %v14741_v36 = vunpack.i.h.bf16 %v14302_v31  ;;  %v14742_v49 = vunpack.i.l.bf16 %v14302_v31  ;;  %v10200_v53 = vunpack.i.h.bf16 %v10198_v3  ;;  %v10199_v62 = vunpack.i.l.bf16 %v10198_v3 }
0x295f   :  { %v14356_v63 = vsel %vm15171_vm7, %v10184_v50, %v10185_v24  ;;  %v14360_v2 = vsel %vm15172_vm3, %v10185_v24, %v14294_v57 }
0x2960   :  { %v6866_v28 = vsel %vm15167_vm15, %v14742_v49, %v14741_v36  ;;  %v6892_v3 = vsel %vm15175_vm6, %v10199_v62, %v10189_v15  ;;  %v14367_v11 = vsel %vm15176_vm5, %v10190_v20, %v10200_v53  ;;  %vm15181_vm15 = vcmask 1039360   ;;  %vm15191_vm6 = vmmov %vm15189_vm1 }
0x2961   :  { %v14317_v42 = vpop.permute.xlu0 %10202  ;;  %v14319_v23 = vpop.permute.xlu1 %10237  ;;  %v7014_v33 = vsel %vm685_vm8, %v6839_v61, %v6866_v28  ;;  %vm15184_vm14 = vmmov %vm15181_vm15 }
0x2962   :  { %v8913_v0 = vpack.c.bf16 %v7014_v33, %v7007_v34  ;;  %v10204_v5 = vunpack.i.l.bf16 %v14317_v42  ;;  %v10205_v29 = vunpack.i.h.bf16 %v14317_v42  ;;  %v14740_v7 = vunpack.i.h.bf16 %v14319_v23  ;;  %vm15185_vm7 = vmmov %vm15184_vm14 }
0x2963   :  { %v10239_v58 = vunpack.i.l.bf16 %v14319_v23  ;;  %vm15186_vm3 = vmmov %vm15185_vm7 }
0x2964   :  { %8914 = vmatprep.subr.bf16.mxu1 %v8913_v0  ;;  %v6946_v42 = vsel %vm15177_vm12, %v10204_v5, %v10194_v43  ;;  %v6948_v44 = vsel %vm15180_vm4, %v10195_v22, %v10205_v29  ;;  %vm15192_vm5 = vmmov %vm15189_vm1 }
0x2965   :  { %v14324_v21 = vpop.permute.xlu0 %10207  ;;  %v14326_v14 = vpop.permute.xlu1 %10242  ;;  %vm15193_vm12 = vmmov %vm15179_vm0 }
0x2966   :  { %v14743_v30 = vunpack.i.l.bf16 %v14324_v21  ;;  %v10245_v20 = vunpack.i.h.bf16 %v14326_v14  ;;  %v10244_v15 = vunpack.i.l.bf16 %v14326_v14 }
0x2968   :  { %v6895_v50 = vsel %vm15182_vm2, %v10200_v53, %v14743_v30  ;;  %vm15199_vm2 = vmmov %vm15189_vm1 }
0x2969   :  { %v14328_v38 = vpop.permute.xlu0 %10212  ;;  %v14330_v10 = vpop.permute.xlu1 %10247 }
0x296a   :  { %v14739_v35 = vunpack.i.h.bf16 %v14330_v10  ;;  %v10249_v39 = vunpack.i.l.bf16 %v14330_v10 }
0x296c   :  { %v6920_v33 = vsel %vm15178_vm10, %v10249_v39, %v14739_v35 }
0x296d   :  { %v14332_v60 = vpop.permute.xlu0 %6990  ;;  %v14334_v16 = vpop.permute.xlu1 %10252 }
0x296e   :  { %v10255_v56 = vunpack.i.h.bf16 %v14334_v16  ;;  %v10254_v48 = vunpack.i.l.bf16 %v14334_v16  ;;  %v14379_v16 = vsel %vm15181_vm15, %v10239_v58, %v14740_v7  ;;  %v7021_v7 = vsel %vm685_vm8, %v6893_v18, %v6920_v33  ;;  %vm15198_vm15 = vmmov %vm15178_vm10 }
0x296f   :  { %v15190_v33 = vunpack.i.h.bf16 %v14302_v31 }
0x2970   :  { %v6974_v34 = vsel %vm15179_vm0, %v10254_v48, %v10255_v56  ;;  %vm15195_vm0 = vmmov %vm15180_vm4 }
0x2971   :  { %v14342_v51 = vpop.permute.xlu0 %6890  ;;  %v14344_v19 = vpop.permute.xlu1 %10257  ;;  %v7028_v36 = vsel %vm685_vm8, %v6947_v47, %v6974_v34  ;;  %vm15196_vm4 = vmmov %vm15187_vm9 }
0x2972   :  { %v10259_v0 = vunpack.i.l.bf16 %v14344_v19 }
0x2974   :  { %v6919_v49 = vsel %vm15183_vm11, %v10259_v0, %v10249_v39  ;;  %vm15200_vm11 = vmmov %vm15189_vm1 }
0x2975   :  { %v10228_v61 = vpop.permute.xlu0 %10227  ;;  %v10263_v28 = vpop.permute.xlu1 %10262 }
0x2976   :  { %v10230_v32 = vunpack.i.h.bf16 %v10228_v61  ;;  %v10229_v24 = vunpack.i.l.bf16 %v10228_v61  ;;  %v10264_v43 = vunpack.i.l.bf16 %v10263_v28  ;;  %v10265_v5 = vunpack.i.h.bf16 %v10263_v28 }
0x2977   :  { %v10260_v61 = vunpack.i.h.bf16 %v14344_v19  ;;  %v15188_v19 = vunpack.i.l.bf16 %v14302_v31 }
0x2978   :  { %v6811_v14 = vsel %vm15184_vm14, %v10229_v24, %v10219_v25  ;;  %v6813_v28 = vsel %vm15185_vm7, %v10220_v45, %v10230_v32  ;;  %v6814_v62 = vsel %vm15186_vm3, %v10230_v32, %v10239_v58  ;;  %v6973_v47 = vsel %vm15187_vm9, %v10264_v43, %v10254_v48  ;;  %vm15202_vm14 = vmmov %vm15186_vm3 }
0x2979   :  { %v10233_v22 = vpop.permute.xlu0 %10232  ;;  %v14387_v35 = vpop.permute.xlu1 %10267  ;;  %v6975_v37 = vsel %vm15193_vm12, %v10255_v56, %v10265_v5  ;;  %v7006_v31 = vsel %vm685_vm8, %v14220_v55, %v6811_v14  ;;  %v7008_v56 = vsel %vm685_vm8, %v14214_v1, %v6813_v28  ;;  %v8917_v55 = vpack.c.bf16 %v7028_v36, %v7021_v7  ;;  %vm15203_vm7 = vmmov %vm15178_vm10 }
0x297a   :  { %v10235_v53 = vunpack.i.h.bf16 %v10233_v22  ;;  %v10234_v30 = vunpack.i.l.bf16 %v10233_v22  ;;  %v10269_v18 = vunpack.i.l.bf16 %v14387_v35  ;;  %v7027_v14 = vsel %vm685_vm8, %v6946_v42, %v6973_v47 }
0x297b   :  { %v15197_v1 = vunpack.i.h.bf16 %v14330_v10  ;;  %v7029_v10 = vsel %vm685_vm8, %v6948_v44, %v6975_v37  ;;  %v6869_v42 = vsel %vm15200_vm11, %v10244_v15, %v10245_v20  ;;  %vm15204_vm3 = vcmask 556032  }
0x297c   :  { %v6865_v39 = vsel %vm15189_vm1, %v10234_v30, %v15188_v19  ;;  %v6867_v34 = vsel %vm15191_vm6, %v15190_v33, %v10235_v53  ;;  %v6868_v25 = vsel %vm15192_vm5, %v10235_v53, %v10244_v15  ;;  %v7009_v30 = vsel %vm685_vm8, %v14223_v17, %v6814_v62  ;;  %vm15206_vm1 = vmmov %vm15195_vm0 }
0x297d   :  { %v14410_v0 = vpop.permute.xlu0 %6809  ;;  %v10273_v45 = vpop.permute.xlu1 %10272  ;;  %v7013_v58 = vsel %vm685_vm8, %v6838_v41, %v6865_v39  ;;  %v7016_v32 = vsel %vm685_vm8, %v6841_v52, %v6868_v25  ;;  %v7015_v48 = vsel %vm685_vm8, %v14337_v27, %v6867_v34  ;;  %v6922_v43 = vsel %vm15178_vm10, %v10260_v61, %v10269_v18  ;;  %vm15207_vm6 = vmmov %vm15196_vm4 }
0x297e   :  { %v10274_v24 = vunpack.i.l.bf16 %v10273_v45  ;;  %v8915_v41 = vpack.c.bf16 %v7013_v58, %v7006_v31  ;;  %v8921_v22 = vpack.c.bf16 %v7016_v32, %v7009_v30  ;;  %v8923_v52 = vpack.c.bf16 %v7015_v48, %v7008_v56  ;;  %vm15208_vm5 = vmmov %vm15196_vm4 }
0x297f   :  { %v15194_v53 = vunpack.i.l.bf16 %v14328_v38  ;;  %v10210_v17 = vunpack.i.h.bf16 %v14324_v21  ;;  %v6921_v62 = vsel %vm15198_vm15, %v15197_v1, %v10260_v61  ;;  %v7020_v33 = vsel %vm685_vm8, %v6892_v3, %v6919_v49  ;;  %vm15209_vm12 = vmmov %vm15204_vm3 }
0x2980   :  { %v6976_v19 = vsel %vm15196_vm4, %v10265_v5, %v10274_v24  ;;  %8916 = vmatpush1.bf16.msra.mxu1 %v8915_v41  ;;  %8922 = vmatprep.subr.bf16.mxu0 %v8921_v22  ;;  %v10270_v5 = vunpack.i.h.bf16 %v14387_v35  ;;  %v7023_v7 = vsel %vm685_vm8, %v6895_v50, %v6922_v43  ;;  %v10275_v61 = vunpack.i.h.bf16 %v10273_v45  ;;  %vm15211_vm10 = vmmov %vm15195_vm0 }
0x2981   :  { %v6949_v27 = vsel %vm15195_vm0, %v10205_v29, %v15194_v53  ;;  %v6864_v28 = vpop.permute.xlu0 %6863  ;;  %v14434_v39 = vpop.permute.xlu1 %6917  ;;  %8918 = vmatprep.subr.bf16.mxu1 %v8917_v55  ;;  %8924 = vmatpush1.bf16.msra.mxu0 %v8923_v52  ;;  %v8919_v47 = vpack.c.bf16 %v7027_v14, %v7020_v33  ;;  %v10215_v25 = vunpack.i.h.bf16 %v14328_v38  ;;  %v15201_v49 = vunpack.i.h.bf16 %v14319_v23  ;;  %vm15212_vm0 = vmmov %vm15203_vm7 }
0x2982   :  { %v7030_v29 = vsel %vm685_vm8, %v6949_v27, %v6976_v19  ;;  %v6870_v36 = vsel %vm15199_vm2, %v10245_v20, %v6864_v28  ;;  %v6924_v58 = vsel %vm15203_vm7, %v10270_v5, %v14434_v39  ;;  %v7022_v50 = vsel %vm685_vm8, %v14367_v11, %v6921_v62  ;;  %vm15213_vm4 = vmmov %vm15204_vm3 }
0x2983   :  { %v8925_v34 = vpack.c.bf16 %v7030_v29, %v7023_v7  ;;  %v6816_v3 = vsel %vm15202_vm14, %v15201_v49, %v14410_v0  ;;  %v7001_v44 = vsel %vm15204_vm3, %v14290_v54, %v14332_v60  ;;  %v7018_v20 = vsel %vm685_vm8, %v14360_v2, %v6870_v36  ;;  %vm15214_vm15 = vmmov %vm15204_vm3  ;;  %v15222_v29 = vld [vmem:[#allocation5_spill] sm:$0xff]  ;;  %v15223_v7 = vld [vmem:[#allocation6_spill] sm:$0xff] }
0x2984   :  { %8920 = vmatpush1.bf16.msra.mxu1 %v8919_v47  ;;  %v8927_v23 = vpack.c.bf16 %v7029_v10, %v7022_v50  ;;  %v7034_v45 = vrot.slane %v13972_v59, 4  ;;  %vm15205_vm9 = vcmask 801792   ;;  %v7017_v31 = vsel %vm685_vm8, %v14356_v63, %v6869_v42  ;;  %vm15219_vm7 = vmmov %vm15204_vm3  ;;  %v15226_v49 = vld [vmem:[#allocation10_spill] sm:$0xff] }
0x2985   :  { %8926 = vmatprep.subr.bf16.mxu0 %v8925_v34  ;;  %v6945_v15 = vpop.permute.xlu0 %6944  ;;  %v6972_v37 = vpop.permute.xlu1 %6971  ;;  %v6897_v32 = vsel %vm15205_vm9, %v10210_v17, %v14342_v51  ;;  %7621 = vmatprep.subr.msk.mxu1 %vm685_vm8, %v7001_v44  ;;  %v7011_v2 = vsel %vm685_vm8, %v14234_v9, %v6816_v3  ;;  %v6977_v30 = vsel %vm15208_vm5, %v10274_v24, %v10275_v61  ;;  %vm15215_vm2 = vcmask 293888   ;;  %vm15217_vm11 = vmmov %vm15205_vm9  ;;  %v15228_v44 = vld [vmem:[#allocation11_spill] sm:$0xff] }
0x2986   :  { %v6951_v48 = vsel %vm15206_vm1, %v10215_v25, %v6945_v15  ;;  %v6978_v11 = vsel %vm15207_vm6, %v10275_v61, %v6972_v37  ;;  %v7025_v56 = vsel %vm685_vm8, %v6897_v32, %v6924_v58  ;;  %8928 = vmatpush1.bf16.msra.mxu0 %v8927_v23  ;;  %v7000_v43 = vsel %vm15209_vm12, %v14292_v12, %v14290_v54  ;;  %vm15218_vm14 = vmmov %vm15215_vm2 }
0x2987   :  { %v7032_v59 = vsel %vm685_vm8, %v6951_v48, %v6978_v11  ;;  %v8929_v41 = vpack.c.bf16 %v7018_v20, %v7011_v2  ;;  %v7010_v22 = vsel %vm685_vm8, %v14231_v26, %v14379_v16  ;;  %v15210_v52 = vmov %v15194_v53  ;;  %vm15220_vm9 = vmmov %vm15215_vm2 }
0x2988   :  { %v8933_v63 = vpack.c.bf16 %v7032_v59, %v7025_v56  ;;  %v6950_v9 = vsel %vm15211_vm10, %v15210_v52, %v10215_v25  ;;  %v6923_v24 = vsel %vm15212_vm0, %v10269_v18, %v10270_v5  ;;  %v7019_v53 = vsel %vm685_vm8, %v14294_v57, %v6864_v28  ;;  %7622 = vmatpush1.msk.msra.mxu1 %vm685_vm8, %v7000_v43  ;;  %vm15221_vm1 = vmmov %vm15215_vm2 }
0x2989   :  { %v6993_v54 = vpop.permute.xlu0 %6992  ;;  %v6995_v12 = vpop.permute.xlu1 %6994  ;;  %v8931_v27 = vpack.c.bf16 %v7017_v31, %v7010_v22  ;;  %7623 = vmatmul.mubr.msk.f32.vlgmr.msra.gmra.mrb[46].mxu1 %vm15215_vm2, %v7034_v45  ;;  %8930 = vmatprep.subr.bf16.mxu1 %v8929_v41  ;;  %v7031_v38 = vsel %vm685_vm8, %v6950_v9, %v6977_v30  ;;  %v15216_v35 = vunpack.i.l.bf16 %v14324_v21  ;;  %v7012_v57 = vsel %vm685_vm8, %v14244_v6, %v14410_v0  ;;  %v15234_v22 = vld [vmem:[#allocation14_spill] sm:$0xff] }
0x298a   :  { %v7002_v26 = vsel %vm15213_vm4, %v14332_v60, %v6993_v54  ;;  %v7003_v16 = vsel %vm15214_vm15, %v6993_v54, %v6995_v12  ;;  %v8938_v19 = vpack.c.bf16 %v7019_v53, %v7012_v57  ;;  %v7033_v55 = vsel %vm685_vm8, %v6945_v15, %v6972_v37  ;;  %7259 = vmatprep.mubr.f32.mxu1 %v15107_v4 }
0x298b   :  { %v6896_v18 = vsel %vm15217_vm11, %v15216_v35, %v10210_v17  ;;  %8932 = vmatpush1.bf16.msra.mxu1 %v8931_v27  ;;  %7624 = vmatprep.subr.msk.mxu0 %vm685_vm8, %v7003_v16  ;;  %v7026_v0 = vsel %vm685_vm8, %v14342_v51, %v14434_v39  ;;  %vm7354_vm2 = vcmask 352256   ;;  %v15237_v35 = vld [vmem:[#allocation15_spill] sm:$0xff] }
0x298c   :  { %8934 = vmatprep.subr.bf16.mxu1 %v8933_v63  ;;  %7625 = vmatpush1.msk.msra.mxu0 %vm685_vm8, %v7002_v26  ;;  %v7024_v60 = vsel %vm685_vm8, %v6896_v18, %v6923_v24  ;;  %v8941_v17 = vpack.c.bf16 %v7033_v55, %v7026_v0  ;;  %v15235_v24 = vld [vmem:[#allocation16_spill] sm:$0xff] }
0x298d   :  { %v6997_v14 = vpop.permute.xlu0 %6996  ;;  %v6999_v1 = vpop.permute.xlu1 %6998  ;;  %7626 = vmatmul.mubr.msk.f32.vlgmr.msra.gmra.mrb[46].mxu0 %vm15218_vm14, %v7034_v45  ;;  %8937 = vmatprep.subr.bf16.mxu0 %v15131_v13  ;;  %v8935_v21 = vpack.c.bf16 %v7031_v38, %v7024_v60 }
0x298e   :  { %v7005_v6 = vsel %vm15219_vm7, %v6997_v14, %v6999_v1  ;;  %8939 = vmatpush3.bf16.msra.mxu0 %v8938_v19  ;;  %8116 = vmatprep.mubr.msk.f32.mxu0 %vm14935_vm13, %v15107_v4  ;;  %v7004_v62 = vsel %vm15204_vm3, %v6995_v12, %v6997_v14 }
0x298f   :  { %8936 = vmatpush1.bf16.msra.mxu1 %v8935_v21  ;;  %8940 = vmatprep.subr.bf16.mxu0 %v15131_v13  ;;  %v7035_v13 = vrot.slane %v14116_v40, 4 }
0x2990   :  { %7627 = vmatprep.subr.msk.mxu1 %vm685_vm8, %v7005_v6 }
0x2992   :  { %8942 = vmatpush3.bf16.msra.mxu0 %v8941_v17 }
0x2993   :  { %7628 = vmatpush1.msk.msra.mxu1 %vm685_vm8, %v7004_v62  ;;  %8114 = vmatprep.subr.mxu0 %v15107_v4 }
0x2994   :  { %7629 = vmatmul.mubr.msk.f32.vlgmr.msra.gmra.mrb[48].mxu1 %vm15220_vm9, %v7034_v45 }
0x2996   :  { %8115 = vmatpush3.msk.msra.mxu0 %vm685_vm8, %v6999_v1  ;;  %vm15224_vm8 = vcmask 1040384  }
0x2997   :  { %8117 = vmatmul.mubr.msk.f32.vlgmr.msra.gmra.mrb[48].mxu0 %vm15221_vm1, %v7034_v45  ;;  %vm15225_vm13 = vmmov %vm15224_vm8 }
0x2998   :  { %vm15227_vm6 = vmmov %vm15224_vm8 }
0x2999   :  { %vm15229_vm5 = vmmov %vm15227_vm6 }
0x299a   :  { %vm15230_vm12 = vmmov %vm15229_vm5 }
0x299b   :  { %vm15231_vm10 = vmmov %vm15229_vm5 }
0x299c   :  { %vm15232_vm0 = vmmov %vm15229_vm5 }
0x299d   :  { %vm15233_vm4 = vmmov %vm15232_vm0 }
0x299e   :  { %vm15236_vm15 = vmmov %vm15232_vm0 }
0x299f   :  { %vm15238_vm11 = vmmov %vm15232_vm0 }
0x29a0   :  { %vm15239_vm14 = vmmov %vm15232_vm0 }
0x29a1   :  { %vm15240_vm7 = vmmov %vm15232_vm0 }
0x2a5c   :  { %v7119_v51 = vpop.f32.mrb[46].mxu1 }
0x2a5d   :  { %v14518_v28 = vadd.f32 %v7119_v51, %v7035_v13  ;;  %v7121_v39 = vpop.f32.mrb[47].mxu1 }
0x2a5e   :  { %v14520_v33 = vadd.f32 %v7121_v39, %v7035_v13 }
0x2a5f   :  { %v7336_v5 = vmul.f32 %v14518_v28, %v15222_v29 }
0x2a60   :  { %v7190_v36 = vpop.f32.mrb[46].mxu0  ;;  %v7337_v4 = vmul.f32 %v14520_v33, %v15223_v7 }
0x2a61   :  { %v14526_v10 = vadd.f32 %v7190_v36, %v7035_v13  ;;  %v7192_v42 = vpop.f32.mrb[47].mxu0  ;;  %v7343_v61 = vsel %vm15224_vm8, %v7336_v5, 0.0  ;;  %v7359_v40 = vmul.f32 %v7336_v5, %v14518_v28 }
0x2a62   :  { %v14530_v47 = vadd.f32 %v7192_v42, %v7035_v13  ;;  %v7344_v34 = vsel %vm15225_vm13, %v7337_v4, 0.0  ;;  %v7360_v25 = vmul.f32 %v7337_v4, %v14520_v33 }
0x2a63   :  { %v7338_v3 = vmul.f32 %v14526_v10, %v15226_v49  ;;  %v7366_v58 = vsel %vm15227_vm6, %v7359_v40, 0.0  ;;  %v7345_v50 = vadd.f32 %v7344_v34, %v7343_v61  ;;  %v10477_v34 = vmov 1966171168  }
0x2a64   :  { %v7339_v20 = vmul.f32 %v14530_v47, %v15228_v44  ;;  %v7367_v15 = vsel %vm15229_vm5, %v7360_v25, 0.0  ;;  %v7459_v25 = vunpack.c.l.s4 %v10477_v34 }
0x2a65   :  { %v7346_v37 = vsel %vm15230_vm12, %v7338_v3, 0.0  ;;  %v7361_v23 = vmul.f32 %v7338_v3, %v14526_v10  ;;  %v7368_v45 = vadd.f32 %v7367_v15, %v7366_v58 }
0x2a66   :  { %v7362_v32 = vmul.f32 %v7339_v20, %v14530_v47  ;;  %v7347_v48 = vadd.f32 %v7346_v37, %v7345_v50  ;;  %v7348_v30 = vsel %vm15232_vm0, %v7339_v20, 0.0  ;;  %v7402_v37 = vrot.slane %v14176_v46, 4 }
0x2a67   :  { %v7369_v11 = vsel %vm15231_vm10, %v7361_v23, 0.0  ;;  %v7261_v31 = vpop.f32.mrb[48].mxu1 }
0x2a68   :  { %v7370_v2 = vadd.f32 %v7369_v11, %v7368_v45  ;;  %v7262_v56 = vadd.f32 %v7261_v31, %v7035_v13  ;;  %v7263_v59 = vpop.f32.mrb[49].mxu1  ;;  %v7371_v43 = vsel %vm15233_vm4, %v7362_v32, 0.0  ;;  %v7349_v9 = vadd.f32 %v7348_v30, %v7347_v48 }
0x2a69   :  { %v7264_v41 = vadd.f32 %v7263_v59, %v7035_v13  ;;  %v7411_v30 = vrot.slane %v14178_v8, 4 }
0x2a6a   :  { %v7340_v63 = vmul.f32 %v7262_v56, %v15234_v22  ;;  %v7332_v52 = vpop.f32.mrb[48].mxu0  ;;  %v7372_v27 = vadd.f32 %v7371_v43, %v7370_v2 }
0x2a6b   :  { %v7341_v53 = vmul.f32 %v7264_v41, %v15235_v24  ;;  %v7333_v54 = vadd.f32 %v7332_v52, %v7035_v13  ;;  %v8118_v12 = vpop.f32.mrb[49].mxu0 }
0x2a6c   :  { %v7350_v26 = vsel %vm15236_vm15, %v7340_v63, 0.0  ;;  %v7363_v16 = vmul.f32 %v7340_v63, %v7262_v56 }
0x2a6d   :  { %v7364_v38 = vmul.f32 %v7341_v53, %v7264_v41  ;;  %v7342_v18 = vmul.f32 %v7333_v54, %v15237_v35  ;;  %v7351_v57 = vadd.f32 %v7350_v26, %v7349_v9  ;;  %v7352_v19 = vsel %vm15238_vm11, %v7341_v53, 0.0 }
0x2a6e   :  { %v7373_v60 = vsel %vm15239_vm14, %v7363_v16, 0.0 }
0x2a6f   :  { %v7365_v55 = vmul.f32 %v7342_v18, %v7333_v54  ;;  %v7353_v14 = vadd.f32 %v7352_v19, %v7351_v57  ;;  %v7355_v1 = vsel %vm7354_vm2, %v7342_v18, 0.0  ;;  %v7374_v21 = vadd.f32 %v7373_v60, %v7372_v27 }
0x2a70   :  { %v7375_v6 = vsel %vm15240_vm7, %v7364_v38, 0.0  ;;  %v15241_v38 = vld [vmem:[#allocation2_spill] sm:$0xff] }
0x2a71   :  { %v7356_v0 = vadd.f32 %v7355_v1, %v7353_v14  ;;  %v7376_v17 = vadd.f32 %v7375_v6, %v7374_v21  ;;  %v7377_v62 = vsel %vm7354_vm2, %v7365_v55, 0.0 }
0x2a73   :  { %7357 = vadd.xlane.f32.xlu0 %v7356_v0  ;;  %v7378_v13 = vadd.f32 %v7377_v62, %v7376_v17 }
0x2a75   :  { %7379 = vadd.xlane.f32.xlu1 %v7378_v13 }
0x2b00   :  { %v7358_v51 = vpop.xlane.xlu0 %7357 }
0x2b01   :  { %v7381_v39 = vmul.f32 0.0015432099, %v7358_v51 }
0x2b02   :  { %v7380_v5 = vpop.xlane.xlu1 %7379 }
0x2b03   :  { %v7382_v36 = vmul.f32 0.0015432099, %v7380_v5  ;;  %v7383_v4 = vmul.f32 %v7381_v39, %v7381_v39  ;;  %v7386_v3 = vsub.f32 %v14518_v28, %v7381_v39  ;;  %v7387_v58 = vsub.f32 %v14520_v33, %v7381_v39 }
0x2b04   :  { %v7388_v50 = vsub.f32 %v14526_v10, %v7381_v39  ;;  %v7389_v20 = vsub.f32 %v14530_v47, %v7381_v39  ;;  %v7390_v23 = vsub.f32 %v7262_v56, %v7381_v39  ;;  %v7391_v45 = vsub.f32 %v7264_v41, %v7381_v39 }
0x2b05   :  { %v7384_v42 = vsub.f32 %v7382_v36, %v7383_v4  ;;  %v7392_v32 = vsub.f32 %v7333_v54, %v7381_v39  ;;  %v7460_v47 = vunpack.c.0.s8 %v7459_v25 }
0x2b07   :  { %v7385_v61 = vmax.f32 %v7384_v42, 0.0  ;;  %v7463_v18 = vsub.s32 %v7460_v47, %v15241_v38 }
0x2b09   :  { %v7393_v40 = vadd.f32 1e-05, %v7385_v61 }
0x2b0b   :  { %10432 = vrsqrt.f32 %v7393_v40 }
0x2b15   :  { %v10433_v15 = vpop.eup %10432 }
0x2b16   :  { %v7395_v48 = vmul.f32 %v10433_v15, %v7386_v3  ;;  %v7396_v11 = vmul.f32 %v10433_v15, %v7387_v58  ;;  %v7397_v31 = vmul.f32 %v10433_v15, %v7388_v50  ;;  %v7398_v2 = vmul.f32 %v10433_v15, %v7389_v20 }
0x2b17   :  { %v7399_v59 = vmul.f32 %v10433_v15, %v7390_v23  ;;  %v7400_v28 = vmul.f32 %v10433_v15, %v7391_v45  ;;  %v7401_v43 = vmul.f32 %v10433_v15, %v7392_v32 }
0x2b18   :  { %v7404_v33 = vmul.f32 %v7402_v37, %v7395_v48  ;;  %v7405_v63 = vmul.f32 %v7402_v37, %v7396_v11  ;;  %v7406_v10 = vmul.f32 %v7402_v37, %v7397_v31  ;;  %v7407_v52 = vmul.f32 %v7402_v37, %v7398_v2 }
0x2b19   :  { %v7408_v9 = vmul.f32 %v7402_v37, %v7399_v59  ;;  %v7409_v53 = vmul.f32 %v7402_v37, %v7400_v28  ;;  %v7410_v46 = vmul.f32 %v7402_v37, %v7401_v43 }
0x2b1a   :  { %v7413_v56 = vadd.f32 %v7411_v30, %v7404_v33  ;;  %v7414_v41 = vadd.f32 %v7411_v30, %v7405_v63  ;;  %v7415_v54 = vadd.f32 %v7411_v30, %v7406_v10  ;;  %v7416_v12 = vadd.f32 %v7411_v30, %v7407_v52 }
0x2b1b   :  { %v7417_v27 = vadd.f32 %v7411_v30, %v7408_v9  ;;  %v7418_v26 = vadd.f32 %v7411_v30, %v7409_v53  ;;  %v7419_v16 = vadd.f32 %v7411_v30, %v7410_v46 }
0x2b1c   :  { %vm7420_vm3 = vcmp.ge.f32.partialorder %v7413_v56, 0.0  ;;  %vm7421_vm9 = vcmp.ge.f32.partialorder %v7414_v41, 0.0  ;;  %vm7422_vm1 = vcmp.ge.f32.partialorder %v7415_v54, 0.0  ;;  %vm7423_vm8 = vcmp.ge.f32.partialorder %v7416_v12, 0.0 }
0x2b1d   :  { %vm7424_vm13 = vcmp.ge.f32.partialorder %v7417_v27, 0.0  ;;  %vm7425_vm6 = vcmp.ge.f32.partialorder %v7418_v26, 0.0  ;;  %vm7426_vm5 = vcmp.ge.f32.partialorder %v7419_v16, 0.0  ;;  %v7427_v8 = vmul.f32 0.1, %v7413_v56 }
0x2b1e   :  { %v7428_v57 = vmul.f32 0.1, %v7414_v41  ;;  %v7429_v19 = vmul.f32 0.1, %v7415_v54  ;;  %v7430_v60 = vmul.f32 0.1, %v7416_v12 }
0x2b1f   :  { %v7431_v55 = vmul.f32 0.1, %v7417_v27  ;;  %v7432_v14 = vmul.f32 0.1, %v7418_v26  ;;  %v7433_v1 = vmul.f32 0.1, %v7419_v16  ;;  %v7434_v21 = vsel %vm7420_vm3, %v7413_v56, %v7427_v8 }
0x2b20   :  { %v7435_v6 = vsel %vm7421_vm9, %v7414_v41, %v7428_v57  ;;  %v7436_v0 = vsel %vm7422_vm1, %v7415_v54, %v7429_v19  ;;  %v7437_v17 = vsel %vm7423_vm8, %v7416_v12, %v7430_v60  ;;  %v7441_v62 = vmul.f32 %v7434_v21, %v15222_v29 }
0x2b21   :  { %v7438_v13 = vsel %vm7424_vm13, %v7417_v27, %v7431_v55  ;;  %v7439_v51 = vsel %vm7425_vm6, %v7418_v26, %v7432_v14  ;;  %v7440_v39 = vsel %vm7426_vm5, %v7419_v16, %v7433_v1  ;;  %v7442_v5 = vmul.f32 %v7435_v6, %v15223_v7 }
0x2b22   :  { %v7443_v36 = vmul.f32 %v7436_v0, %v15226_v49  ;;  %v7444_v4 = vmul.f32 %v7437_v17, %v15228_v44  ;;  %v7445_v42 = vmul.f32 %v7438_v13, %v15234_v22  ;;  %v7446_v61 = vmul.f32 %v7439_v51, %v15235_v24 }
0x2b23   :  { %v7447_v40 = vmul.f32 %v7440_v39, %v15237_v35  ;;  %v7455_v34 = vcombine.low %v7441_v62, %v7442_v5  ;;  %v15242_v49 = vlaneseq }
0x2b24   :  { %v7456_v29 = vcombine.low %v7443_v36, %v7444_v4  ;;  %v7457_v25 = vcombine.low %v7445_v42, %v7446_v61 }
0x2b25   :  { %v7464_v3 = vrot.slane %v7455_v34, %v7463_v18  ;;  %v7485_v20 = vrot.slane %v7447_v40, %v7463_v18  ;;  %vm7506_vm12 = vcmp.lt.s32.totalorder %v15242_v49, 812 }
0x2b26   :  { %v7471_v58 = vrot.slane %v7456_v29, %v7463_v18  ;;  %v7478_v50 = vrot.slane %v7457_v25, %v7463_v18 }
0x2b28   :  { %v7486_v15 = vcombine.low %v7464_v3, %v7471_v58  ;;  %v7487_v37 = vcombine.low %v7478_v50, %v7485_v20 }
0x2b2a   :  { %v7494_v7 = vrot.slane %v7486_v15, %v7463_v18  ;;  %v7501_v23 = vrot.slane %v7487_v37, %v7463_v18 }
0x2b2c   :  { %v7502_v44 = vcombine.low %v7494_v7, %v7501_v23 }
0x2b2e   :  { %7508 = vst.msk [vmem:[%s14580_s6] sm:$0x7f] %vm7506_vm12, %v7502_v44 }

</bundles_post_ra>
